<compile_context>
chip_gen: v6e
topology: v6e:2x2x1
jax: 0.10.0
libtpu: 0.0.40
codegen_flags: <defaults>
</compile_context>

<pallas_src>
import numpy as np

import jax
import jax.numpy as jnp
from jax import lax
from jax.experimental import pallas as pl
from jax.experimental.pallas import tpu as pltpu

# ---- geometry implied by the module -----------------------------------------
L_IN = 24960            # input length (forced by fc in_features = 32*39*40)
C1, C2 = 16, 32
K1, K2 = 5, 3
T2 = 1560               # time length after two (conv s2 + pool s2) stages
FC_IN = C2 * T2         # 49920
NG = 10                 # 8 = 4 output phases x 2 pool phases, + 2 shifted groups
                        #     (h1 at index 4u-1, needed by conv2's left padding)


# ---- fused kernel ------------------------------------------------------------
def fused_kernel(x_ref, w1_ref, b1_ref, w2_ref, b2_ref, wfc_ref, bfc_ref, o_ref):
    f32 = jnp.float32

    # ---- stage 1: conv1(k5,s2,p2) + relu + maxpool(2,2), polyphase form -----
    # x_ref[0, q, 1+u] = x[16u + q];  columns 0 and T2+1 are zeros (conv halo).
    xm = x_ref[0, :, 0:T2]            # x16[q, u-1]
    x0 = x_ref[0, :, 1:T2 + 1]        # x16[q, u]
    xp = x_ref[0, :, 2:T2 + 2]        # x16[q, u+1]
    xx = jnp.concatenate([xm, x0, xp], axis=0)                      # (48, T2)

    # one MXU matmul produces every (output-phase, pool-phase) row group
    y = jnp.dot(w1_ref[...], xx, preferred_element_type=f32) + b1_ref[...]  # (160, T2)

    h1p = []                           # h1p[p1][c, u] = h1[c, 4u + p1]
    for p1 in range(4):
        base = 32 * p1
        h1p.append(jnp.maximum(jnp.maximum(y[base:base + C1],
                                           y[base + C1:base + 2 * C1]), 0.0))
    # shifted phase: h1[c, 4u - 1]; column u == 0 is conv2's zero padding
    col = lax.broadcasted_iota(jnp.int32, (C1, T2), 1)
    h1p3m = jnp.where(col == 0, 0.0,
                      jnp.maximum(jnp.maximum(y[128:128 + C1],
                                              y[128 + C1:128 + 2 * C1]), 0.0))

    # ---- stage 2: conv2(k3,s2,p1) + relu + maxpool(2,2) ----------------------
    # K=48 tap matrices (3 taps x 16 in-channels) per pool phase.
    t0 = jnp.concatenate([h1p3m, h1p[0], h1p[1]], axis=0)           # (48, T2)
    t1 = jnp.concatenate([h1p[1], h1p[2], h1p[3]], axis=0)          # (48, T2)
    w2 = w2_ref[...]
    y20 = jnp.dot(w2, t0, preferred_element_type=f32)
    y21 = jnp.dot(w2, t1, preferred_element_type=f32)
    h2 = jnp.maximum(jnp.maximum(y20, y21) + b2_ref[...], 0.0)      # (C2, T2)

    # ---- stage 3: fc over the flattened (C2, T2) features --------------------
    # logits[n] = sum_{c,t} wfc[n, c*T2 + t] * h2[c, t] + bfc[n]
    # weight stored channel-major: wfc_ref[c] is a contiguous lane-dense (NC, T2)
    # slab.  VPU accumulate over channels, then one lane reduction.
    nc = wfc_ref.shape[1]
    acc = jnp.zeros((nc, T2), f32)
    for c in range(C2):
        acc = acc + wfc_ref[c] * h2[c:c + 1, :]
    o_ref[0] = jnp.sum(acc, axis=1, keepdims=True) + bfc_ref[...]   # (nc, 1)


# ---- one-time parameter repacking (kernel-friendly layouts) ------------------
def _phase_select():
    # S[g, k, j] = 1 iff tap k of row-group g reads row j of [x(u-1); x(u); x(u+1)]
    S = np.zeros((NG, K1, 3 * C1), np.float32)
    groups = [(p1, r) for p1 in range(4) for r in range(2)] + [(-1, 0), (-1, 1)]
    for g, (p1, r) in enumerate(groups):
        for k in range(K1):
            m = 4 * p1 + 2 * r + k - 2        # x offset relative to 16u
            if m < 0:
                row = m + 16                   # x(u-1) block
            elif m < 16:
                row = 16 + m                   # x(u)   block
            else:
                row = 32 + (m - 16)            # x(u+1) block
            S[g, k, row] = 1.0
    return S


def prepare_params(params):
    """Repack PyTorch-layout parameters into the kernel layout (done once)."""
    w1 = params["w1"][:, 0, :]                                          # (C1, K1)
    w1big = jnp.einsum("ck,gkj->gcj", w1,
                       jnp.asarray(_phase_select())).reshape(NG * C1, 3 * C1)
    b1big = jnp.tile(params["b1"], NG)[:, None]                         # (160, 1)
    w2f = jnp.transpose(params["w2"], (0, 2, 1)).reshape(C2, K2 * C1)   # (32, 48)
    b2c = params["b2"][:, None]                                         # (32, 1)
    nc = params["wfc"].shape[0]
    wfck = jnp.transpose(params["wfc"].reshape(nc, C2, T2), (1, 0, 2))  # (32, NC, T2)
    bfcc = params["bfc"][:, None]                                       # (NC, 1)
    return dict(w1=w1big, b1=b1big, w2=w2f, b2=b2c, wfc=wfck, bfc=bfcc)


# ---- forward -----------------------------------------------------------------
@jax.jit
def wav2vec2_forward(x, prep):
    B = x.shape[0]
    nc = prep["bfc"].shape[0]
    f32 = jnp.float32

    # polyphase-by-16 re-layout of the input, + one zero halo column each side
    xpoly = jnp.transpose(x.reshape(B, T2, 16), (0, 2, 1))              # (B, 16, T2)
    xpoly = jnp.pad(xpoly, ((0, 0), (0, 0), (1, 1)))                    # (B, 16, T2+2)

    logits3 = pl.pallas_call(
        fused_kernel,
        out_shape=jax.ShapeDtypeStruct((B, nc, 1), f32),
        grid=(B,),
        in_specs=[
            pl.BlockSpec((1, C1, T2 + 2), lambda b: (b, 0, 0)),         # x (per batch)
            pl.BlockSpec((NG * C1, 3 * C1), lambda b: (0, 0)),          # w1big (resident)
            pl.BlockSpec((NG * C1, 1), lambda b: (0, 0)),               # b1big
            pl.BlockSpec((C2, K2 * C1), lambda b: (0, 0)),              # w2f
            pl.BlockSpec((C2, 1), lambda b: (0, 0)),                    # b2
            pl.BlockSpec((C2, nc, T2), lambda b: (0, 0, 0)),            # fc weight
            pl.BlockSpec((nc, 1), lambda b: (0, 0)),                    # fc bias
        ],
        out_specs=pl.BlockSpec((1, nc, 1), lambda b: (b, 0, 0)),
        compiler_params=pltpu.CompilerParams(
            dimension_semantics=("parallel",),
            vmem_limit_bytes=32 * 1024 * 1024),
    )(xpoly, prep["w1"], prep["b1"], prep["w2"], prep["b2"],
      prep["wfc"], prep["bfc"])
    return logits3[:, :, 0]


# ---- pure-JAX reference (for correctness check) ------------------------------
def ref_forward(x, params):
    dn = ("NCH", "OIH", "NCH")
    y = lax.conv_general_dilated(x, params["w1"], (2,), [(2, 2)],
                                 dimension_numbers=dn)
    y = jnp.maximum(y + params["b1"][None, :, None], 0.0)
    y = lax.reduce_window(y, -jnp.inf, lax.max, (1, 1, 2), (1, 1, 2), "VALID")
    y = lax.conv_general_dilated(y, params["w2"], (2,), [(1, 1)],
                                 dimension_numbers=dn)
    y = jnp.maximum(y + params["b2"][None, :, None], 0.0)
    y = lax.reduce_window(y, -jnp.inf, lax.max, (1, 1, 2), (1, 1, 2), "VALID")
    y = y.reshape(y.shape[0], -1)
    return y @ params["wfc"].T + params["bfc"][None, :]


if __name__ == "__main__":
    num_classes = 16
    B = 2

    key = jax.random.PRNGKey(0)
    ks = jax.random.split(key, 7)
    params = {
        "w1": 0.1 * jax.random.normal(ks[0], (C1, 1, K1), jnp.float32),
        "b1": 0.1 * jax.random.normal(ks[1], (C1,), jnp.float32),
        "w2": 0.1 * jax.random.normal(ks[2], (C2, C1, K2), jnp.float32),
        "b2": 0.1 * jax.random.normal(ks[3], (C2,), jnp.float32),
        "wfc": 0.01 * jax.random.normal(ks[4], (num_classes, FC_IN), jnp.float32),
        "bfc": 0.01 * jax.random.normal(ks[5], (num_classes,), jnp.float32),
    }
    x = jax.random.normal(ks[6], (B, 1, L_IN), jnp.float32)

    prep = prepare_params(params)                 # one-time weight repack
    out = jax.block_until_ready(wav2vec2_forward(x, prep))
    ref = ref_forward(x, params)
    np.testing.assert_allclose(np.asarray(out), np.asarray(ref),
                               rtol=2e-3, atol=2e-3)
    print("KERNEL_OK")
</pallas_src>

<mosaic_0001>
module attributes {stable_mosaic.version = 11 : i64} {
  func.func @fused_kernel(%arg0: i32, %arg1: memref<1x16x1562xf32, #tpu.memory_space<vmem>>, %arg2: memref<160x48xf32, #tpu.memory_space<vmem>>, %arg3: memref<160x1xf32, #tpu.memory_space<vmem>>, %arg4: memref<32x48xf32, #tpu.memory_space<vmem>>, %arg5: memref<32x1xf32, #tpu.memory_space<vmem>>, %arg6: memref<32x16x1560xf32, #tpu.memory_space<vmem>>, %arg7: memref<16x1xf32, #tpu.memory_space<vmem>>, %arg8: memref<1x16x1xf32, #tpu.memory_space<vmem>>) attributes {dimension_semantics = [#tpu.dimension_semantics<parallel>], iteration_bounds = array<i64: 2>, scalar_prefetch = 0 : i64, scratch_operands = 0 : i64, tpu.core_type = #tpu.core_type<tc>, window_params = [{transform_indices = @transform_0, window_bounds = array<i64: 1, 16, 1562>}, {pipeline_mode = #tpu.pipeline_mode<synchronous>, transform_indices = @transform_1, window_bounds = array<i64: 160, 48>}, {pipeline_mode = #tpu.pipeline_mode<synchronous>, transform_indices = @transform_2, window_bounds = array<i64: 160, 1>}, {pipeline_mode = #tpu.pipeline_mode<synchronous>, transform_indices = @transform_3, window_bounds = array<i64: 32, 48>}, {pipeline_mode = #tpu.pipeline_mode<synchronous>, transform_indices = @transform_4, window_bounds = array<i64: 32, 1>}, {pipeline_mode = #tpu.pipeline_mode<synchronous>, transform_indices = @transform_5, window_bounds = array<i64: 32, 16, 1560>}, {pipeline_mode = #tpu.pipeline_mode<synchronous>, transform_indices = @transform_6, window_bounds = array<i64: 16, 1>}, {transform_indices = @transform_7, window_bounds = array<i64: 1, 16, 1>}]} {
    %c0 = arith.constant 0 : index
    %c0_0 = arith.constant 0 : index
    %c0_1 = arith.constant 0 : index
    %0 = vector.load %arg1[%c0, %c0_0, %c0_1] : memref<1x16x1562xf32, #tpu.memory_space<vmem>>, vector<1x16x1560xf32>
    %1 = vector.shape_cast %0 : vector<1x16x1560xf32> to vector<16x1560xf32>
    %c0_2 = arith.constant 0 : index
    %c0_3 = arith.constant 0 : index
    %c1 = arith.constant 1 : index
    %2 = vector.load %arg1[%c0_2, %c0_3, %c1] : memref<1x16x1562xf32, #tpu.memory_space<vmem>>, vector<1x16x1560xf32>
    %3 = vector.shape_cast %2 : vector<1x16x1560xf32> to vector<16x1560xf32>
    %c0_4 = arith.constant 0 : index
    %c0_5 = arith.constant 0 : index
    %c2 = arith.constant 2 : index
    %4 = vector.load %arg1[%c0_4, %c0_5, %c2] : memref<1x16x1562xf32, #tpu.memory_space<vmem>>, vector<1x16x1560xf32>
    %5 = vector.shape_cast %4 : vector<1x16x1560xf32> to vector<16x1560xf32>
    %6 = tpu.concatenate %1, %3, %5 in 0 : vector<16x1560xf32>, vector<16x1560xf32>, vector<16x1560xf32> -> vector<48x1560xf32>
    %c0_6 = arith.constant 0 : index
    %c0_7 = arith.constant 0 : index
    %7 = vector.load %arg2[%c0_6, %c0_7] : memref<160x48xf32, #tpu.memory_space<vmem>>, vector<160x48xf32>
    %cst = arith.constant dense<0.000000e+00> : vector<160x1560xf32>
    %8 = tpu.matmul %7, %6, %cst {dimension_numbers = #tpu.dot_dimension_numbers<[1], [0], [0], [1], [0, 0, 1, 1], [], []>} : vector<160x48xf32>, vector<48x1560xf32>, vector<160x1560xf32> -> vector<160x1560xf32>
    %c0_8 = arith.constant 0 : index
    %c0_9 = arith.constant 0 : index
    %9 = vector.load %arg3[%c0_8, %c0_9] : memref<160x1xf32, #tpu.memory_space<vmem>>, vector<160x1xf32>
    %10 = vector.broadcast %9 : vector<160x1xf32> to vector<160x1560xf32>
    %11 = arith.addf %8, %10 : vector<160x1560xf32>
    %12 = vector.extract_strided_slice %11 {offsets = [0, 0], sizes = [16, 1560], strides = [1, 1]} : vector<160x1560xf32> to vector<16x1560xf32>
    %13 = vector.extract_strided_slice %11 {offsets = [16, 0], sizes = [16, 1560], strides = [1, 1]} : vector<160x1560xf32> to vector<16x1560xf32>
    %14 = arith.maximumf %12, %13 : vector<16x1560xf32>
    %cst_10 = arith.constant 0.000000e+00 : f32
    %15 = vector.broadcast %cst_10 : f32 to vector<16x1560xf32>
    %16 = arith.maximumf %14, %15 : vector<16x1560xf32>
    %17 = vector.extract_strided_slice %11 {offsets = [32, 0], sizes = [16, 1560], strides = [1, 1]} : vector<160x1560xf32> to vector<16x1560xf32>
    %18 = vector.extract_strided_slice %11 {offsets = [48, 0], sizes = [16, 1560], strides = [1, 1]} : vector<160x1560xf32> to vector<16x1560xf32>
    %19 = arith.maximumf %17, %18 : vector<16x1560xf32>
    %cst_11 = arith.constant 0.000000e+00 : f32
    %20 = vector.broadcast %cst_11 : f32 to vector<16x1560xf32>
    %21 = arith.maximumf %19, %20 : vector<16x1560xf32>
    %22 = vector.extract_strided_slice %11 {offsets = [64, 0], sizes = [16, 1560], strides = [1, 1]} : vector<160x1560xf32> to vector<16x1560xf32>
    %23 = vector.extract_strided_slice %11 {offsets = [80, 0], sizes = [16, 1560], strides = [1, 1]} : vector<160x1560xf32> to vector<16x1560xf32>
    %24 = arith.maximumf %22, %23 : vector<16x1560xf32>
    %cst_12 = arith.constant 0.000000e+00 : f32
    %25 = vector.broadcast %cst_12 : f32 to vector<16x1560xf32>
    %26 = arith.maximumf %24, %25 : vector<16x1560xf32>
    %27 = vector.extract_strided_slice %11 {offsets = [96, 0], sizes = [16, 1560], strides = [1, 1]} : vector<160x1560xf32> to vector<16x1560xf32>
    %28 = vector.extract_strided_slice %11 {offsets = [112, 0], sizes = [16, 1560], strides = [1, 1]} : vector<160x1560xf32> to vector<16x1560xf32>
    %29 = arith.maximumf %27, %28 : vector<16x1560xf32>
    %cst_13 = arith.constant 0.000000e+00 : f32
    %30 = vector.broadcast %cst_13 : f32 to vector<16x1560xf32>
    %31 = arith.maximumf %29, %30 : vector<16x1560xf32>
    %32 = tpu.iota {dimensions = array<i32: 1>} : vector<16x1560xi32>
    %c0_i32 = arith.constant 0 : i32
    %33 = vector.broadcast %c0_i32 : i32 to vector<16x1560xi32>
    %34 = arith.cmpi eq, %32, %33 : vector<16x1560xi32>
    %35 = vector.extract_strided_slice %11 {offsets = [128, 0], sizes = [16, 1560], strides = [1, 1]} : vector<160x1560xf32> to vector<16x1560xf32>
    %36 = vector.extract_strided_slice %11 {offsets = [144, 0], sizes = [16, 1560], strides = [1, 1]} : vector<160x1560xf32> to vector<16x1560xf32>
    %37 = arith.maximumf %35, %36 : vector<16x1560xf32>
    %cst_14 = arith.constant 0.000000e+00 : f32
    %38 = vector.broadcast %cst_14 : f32 to vector<16x1560xf32>
    %39 = arith.maximumf %37, %38 : vector<16x1560xf32>
    %cst_15 = arith.constant 0.000000e+00 : f32
    %40 = vector.broadcast %cst_15 : f32 to vector<16x1560xf32>
    %41 = arith.select %34, %40, %39 : vector<16x1560xi1>, vector<16x1560xf32>
    %42 = tpu.concatenate %41, %16, %21 in 0 : vector<16x1560xf32>, vector<16x1560xf32>, vector<16x1560xf32> -> vector<48x1560xf32>
    %43 = tpu.concatenate %21, %26, %31 in 0 : vector<16x1560xf32>, vector<16x1560xf32>, vector<16x1560xf32> -> vector<48x1560xf32>
    %c0_16 = arith.constant 0 : index
    %c0_17 = arith.constant 0 : index
    %44 = vector.load %arg4[%c0_16, %c0_17] : memref<32x48xf32, #tpu.memory_space<vmem>>, vector<32x48xf32>
    %cst_18 = arith.constant dense<0.000000e+00> : vector<32x1560xf32>
    %45 = tpu.matmul %44, %42, %cst_18 {dimension_numbers = #tpu.dot_dimension_numbers<[1], [0], [0], [1], [0, 0, 1, 1], [], []>} : vector<32x48xf32>, vector<48x1560xf32>, vector<32x1560xf32> -> vector<32x1560xf32>
    %cst_19 = arith.constant dense<0.000000e+00> : vector<32x1560xf32>
    %46 = tpu.matmul %44, %43, %cst_19 {dimension_numbers = #tpu.dot_dimension_numbers<[1], [0], [0], [1], [0, 0, 1, 1], [], []>} : vector<32x48xf32>, vector<48x1560xf32>, vector<32x1560xf32> -> vector<32x1560xf32>
    %47 = arith.maximumf %45, %46 : vector<32x1560xf32>
    %c0_20 = arith.constant 0 : index
    %c0_21 = arith.constant 0 : index
    %48 = vector.load %arg5[%c0_20, %c0_21] : memref<32x1xf32, #tpu.memory_space<vmem>>, vector<32x1xf32>
    %49 = vector.broadcast %48 : vector<32x1xf32> to vector<32x1560xf32>
    %50 = arith.addf %47, %49 : vector<32x1560xf32>
    %cst_22 = arith.constant 0.000000e+00 : f32
    %51 = vector.broadcast %cst_22 : f32 to vector<32x1560xf32>
    %52 = arith.maximumf %50, %51 : vector<32x1560xf32>
    %cst_23 = arith.constant 0.000000e+00 : f32
    %53 = vector.broadcast %cst_23 : f32 to vector<16x1560xf32>
    %c0_24 = arith.constant 0 : index
    %c0_25 = arith.constant 0 : index
    %c0_26 = arith.constant 0 : index
    %54 = vector.load %arg6[%c0_24, %c0_25, %c0_26] : memref<32x16x1560xf32, #tpu.memory_space<vmem>>, vector<1x16x1560xf32>
    %55 = vector.shape_cast %54 : vector<1x16x1560xf32> to vector<16x1560xf32>
    %56 = vector.extract_strided_slice %52 {offsets = [0, 0], sizes = [1, 1560], strides = [1, 1]} : vector<32x1560xf32> to vector<1x1560xf32>
    %57 = vector.broadcast %56 : vector<1x1560xf32> to vector<16x1560xf32>
    %58 = arith.mulf %55, %57 : vector<16x1560xf32>
    %59 = arith.addf %53, %58 : vector<16x1560xf32>
    %c1_27 = arith.constant 1 : index
    %c0_28 = arith.constant 0 : index
    %c0_29 = arith.constant 0 : index
    %60 = vector.load %arg6[%c1_27, %c0_28, %c0_29] : memref<32x16x1560xf32, #tpu.memory_space<vmem>>, vector<1x16x1560xf32>
    %61 = vector.shape_cast %60 : vector<1x16x1560xf32> to vector<16x1560xf32>
    %62 = vector.extract_strided_slice %52 {offsets = [1, 0], sizes = [1, 1560], strides = [1, 1]} : vector<32x1560xf32> to vector<1x1560xf32>
    %63 = vector.broadcast %62 : vector<1x1560xf32> to vector<16x1560xf32>
    %64 = arith.mulf %61, %63 : vector<16x1560xf32>
    %65 = arith.addf %59, %64 : vector<16x1560xf32>
    %c2_30 = arith.constant 2 : index
    %c0_31 = arith.constant 0 : index
    %c0_32 = arith.constant 0 : index
    %66 = vector.load %arg6[%c2_30, %c0_31, %c0_32] : memref<32x16x1560xf32, #tpu.memory_space<vmem>>, vector<1x16x1560xf32>
    %67 = vector.shape_cast %66 : vector<1x16x1560xf32> to vector<16x1560xf32>
    %68 = vector.extract_strided_slice %52 {offsets = [2, 0], sizes = [1, 1560], strides = [1, 1]} : vector<32x1560xf32> to vector<1x1560xf32>
    %69 = vector.broadcast %68 : vector<1x1560xf32> to vector<16x1560xf32>
    %70 = arith.mulf %67, %69 : vector<16x1560xf32>
    %71 = arith.addf %65, %70 : vector<16x1560xf32>
    %c3 = arith.constant 3 : index
    %c0_33 = arith.constant 0 : index
    %c0_34 = arith.constant 0 : index
    %72 = vector.load %arg6[%c3, %c0_33, %c0_34] : memref<32x16x1560xf32, #tpu.memory_space<vmem>>, vector<1x16x1560xf32>
    %73 = vector.shape_cast %72 : vector<1x16x1560xf32> to vector<16x1560xf32>
    %74 = vector.extract_strided_slice %52 {offsets = [3, 0], sizes = [1, 1560], strides = [1, 1]} : vector<32x1560xf32> to vector<1x1560xf32>
    %75 = vector.broadcast %74 : vector<1x1560xf32> to vector<16x1560xf32>
    %76 = arith.mulf %73, %75 : vector<16x1560xf32>
    %77 = arith.addf %71, %76 : vector<16x1560xf32>
    %c4 = arith.constant 4 : index
    %c0_35 = arith.constant 0 : index
    %c0_36 = arith.constant 0 : index
    %78 = vector.load %arg6[%c4, %c0_35, %c0_36] : memref<32x16x1560xf32, #tpu.memory_space<vmem>>, vector<1x16x1560xf32>
    %79 = vector.shape_cast %78 : vector<1x16x1560xf32> to vector<16x1560xf32>
    %80 = vector.extract_strided_slice %52 {offsets = [4, 0], sizes = [1, 1560], strides = [1, 1]} : vector<32x1560xf32> to vector<1x1560xf32>
    %81 = vector.broadcast %80 : vector<1x1560xf32> to vector<16x1560xf32>
    %82 = arith.mulf %79, %81 : vector<16x1560xf32>
    %83 = arith.addf %77, %82 : vector<16x1560xf32>
    %c5 = arith.constant 5 : index
    %c0_37 = arith.constant 0 : index
    %c0_38 = arith.constant 0 : index
    %84 = vector.load %arg6[%c5, %c0_37, %c0_38] : memref<32x16x1560xf32, #tpu.memory_space<vmem>>, vector<1x16x1560xf32>
    %85 = vector.shape_cast %84 : vector<1x16x1560xf32> to vector<16x1560xf32>
    %86 = vector.extract_strided_slice %52 {offsets = [5, 0], sizes = [1, 1560], strides = [1, 1]} : vector<32x1560xf32> to vector<1x1560xf32>
    %87 = vector.broadcast %86 : vector<1x1560xf32> to vector<16x1560xf32>
    %88 = arith.mulf %85, %87 : vector<16x1560xf32>
    %89 = arith.addf %83, %88 : vector<16x1560xf32>
    %c6 = arith.constant 6 : index
    %c0_39 = arith.constant 0 : index
    %c0_40 = arith.constant 0 : index
    %90 = vector.load %arg6[%c6, %c0_39, %c0_40] : memref<32x16x1560xf32, #tpu.memory_space<vmem>>, vector<1x16x1560xf32>
    %91 = vector.shape_cast %90 : vector<1x16x1560xf32> to vector<16x1560xf32>
    %92 = vector.extract_strided_slice %52 {offsets = [6, 0], sizes = [1, 1560], strides = [1, 1]} : vector<32x1560xf32> to vector<1x1560xf32>
    %93 = vector.broadcast %92 : vector<1x1560xf32> to vector<16x1560xf32>
    %94 = arith.mulf %91, %93 : vector<16x1560xf32>
    %95 = arith.addf %89, %94 : vector<16x1560xf32>
    %c7 = arith.constant 7 : index
    %c0_41 = arith.constant 0 : index
    %c0_42 = arith.constant 0 : index
    %96 = vector.load %arg6[%c7, %c0_41, %c0_42] : memref<32x16x1560xf32, #tpu.memory_space<vmem>>, vector<1x16x1560xf32>
    %97 = vector.shape_cast %96 : vector<1x16x1560xf32> to vector<16x1560xf32>
    %98 = vector.extract_strided_slice %52 {offsets = [7, 0], sizes = [1, 1560], strides = [1, 1]} : vector<32x1560xf32> to vector<1x1560xf32>
    %99 = vector.broadcast %98 : vector<1x1560xf32> to vector<16x1560xf32>
    %100 = arith.mulf %97, %99 : vector<16x1560xf32>
    %101 = arith.addf %95, %100 : vector<16x1560xf32>
    %c8 = arith.constant 8 : index
    %c0_43 = arith.constant 0 : index
    %c0_44 = arith.constant 0 : index
    %102 = vector.load %arg6[%c8, %c0_43, %c0_44] : memref<32x16x1560xf32, #tpu.memory_space<vmem>>, vector<1x16x1560xf32>
    %103 = vector.shape_cast %102 : vector<1x16x1560xf32> to vector<16x1560xf32>
    %104 = vector.extract_strided_slice %52 {offsets = [8, 0], sizes = [1, 1560], strides = [1, 1]} : vector<32x1560xf32> to vector<1x1560xf32>
    %105 = vector.broadcast %104 : vector<1x1560xf32> to vector<16x1560xf32>
    %106 = arith.mulf %103, %105 : vector<16x1560xf32>
    %107 = arith.addf %101, %106 : vector<16x1560xf32>
    %c9 = arith.constant 9 : index
    %c0_45 = arith.constant 0 : index
    %c0_46 = arith.constant 0 : index
    %108 = vector.load %arg6[%c9, %c0_45, %c0_46] : memref<32x16x1560xf32, #tpu.memory_space<vmem>>, vector<1x16x1560xf32>
    %109 = vector.shape_cast %108 : vector<1x16x1560xf32> to vector<16x1560xf32>
    %110 = vector.extract_strided_slice %52 {offsets = [9, 0], sizes = [1, 1560], strides = [1, 1]} : vector<32x1560xf32> to vector<1x1560xf32>
    %111 = vector.broadcast %110 : vector<1x1560xf32> to vector<16x1560xf32>
    %112 = arith.mulf %109, %111 : vector<16x1560xf32>
    %113 = arith.addf %107, %112 : vector<16x1560xf32>
    %c10 = arith.constant 10 : index
    %c0_47 = arith.constant 0 : index
    %c0_48 = arith.constant 0 : index
    %114 = vector.load %arg6[%c10, %c0_47, %c0_48] : memref<32x16x1560xf32, #tpu.memory_space<vmem>>, vector<1x16x1560xf32>
    %115 = vector.shape_cast %114 : vector<1x16x1560xf32> to vector<16x1560xf32>
    %116 = vector.extract_strided_slice %52 {offsets = [10, 0], sizes = [1, 1560], strides = [1, 1]} : vector<32x1560xf32> to vector<1x1560xf32>
    %117 = vector.broadcast %116 : vector<1x1560xf32> to vector<16x1560xf32>
    %118 = arith.mulf %115, %117 : vector<16x1560xf32>
    %119 = arith.addf %113, %118 : vector<16x1560xf32>
    %c11 = arith.constant 11 : index
    %c0_49 = arith.constant 0 : index
    %c0_50 = arith.constant 0 : index
    %120 = vector.load %arg6[%c11, %c0_49, %c0_50] : memref<32x16x1560xf32, #tpu.memory_space<vmem>>, vector<1x16x1560xf32>
    %121 = vector.shape_cast %120 : vector<1x16x1560xf32> to vector<16x1560xf32>
    %122 = vector.extract_strided_slice %52 {offsets = [11, 0], sizes = [1, 1560], strides = [1, 1]} : vector<32x1560xf32> to vector<1x1560xf32>
    %123 = vector.broadcast %122 : vector<1x1560xf32> to vector<16x1560xf32>
    %124 = arith.mulf %121, %123 : vector<16x1560xf32>
    %125 = arith.addf %119, %124 : vector<16x1560xf32>
    %c12 = arith.constant 12 : index
    %c0_51 = arith.constant 0 : index
    %c0_52 = arith.constant 0 : index
    %126 = vector.load %arg6[%c12, %c0_51, %c0_52] : memref<32x16x1560xf32, #tpu.memory_space<vmem>>, vector<1x16x1560xf32>
    %127 = vector.shape_cast %126 : vector<1x16x1560xf32> to vector<16x1560xf32>
    %128 = vector.extract_strided_slice %52 {offsets = [12, 0], sizes = [1, 1560], strides = [1, 1]} : vector<32x1560xf32> to vector<1x1560xf32>
    %129 = vector.broadcast %128 : vector<1x1560xf32> to vector<16x1560xf32>
    %130 = arith.mulf %127, %129 : vector<16x1560xf32>
    %131 = arith.addf %125, %130 : vector<16x1560xf32>
    %c13 = arith.constant 13 : index
    %c0_53 = arith.constant 0 : index
    %c0_54 = arith.constant 0 : index
    %132 = vector.load %arg6[%c13, %c0_53, %c0_54] : memref<32x16x1560xf32, #tpu.memory_space<vmem>>, vector<1x16x1560xf32>
    %133 = vector.shape_cast %132 : vector<1x16x1560xf32> to vector<16x1560xf32>
    %134 = vector.extract_strided_slice %52 {offsets = [13, 0], sizes = [1, 1560], strides = [1, 1]} : vector<32x1560xf32> to vector<1x1560xf32>
    %135 = vector.broadcast %134 : vector<1x1560xf32> to vector<16x1560xf32>
    %136 = arith.mulf %133, %135 : vector<16x1560xf32>
    %137 = arith.addf %131, %136 : vector<16x1560xf32>
    %c14 = arith.constant 14 : index
    %c0_55 = arith.constant 0 : index
    %c0_56 = arith.constant 0 : index
    %138 = vector.load %arg6[%c14, %c0_55, %c0_56] : memref<32x16x1560xf32, #tpu.memory_space<vmem>>, vector<1x16x1560xf32>
    %139 = vector.shape_cast %138 : vector<1x16x1560xf32> to vector<16x1560xf32>
    %140 = vector.extract_strided_slice %52 {offsets = [14, 0], sizes = [1, 1560], strides = [1, 1]} : vector<32x1560xf32> to vector<1x1560xf32>
    %141 = vector.broadcast %140 : vector<1x1560xf32> to vector<16x1560xf32>
    %142 = arith.mulf %139, %141 : vector<16x1560xf32>
    %143 = arith.addf %137, %142 : vector<16x1560xf32>
    %c15 = arith.constant 15 : index
    %c0_57 = arith.constant 0 : index
    %c0_58 = arith.constant 0 : index
    %144 = vector.load %arg6[%c15, %c0_57, %c0_58] : memref<32x16x1560xf32, #tpu.memory_space<vmem>>, vector<1x16x1560xf32>
    %145 = vector.shape_cast %144 : vector<1x16x1560xf32> to vector<16x1560xf32>
    %146 = vector.extract_strided_slice %52 {offsets = [15, 0], sizes = [1, 1560], strides = [1, 1]} : vector<32x1560xf32> to vector<1x1560xf32>
    %147 = vector.broadcast %146 : vector<1x1560xf32> to vector<16x1560xf32>
    %148 = arith.mulf %145, %147 : vector<16x1560xf32>
    %149 = arith.addf %143, %148 : vector<16x1560xf32>
    %c16 = arith.constant 16 : index
    %c0_59 = arith.constant 0 : index
    %c0_60 = arith.constant 0 : index
    %150 = vector.load %arg6[%c16, %c0_59, %c0_60] : memref<32x16x1560xf32, #tpu.memory_space<vmem>>, vector<1x16x1560xf32>
    %151 = vector.shape_cast %150 : vector<1x16x1560xf32> to vector<16x1560xf32>
    %152 = vector.extract_strided_slice %52 {offsets = [16, 0], sizes = [1, 1560], strides = [1, 1]} : vector<32x1560xf32> to vector<1x1560xf32>
    %153 = vector.broadcast %152 : vector<1x1560xf32> to vector<16x1560xf32>
    %154 = arith.mulf %151, %153 : vector<16x1560xf32>
    %155 = arith.addf %149, %154 : vector<16x1560xf32>
    %c17 = arith.constant 17 : index
    %c0_61 = arith.constant 0 : index
    %c0_62 = arith.constant 0 : index
    %156 = vector.load %arg6[%c17, %c0_61, %c0_62] : memref<32x16x1560xf32, #tpu.memory_space<vmem>>, vector<1x16x1560xf32>
    %157 = vector.shape_cast %156 : vector<1x16x1560xf32> to vector<16x1560xf32>
    %158 = vector.extract_strided_slice %52 {offsets = [17, 0], sizes = [1, 1560], strides = [1, 1]} : vector<32x1560xf32> to vector<1x1560xf32>
    %159 = vector.broadcast %158 : vector<1x1560xf32> to vector<16x1560xf32>
    %160 = arith.mulf %157, %159 : vector<16x1560xf32>
    %161 = arith.addf %155, %160 : vector<16x1560xf32>
    %c18 = arith.constant 18 : index
    %c0_63 = arith.constant 0 : index
    %c0_64 = arith.constant 0 : index
    %162 = vector.load %arg6[%c18, %c0_63, %c0_64] : memref<32x16x1560xf32, #tpu.memory_space<vmem>>, vector<1x16x1560xf32>
    %163 = vector.shape_cast %162 : vector<1x16x1560xf32> to vector<16x1560xf32>
    %164 = vector.extract_strided_slice %52 {offsets = [18, 0], sizes = [1, 1560], strides = [1, 1]} : vector<32x1560xf32> to vector<1x1560xf32>
    %165 = vector.broadcast %164 : vector<1x1560xf32> to vector<16x1560xf32>
    %166 = arith.mulf %163, %165 : vector<16x1560xf32>
    %167 = arith.addf %161, %166 : vector<16x1560xf32>
    %c19 = arith.constant 19 : index
    %c0_65 = arith.constant 0 : index
    %c0_66 = arith.constant 0 : index
    %168 = vector.load %arg6[%c19, %c0_65, %c0_66] : memref<32x16x1560xf32, #tpu.memory_space<vmem>>, vector<1x16x1560xf32>
    %169 = vector.shape_cast %168 : vector<1x16x1560xf32> to vector<16x1560xf32>
    %170 = vector.extract_strided_slice %52 {offsets = [19, 0], sizes = [1, 1560], strides = [1, 1]} : vector<32x1560xf32> to vector<1x1560xf32>
    %171 = vector.broadcast %170 : vector<1x1560xf32> to vector<16x1560xf32>
    %172 = arith.mulf %169, %171 : vector<16x1560xf32>
    %173 = arith.addf %167, %172 : vector<16x1560xf32>
    %c20 = arith.constant 20 : index
    %c0_67 = arith.constant 0 : index
    %c0_68 = arith.constant 0 : index
    %174 = vector.load %arg6[%c20, %c0_67, %c0_68] : memref<32x16x1560xf32, #tpu.memory_space<vmem>>, vector<1x16x1560xf32>
    %175 = vector.shape_cast %174 : vector<1x16x1560xf32> to vector<16x1560xf32>
    %176 = vector.extract_strided_slice %52 {offsets = [20, 0], sizes = [1, 1560], strides = [1, 1]} : vector<32x1560xf32> to vector<1x1560xf32>
    %177 = vector.broadcast %176 : vector<1x1560xf32> to vector<16x1560xf32>
    %178 = arith.mulf %175, %177 : vector<16x1560xf32>
    %179 = arith.addf %173, %178 : vector<16x1560xf32>
    %c21 = arith.constant 21 : index
    %c0_69 = arith.constant 0 : index
    %c0_70 = arith.constant 0 : index
    %180 = vector.load %arg6[%c21, %c0_69, %c0_70] : memref<32x16x1560xf32, #tpu.memory_space<vmem>>, vector<1x16x1560xf32>
    %181 = vector.shape_cast %180 : vector<1x16x1560xf32> to vector<16x1560xf32>
    %182 = vector.extract_strided_slice %52 {offsets = [21, 0], sizes = [1, 1560], strides = [1, 1]} : vector<32x1560xf32> to vector<1x1560xf32>
    %183 = vector.broadcast %182 : vector<1x1560xf32> to vector<16x1560xf32>
    %184 = arith.mulf %181, %183 : vector<16x1560xf32>
    %185 = arith.addf %179, %184 : vector<16x1560xf32>
    %c22 = arith.constant 22 : index
    %c0_71 = arith.constant 0 : index
    %c0_72 = arith.constant 0 : index
    %186 = vector.load %arg6[%c22, %c0_71, %c0_72] : memref<32x16x1560xf32, #tpu.memory_space<vmem>>, vector<1x16x1560xf32>
    %187 = vector.shape_cast %186 : vector<1x16x1560xf32> to vector<16x1560xf32>
    %188 = vector.extract_strided_slice %52 {offsets = [22, 0], sizes = [1, 1560], strides = [1, 1]} : vector<32x1560xf32> to vector<1x1560xf32>
    %189 = vector.broadcast %188 : vector<1x1560xf32> to vector<16x1560xf32>
    %190 = arith.mulf %187, %189 : vector<16x1560xf32>
    %191 = arith.addf %185, %190 : vector<16x1560xf32>
    %c23 = arith.constant 23 : index
    %c0_73 = arith.constant 0 : index
    %c0_74 = arith.constant 0 : index
    %192 = vector.load %arg6[%c23, %c0_73, %c0_74] : memref<32x16x1560xf32, #tpu.memory_space<vmem>>, vector<1x16x1560xf32>
    %193 = vector.shape_cast %192 : vector<1x16x1560xf32> to vector<16x1560xf32>
    %194 = vector.extract_strided_slice %52 {offsets = [23, 0], sizes = [1, 1560], strides = [1, 1]} : vector<32x1560xf32> to vector<1x1560xf32>
    %195 = vector.broadcast %194 : vector<1x1560xf32> to vector<16x1560xf32>
    %196 = arith.mulf %193, %195 : vector<16x1560xf32>
    %197 = arith.addf %191, %196 : vector<16x1560xf32>
    %c24 = arith.constant 24 : index
    %c0_75 = arith.constant 0 : index
    %c0_76 = arith.constant 0 : index
    %198 = vector.load %arg6[%c24, %c0_75, %c0_76] : memref<32x16x1560xf32, #tpu.memory_space<vmem>>, vector<1x16x1560xf32>
    %199 = vector.shape_cast %198 : vector<1x16x1560xf32> to vector<16x1560xf32>
    %200 = vector.extract_strided_slice %52 {offsets = [24, 0], sizes = [1, 1560], strides = [1, 1]} : vector<32x1560xf32> to vector<1x1560xf32>
    %201 = vector.broadcast %200 : vector<1x1560xf32> to vector<16x1560xf32>
    %202 = arith.mulf %199, %201 : vector<16x1560xf32>
    %203 = arith.addf %197, %202 : vector<16x1560xf32>
    %c25 = arith.constant 25 : index
    %c0_77 = arith.constant 0 : index
    %c0_78 = arith.constant 0 : index
    %204 = vector.load %arg6[%c25, %c0_77, %c0_78] : memref<32x16x1560xf32, #tpu.memory_space<vmem>>, vector<1x16x1560xf32>
    %205 = vector.shape_cast %204 : vector<1x16x1560xf32> to vector<16x1560xf32>
    %206 = vector.extract_strided_slice %52 {offsets = [25, 0], sizes = [1, 1560], strides = [1, 1]} : vector<32x1560xf32> to vector<1x1560xf32>
    %207 = vector.broadcast %206 : vector<1x1560xf32> to vector<16x1560xf32>
    %208 = arith.mulf %205, %207 : vector<16x1560xf32>
    %209 = arith.addf %203, %208 : vector<16x1560xf32>
    %c26 = arith.constant 26 : index
    %c0_79 = arith.constant 0 : index
    %c0_80 = arith.constant 0 : index
    %210 = vector.load %arg6[%c26, %c0_79, %c0_80] : memref<32x16x1560xf32, #tpu.memory_space<vmem>>, vector<1x16x1560xf32>
    %211 = vector.shape_cast %210 : vector<1x16x1560xf32> to vector<16x1560xf32>
    %212 = vector.extract_strided_slice %52 {offsets = [26, 0], sizes = [1, 1560], strides = [1, 1]} : vector<32x1560xf32> to vector<1x1560xf32>
    %213 = vector.broadcast %212 : vector<1x1560xf32> to vector<16x1560xf32>
    %214 = arith.mulf %211, %213 : vector<16x1560xf32>
    %215 = arith.addf %209, %214 : vector<16x1560xf32>
    %c27 = arith.constant 27 : index
    %c0_81 = arith.constant 0 : index
    %c0_82 = arith.constant 0 : index
    %216 = vector.load %arg6[%c27, %c0_81, %c0_82] : memref<32x16x1560xf32, #tpu.memory_space<vmem>>, vector<1x16x1560xf32>
    %217 = vector.shape_cast %216 : vector<1x16x1560xf32> to vector<16x1560xf32>
    %218 = vector.extract_strided_slice %52 {offsets = [27, 0], sizes = [1, 1560], strides = [1, 1]} : vector<32x1560xf32> to vector<1x1560xf32>
    %219 = vector.broadcast %218 : vector<1x1560xf32> to vector<16x1560xf32>
    %220 = arith.mulf %217, %219 : vector<16x1560xf32>
    %221 = arith.addf %215, %220 : vector<16x1560xf32>
    %c28 = arith.constant 28 : index
    %c0_83 = arith.constant 0 : index
    %c0_84 = arith.constant 0 : index
    %222 = vector.load %arg6[%c28, %c0_83, %c0_84] : memref<32x16x1560xf32, #tpu.memory_space<vmem>>, vector<1x16x1560xf32>
    %223 = vector.shape_cast %222 : vector<1x16x1560xf32> to vector<16x1560xf32>
    %224 = vector.extract_strided_slice %52 {offsets = [28, 0], sizes = [1, 1560], strides = [1, 1]} : vector<32x1560xf32> to vector<1x1560xf32>
    %225 = vector.broadcast %224 : vector<1x1560xf32> to vector<16x1560xf32>
    %226 = arith.mulf %223, %225 : vector<16x1560xf32>
    %227 = arith.addf %221, %226 : vector<16x1560xf32>
    %c29 = arith.constant 29 : index
    %c0_85 = arith.constant 0 : index
    %c0_86 = arith.constant 0 : index
    %228 = vector.load %arg6[%c29, %c0_85, %c0_86] : memref<32x16x1560xf32, #tpu.memory_space<vmem>>, vector<1x16x1560xf32>
    %229 = vector.shape_cast %228 : vector<1x16x1560xf32> to vector<16x1560xf32>
    %230 = vector.extract_strided_slice %52 {offsets = [29, 0], sizes = [1, 1560], strides = [1, 1]} : vector<32x1560xf32> to vector<1x1560xf32>
    %231 = vector.broadcast %230 : vector<1x1560xf32> to vector<16x1560xf32>
    %232 = arith.mulf %229, %231 : vector<16x1560xf32>
    %233 = arith.addf %227, %232 : vector<16x1560xf32>
    %c30 = arith.constant 30 : index
    %c0_87 = arith.constant 0 : index
    %c0_88 = arith.constant 0 : index
    %234 = vector.load %arg6[%c30, %c0_87, %c0_88] : memref<32x16x1560xf32, #tpu.memory_space<vmem>>, vector<1x16x1560xf32>
    %235 = vector.shape_cast %234 : vector<1x16x1560xf32> to vector<16x1560xf32>
    %236 = vector.extract_strided_slice %52 {offsets = [30, 0], sizes = [1, 1560], strides = [1, 1]} : vector<32x1560xf32> to vector<1x1560xf32>
    %237 = vector.broadcast %236 : vector<1x1560xf32> to vector<16x1560xf32>
    %238 = arith.mulf %235, %237 : vector<16x1560xf32>
    %239 = arith.addf %233, %238 : vector<16x1560xf32>
    %c31 = arith.constant 31 : index
    %c0_89 = arith.constant 0 : index
    %c0_90 = arith.constant 0 : index
    %240 = vector.load %arg6[%c31, %c0_89, %c0_90] : memref<32x16x1560xf32, #tpu.memory_space<vmem>>, vector<1x16x1560xf32>
    %241 = vector.shape_cast %240 : vector<1x16x1560xf32> to vector<16x1560xf32>
    %242 = vector.extract_strided_slice %52 {offsets = [31, 0], sizes = [1, 1560], strides = [1, 1]} : vector<32x1560xf32> to vector<1x1560xf32>
    %243 = vector.broadcast %242 : vector<1x1560xf32> to vector<16x1560xf32>
    %244 = arith.mulf %241, %243 : vector<16x1560xf32>
    %245 = arith.addf %239, %244 : vector<16x1560xf32>
    %cst_91 = arith.constant dense<0.000000e+00> : vector<16xf32>
    %246 = vector.multi_reduction <add>, %245, %cst_91 [1] : vector<16x1560xf32> to vector<16xf32>
    %247 = vector.shape_cast %246 : vector<16xf32> to vector<16x1xf32>
    %c0_92 = arith.constant 0 : index
    %c0_93 = arith.constant 0 : index
    %248 = vector.load %arg7[%c0_92, %c0_93] : memref<16x1xf32, #tpu.memory_space<vmem>>, vector<16x1xf32>
    %249 = arith.addf %247, %248 : vector<16x1xf32>
    %c0_94 = arith.constant 0 : index
    %c0_95 = arith.constant 0 : index
    %c0_96 = arith.constant 0 : index
    %250 = vector.load %arg8[%c0_94, %c0_95, %c0_96] : memref<1x16x1xf32, #tpu.memory_space<vmem>>, vector<1x16x1xf32>
    %251 = vector.shape_cast %250 : vector<1x16x1xf32> to vector<16x1xf32>
    %252 = vector.shape_cast %249 : vector<16x1xf32> to vector<1x16x1xf32>
    tpu.vector_store %arg8[%c0_94, %c0_95, %c0_96], %252 {strides = array<i32>} : memref<1x16x1xf32, #tpu.memory_space<vmem>>, vector<1x16x1xf32>,
    return
  }
  func.func @transform_0(%arg0: i32) -> (i32, i32, i32) {
    %c0_i32 = arith.constant 0 : i32
    %c0_i32_0 = arith.constant 0 : i32
    %c0_i32_1 = arith.constant 0 : i32
    return %arg0, %c0_i32, %c0_i32_0 : i32, i32, i32
  }
  func.func @transform_1(%arg0: i32) -> (i32, i32) {
    %c0_i32 = arith.constant 0 : i32
    %c0_i32_0 = arith.constant 0 : i32
    %c0_i32_1 = arith.constant 0 : i32
    return %c0_i32, %c0_i32_0 : i32, i32
  }
  func.func @transform_2(%arg0: i32) -> (i32, i32) {
    %c0_i32 = arith.constant 0 : i32
    %c0_i32_0 = arith.constant 0 : i32
    %c0_i32_1 = arith.constant 0 : i32
    return %c0_i32, %c0_i32_0 : i32, i32
  }
  func.func @transform_3(%arg0: i32) -> (i32, i32) {
    %c0_i32 = arith.constant 0 : i32
    %c0_i32_0 = arith.constant 0 : i32
    %c0_i32_1 = arith.constant 0 : i32
    return %c0_i32, %c0_i32_0 : i32, i32
  }
  func.func @transform_4(%arg0: i32) -> (i32, i32) {
    %c0_i32 = arith.constant 0 : i32
    %c0_i32_0 = arith.constant 0 : i32
    %c0_i32_1 = arith.constant 0 : i32
    return %c0_i32, %c0_i32_0 : i32, i32
  }
  func.func @transform_5(%arg0: i32) -> (i32, i32, i32) {
    %c0_i32 = arith.constant 0 : i32
    %c0_i32_0 = arith.constant 0 : i32
    %c0_i32_1 = arith.constant 0 : i32
    %c0_i32_2 = arith.constant 0 : i32
    return %c0_i32, %c0_i32_0, %c0_i32_1 : i32, i32, i32
  }
  func.func @transform_6(%arg0: i32) -> (i32, i32) {
    %c0_i32 = arith.constant 0 : i32
    %c0_i32_0 = arith.constant 0 : i32
    %c0_i32_1 = arith.constant 0 : i32
    return %c0_i32, %c0_i32_0 : i32, i32
  }
  func.func @transform_7(%arg0: i32) -> (i32, i32, i32) {
    %c0_i32 = arith.constant 0 : i32
    %c0_i32_0 = arith.constant 0 : i32
    %c0_i32_1 = arith.constant 0 : i32
    return %arg0, %c0_i32, %c0_i32_0 : i32, i32, i32
  }
}

</mosaic_0001>

<bundles_post_ra>
// kernel: wav2vec2_forward.1
= control target key start
LH: loop header
LB: loop body
LE: loop exit
PB: predicated region body
PF: predicated region fallthrough
CT: control target
= control target key end

     0   :  { %s9260_s24 = smov 0   ;;  %s16704_s0 = inlined_call_operand.vmem [shape: f32[2,16,1562], index: 0, kind: input, shape index: {}]   ;;  %s16705_s1 = inlined_call_operand.vmem [shape: f32[160,48], index: 1, kind: input, shape index: {}]   ;;  %s16706_s2 = inlined_call_operand.vmem [shape: f32[160,1], index: 2, kind: input, shape index: {}]   ;;  %s16707_s3 = inlined_call_operand.vmem [shape: f32[32,48], index: 3, kind: input, shape index: {}]   ;;  %s16708_s4 = inlined_call_operand.vmem [shape: f32[32,1], index: 4, kind: input, shape index: {}]   ;;  %s16709_s5 = inlined_call_operand.vmem [shape: f32[32,16,1560], index: 5, kind: input, shape index: {}]   ;;  %s16710_s6 = inlined_call_operand.vmem [shape: f32[16,1], index: 6, kind: input, shape index: {}]   ;;  %s16711_s7 = inlined_call_operand.vmem [shape: f32[2,16,1], index: 7, kind: output, shape index: {}]  }
   0x1 LB: > { %s8044_s25 = sadd.s32 4294967295, %s9214_s24   ;;  %p8048_p0 = scmp.ge.s32.totalorder %s9214_s24, 1  ;;  %s9214_s24 = sphi %s9260_s24, %s17_s24  }
   0x2   : > { %p237_p1 = scmp.lt.s32.totalorder %s9214_s24, 3 }
   0x4   : > { %p238_p2 = pnand %p8048_p0, %p237_p1 }
   0x6   : > { %241 = sbr.rel (%p238_p2) target bundleno = 1573 (0x625), region = 48 }
   0xb   : > { %p269_p3 = scmp.lt.s32.totalorder %s8044_s25, 1  ;;  %s9216_s30 = smov 126   ;;  %v16714_v6 = vmov 0.0   ;;  %v9219_v21 = vmov 0   ;;  %v562_v28 = vld [vmem:[%s16706_s2 + $0x28] sm:$0xff]  ;;  %v564_v29 = vld [vmem:[%s16706_s2 + $0x38] sm:$0xff] }
   0xc   : > { %s9217_s8 = smov 127   ;;  %802 = vmatprep.mubr.f32.mxu0 %v16714_v6  ;;  %987 = vmatprep.mubr.f32.mxu1 %v16714_v6  ;;  %v563_v30 = vld [vmem:[%s16706_s2 + $0x30] sm:$0xff]  ;;  %v561_v31 = vld [vmem:[%s16706_s2 + $0x20] sm:$0xff]  ;;  %v560_v32 = vld [vmem:[%s16706_s2 + $0x18] sm:$0xff]  ;;  %vm486_vm0 = vcmask 1031168   ;;  %vm383_vm1 = vcmask 1039360  }
   0xd   : > { %s17701_s25 = smov (!%p269_p3, %s8044_s25), 1  ;;  %9200 = vset.pattern.permute.xlu1 %v9219_v21  ;;  %9199 = vset.pattern.permute.xlu0 %v9219_v21  ;;  %v558_v33 = vld [vmem:[%s16706_s2 + $0x8] sm:$0xff]  ;;  %v559_v34 = vld [vmem:[%s16706_s2 + $0x10] sm:$0xff]  ;;  %v557_v35 = vld [vmem:[%s16706_s2] sm:$0xff]  ;;  %vm677_vm2 = vcmask 392192   ;;  %vm7962_vm4 = vcmask 195584  }
   0xe   : > { %s9186_s26 = smul.u32 208, %s17701_s25  ;;  %v576_v38 = vld [vmem:[%s16706_s2 + $0x98] sm:$0xff]  ;;  %v574_v41 = vld [vmem:[%s16706_s2 + $0x88] sm:$0xff]  ;;  %v575_v44 = vld [vmem:[%s16706_s2 + $0x90] sm:$0xff]  ;;  %s9060_s19 = sshll.u32 %s17701_s25, 4  ;;  %vm7986_vm5 = vcmask 7168  }
   0xf   : > { %v573_v47 = vld [vmem:[%s16706_s2 + $0x80] sm:$0xff]  ;;  %v572_v50 = vld [vmem:[%s16706_s2 + $0x78] sm:$0xff]  ;;  %v570_v53 = vld [vmem:[%s16706_s2 + $0x68] sm:$0xff] }
  0x10   : > { %s9274_s29 = scalar_lea.vmem %s16704_s0, %s9186_s26  ;;  %v571_v55 = vld [vmem:[%s16706_s2 + $0x70] sm:$0xff]  ;;  %v569_v58 = vld [vmem:[%s16706_s2 + $0x60] sm:$0xff]  ;;  %v568_v60 = vld [vmem:[%s16706_s2 + $0x58] sm:$0xff]  ;;  %s278_s26 = scalar_lea.vmem %s16711_s7, %s9060_s19 }
  0x11   : > { %v9277_v0 = vld [vmem:[%s9274_s29 + $0x70] sm:$0xff]  ;;  %v9280_v1 = vld [vmem:[%s9274_s29 + $0x68] sm:$0xff]  ;;  %v9287_v2 = vld [vmem:[%s9274_s29 + $0x78] sm:$0xff] }
  0x12   : > { %462 = vrot.lane.b32.xlu0 %v9277_v0, %s9216_s30  ;;  %460 = vrot.lane.b32.xlu1 %v9280_v1, %s9216_s30  ;;  %v9290_v3 = vld [vmem:[%s9274_s29 + $0x8] sm:$0xff]  ;;  %v9297_v4 = vld [vmem:[%s9274_s29 + $0x10] sm:$0xff] }
  0x13   : > { %v9300_v5 = vld [vmem:[%s9274_s29] sm:$0xff]  ;;  %v9324_v8 = vld [vmem:[%s9274_s29 + $0x88] sm:$0xff]  ;;  %v9331_v9 = vld [vmem:[%s9274_s29 + $0x18] sm:$0xff] }
  0x14   : > { %v9321_v7 = vld [vmem:[%s9274_s29 + $0x80] sm:$0xff]  ;;  %v9349_v11 = vld [vmem:[%s9274_s29 + $0x90] sm:$0xff]  ;;  %v9352_v12 = vld [vmem:[%s9274_s29 + $0x98] sm:$0xff] }
  0x15   : > { %v9334_v10 = vld [vmem:[%s9274_s29 + $0x20] sm:$0xff]  ;;  %v9359_v13 = vld [vmem:[%s9274_s29 + $0x28] sm:$0xff]  ;;  %v9362_v14 = vld [vmem:[%s9274_s29 + $0x30] sm:$0xff] }
  0x16   : > { %464 = vrot.lane.b32.xlu0 %v9287_v2, %s9216_s30  ;;  %436 = vrot.lane.b32.xlu1 %v9290_v3, %s9216_s30  ;;  %v9377_v15 = vld [vmem:[%s9274_s29 + $0xa0] sm:$0xff]  ;;  %v9380_v16 = vld [vmem:[%s9274_s29 + $0xa8] sm:$0xff] }
  0x17   : > { %v9387_v17 = vld [vmem:[%s9274_s29 + $0x38] sm:$0xff]  ;;  %v9390_v18 = vld [vmem:[%s9274_s29 + $0x40] sm:$0xff]  ;;  %v9405_v19 = vld [vmem:[%s9274_s29 + $0xb0] sm:$0xff] }
  0x18   : > { %v9408_v20 = vld [vmem:[%s9274_s29 + $0xb8] sm:$0xff]  ;;  %v9415_v22 = vld [vmem:[%s9274_s29 + $0x48] sm:$0xff]  ;;  %v9418_v23 = vld [vmem:[%s9274_s29 + $0x50] sm:$0xff] }
  0x19   : > { %v9433_v24 = vld [vmem:[%s9274_s29 + $0xc0] sm:$0xff]  ;;  %v9436_v25 = vld [vmem:[%s9274_s29 + $0xc8] sm:$0xff]  ;;  %v9443_v26 = vld [vmem:[%s9274_s29 + $0x58] sm:$0xff] }
  0x1a   : > { %438 = vrot.lane.b32.xlu0 %v9297_v4, %s9216_s30  ;;  %434 = vrot.lane.b32.xlu1 %v9300_v5, %s9216_s30  ;;  %v9446_v27 = vld [vmem:[%s9274_s29 + $0x60] sm:$0xff]  ;;  %v566_v63 = vld [vmem:[%s16706_s2 + $0x48] sm:$0xff] }
  0x1e   : > { %359 = vrot.lane.b32.xlu0 %v9277_v0, %s9217_s8  ;;  %361 = vrot.lane.b32.xlu1 %v9287_v2, %s9217_s8 }
  0x22   : > { %357 = vrot.lane.b32.xlu0 %v9280_v1, %s9217_s8  ;;  %333 = vrot.lane.b32.xlu1 %v9290_v3, %s9217_s8 }
  0x26   : > { %335 = vrot.lane.b32.xlu0 %v9297_v4, %s9217_s8  ;;  %331 = vrot.lane.b32.xlu1 %v9300_v5, %s9217_s8 }
  0x2a   : > { %466 = vrot.lane.b32.xlu0 %v9321_v7, %s9216_s30  ;;  %468 = vrot.lane.b32.xlu1 %v9324_v8, %s9216_s30 }
  0x2e   : > { %440 = vrot.lane.b32.xlu0 %v9331_v9, %s9216_s30  ;;  %442 = vrot.lane.b32.xlu1 %v9334_v10, %s9216_s30 }
  0x32   : > { %363 = vrot.lane.b32.xlu0 %v9321_v7, %s9217_s8  ;;  %365 = vrot.lane.b32.xlu1 %v9324_v8, %s9217_s8 }
  0x36   : > { %337 = vrot.lane.b32.xlu0 %v9331_v9, %s9217_s8  ;;  %339 = vrot.lane.b32.xlu1 %v9334_v10, %s9217_s8 }
  0x3a   : > { %470 = vrot.lane.b32.xlu0 %v9349_v11, %s9216_s30  ;;  %472 = vrot.lane.b32.xlu1 %v9352_v12, %s9216_s30 }
  0x3e   : > { %444 = vrot.lane.b32.xlu0 %v9359_v13, %s9216_s30  ;;  %446 = vrot.lane.b32.xlu1 %v9362_v14, %s9216_s30 }
  0x42   : > { %367 = vrot.lane.b32.xlu0 %v9349_v11, %s9217_s8  ;;  %369 = vrot.lane.b32.xlu1 %v9352_v12, %s9217_s8 }
  0x46   : > { %341 = vrot.lane.b32.xlu0 %v9359_v13, %s9217_s8  ;;  %343 = vrot.lane.b32.xlu1 %v9362_v14, %s9217_s8 }
  0x4a   : > { %474 = vrot.lane.b32.xlu0 %v9377_v15, %s9216_s30  ;;  %476 = vrot.lane.b32.xlu1 %v9380_v16, %s9216_s30 }
  0x4e   : > { %448 = vrot.lane.b32.xlu0 %v9387_v17, %s9216_s30  ;;  %450 = vrot.lane.b32.xlu1 %v9390_v18, %s9216_s30 }
  0x52   : > { %371 = vrot.lane.b32.xlu0 %v9377_v15, %s9217_s8  ;;  %373 = vrot.lane.b32.xlu1 %v9380_v16, %s9217_s8 }
  0x56   : > { %345 = vrot.lane.b32.xlu0 %v9387_v17, %s9217_s8  ;;  %347 = vrot.lane.b32.xlu1 %v9390_v18, %s9217_s8 }
  0x5a   : > { %478 = vrot.lane.b32.xlu0 %v9405_v19, %s9216_s30  ;;  %480 = vrot.lane.b32.xlu1 %v9408_v20, %s9216_s30 }
  0x5e   : > { %452 = vrot.lane.b32.xlu0 %v9415_v22, %s9216_s30  ;;  %454 = vrot.lane.b32.xlu1 %v9418_v23, %s9216_s30 }
  0x62   : > { %375 = vrot.lane.b32.xlu0 %v9405_v19, %s9217_s8  ;;  %377 = vrot.lane.b32.xlu1 %v9408_v20, %s9217_s8 }
  0x66   : > { %349 = vrot.lane.b32.xlu0 %v9415_v22, %s9217_s8  ;;  %351 = vrot.lane.b32.xlu1 %v9418_v23, %s9217_s8 }
  0x6a   : > { %482 = vrot.lane.b32.xlu0 %v9433_v24, %s9216_s30  ;;  %484 = vrot.lane.b32.xlu1 %v9436_v25, %s9216_s30 }
  0x6e   : > { %456 = vrot.lane.b32.xlu0 %v9443_v26, %s9216_s30  ;;  %458 = vrot.lane.b32.xlu1 %v9446_v27, %s9216_s30 }
  0x72   : > { %379 = vrot.lane.b32.xlu0 %v9433_v24, %s9217_s8  ;;  %381 = vrot.lane.b32.xlu1 %v9436_v25, %s9217_s8 }
  0x76   : > { %353 = vrot.lane.b32.xlu0 %v9443_v26, %s9217_s8  ;;  %355 = vrot.lane.b32.xlu1 %v9446_v27, %s9217_s8 }
  0x7a   : > { %604 = vperm.xlu0 %9199, %v562_v28   ;;  %614 = vperm.xlu1 %9200, %v564_v29  }
  0x7e   : > { %609 = vperm.xlu0 %9199, %v563_v30   ;;  %599 = vperm.xlu1 %9200, %v561_v31  }
  0x82   : > { %594 = vperm.xlu0 %9199, %v560_v32   ;;  %584 = vperm.xlu1 %9200, %v558_v33   ;;  %v9529_v33 = vld [vmem:[%s16705_s1] sm:$0xff] }
  0x84   : > { %v463_v36 = vpop.permute.xlu0 %462  ;;  %v461_v37 = vpop.permute.xlu1 %460 }
  0x85   : > { %v499_v43 = vsel %vm486_vm0, %v461_v37, %v463_v36  ;;  %v9547_v37 = vld [vmem:[%s16705_s1 + $0x8] sm:$0xff] }
  0x86   : > { %589 = vperm.xlu0 %9199, %v559_v34   ;;  %579 = vperm.xlu1 %9200, %v557_v35   ;;  %v567_v34 = vld [vmem:[%s16706_s2 + $0x50] sm:$0xff] }
  0x88   : > { %v465_v39 = vpop.permute.xlu0 %464  ;;  %v437_v40 = vpop.permute.xlu1 %436 }
  0x89   : > { %v500_v42 = vsel %vm486_vm0, %v463_v36, %v465_v39 }
  0x8a   : > { %758 = vmatprep.subr.mxu0 %v500_v42  ;;  %674 = vperm.xlu0 %9199, %v576_v38  }
  0x8b   : > { %759 = vmatpush1.msra.mxu0 %v499_v43  ;;  %664 = vperm.xlu1 %9200, %v574_v41   ;;  %v9557_v41 = vld [vmem:[%s16705_s1 + $0x10] sm:$0xff] }
  0x8c   : > { %v439_v45 = vpop.permute.xlu0 %438  ;;  %v435_v46 = vpop.permute.xlu1 %434 }
  0x8d   : > { %v488_v48 = vsel %vm486_vm0, %v437_v40, %v439_v45  ;;  %v487_v49 = vsel %vm486_vm0, %v435_v46, %v437_v40  ;;  %v9567_v46 = vld [vmem:[%s16705_s1 + $0x18] sm:$0xff] }
  0x8e   : > { %760 = vmatprep.subr.mxu0 %v488_v48  ;;  %669 = vperm.xlu0 %9199, %v575_v44  }
  0x8f   : > { %761 = vmatpush1.msra.mxu0 %v487_v49  ;;  %659 = vperm.xlu1 %9200, %v573_v47  }
  0x90   : > { %v360_v51 = vpop.permute.xlu0 %359  ;;  %v362_v52 = vpop.permute.xlu1 %361 }
  0x91   : > { %v397_v54 = vsel %vm383_vm1, %v360_v51, %v362_v52 }
  0x92   : > { %762 = vmatprep.subr.mxu0 %v397_v54  ;;  %654 = vperm.xlu0 %9199, %v572_v50  }
  0x93   : > { %644 = vperm.xlu1 %9200, %v570_v53  }
  0x94   : > { %v358_v56 = vpop.permute.xlu0 %357  ;;  %v334_v57 = vpop.permute.xlu1 %333 }
  0x95   : > { %v396_v59 = vsel %vm383_vm1, %v358_v56, %v360_v51  ;;  %v9579_v51 = vld [vmem:[%s16705_s1 + $0x20] sm:$0xff] }
  0x96   : > { %763 = vmatpush1.msra.mxu0 %v396_v59  ;;  %649 = vperm.xlu0 %9199, %v571_v55  }
  0x97   : > { %639 = vperm.xlu1 %9200, %v569_v58  }
  0x98   : > { %v336_v61 = vpop.permute.xlu0 %335  ;;  %v332_v62 = vpop.permute.xlu1 %331 }
  0x99   : > { %v385_v21 = vsel %vm383_vm1, %v334_v57, %v336_v61  ;;  %v384_v28 = vsel %vm383_vm1, %v332_v62, %v334_v57  ;;  %v9607_v57 = vld [vmem:[%s16705_s1 + $0x30] sm:$0xff]  ;;  %v9620_v62 = vld [vmem:[%s16705_s1 + $0x38] sm:$0xff] }
  0x9a   : > { %764 = vmatprep.subr.mxu0 %v385_v21  ;;  %634 = vperm.xlu0 %9199, %v568_v60  }
  0x9b   : > { %765 = vmatpush1.msra.mxu0 %v384_v28  ;;  %624 = vperm.xlu1 %9200, %v566_v63  }
  0x9c   : > { %v467_v29 = vpop.permute.xlu0 %466  ;;  %766 = vmatprep.subr.mxu0 %v9277_v0  ;;  %v469_v30 = vpop.permute.xlu1 %468  ;;  %v565_v0 = vld [vmem:[%s16706_s2 + $0x40] sm:$0xff] }
  0x9d   : > { %767 = vmatpush1.msra.mxu0 %v9280_v1  ;;  %v502_v31 = vsel %vm486_vm0, %v467_v29, %v469_v30  ;;  %v501_v32 = vsel %vm486_vm0, %v465_v39, %v467_v29 }
  0x9e   : > { %768 = vmatprep.subr.mxu0 %v9290_v3  ;;  %943 = vmatprep.subr.mxu1 %v502_v31 }
  0x9f   : > { %769 = vmatpush1.msra.mxu0 %v9300_v5  ;;  %944 = vmatpush1.msra.mxu1 %v501_v32 }
  0xa0   : > { %v441_v1 = vpop.permute.xlu0 %440  ;;  %8052 = vmatmul.mubr.msk.f32.vlgmr.msra.gmra.mxu0 %vm677_vm2, %v9529_v33  ;;  %v443_v35 = vpop.permute.xlu1 %442  ;;  %629 = vperm.xlu0 %9199, %v567_v34  }
  0xa1   : > { %v490_v36 = vsel %vm486_vm0, %v441_v1, %v443_v35  ;;  %808 = vmatprep.mubr.f32.mxu0 %v16714_v6  ;;  %v489_v3 = vsel %vm486_vm0, %v439_v45, %v441_v1  ;;  %619 = vperm.xlu1 %9200, %v565_v0  }
  0xa2   : > { %945 = vmatprep.subr.mxu1 %v490_v36 }
  0xa3   : > { %946 = vmatpush1.msra.mxu1 %v489_v3 }
  0xa4   : > { %v364_v5 = vpop.permute.xlu0 %363  ;;  %8053 = vmatmul.mubr.msk.f32.gmra.mxu0 %vm677_vm2, %v9547_v37  ;;  %v366_v38 = vpop.permute.xlu1 %365 }
  0xa5   : > { %v399_v39 = vsel %vm383_vm1, %v364_v5, %v366_v38  ;;  %814 = vmatprep.mubr.f32.mxu0 %v16714_v6  ;;  %v398_v40 = vsel %vm383_vm1, %v362_v52, %v364_v5 }
  0xa6   : > { %947 = vmatprep.subr.mxu1 %v399_v39  ;;  %v9688_v39 = vld [vmem:[%s16705_s1 + $0x58] sm:$0xff] }
  0xa7   : > { %948 = vmatpush1.msra.mxu1 %v398_v40 }
  0xa8   : > { %v338_v42 = vpop.permute.xlu0 %337  ;;  %8054 = vmatmul.mubr.msk.f32.gmra.mxu0 %vm677_vm2, %v9557_v41  ;;  %v340_v43 = vpop.permute.xlu1 %339 }
  0xa9   : > { %v387_v44 = vsel %vm383_vm1, %v338_v42, %v340_v43  ;;  %820 = vmatprep.mubr.f32.mxu0 %v16714_v6  ;;  %v386_v45 = vsel %vm383_vm1, %v336_v61, %v338_v42 }
  0xaa   : > { %949 = vmatprep.subr.mxu1 %v387_v44 }
  0xab   : > { %950 = vmatpush1.msra.mxu1 %v386_v45 }
  0xac   : > { %v471_v47 = vpop.permute.xlu0 %470  ;;  %8055 = vmatmul.mubr.msk.f32.gmra.mxu0 %vm677_vm2, %v9567_v46  ;;  %951 = vmatprep.subr.mxu1 %v9321_v7  ;;  %v473_v48 = vpop.permute.xlu1 %472 }
  0xad   : > { %v503_v49 = vsel %vm486_vm0, %v469_v30, %v471_v47  ;;  %952 = vmatpush1.msra.mxu1 %v9287_v2  ;;  %v504_v50 = vsel %vm486_vm0, %v471_v47, %v473_v48  ;;  %826 = vmatprep.mubr.f32.mxu0 %v16714_v6  ;;  %v9636_v30 = vld [vmem:[%s16705_s1 + $0x40] sm:$0xff] }
  0xae   : > { %953 = vmatprep.subr.mxu1 %v9331_v9  ;;  %1128 = vmatprep.subr.mxu0 %v504_v50  ;;  %v9749_v50 = vld [vmem:[%s16705_s1 + $0x78] sm:$0xff] }
  0xaf   : > { %954 = vmatpush1.msra.mxu1 %v9297_v4  ;;  %1129 = vmatpush1.msra.mxu0 %v503_v49  ;;  %v9594_v4 = vld [vmem:[%s16705_s1 + $0x28] sm:$0xff]  ;;  %v9736_v49 = vld [vmem:[%s16705_s1 + $0x70] sm:$0xff] }
  0xb0   : > { %v445_v7 = vpop.permute.xlu0 %444  ;;  %8056 = vmatmul.mubr.msk.f32.gmra.mxu0 %vm677_vm2, %v9579_v51  ;;  %8072 = vmatmul.mubr.msk.f32.vlgmr.msra.gmra.mxu1 %vm677_vm2, %v9529_v33  ;;  %v447_v2 = vpop.permute.xlu1 %446 }
  0xb1   : > { %v491_v52 = vsel %vm486_vm0, %v443_v35, %v445_v7  ;;  %v492_v53 = vsel %vm486_vm0, %v445_v7, %v447_v2  ;;  %832 = vmatprep.mubr.f32.mxu0 %v16714_v6  ;;  %993 = vmatprep.mubr.f32.mxu1 %v16714_v6 }
  0xb2   : > { %1130 = vmatprep.subr.mxu0 %v492_v53 }
  0xb3   : > { %1131 = vmatpush1.msra.mxu0 %v491_v52  ;;  %v9764_v52 = vld [vmem:[%s16705_s1 + $0x80] sm:$0xff] }
  0xb4   : > { %v368_v9 = vpop.permute.xlu0 %367  ;;  %8057 = vmatmul.mubr.msk.f32.gmra.mxu0 %vm677_vm2, %v9594_v4  ;;  %8073 = vmatmul.mubr.msk.f32.gmra.mxu1 %vm677_vm2, %v9547_v37  ;;  %v370_v54 = vpop.permute.xlu1 %369 }
  0xb5   : > { %v400_v55 = vsel %vm383_vm1, %v366_v38, %v368_v9  ;;  %v401_v56 = vsel %vm383_vm1, %v368_v9, %v370_v54  ;;  %838 = vmatprep.mubr.f32.mxu0 %v16714_v6  ;;  %999 = vmatprep.mubr.f32.mxu1 %v16714_v6  ;;  %v9778_v9 = vld [vmem:[%s16705_s1 + $0x88] sm:$0xff] }
  0xb6   : > { %1132 = vmatprep.subr.mxu0 %v401_v56 }
  0xb7   : > { %1133 = vmatpush1.msra.mxu0 %v400_v55  ;;  %v9800_v55 = vld [vmem:[%s16705_s1 + $0x98] sm:$0xff] }
  0xb8   : > { %v342_v58 = vpop.permute.xlu0 %341  ;;  %8058 = vmatmul.mubr.msk.f32.gmra.mxu0 %vm677_vm2, %v9607_v57  ;;  %8074 = vmatmul.mubr.msk.f32.gmra.mxu1 %vm677_vm2, %v9557_v41  ;;  %v344_v59 = vpop.permute.xlu1 %343 }
  0xb9   : > { %v388_v60 = vsel %vm383_vm1, %v340_v43, %v342_v58  ;;  %v389_v61 = vsel %vm383_vm1, %v342_v58, %v344_v59  ;;  %844 = vmatprep.mubr.f32.mxu0 %v16714_v6  ;;  %1005 = vmatprep.mubr.f32.mxu1 %v16714_v6  ;;  %v9703_v43 = vld [vmem:[%s16705_s1 + $0x60] sm:$0xff] }
  0xba   : > { %1134 = vmatprep.subr.mxu0 %v389_v61 }
  0xbb   : > { %1135 = vmatpush1.msra.mxu0 %v388_v60 }
  0xbc   : > { %v475_v63 = vpop.permute.xlu0 %474  ;;  %8059 = vmatmul.mubr.msk.f32.gmra.mxu0 %vm677_vm2, %v9620_v62  ;;  %8075 = vmatmul.mubr.msk.f32.gmra.mxu1 %vm677_vm2, %v9567_v46  ;;  %v9626_v21 = vpop.permute.xlu1 %476 }
  0xbd   : > { %v505_v28 = vsel %vm486_vm0, %v473_v48, %v475_v63  ;;  %v506_v29 = vsel %vm486_vm0, %v475_v63, %v9626_v21  ;;  %850 = vmatprep.mubr.f32.mxu0 %v16714_v6  ;;  %1011 = vmatprep.mubr.f32.mxu1 %v16714_v6  ;;  %v9721_v48 = vld [vmem:[%s16705_s1 + $0x68] sm:$0xff] }
  0xbe   : > { %1313 = vmatprep.subr.mxu1 %v506_v29  ;;  %1136 = vmatprep.subr.mxu0 %v9349_v11 }
  0xbf   : > { %1314 = vmatpush1.msra.mxu1 %v505_v28  ;;  %1137 = vmatpush1.msra.mxu0 %v9324_v8  ;;  %v9654_v8 = vld [vmem:[%s16705_s1 + $0x48] sm:$0xff] }
  0xc0   : > { %v449_v31 = vpop.permute.xlu0 %448  ;;  %8060 = vmatmul.mubr.msk.f32.gmra.mxu0 %vm677_vm2, %v9636_v30  ;;  %8076 = vmatmul.mubr.msk.f32.gmra.mxu1 %vm677_vm2, %v9579_v51  ;;  %v9644_v32 = vpop.permute.xlu1 %450  ;;  %v3633_v28 = vld [vmem:[%s16708_s4 + $0x8] sm:$0xff] }
  0xc1   : > { %v493_v34 = vsel %vm486_vm0, %v447_v2, %v449_v31  ;;  %v494_v0 = vsel %vm486_vm0, %v449_v31, %v9644_v32  ;;  %856 = vmatprep.mubr.f32.mxu0 %v16714_v6  ;;  %1017 = vmatprep.mubr.f32.mxu1 %v16714_v6 }
  0xc2   : > { %1315 = vmatprep.subr.mxu1 %v494_v0  ;;  %1138 = vmatprep.subr.mxu0 %v9359_v13 }
  0xc3   : > { %1316 = vmatpush1.msra.mxu1 %v493_v34  ;;  %1139 = vmatpush1.msra.mxu0 %v9334_v10  ;;  %v9672_v10 = vld [vmem:[%s16705_s1 + $0x50] sm:$0xff] }
  0xc4   : > { %v372_v11 = vpop.permute.xlu0 %371  ;;  %8061 = vmatmul.mubr.msk.f32.gmra.mxu0 %vm677_vm2, %v9654_v8  ;;  %8077 = vmatmul.mubr.msk.f32.gmra.mxu1 %vm677_vm2, %v9594_v4  ;;  %v9662_v1 = vpop.permute.xlu1 %373 }
  0xc5   : > { %v402_v35 = vsel %vm383_vm1, %v370_v54, %v372_v11  ;;  %v403_v36 = vsel %vm383_vm1, %v372_v11, %v9662_v1  ;;  %862 = vmatprep.mubr.f32.mxu0 %v16714_v6  ;;  %1023 = vmatprep.mubr.f32.mxu1 %v16714_v6  ;;  %v9789_v54 = vld [vmem:[%s16705_s1 + $0x90] sm:$0xff] }
  0xc6   : > { %1317 = vmatprep.subr.mxu1 %v403_v36  ;;  %3643 = vperm.xlu0 %9199, %v3633_v28   ;;  %v3634_v11 = vld [vmem:[%s16708_s4 + $0x10] sm:$0xff] }
  0xc7   : > { %1318 = vmatpush1.msra.mxu1 %v402_v35 }
  0xc8   : > { %v346_v13 = vpop.permute.xlu0 %345  ;;  %8062 = vmatmul.mubr.msk.f32.gmra.mxu0 %vm677_vm2, %v9672_v10  ;;  %8078 = vmatmul.mubr.msk.f32.gmra.mxu1 %vm677_vm2, %v9607_v57  ;;  %v9678_v3 = vpop.permute.xlu1 %347 }
  0xc9   : > { %v390_v5 = vsel %vm383_vm1, %v344_v59, %v346_v13  ;;  %v391_v38 = vsel %vm383_vm1, %v346_v13, %v9678_v3  ;;  %868 = vmatprep.mubr.f32.mxu0 %v16714_v6  ;;  %1029 = vmatprep.mubr.f32.mxu1 %v16714_v6 }
  0xca   : > { %1319 = vmatprep.subr.mxu1 %v391_v38 }
  0xcb   : > { %1320 = vmatpush1.msra.mxu1 %v390_v5 }
  0xcc   : > { %v9690_v40 = vpop.permute.xlu0 %478  ;;  %8063 = vmatmul.mubr.msk.f32.gmra.mxu0 %vm677_vm2, %v9688_v39  ;;  %8079 = vmatmul.mubr.msk.f32.gmra.mxu1 %vm677_vm2, %v9620_v62  ;;  %v9696_v42 = vpop.permute.xlu1 %480 }
  0xcd   : > { %874 = vmatprep.mubr.f32.mxu0 %v16714_v6  ;;  %1035 = vmatprep.mubr.f32.mxu1 %v16714_v6  ;;  %v508_v44 = vsel %vm486_vm0, %v9690_v40, %v9696_v42  ;;  %v507_v56 = vsel %vm486_vm0, %v9626_v21, %v9690_v40 }
  0xce   : > { %1498 = vmatprep.subr.mxu0 %v508_v44  ;;  %1321 = vmatprep.subr.mxu1 %v9377_v15 }
  0xcf   : > { %1322 = vmatpush1.msra.mxu1 %v9352_v12 }
  0xd0   : > { %v453_v45 = vpop.permute.xlu0 %452  ;;  %8064 = vmatmul.mubr.msk.f32.gmra.mxu0 %vm677_vm2, %v9703_v43  ;;  %8080 = vmatmul.mubr.msk.f32.gmra.mxu1 %vm677_vm2, %v9636_v30  ;;  %v9714_v47 = vpop.permute.xlu1 %454 }
  0xd1   : > { %880 = vmatprep.mubr.f32.mxu0 %v16714_v6  ;;  %1041 = vmatprep.mubr.f32.mxu1 %v16714_v6  ;;  %v496_v58 = vsel %vm486_vm0, %v453_v45, %v9714_v47  ;;  %v495_v59 = vsel %vm486_vm0, %v9644_v32, %v453_v45  ;;  %v3632_v32 = vld [vmem:[%s16708_s4] sm:$0xff] }
  0xd2   : > { %1323 = vmatprep.subr.mxu1 %v9387_v17  ;;  %3638 = vperm.xlu1 %9200, %v3632_v32  }
  0xd3   : > { %1324 = vmatpush1.msra.mxu1 %v9362_v14 }
  0xd4   : > { %8065 = vmatmul.mubr.msk.f32.gmra.mxu0 %vm677_vm2, %v9721_v48  ;;  %8081 = vmatmul.mubr.msk.f32.gmra.mxu1 %vm677_vm2, %v9654_v8  ;;  %v376_v12 = vpop.permute.xlu0 %375  ;;  %v9729_v15 = vpop.permute.xlu1 %377 }
  0xd5   : > { %886 = vmatprep.mubr.f32.mxu0 %v16714_v6  ;;  %1047 = vmatprep.mubr.f32.mxu1 %v16714_v6  ;;  %v405_v60 = vsel %vm383_vm1, %v376_v12, %v9729_v15  ;;  %v404_v61 = vsel %vm383_vm1, %v9662_v1, %v376_v12 }
  0xd6   : > { %3648 = vperm.xlu1 %9200, %v3634_v11  }
  0xd8   : > { %8066 = vmatmul.mubr.msk.f32.gmra.mxu0 %vm677_vm2, %v9736_v49  ;;  %8082 = vmatmul.mubr.msk.f32.gmra.mxu1 %vm677_vm2, %v9672_v10  ;;  %v350_v14 = vpop.permute.xlu0 %349  ;;  %v9742_v17 = vpop.permute.xlu1 %351 }
  0xd9   : > { %892 = vmatprep.mubr.f32.mxu0 %v16714_v6  ;;  %1053 = vmatprep.mubr.f32.mxu1 %v16714_v6  ;;  %v393_v63 = vsel %vm383_vm1, %v350_v14, %v9742_v17  ;;  %v392_v21 = vsel %vm383_vm1, %v9678_v3, %v350_v14 }
  0xdc   : > { %8067 = vmatmul.mubr.msk.f32.gmra.mxu0 %vm677_vm2, %v9749_v50  ;;  %8083 = vmatmul.mubr.msk.f32.gmra.mxu1 %vm677_vm2, %v9688_v39  ;;  %v9755_v7 = vpop.permute.xlu0 %482  ;;  %v9757_v2 = vpop.permute.xlu1 %484 }
  0xdd   : > { %898 = vmatprep.mubr.f32.mxu0 %v16714_v6  ;;  %1059 = vmatprep.mubr.f32.mxu1 %v16714_v6  ;;  %v510_v53 = vsel %vm486_vm0, %v9755_v7, %v9757_v2 }
  0xde   : > { %1683 = vmatprep.subr.mxu1 %v510_v53 }
  0xe0   : > { %8068 = vmatmul.mubr.msk.f32.gmra.mxu0 %vm677_vm2, %v9764_v52  ;;  %8084 = vmatmul.mubr.msk.f32.gmra.mxu1 %vm677_vm2, %v9703_v43  ;;  %v457_v29 = vpop.permute.xlu0 %456  ;;  %v9843_v31 = vpop.permute.xlu1 %458 }
  0xe1   : > { %904 = vmatprep.mubr.f32.mxu0 %v16714_v6  ;;  %1065 = vmatprep.mubr.f32.mxu1 %v16714_v6  ;;  %v498_v0 = vsel %vm486_vm0, %v457_v29, %v9843_v31 }
  0xe4   : > { %8069 = vmatmul.mubr.msk.f32.gmra.mxu0 %vm677_vm2, %v9778_v9  ;;  %8085 = vmatmul.mubr.msk.f32.gmra.mxu1 %vm677_vm2, %v9721_v48  ;;  %v9865_v34 = vpop.permute.xlu1 %381 }
  0xe5   : > { %910 = vmatprep.mubr.f32.mxu0 %v16714_v6  ;;  %1071 = vmatprep.mubr.f32.mxu1 %v16714_v6 }
  0xe8   : > { %8070 = vmatmul.mubr.msk.f32.gmra.mxu0 %vm677_vm2, %v9789_v54  ;;  %8086 = vmatmul.mubr.msk.f32.gmra.mxu1 %vm677_vm2, %v9736_v49  ;;  %v9887_v36 = vpop.permute.xlu1 %355 }
  0xe9   : > { %916 = vmatprep.mubr.f32.mxu0 %v16714_v6  ;;  %1077 = vmatprep.mubr.f32.mxu1 %v16714_v6 }
  0xec   : > { %8071 = vmatmul.mubr.msk.f32.gmra.mxu0 %vm677_vm2, %v9800_v55  ;;  %8087 = vmatmul.mubr.msk.f32.gmra.mxu1 %vm677_vm2, %v9749_v50 }
  0xed   : > { %1083 = vmatprep.mubr.f32.mxu1 %v16714_v6  ;;  %1172 = vmatprep.mubr.f32.mxu0 %v16714_v6 }
  0xf0   : > { %8088 = vmatmul.mubr.msk.f32.gmra.mxu1 %vm677_vm2, %v9764_v52  ;;  %8092 = vmatmul.mubr.msk.f32.vlgmr.msra.gmra.mxu0 %vm677_vm2, %v9529_v33 }
  0xf1   : > { %1499 = vmatpush1.msra.mxu0 %v507_v56  ;;  %1089 = vmatprep.mubr.f32.mxu1 %v16714_v6 }
  0xf2   : > { %1500 = vmatprep.subr.mxu0 %v496_v58  ;;  %1178 = vmatprep.mubr.f32.mxu0 %v16714_v6 }
  0xf3   : > { %1501 = vmatpush1.msra.mxu0 %v495_v59 }
  0xf4   : > { %1502 = vmatprep.subr.mxu0 %v405_v60  ;;  %8089 = vmatmul.mubr.msk.f32.gmra.mxu1 %vm677_vm2, %v9778_v9 }
  0xf5   : > { %8093 = vmatmul.mubr.msk.f32.gmra.mxu0 %vm677_vm2, %v9547_v37  ;;  %1095 = vmatprep.mubr.f32.mxu1 %v16714_v6 }
  0xf6   : > { %1503 = vmatpush1.msra.mxu0 %v404_v61  ;;  %1184 = vmatprep.mubr.f32.mxu0 %v16714_v6 }
  0xf7   : > { %1504 = vmatprep.subr.mxu0 %v393_v63 }
  0xf8   : > { %1505 = vmatpush1.msra.mxu0 %v392_v21  ;;  %8090 = vmatmul.mubr.msk.f32.gmra.mxu1 %vm677_vm2, %v9789_v54 }
  0xf9   : > { %8094 = vmatmul.mubr.msk.f32.gmra.mxu0 %vm677_vm2, %v9557_v41  ;;  %1101 = vmatprep.mubr.f32.mxu1 %v16714_v6 }
  0xfa   : > { %1190 = vmatprep.mubr.f32.mxu0 %v16714_v6  ;;  %1506 = vmatprep.subr.mxu0 %v9405_v19  ;;  %v3635_v19 = vld [vmem:[%s16708_s4 + $0x18] sm:$0xff] }
  0xfb   : > { %1507 = vmatpush1.msra.mxu0 %v9380_v16  ;;  %v509_v16 = vsel %vm486_vm0, %v9696_v42, %v9755_v7  ;;  %3653 = vperm.xlu0 %9199, %v3635_v19  }
  0xfc   : > { %8091 = vmatmul.mubr.msk.f32.gmra.mxu1 %vm677_vm2, %v9800_v55  ;;  %1508 = vmatprep.subr.mxu0 %v9415_v22  ;;  %v380_v22 = vpop.permute.xlu0 %379 }
  0xfd   : > { %8095 = vmatmul.mubr.msk.f32.gmra.mxu0 %vm677_vm2, %v9567_v46  ;;  %1357 = vmatprep.mubr.f32.mxu1 %v16714_v6  ;;  %v407_v1 = vsel %vm383_vm1, %v380_v22, %v9865_v34  ;;  %v406_v13 = vsel %vm383_vm1, %v9729_v15, %v380_v22 }
  0xfe   : > { %1196 = vmatprep.mubr.f32.mxu0 %v16714_v6  ;;  %1509 = vmatpush1.msra.mxu0 %v9390_v18  ;;  %v497_v18 = vsel %vm486_vm0, %v9714_v47, %v457_v29 }
  0xff   : > { %9108 = vmatprep.subr.mxu0 %v9757_v2 }
 0x100   : > { %8112 = vmatmul.mubr.msk.f32.vlgmr.msra.gmra.mxu1 %vm677_vm2, %v9529_v33  ;;  %v354_v35 = vpop.permute.xlu0 %353 }
 0x101   : > { %8096 = vmatmul.mubr.msk.f32.gmra.mxu0 %vm677_vm2, %v9579_v51  ;;  %1684 = vmatpush1.msra.mxu1 %v509_v16  ;;  %v395_v3 = vsel %vm383_vm1, %v354_v35, %v9887_v36  ;;  %v394_v5 = vsel %vm383_vm1, %v9742_v17, %v354_v35 }
 0x102   : > { %1202 = vmatprep.mubr.f32.mxu0 %v16714_v6  ;;  %1363 = vmatprep.mubr.f32.mxu1 %v16714_v6 }
 0x103   : > { %1685 = vmatprep.subr.mxu1 %v498_v0 }
 0x104   : > { %8113 = vmatmul.mubr.msk.f32.gmra.mxu1 %vm677_vm2, %v9547_v37 }
 0x105   : > { %8097 = vmatmul.mubr.msk.f32.gmra.mxu0 %vm677_vm2, %v9594_v4  ;;  %1686 = vmatpush1.msra.mxu1 %v497_v18 }
 0x106   : > { %1208 = vmatprep.mubr.f32.mxu0 %v16714_v6  ;;  %1369 = vmatprep.mubr.f32.mxu1 %v16714_v6 }
 0x107   : > { %1687 = vmatprep.subr.mxu1 %v407_v1 }
 0x108   : > { %8114 = vmatmul.mubr.msk.f32.gmra.mxu1 %vm677_vm2, %v9557_v41 }
 0x109   : > { %8098 = vmatmul.mubr.msk.f32.gmra.mxu0 %vm677_vm2, %v9607_v57  ;;  %1688 = vmatpush1.msra.mxu1 %v406_v13 }
 0x10a   : > { %1214 = vmatprep.mubr.f32.mxu0 %v16714_v6  ;;  %1375 = vmatprep.mubr.f32.mxu1 %v16714_v6 }
 0x10b   : > { %1689 = vmatprep.subr.mxu1 %v395_v3 }
 0x10c   : > { %8115 = vmatmul.mubr.msk.f32.gmra.mxu1 %vm677_vm2, %v9567_v46 }
 0x10d   : > { %8099 = vmatmul.mubr.msk.f32.gmra.mxu0 %vm677_vm2, %v9620_v62  ;;  %1690 = vmatpush1.msra.mxu1 %v394_v5 }
 0x10e   : > { %1220 = vmatprep.mubr.f32.mxu0 %v16714_v6  ;;  %1381 = vmatprep.mubr.f32.mxu1 %v16714_v6 }
 0x10f   : > { %1691 = vmatprep.subr.mxu1 %v9433_v24 }
 0x110   : > { %8116 = vmatmul.mubr.msk.f32.gmra.mxu1 %vm677_vm2, %v9579_v51 }
 0x111   : > { %8100 = vmatmul.mubr.msk.f32.gmra.mxu0 %vm677_vm2, %v9636_v30  ;;  %1387 = vmatprep.mubr.f32.mxu1 %v16714_v6 }
 0x112   : > { %1226 = vmatprep.mubr.f32.mxu0 %v16714_v6  ;;  %1692 = vmatpush1.msra.mxu1 %v9408_v20  ;;  %v10025_v20 = vpop.permute.xlu0 %604 }
 0x113   : > { %1693 = vmatprep.subr.mxu1 %v9443_v26 }
 0x114   : > { %8117 = vmatmul.mubr.msk.f32.gmra.mxu1 %vm677_vm2, %v9594_v4 }
 0x115   : > { %8101 = vmatmul.mubr.msk.f32.gmra.mxu0 %vm677_vm2, %v9654_v8  ;;  %1393 = vmatprep.mubr.f32.mxu1 %v16714_v6 }
 0x116   : > { %1232 = vmatprep.mubr.f32.mxu0 %v16714_v6  ;;  %1694 = vmatpush1.msra.mxu1 %v9418_v23  ;;  %v10028_v23 = vpop.permute.xlu1 %614  ;;  %v10036_v24 = vpop.permute.xlu0 %609 }
 0x118   : > { %8118 = vmatmul.mubr.msk.f32.gmra.mxu1 %vm677_vm2, %v9607_v57 }
 0x119   : > { %8102 = vmatmul.mubr.msk.f32.gmra.mxu0 %vm677_vm2, %v9672_v10  ;;  %1399 = vmatprep.mubr.f32.mxu1 %v16714_v6 }
 0x11a   : > { %1238 = vmatprep.mubr.f32.mxu0 %v16714_v6  ;;  %v10051_v26 = vpop.permute.xlu0 %594 }
 0x11c   : > { %8119 = vmatmul.mubr.msk.f32.gmra.mxu1 %vm677_vm2, %v9620_v62 }
 0x11d   : > { %8103 = vmatmul.mubr.msk.f32.gmra.mxu0 %vm677_vm2, %v9688_v39  ;;  %1405 = vmatprep.mubr.f32.mxu1 %v16714_v6 }
 0x11e   : > { %1244 = vmatprep.mubr.f32.mxu0 %v16714_v6 }
 0x120   : > { %8120 = vmatmul.mubr.msk.f32.gmra.mxu1 %vm677_vm2, %v9636_v30 }
 0x121   : > { %8104 = vmatmul.mubr.msk.f32.gmra.mxu0 %vm677_vm2, %v9703_v43  ;;  %1411 = vmatprep.mubr.f32.mxu1 %v16714_v6 }
 0x122   : > { %1250 = vmatprep.mubr.f32.mxu0 %v16714_v6 }
 0x124   : > { %8121 = vmatmul.mubr.msk.f32.gmra.mxu1 %vm677_vm2, %v9654_v8 }
 0x125   : > { %8105 = vmatmul.mubr.msk.f32.gmra.mxu0 %vm677_vm2, %v9721_v48  ;;  %1417 = vmatprep.mubr.f32.mxu1 %v16714_v6 }
 0x126   : > { %1256 = vmatprep.mubr.f32.mxu0 %v16714_v6 }
 0x128   : > { %8122 = vmatmul.mubr.msk.f32.gmra.mxu1 %vm677_vm2, %v9672_v10 }
 0x129   : > { %8106 = vmatmul.mubr.msk.f32.gmra.mxu0 %vm677_vm2, %v9736_v49  ;;  %1423 = vmatprep.mubr.f32.mxu1 %v16714_v6 }
 0x12a   : > { %1262 = vmatprep.mubr.f32.mxu0 %v16714_v6 }
 0x12c   : > { %8123 = vmatmul.mubr.msk.f32.gmra.mxu1 %vm677_vm2, %v9688_v39 }
 0x12d   : > { %8107 = vmatmul.mubr.msk.f32.gmra.mxu0 %vm677_vm2, %v9749_v50  ;;  %1429 = vmatprep.mubr.f32.mxu1 %v16714_v6 }
 0x12e   : > { %1268 = vmatprep.mubr.f32.mxu0 %v16714_v6 }
 0x130   : > { %8124 = vmatmul.mubr.msk.f32.gmra.mxu1 %vm677_vm2, %v9703_v43 }
 0x131   : > { %8108 = vmatmul.mubr.msk.f32.gmra.mxu0 %vm677_vm2, %v9764_v52  ;;  %1435 = vmatprep.mubr.f32.mxu1 %v16714_v6 }
 0x132   : > { %1274 = vmatprep.mubr.f32.mxu0 %v16714_v6 }
 0x134   : > { %8125 = vmatmul.mubr.msk.f32.gmra.mxu1 %vm677_vm2, %v9721_v48 }
 0x135   : > { %8109 = vmatmul.mubr.msk.f32.gmra.mxu0 %vm677_vm2, %v9778_v9  ;;  %1441 = vmatprep.mubr.f32.mxu1 %v16714_v6 }
 0x136   : > { %1280 = vmatprep.mubr.f32.mxu0 %v16714_v6 }
 0x138   : > { %8126 = vmatmul.mubr.msk.f32.gmra.mxu1 %vm677_vm2, %v9736_v49 }
 0x139   : > { %8110 = vmatmul.mubr.msk.f32.gmra.mxu0 %vm677_vm2, %v9789_v54  ;;  %1447 = vmatprep.mubr.f32.mxu1 %v16714_v6 }
 0x13a   : > { %1286 = vmatprep.mubr.f32.mxu0 %v16714_v6 }
 0x13c   : > { %8127 = vmatmul.mubr.msk.f32.gmra.mxu1 %vm677_vm2, %v9749_v50 }
 0x13d   : > { %8111 = vmatmul.mubr.msk.f32.gmra.mxu0 %vm677_vm2, %v9800_v55  ;;  %1453 = vmatprep.mubr.f32.mxu1 %v16714_v6 }
 0x13e   : > { %1542 = vmatprep.mubr.f32.mxu0 %v16714_v6 }
 0x140   : > { %8128 = vmatmul.mubr.msk.f32.gmra.mxu1 %vm677_vm2, %v9764_v52 }
 0x141   : > { %8132 = vmatmul.mubr.msk.f32.vlgmr.msra.gmra.mxu0 %vm677_vm2, %v9529_v33  ;;  %1459 = vmatprep.mubr.f32.mxu1 %v16714_v6 }
 0x142   : > { %9109 = vmatpush3.msra.mxu0 %v9757_v2  ;;  %1548 = vmatprep.mubr.f32.mxu0 %v16714_v6 }
 0x143   : > { %9110 = vmatprep.subr.mxu0 %v9843_v31 }
 0x144   : > { %9111 = vmatpush3.msra.mxu0 %v9843_v31  ;;  %8129 = vmatmul.mubr.msk.f32.gmra.mxu1 %vm677_vm2, %v9778_v9 }
 0x145   : > { %9112 = vmatprep.subr.mxu0 %v9865_v34  ;;  %8133 = vmatmul.mubr.msk.f32.gmra.mxu0 %vm677_vm2, %v9547_v37 }
 0x146   : > { %9113 = vmatpush3.msra.mxu0 %v9865_v34  ;;  %1465 = vmatprep.mubr.f32.mxu1 %v16714_v6 }
 0x147   : > { %9114 = vmatprep.subr.mxu0 %v9887_v36  ;;  %1554 = vmatprep.mubr.f32.mxu0 %v16714_v6 }
 0x148   : > { %9115 = vmatpush3.msra.mxu0 %v9887_v36  ;;  %8130 = vmatmul.mubr.msk.f32.gmra.mxu1 %vm677_vm2, %v9789_v54 }
 0x149   : > { %8134 = vmatmul.mubr.msk.f32.gmra.mxu0 %vm677_vm2, %v9557_v41  ;;  %1471 = vmatprep.mubr.f32.mxu1 %v16714_v6 }
 0x14a   : > { %1560 = vmatprep.mubr.f32.mxu0 %v16714_v6  ;;  %9116 = vmatprep.subr.mxu0 %v9436_v25 }
 0x14b   : > { %9117 = vmatpush3.msra.mxu0 %v9436_v25  ;;  %v10043_v25 = vpop.permute.xlu1 %599 }
 0x14c   : > { %8131 = vmatmul.mubr.msk.f32.gmra.mxu1 %vm677_vm2, %v9800_v55  ;;  %9118 = vmatprep.subr.mxu0 %v9446_v27 }
 0x14d   : > { %8135 = vmatmul.mubr.msk.f32.gmra.mxu0 %vm677_vm2, %v9567_v46  ;;  %1727 = vmatprep.mubr.f32.mxu1 %v16714_v6 }
 0x14e   : > { %1566 = vmatprep.mubr.f32.mxu0 %v16714_v6  ;;  %9119 = vmatpush3.msra.mxu0 %v9446_v27 }
 0x14f   : > { %v10054_v27 = vpop.permute.xlu1 %584 }
 0x150   : > { %8152 = vmatmul.mubr.msk.f32.vlgmr.msra.gmra.mxu1 %vm677_vm2, %v9529_v33 }
 0x151   : > { %8136 = vmatmul.mubr.msk.f32.gmra.mxu0 %vm677_vm2, %v9579_v51  ;;  %1733 = vmatprep.mubr.f32.mxu1 %v16714_v6 }
 0x152   : > { %1572 = vmatprep.mubr.f32.mxu0 %v16714_v6 }
 0x153   : > { %v10075_v40 = vpop.permute.xlu1 %579 }
 0x154   : > { %8153 = vmatmul.mubr.msk.f32.gmra.mxu1 %vm677_vm2, %v9547_v37 }
 0x155   : > { %8137 = vmatmul.mubr.msk.f32.gmra.mxu0 %vm677_vm2, %v9594_v4  ;;  %1739 = vmatprep.mubr.f32.mxu1 %v16714_v6 }
 0x156   : > { %1578 = vmatprep.mubr.f32.mxu0 %v16714_v6 }
 0x157   : > { %v10089_v47 = vpop.permute.xlu1 %664 }
 0x158   : > { %8154 = vmatmul.mubr.msk.f32.gmra.mxu1 %vm677_vm2, %v9557_v41  ;;  %v10066_v41 = vpop.permute.xlu0 %589 }
 0x159   : > { %8138 = vmatmul.mubr.msk.f32.gmra.mxu0 %vm677_vm2, %v9607_v57  ;;  %1745 = vmatprep.mubr.f32.mxu1 %v16714_v6 }
 0x15a   : > { %1584 = vmatprep.mubr.f32.mxu0 %v16714_v6 }
 0x15b   : > { %v10102_v7 = vpop.permute.xlu1 %659 }
 0x15c   : > { %8155 = vmatmul.mubr.msk.f32.gmra.mxu1 %vm677_vm2, %v9567_v46  ;;  %v10080_v44 = vpop.permute.xlu0 %674 }
 0x15d   : > { %8139 = vmatmul.mubr.msk.f32.gmra.mxu0 %vm677_vm2, %v9620_v62  ;;  %1751 = vmatprep.mubr.f32.mxu1 %v16714_v6 }
 0x15e   : > { %1590 = vmatprep.mubr.f32.mxu0 %v16714_v6 }
 0x15f   : > { %v10121_v63 = vpop.permute.xlu1 %644 }
 0x160   : > { %v10056_v33 = vpop.f32.mrf.mxu0  ;;  %8156 = vmatmul.mubr.msk.f32.gmra.mxu1 %vm677_vm2, %v9579_v51  ;;  %v10099_v14 = vpop.permute.xlu0 %669 }
 0x161   : > { %8140 = vmatmul.mubr.msk.f32.gmra.mxu0 %vm677_vm2, %v9636_v30  ;;  %1757 = vmatprep.mubr.f32.mxu1 %v16714_v6 }
 0x162   : > { %v10063_v37 = vpop.f32.mrf.mxu0  ;;  %1596 = vmatprep.mubr.f32.mxu0 %v16714_v6 }
 0x163   : > { %v10144_v11 = vpop.permute.xlu1 %639 }
 0x164   : > { %v10068_v38 = vpop.f32.mrf.mxu0  ;;  %8157 = vmatmul.mubr.msk.f32.gmra.mxu1 %vm677_vm2, %v9594_v4  ;;  %v10112_v59 = vpop.permute.xlu0 %654 }
 0x165   : > { %8141 = vmatmul.mubr.msk.f32.gmra.mxu0 %vm677_vm2, %v9654_v8  ;;  %1763 = vmatprep.mubr.f32.mxu1 %v16714_v6 }
 0x166   : > { %v10077_v42 = vpop.f32.mrf.mxu0  ;;  %1602 = vmatprep.mubr.f32.mxu0 %v16714_v6 }
 0x168   : > { %v10082_v45 = vpop.f32.mrf.mxu0  ;;  %8158 = vmatmul.mubr.msk.f32.gmra.mxu1 %vm677_vm2, %v9607_v57  ;;  %v10137_v16 = vpop.permute.xlu0 %649 }
 0x169   : > { %8142 = vmatmul.mubr.msk.f32.gmra.mxu0 %vm677_vm2, %v9672_v10  ;;  %1769 = vmatprep.mubr.f32.mxu1 %v16714_v6 }
 0x16a   : > { %v10091_v12 = vpop.f32.mrf.mxu0  ;;  %1608 = vmatprep.mubr.f32.mxu0 %v16714_v6 }
 0x16c   : > { %v822_v15 = vpop.f32.mrf.mxu0  ;;  %8159 = vmatmul.mubr.msk.f32.gmra.mxu1 %vm677_vm2, %v9620_v62 }
 0x16d   : > { %8143 = vmatmul.mubr.msk.f32.gmra.mxu0 %vm677_vm2, %v9688_v39  ;;  %1775 = vmatprep.mubr.f32.mxu1 %v16714_v6 }
 0x16e   : > { %v824_v17 = vpop.f32.mrf.mxu0  ;;  %1614 = vmatprep.mubr.f32.mxu0 %v16714_v6 }
 0x170   : > { %v828_v2 = vpop.f32.mrf.mxu0  ;;  %v989_v53 = vpop.f32.mrf.mxu1  ;;  %8160 = vmatmul.mubr.msk.f32.gmra.mxu1 %vm677_vm2, %v9636_v30 }
 0x171   : > { %8144 = vmatmul.mubr.msk.f32.gmra.mxu0 %vm677_vm2, %v9703_v43  ;;  %1781 = vmatprep.mubr.f32.mxu1 %v16714_v6  ;;  %v10129_v32 = vadd.f32 %v989_v53, %v10075_v40 }
 0x172   : > { %v830_v56 = vpop.f32.mrf.mxu0  ;;  %v10109_v58 = vpop.f32.mrf.mxu1  ;;  %1620 = vmatprep.mubr.f32.mxu0 %v16714_v6 }
 0x173   : > { %16956 = vst [vmem:[#allocation2_spill] sm:$0xff] %v10109_v58  ;;  %16959 = vst [vmem:[#allocation5_spill] sm:$0xff] %v10129_v32  ;;  %v831_v53 = vadd.f32 %v830_v56, %v10043_v25  ;;  %v823_v32 = vadd.f32 %v822_v15, %v10051_v26  ;;  %v829_v56 = vadd.f32 %v828_v2, %v10043_v25 }
 0x174   : > { %v834_v60 = vpop.f32.mrf.mxu0  ;;  %v10114_v61 = vpop.f32.mrf.mxu1  ;;  %8161 = vmatmul.mubr.msk.f32.gmra.mxu1 %vm677_vm2, %v9654_v8  ;;  %v813_v15 = vadd.f32 %v10077_v42, %v10054_v27  ;;  %v819_v2 = vadd.f32 %v10091_v12, %v10066_v41  ;;  %v807_v12 = vadd.f32 %v10063_v37, %v10075_v40 }
 0x175   : > { %16957 = vst [vmem:[#allocation3_spill] sm:$0xff] %v10114_v61  ;;  %8145 = vmatmul.mubr.msk.f32.gmra.mxu0 %vm677_vm2, %v9721_v48  ;;  %1787 = vmatprep.mubr.f32.mxu1 %v16714_v6  ;;  %v835_v36 = vadd.f32 %v834_v60, %v10025_v20  ;;  %v825_v60 = vadd.f32 %v824_v17, %v10051_v26 }
 0x176   : > { %v836_v21 = vpop.f32.mrf.mxu0  ;;  %v10123_v28 = vpop.f32.mrf.mxu1  ;;  %1626 = vmatprep.mubr.f32.mxu0 %v16714_v6  ;;  %v2014_v37 = vmax.f32 %v807_v12, %v819_v2 }
 0x177   : > { %16958 = vst [vmem:[#allocation4_spill] sm:$0xff] %v10123_v28 }
 0x178   : > { %v840_v29 = vpop.f32.mrf.mxu0  ;;  %v1001_v31 = vpop.f32.mrf.mxu1  ;;  %8162 = vmatmul.mubr.msk.f32.gmra.mxu1 %vm677_vm2, %v9672_v10  ;;  %v2040_v12 = vmax.f32 %v2014_v37, 0.0 }
 0x179   : > { %v10132_v19 = vadd.f32 %v1001_v31, %v10066_v41  ;;  %8146 = vmatmul.mubr.msk.f32.gmra.mxu0 %vm677_vm2, %v9736_v49  ;;  %1793 = vmatprep.mubr.f32.mxu1 %v16714_v6  ;;  %v837_v31 = vadd.f32 %v836_v21, %v10025_v20 }
 0x17a   : > { %v842_v22 = vpop.f32.mrf.mxu0  ;;  %v10139_v34 = vpop.f32.mrf.mxu1  ;;  %1632 = vmatprep.mubr.f32.mxu0 %v16714_v6 }
 0x17b   : > { %16960 = vst [vmem:[#allocation6_spill] sm:$0xff] %v10132_v19  ;;  %16961 = vst [vmem:[#allocation7_spill] sm:$0xff] %v10139_v34  ;;  %v843_v35 = vadd.f32 %v842_v22, %v10036_v24  ;;  %v841_v22 = vadd.f32 %v840_v29, %v10036_v24  ;;  %v10163_v19 = vpop.permute.xlu0 %634  ;;  %v16963_v29 = vmov 0.0  }
 0x17c   : > { %v846_v18 = vpop.f32.mrf.mxu0  ;;  %v10146_v1 = vpop.f32.mrf.mxu1  ;;  %8163 = vmatmul.mubr.msk.f32.gmra.mxu1 %vm677_vm2, %v9688_v39 }
 0x17d   : > { %8147 = vmatmul.mubr.msk.f32.gmra.mxu0 %vm677_vm2, %v9749_v50  ;;  %1799 = vmatprep.mubr.f32.mxu1 %v16714_v6  ;;  %v847_v13 = vadd.f32 %v846_v18, %v10028_v23  ;;  %v2066_v21 = vmax.f32 %v831_v53, %v843_v35  ;;  %v2065_v35 = vmax.f32 %v829_v56, %v841_v22 }
 0x17e   : > { %v848_v3 = vpop.f32.mrf.mxu0  ;;  %v10156_v5 = vpop.f32.mrf.mxu1  ;;  %1638 = vmatprep.mubr.f32.mxu0 %v16714_v6  ;;  %v817_v53 = vadd.f32 %v10082_v45, %v10066_v41 }
 0x17f   : > { %v849_v0 = vadd.f32 %v848_v3, %v10028_v23  ;;  %v2078_v18 = vmax.f32 %v835_v36, %v847_v13  ;;  %v10175_v3 = vpop.permute.xlu1 %624  ;;  %v10205_v45 = vpop.permute.xlu0 %629 }
 0x180   : > { %v852_v58 = vpop.f32.mrf.mxu0  ;;  %v10167_v61 = vpop.f32.mrf.mxu1  ;;  %8164 = vmatmul.mubr.msk.f32.gmra.mxu1 %vm677_vm2, %v9703_v43 }
 0x181   : > { %16962 = vst [vmem:[#allocation8_spill] sm:$0xff] %v10167_v61  ;;  %v2079_v6 = vmax.f32 %v837_v31, %v849_v0  ;;  %8148 = vmatmul.mubr.msk.f32.gmra.mxu0 %vm677_vm2, %v9764_v52  ;;  %1805 = vmatprep.mubr.f32.mxu1 %v16963_v29  ;;  %v811_v0 = vadd.f32 %v10068_v38, %v10054_v27  ;;  %v10190_v34 = vmax.f32 %v2078_v18, 0.0 }
 0x182   : > { %v854_v17 = vpop.f32.mrf.mxu0  ;;  %v10179_v36 = vpop.f32.mrf.mxu1  ;;  %1644 = vmatprep.mubr.f32.mxu0 %v16963_v29  ;;  %v2027_v31 = vmax.f32 %v813_v15, %v825_v60  ;;  %v805_v38 = vadd.f32 %v10056_v33, %v10075_v40 }
 0x183   : > { %v10186_v13 = vmax.f32 %v2079_v6, 0.0  ;;  %16965 = vst [vmem:[#allocation10_spill] sm:$0xff] %v10190_v34  ;;  %v2026_v61 = vmax.f32 %v811_v0, %v823_v32  ;;  %v10201_v6 = vmax.f32 %v2066_v21, 0.0  ;;  %v10211_v32 = vmax.f32 %v2065_v35, 0.0  ;;  %v10215_v56 = vpop.permute.xlu1 %619 }
 0x184   : > { %v858_v42 = vpop.f32.mrf.mxu0  ;;  %v10192_v28 = vpop.f32.mrf.mxu1  ;;  %8165 = vmatmul.mubr.msk.f32.gmra.mxu1 %vm677_vm2, %v9721_v48  ;;  %v2013_v18 = vmax.f32 %v805_v38, %v817_v53  ;;  %v2053_v15 = vmax.f32 %v2027_v31, 0.0  ;;  %v10231_v38 = vadd.f32 %v852_v58, %v10215_v56 }
 0x185   : > { %16964 = vst [vmem:[#allocation9_spill] sm:$0xff] %v10186_v13  ;;  %8149 = vmatmul.mubr.msk.f32.gmra.mxu0 %vm677_vm2, %v9778_v9  ;;  %2362 = vmatprep.subr.mxu1 %v10186_v13  ;;  %16966 = vst [vmem:[#allocation11_spill] sm:$0xff] %v10201_v6  ;;  %v2052_v0 = vmax.f32 %v2026_v61, 0.0  ;;  %v10247_v37 = vadd.f32 %v858_v42, %v10175_v3  ;;  %v9202_v42 = vld [vmem:[%s16705_s1 + $0x8] sm:$0xff] }
 0x186   : > { %v860_v22 = vpop.f32.mrf.mxu0  ;;  %v10207_v60 = vpop.f32.mrf.mxu1  ;;  %2363 = vmatpush1.msra.mxu1 %v10190_v34  ;;  %1650 = vmatprep.mubr.f32.mxu0 %v16963_v29  ;;  %16967 = vst [vmem:[#allocation12_spill] sm:$0xff] %v10211_v32  ;;  %16969 = vst [vmem:[#allocation14_spill] sm:$0xff] %v10231_v38  ;;  %v2039_v61 = vmax.f32 %v2013_v18, 0.0 }
 0x187   : > { %1811 = vmatprep.mubr.f32.mxu1 %v16963_v29  ;;  %2364 = vmatprep.subr.mxu1 %v10201_v6  ;;  %16972 = vst [vmem:[#allocation17_spill] sm:$0xff] %v10247_v37 }
 0x188   : > { %v864_v33 = vpop.f32.mrf.mxu0  ;;  %v10217_v21 = vpop.f32.mrf.mxu1  ;;  %8166 = vmatmul.mubr.msk.f32.gmra.mxu1 %vm677_vm2, %v9736_v49 }
 0x189   : > { %8150 = vmatmul.mubr.msk.f32.gmra.mxu0 %vm677_vm2, %v9789_v54  ;;  %2365 = vmatpush1.msra.mxu1 %v10211_v32  ;;  %v10225_v2 = vadd.f32 %v864_v33, %v10205_v45 }
 0x18a   : > { %2366 = vmatprep.subr.mxu1 %v2053_v15  ;;  %v866_v35 = vpop.f32.mrf.mxu0  ;;  %v10227_v53 = vpop.f32.mrf.mxu1  ;;  %1656 = vmatprep.mubr.f32.mxu0 %v16963_v29  ;;  %v10242_v15 = vadd.f32 %v854_v17, %v10215_v56  ;;  %v9201_v17 = vld [vmem:[%s16705_s1] sm:$0xff] }
 0x18b   : > { %16968 = vst [vmem:[#allocation13_spill] sm:$0xff] %v10225_v2  ;;  %2367 = vmatpush1.msra.mxu1 %v2052_v0  ;;  %1817 = vmatprep.mubr.f32.mxu1 %v16963_v29  ;;  %v10235_v31 = vadd.f32 %v866_v35, %v10205_v45 }
 0x18c   : > { %2368 = vmatprep.subr.mxu1 %v2040_v12  ;;  %v870_v33 = vpop.f32.mrf.mxu0  ;;  %v10237_v32 = vpop.f32.mrf.mxu1  ;;  %8167 = vmatmul.mubr.msk.f32.gmra.mxu1 %vm677_vm2, %v9749_v50  ;;  %16971 = vst [vmem:[#allocation16_spill] sm:$0xff] %v10242_v15  ;;  %v9203_v12 = vld [vmem:[%s16705_s1 + $0x10] sm:$0xff] }
 0x18d   : > { %16970 = vst [vmem:[#allocation15_spill] sm:$0xff] %v10235_v31  ;;  %v10250_v18 = vadd.f32 %v870_v33, %v10163_v19  ;;  %8151 = vmatmul.mubr.msk.f32.gmra.mxu0 %vm677_vm2, %v9800_v55  ;;  %2369 = vmatpush1.msra.mxu1 %v2039_v61  ;;  %v10266_v33 = vadd.f32 %v860_v22, %v10175_v3 }
 0x18e   : > { %v872_v0 = vpop.f32.mrf.mxu0  ;;  %v10254_v35 = vpop.f32.mrf.mxu1  ;;  %1823 = vmatprep.mubr.f32.mxu1 %v16963_v29  ;;  %9120 = vmatprep.mubr.msk.f32.mxu0 %vm677_vm2, %v9201_v17 }
 0x18f   : > { %16973 = vst [vmem:[#allocation18_spill] sm:$0xff] %v10250_v18  ;;  %16974 = vst [vmem:[#allocation19_spill] sm:$0xff] %v10266_v33  ;;  %v10269_v61 = vadd.f32 %v872_v0, %v10163_v19 }
 0x190   : > { %v876_v58 = vpop.f32.mrf.mxu0  ;;  %v1037_v6 = vpop.f32.mrf.mxu1  ;;  %8168 = vmatmul.mubr.msk.f32.gmra.mxu1 %vm677_vm2, %v9764_v52 }
 0x191   : > { %16975 = vst [vmem:[#allocation20_spill] sm:$0xff] %v10269_v61  ;;  %9121 = vmatmul.mubr.msk.f32.vlgmr.msra.gmra.mxu0 %vm677_vm2, %v9202_v42  ;;  %1829 = vmatprep.mubr.f32.mxu1 %v16963_v29  ;;  %v10296_v2 = vadd.f32 %v876_v58, %v10144_v11  ;;  %v10301_v31 = vadd.f32 %v1037_v6, %v10215_v56 }
 0x192   : > { %v10280_v22 = vpop.f32.mrf.mxu0  ;;  %v1039_v0 = vpop.f32.mrf.mxu1  ;;  %9123 = vmatprep.mubr.msk.f32.mxu0 %vm677_vm2, %v9203_v12 }
 0x193   : > { %16976 = vst [vmem:[#allocation21_spill] sm:$0xff] %v10280_v22  ;;  %16977 = vst [vmem:[#allocation22_spill] sm:$0xff] %v10296_v2  ;;  %v10317_v6 = vadd.f32 %v1039_v0, %v10215_v56 }
 0x194   : > { %v882_v34 = vpop.f32.mrf.mxu0  ;;  %v1043_v13 = vpop.f32.mrf.mxu1  ;;  %8169 = vmatmul.mubr.msk.f32.gmra.mxu1 %vm677_vm2, %v9778_v9  ;;  %16978 = vst [vmem:[#allocation23_spill] sm:$0xff] %v10301_v31 }
 0x195   : > { %9124 = vmatmul.mubr.msk.f32.gmra.mxu0 %vm677_vm2, %v9567_v46  ;;  %1835 = vmatprep.mubr.f32.mxu1 %v16963_v29  ;;  %16981 = vst [vmem:[#allocation26_spill] sm:$0xff] %v10317_v6  ;;  %v10334_v0 = vadd.f32 %v882_v34, %v10121_v63 }
 0x196   : > { %v10291_v42 = vpop.f32.mrf.mxu0  ;;  %v1045_v17 = vpop.f32.mrf.mxu1  ;;  %9126 = vmatprep.mubr.msk.f32.mxu0 %vm677_vm2, %v9579_v51 }
 0x197   : > { %16983 = vst [vmem:[#allocation28_spill] sm:$0xff] %v10334_v0 }
 0x198   : > { %v888_v12 = vpop.f32.mrf.mxu0  ;;  %v1049_v38 = vpop.f32.mrf.mxu1  ;;  %8170 = vmatmul.mubr.msk.f32.gmra.mxu1 %vm677_vm2, %v9789_v54 }
 0x199   : > { %v10304_v46 = vadd.f32 %v888_v12, %v10137_v16  ;;  %v10307_v15 = vadd.f32 %v1049_v38, %v10205_v45  ;;  %9127 = vmatmul.mubr.msk.f32.gmra.mxu0 %vm677_vm2, %v9594_v4  ;;  %1841 = vmatprep.mubr.f32.mxu1 %v16963_v29  ;;  %v10337_v38 = vadd.f32 %v1043_v13, %v10175_v3 }
 0x19a   : > { %v10312_v51 = vpop.f32.mrf.mxu0  ;;  %v1051_v58 = vpop.f32.mrf.mxu1  ;;  %9129 = vmatprep.mubr.msk.f32.mxu0 %vm677_vm2, %v9607_v57 }
 0x19b   : > { %16979 = vst [vmem:[#allocation24_spill] sm:$0xff] %v10304_v46  ;;  %16980 = vst [vmem:[#allocation25_spill] sm:$0xff] %v10307_v15  ;;  %v10324_v18 = vadd.f32 %v1051_v58, %v10205_v45 }
 0x19c   : > { %v894_v4 = vpop.f32.mrf.mxu0  ;;  %v1055_v37 = vpop.f32.mrf.mxu1  ;;  %8171 = vmatmul.mubr.msk.f32.gmra.mxu1 %vm677_vm2, %v9800_v55  ;;  %16984 = vst [vmem:[#allocation29_spill] sm:$0xff] %v10337_v38 }
 0x19d   : > { %16982 = vst [vmem:[#allocation27_spill] sm:$0xff] %v10324_v18  ;;  %9130 = vmatmul.mubr.msk.f32.gmra.mxu0 %vm677_vm2, %v9620_v62  ;;  %2406 = vmatprep.mubr.f32.mxu1 %v16963_v29  ;;  %v10340_v58 = vadd.f32 %v894_v4, %v10112_v59  ;;  %v10343_v12 = vadd.f32 %v1055_v37, %v10163_v19 }
 0x19e   : > { %v10345_v15 = vpop.f32.mrf.mxu0  ;;  %v1057_v57 = vpop.f32.mrf.mxu1  ;;  %9132 = vmatprep.mubr.msk.f32.mxu0 %vm677_vm2, %v9636_v30  ;;  %v10350_v62 = vadd.f32 %v1045_v17, %v10175_v3 }
 0x19f   : > { %16985 = vst [vmem:[#allocation30_spill] sm:$0xff] %v10340_v58  ;;  %16986 = vst [vmem:[#allocation31_spill] sm:$0xff] %v10343_v12  ;;  %v10353_v34 = vadd.f32 %v1057_v57, %v10163_v19 }
 0x1a0   : > { %16987 = vst [vmem:[#allocation32_spill] sm:$0xff] %v10350_v62  ;;  %v900_v37 = vpop.f32.mrf.mxu0  ;;  %v1061_v31 = vpop.f32.mrf.mxu1 }
 0x1a1   : > { %16988 = vst [vmem:[#allocation33_spill] sm:$0xff] %v10353_v34  ;;  %9133 = vmatmul.mubr.msk.f32.gmra.mxu0 %vm677_vm2, %v9654_v8  ;;  %v10374_v8 = vadd.f32 %v1061_v31, %v10144_v11 }
 0x1a2   : > { %v902_v30 = vpop.f32.mrf.mxu0  ;;  %v10363_v17 = vpop.f32.mrf.mxu1  ;;  %9135 = vmatprep.mubr.msk.f32.mxu0 %vm677_vm2, %v9672_v10  ;;  %v16736_v10 = vlaneseq }
 0x1a3   : > { %16989 = vst [vmem:[#allocation34_spill] sm:$0xff] %v10363_v17  ;;  %16991 = vst [vmem:[#allocation36_spill] sm:$0xff] %v10374_v8 }
 0x1a4   : > { %v906_v57 = vpop.f32.mrf.mxu0  ;;  %v1067_v6 = vpop.f32.mrf.mxu1 }
 0x1a5   : > { %9136 = vmatmul.mubr.msk.f32.gmra.mxu0 %vm677_vm2, %v9688_v39  ;;  %v907_v31 = vadd.f32 %v906_v57, %v10089_v47 }
 0x1a6   : > { %v908_v4 = vpop.f32.mrf.mxu0  ;;  %v10369_v13 = vpop.f32.mrf.mxu1  ;;  %9138 = vmatprep.mubr.msk.f32.mxu0 %vm677_vm2, %v9703_v43 }
 0x1a7   : > { %16990 = vst [vmem:[#allocation35_spill] sm:$0xff] %v10369_v13  ;;  %v10393_v13 = vadd.f32 %v1067_v6, %v10121_v63  ;;  %v909_v6 = vadd.f32 %v908_v4, %v10089_v47  ;;  %v1028_v4 = vadd.f32 %v10227_v53, %v10036_v24 }
 0x1a8   : > { %v912_v18 = vpop.f32.mrf.mxu0  ;;  %v1073_v12 = vpop.f32.mrf.mxu1 }
 0x1a9   : > { %v10377_v38 = vadd.f32 %v1073_v12, %v10137_v16  ;;  %9139 = vmatmul.mubr.msk.f32.gmra.mxu0 %vm677_vm2, %v9721_v48  ;;  %v2222_v48 = vand.u32 127, %v16736_v10  ;;  %16994 = vst [vmem:[#allocation39_spill] sm:$0xff] %v10393_v13 }
 0x1aa   : > { %v914_v34 = vpop.f32.mrf.mxu0  ;;  %v10381_v39 = vpop.f32.mrf.mxu1  ;;  %9141 = vmatprep.mubr.msk.f32.mxu0 %vm677_vm2, %v9736_v49 }
 0x1ab   : > { %16992 = vst [vmem:[#allocation37_spill] sm:$0xff] %v10377_v38  ;;  %16993 = vst [vmem:[#allocation38_spill] sm:$0xff] %v10381_v39  ;;  %v915_v12 = vadd.f32 %v914_v34, %v10099_v14  ;;  %v913_v39 = vadd.f32 %v912_v18, %v10099_v14  ;;  %v903_v34 = vadd.f32 %v902_v30, %v10102_v7  ;;  %vm9061_vm3 = vcmp.ne.s32.totalorder %v2222_v48, 0  ;;  %v10482_v48 = vld [vmem:[%s16707_s3 + $0x8] sm:$0xff] }
 0x1ac   : > { %v918_v62 = vpop.f32.mrf.mxu0  ;;  %v1079_v17 = vpop.f32.mrf.mxu1 }
 0x1ad   : > { %9142 = vmatmul.mubr.msk.f32.gmra.mxu0 %vm677_vm2, %v9749_v50  ;;  %v919_v49 = vadd.f32 %v918_v62, %v10080_v44  ;;  %v10398_v43 = vadd.f32 %v1079_v17, %v10112_v59  ;;  %v1034_v50 = vadd.f32 %v10254_v35, %v10028_v23  ;;  %v1032_v62 = vadd.f32 %v10237_v32, %v10028_v23 }
 0x1ae   : > { %v920_v38 = vpop.f32.mrf.mxu0  ;;  %v10400_v8 = vpop.f32.mrf.mxu1  ;;  %9144 = vmatprep.mubr.msk.f32.mxu0 %vm677_vm2, %v9764_v52  ;;  %v901_v17 = vadd.f32 %v900_v37, %v10102_v7  ;;  %v1022_v35 = vadd.f32 %v10207_v60, %v10025_v20  ;;  %v1020_v32 = vadd.f32 %v10192_v28, %v10025_v20  ;;  %v1026_v37 = vadd.f32 %v10217_v21, %v10036_v24 }
 0x1af   : > { %16995 = vst [vmem:[#allocation40_spill] sm:$0xff] %v10398_v43  ;;  %16996 = vst [vmem:[#allocation41_spill] sm:$0xff] %v10400_v8  ;;  %v921_v18 = vadd.f32 %v920_v38, %v10080_v44  ;;  %v2261_v57 = vmax.f32 %v907_v31, %v919_v49  ;;  %v2249_v38 = vmax.f32 %v903_v34, %v915_v12  ;;  %v16999_v43 = vld [vmem:[#allocation7_spill] sm:$0xff] }
 0x1b0   : > { %v10414_v8 = vpop.f32.mrf.mxu1  ;;  %v10416_v52 = vpop.f32.mrf.mxu0  ;;  %v2248_v31 = vmax.f32 %v901_v17, %v913_v39  ;;  %v1010_v60 = vadd.f32 %v10156_v5, %v10051_v26  ;;  %v2081_v53 = vmax.f32 %v1022_v35, %v1034_v50  ;;  %v1008_v21 = vadd.f32 %v10146_v1, %v10051_v26  ;;  %v16997_v39 = vld [vmem:[#allocation8_spill] sm:$0xff] }
 0x1b1   : > { %v2262_v30 = vmax.f32 %v909_v6, %v921_v18  ;;  %9145 = vmatmul.mubr.msk.f32.gmra.mxu0 %vm677_vm2, %v9778_v9  ;;  %v1016_v9 = vadd.f32 %v10179_v36, %v10043_v25  ;;  %v1014_v12 = vadd.f32 %v16997_v39, %v10043_v25  ;;  %v2080_v34 = vmax.f32 %v1020_v32, %v1032_v62  ;;  %v17000_v36 = vld [vmem:[#allocation3_spill] sm:$0xff] }
 0x1b2   : > { %v10428_v49 = vpop.f32.mrf.mxu1  ;;  %v10430_v10 = vpop.f32.mrf.mxu0  ;;  %9147 = vmatprep.mubr.msk.f32.mxu0 %vm677_vm2, %v9789_v54  ;;  %v2287_v6 = vmax.f32 %v2261_v57, 0.0  ;;  %v16998_v54 = vld [vmem:[#allocation4_spill] sm:$0xff]  ;;  %v1004_v5 = vadd.f32 %v16999_v43, %v10066_v41  ;;  %v2275_v1 = vmax.f32 %v2249_v38, 0.0  ;;  %v996_v50 = vadd.f32 %v17000_v36, %v10054_v27  ;;  %v10456_v43 = vld [vmem:[%s16707_s3] sm:$0xff]  ;;  %v17006_v36 = vld [vmem:[#allocation5_spill] sm:$0xff] }
 0x1b3   : > { %v2288_v28 = vmax.f32 %v2262_v30, 0.0  ;;  %v998_v17 = vadd.f32 %v16998_v54, %v10054_v27  ;;  %v2068_v13 = vmax.f32 %v1016_v9, %v1028_v4  ;;  %v2067_v62 = vmax.f32 %v1014_v12, %v1026_v37  ;;  %v17001_v4 = vld [vmem:[#allocation2_spill] sm:$0xff] }
 0x1b4   : > { %v1091_v18 = vpop.f32.mrf.mxu1  ;;  %v2274_v57 = vmax.f32 %v2248_v31, 0.0  ;;  %v10463_v32 = vmax.f32 %v2081_v53, 0.0  ;;  %v2028_v37 = vmax.f32 %v996_v50, %v1008_v21  ;;  %v10465_v31 = vmax.f32 %v2080_v34, 0.0  ;;  %v17007_v50 = vld [vmem:[#allocation6_spill] sm:$0xff] }
 0x1b5   : > { %v10446_v61 = vpop.f32.mrf.mxu0  ;;  %9148 = vmatmul.mubr.msk.f32.gmra.mxu0 %vm677_vm2, %v9800_v55  ;;  %2370 = vmatprep.subr.mxu1 %v2288_v28  ;;  %v992_v55 = vadd.f32 %v17001_v4, %v10075_v40  ;;  %v2029_v30 = vmax.f32 %v998_v17, %v1010_v60  ;;  %v10473_v60 = vmax.f32 %v2068_v13, 0.0  ;;  %v10475_v12 = vmax.f32 %v2067_v62, 0.0 }
 0x1b6   : > { %v1093_v35 = vpop.f32.mrf.mxu1  ;;  %8193 = vmatpush1.msk.msra.mxu1 %vm9061_vm3, %v2287_v6  ;;  %2673 = vmatprep.mubr.f32.mxu0 %v16963_v29  ;;  %17002 = vst [vmem:[#allocation8_spill] sm:$0xff] %v10463_v32  ;;  %17003 = vst [vmem:[#allocation4_spill] sm:$0xff] %v10465_v31  ;;  %v2054_v6 = vmax.f32 %v2028_v37, 0.0  ;;  %v17008_v62 = vmax.f32 %v17006_v36, %v17007_v50  ;;  %v1092_v4 = vadd.f32 %v1091_v18, %v10089_v47  ;;  %v10503_v37 = vld [vmem:[%s16707_s3 + $0x10] sm:$0xff] }
 0x1b7   : > { %v10461_v38 = vpop.f32.mrf.mxu0  ;;  %2372 = vmatprep.subr.mxu1 %v2275_v1  ;;  %v2016_v28 = vmax.f32 %v992_v55, %v1004_v5  ;;  %17004 = vst [vmem:[#allocation7_spill] sm:$0xff] %v10473_v60  ;;  %17005 = vst [vmem:[#allocation3_spill] sm:$0xff] %v10475_v12  ;;  %v2055_v34 = vmax.f32 %v2029_v30, 0.0  ;;  %v1086_v18 = vadd.f32 %v10414_v8, %v10102_v7 }
 0x1b8   : > { %v1097_v9 = vpop.f32.mrf.mxu1  ;;  %8195 = vmatpush1.msk.msra.mxu1 %vm9061_vm3, %v2274_v57  ;;  %v2041_v57 = vmax.f32 %v17008_v62, 0.0 }
 0x1b9   : > { %v10468_v39 = vpop.f32.mrf.mxu0  ;;  %2451 = vmatprep.subr.mxu1 %v10463_v32  ;;  %8196 = vmatmul.mubr.msk.f32.vlgmr.msra.gmra.mxu1 %vm677_vm2, %v10456_v43  ;;  %v2042_v1 = vmax.f32 %v2016_v28, 0.0  ;;  %v1098_v55 = vadd.f32 %v1097_v9, %v10099_v14  ;;  %v1088_v28 = vadd.f32 %v10428_v49, %v10102_v7 }
 0x1ba   : > { %v1099_v53 = vpop.f32.mrf.mxu1  ;;  %2452 = vmatpush1.msra.mxu1 %v10465_v31  ;;  %2412 = vmatprep.mubr.f32.mxu1 %v16963_v29 }
 0x1bb   : > { %v10484_v21 = vpop.f32.mrf.mxu0  ;;  %2453 = vmatprep.subr.mxu1 %v10473_v60  ;;  %v1100_v54 = vadd.f32 %v1099_v53, %v10099_v14  ;;  %v1094_v53 = vadd.f32 %v1093_v35, %v10089_v47  ;;  %v2250_v49 = vmax.f32 %v1086_v18, %v1098_v55  ;;  %v10521_v35 = vld [vmem:[%s16707_s3 + $0x18] sm:$0xff] }
 0x1bc   : > { %v1103_v13 = vpop.f32.mrf.mxu1  ;;  %2454 = vmatpush1.msra.mxu1 %v10475_v12 }
 0x1bd   : > { %v1104_v17 = vadd.f32 %v1103_v13, %v10080_v44  ;;  %v10490_v5 = vpop.f32.mrf.mxu0  ;;  %2455 = vmatprep.subr.mxu1 %v2055_v34  ;;  %8197 = vmatmul.mubr.msk.f32.gmra.mxu1 %vm677_vm2, %v10482_v48  ;;  %v2251_v36 = vmax.f32 %v1088_v28, %v1100_v54  ;;  %v2276_v55 = vmax.f32 %v2250_v49, 0.0 }
 0x1be   : > { %v1105_v30 = vpop.f32.mrf.mxu1  ;;  %2456 = vmatpush1.msra.mxu1 %v2054_v6  ;;  %2418 = vmatprep.mubr.f32.mxu1 %v16963_v29 }
 0x1bf   : > { %v1106_v34 = vadd.f32 %v1105_v30, %v10080_v44  ;;  %v1194_v13 = vpop.f32.mrf.mxu0  ;;  %2457 = vmatprep.subr.mxu1 %v2042_v1  ;;  %v2263_v9 = vmax.f32 %v1092_v4, %v1104_v17  ;;  %v2277_v4 = vmax.f32 %v2251_v36, 0.0 }
 0x1c0   : > { %v10511_v6 = vpop.f32.mrf.mxu1  ;;  %2458 = vmatpush1.msra.mxu1 %v2041_v57  ;;  %v1195_v31 = vadd.f32 %v1194_v13, %v10051_v26  ;;  %v1183_v13 = vadd.f32 %v10461_v38, %v10054_v27  ;;  %v1177_v38 = vadd.f32 %v10430_v10, %v10075_v40 }
 0x1c1   : > { %v2264_v50 = vmax.f32 %v1094_v53, %v1106_v34  ;;  %v1198_v62 = vpop.f32.mrf.mxu0  ;;  %8198 = vmatmul.mubr.msk.f32.gmra.mxu1 %vm677_vm2, %v10503_v37  ;;  %v2289_v1 = vmax.f32 %v2263_v9, 0.0 }
 0x1c2   : > { %v10515_v12 = vpop.f32.mrf.mxu1  ;;  %2424 = vmatprep.mubr.f32.mxu1 %v16963_v29  ;;  %v1199_v2 = vadd.f32 %v1198_v62, %v10043_v25  ;;  %v1187_v62 = vadd.f32 %v10468_v39, %v10066_v41  ;;  %v2031_v0 = vmax.f32 %v1183_v13, %v1195_v31 }
 0x1c3   : > { %v1200_v8 = vpop.f32.mrf.mxu0  ;;  %v2290_v17 = vmax.f32 %v2264_v50, 0.0 }
 0x1c4   : > { %v10523_v57 = vpop.f32.mrf.mxu1  ;;  %v1201_v32 = vadd.f32 %v1200_v8, %v10043_v25  ;;  %v1189_v8 = vadd.f32 %v10484_v21, %v10066_v41 }
 0x1c5   : > { %v1204_v54 = vpop.f32.mrf.mxu0  ;;  %2459 = vmatprep.subr.mxu1 %v2290_v17  ;;  %8199 = vmatmul.mubr.msk.f32.gmra.mxu1 %vm677_vm2, %v10521_v35 }
 0x1c6   : > { %v10527_v30 = vpop.f32.mrf.mxu1  ;;  %2460 = vmatpush1.msra.mxu1 %v2289_v1  ;;  %2495 = vmatprep.mubr.f32.mxu1 %v16963_v29 }
 0x1c7   : > { %v1206_v28 = vpop.f32.mrf.mxu0  ;;  %2461 = vmatprep.subr.mxu1 %v2277_v4  ;;  %v1205_v4 = vadd.f32 %v1204_v54, %v10025_v20 }
 0x1c8   : > { %v10530_v53 = vpop.f32.mrf.mxu1  ;;  %2462 = vmatpush1.msra.mxu1 %v2276_v55  ;;  %v1207_v33 = vadd.f32 %v1206_v28, %v10025_v20 }
 0x1c9   : > { %v1210_v34 = vpop.f32.mrf.mxu0  ;;  %8200 = vmatmul.mubr.msk.f32.vlgmr.msra.gmra.mxu1 %vm677_vm2, %v10456_v43 }
 0x1ca   : > { %v10534_v18 = vpop.f32.mrf.mxu1  ;;  %2501 = vmatprep.mubr.f32.mxu1 %v16963_v29  ;;  %v1211_v55 = vadd.f32 %v1210_v34, %v10036_v24 }
 0x1cb   : > { %v1212_v9 = vpop.f32.mrf.mxu0 }
 0x1cc   : > { %v10537_v36 = vpop.f32.mrf.mxu1  ;;  %v1213_v49 = vadd.f32 %v1212_v9, %v10036_v24 }
 0x1cd   : > { %v1216_v50 = vpop.f32.mrf.mxu0  ;;  %8201 = vmatmul.mubr.msk.f32.gmra.mxu1 %vm677_vm2, %v10482_v48 }
 0x1ce   : > { %v1217_v17 = vadd.f32 %v1216_v50, %v10028_v23  ;;  %v10543_v1 = vpop.f32.mrf.mxu1  ;;  %2507 = vmatprep.mubr.f32.mxu1 %v16963_v29  ;;  %v1193_v50 = vadd.f32 %v10490_v5, %v10051_v26  ;;  %v2070_v28 = vmax.f32 %v1201_v32, %v1213_v49  ;;  %v1181_v5 = vadd.f32 %v10446_v61, %v10054_v27 }
 0x1cf   : > { %v1218_v60 = vpop.f32.mrf.mxu0 }
 0x1d0   : > { %v1219_v46 = vadd.f32 %v1218_v60, %v10028_v23  ;;  %v10552_v9 = vpop.f32.mrf.mxu1  ;;  %v2082_v58 = vmax.f32 %v1205_v4, %v1217_v17  ;;  %v2069_v17 = vmax.f32 %v1199_v2, %v1211_v55  ;;  %v2018_v2 = vmax.f32 %v1177_v38, %v1189_v8 }
 0x1d1   : > { %v1222_v54 = vpop.f32.mrf.mxu0  ;;  %8202 = vmatmul.mubr.msk.f32.gmra.mxu1 %vm677_vm2, %v10503_v37  ;;  %v10581_v49 = vmax.f32 %v2070_v28, 0.0 }
 0x1d2   : > { %v2083_v60 = vmax.f32 %v1207_v33, %v1219_v46  ;;  %v1385_v34 = vpop.f32.mrf.mxu1  ;;  %2513 = vmatprep.mubr.f32.mxu1 %v16963_v29  ;;  %v1175_v33 = vadd.f32 %v10416_v52, %v10075_v40  ;;  %v2030_v46 = vmax.f32 %v1181_v5, %v1193_v50  ;;  %v10576_v32 = vmax.f32 %v2082_v58, 0.0 }
 0x1d3   : > { %v10568_v4 = vpop.f32.mrf.mxu0  ;;  %17012 = vst [vmem:[#allocation42_spill] sm:$0xff] %v10581_v49  ;;  %v10584_v31 = vmax.f32 %v2069_v17, 0.0  ;;  %v2057_v52 = vmax.f32 %v2031_v0, 0.0  ;;  %v10592_v8 = vadd.f32 %v1222_v54, %v10215_v56  ;;  %v2044_v5 = vmax.f32 %v2018_v2, 0.0 }
 0x1d4   : > { %17009 = vst [vmem:[#allocation2_spill] sm:$0xff] %v10568_v4  ;;  %v1389_v22 = vpop.f32.mrf.mxu1  ;;  %v10572_v21 = vmax.f32 %v2083_v60, 0.0  ;;  %17011 = vst [vmem:[#allocation6_spill] sm:$0xff] %v10576_v32  ;;  %v2017_v10 = vmax.f32 %v1175_v33, %v1187_v62  ;;  %v2056_v50 = vmax.f32 %v2030_v46, 0.0 }
 0x1d5   : > { %v1228_v61 = vpop.f32.mrf.mxu0  ;;  %8203 = vmatmul.mubr.msk.f32.gmra.mxu1 %vm677_vm2, %v10521_v35  ;;  %17013 = vst [vmem:[#allocation43_spill] sm:$0xff] %v10584_v31  ;;  %17015 = vst [vmem:[#allocation45_spill] sm:$0xff] %v10592_v8  ;;  %v1390_v2 = vadd.f32 %v1389_v22, %v10025_v20  ;;  %v1378_v22 = vadd.f32 %v10537_v36, %v10051_v26  ;;  %v1366_v36 = vadd.f32 %v10523_v57, %v10054_v27 }
 0x1d6   : > { %17010 = vst [vmem:[#allocation5_spill] sm:$0xff] %v10572_v21  ;;  %2540 = vmatprep.subr.mxu1 %v10572_v21  ;;  %v1391_v39 = vpop.f32.mrf.mxu1  ;;  %2584 = vmatprep.mubr.f32.mxu1 %v16963_v29  ;;  %v2043_v62 = vmax.f32 %v2017_v10, 0.0 }
 0x1d7   : > { %v10586_v55 = vpop.f32.mrf.mxu0  ;;  %2541 = vmatpush1.msra.mxu1 %v10576_v32  ;;  %v1392_v0 = vadd.f32 %v1391_v39, %v10025_v20 }
 0x1d8   : > { %17014 = vst [vmem:[#allocation44_spill] sm:$0xff] %v10586_v55  ;;  %2542 = vmatprep.subr.mxu1 %v10581_v49  ;;  %v1395_v58 = vpop.f32.mrf.mxu1 }
 0x1d9   : > { %v1234_v13 = vpop.f32.mrf.mxu0  ;;  %2543 = vmatpush1.msra.mxu1 %v10584_v31  ;;  %v1396_v10 = vadd.f32 %v1395_v58, %v10036_v24  ;;  %v1384_v58 = vadd.f32 %v10552_v9, %v10043_v25  ;;  %v1372_v9 = vadd.f32 %v10530_v53, %v10066_v41 }
 0x1da   : > { %v10595_v28 = vadd.f32 %v1234_v13, %v10205_v45  ;;  %2544 = vmatprep.subr.mxu1 %v2057_v52  ;;  %v1397_v60 = vpop.f32.mrf.mxu1  ;;  %v10604_v13 = vadd.f32 %v1228_v61, %v10175_v3 }
 0x1db   : > { %v10597_v17 = vpop.f32.mrf.mxu0  ;;  %2545 = vmatpush1.msra.mxu1 %v2056_v50  ;;  %v1398_v33 = vadd.f32 %v1397_v60, %v10036_v24  ;;  %v1386_v60 = vadd.f32 %v1385_v34, %v10043_v25  ;;  %v1374_v34 = vadd.f32 %v10534_v18, %v10066_v41  ;;  %v2071_v32 = vmax.f32 %v1384_v58, %v1396_v10 }
 0x1dc   : > { %17016 = vst [vmem:[#allocation46_spill] sm:$0xff] %v10595_v28  ;;  %17017 = vst [vmem:[#allocation47_spill] sm:$0xff] %v10597_v17  ;;  %2546 = vmatprep.subr.mxu1 %v2044_v5  ;;  %v1401_v38 = vpop.f32.mrf.mxu1  ;;  %v1380_v5 = vadd.f32 %v10543_v1, %v10051_v26  ;;  %v1368_v1 = vadd.f32 %v10527_v30, %v10054_v27  ;;  %v1360_v18 = vadd.f32 %v10511_v6, %v10075_v40 }
 0x1dd   : > { %v1240_v46 = vpop.f32.mrf.mxu0  ;;  %v1402_v54 = vadd.f32 %v1401_v38, %v10028_v23  ;;  %2547 = vmatpush1.msra.mxu1 %v2043_v62  ;;  %17018 = vst [vmem:[#allocation48_spill] sm:$0xff] %v10604_v13  ;;  %v2072_v39 = vmax.f32 %v1386_v60, %v1398_v33 }
 0x1de   : > { %v10609_v52 = vadd.f32 %v1240_v46, %v10163_v19  ;;  %v1403_v50 = vpop.f32.mrf.mxu1 }
 0x1df   : > { %v10615_v38 = vpop.f32.mrf.mxu0  ;;  %v1404_v61 = vadd.f32 %v1403_v50, %v10028_v23  ;;  %v2084_v46 = vmax.f32 %v1390_v2, %v1402_v54  ;;  %v1362_v54 = vadd.f32 %v10515_v12, %v10075_v40  ;;  %v2033_v2 = vmax.f32 %v1368_v1, %v1380_v5 }
 0x1e0   : > { %17019 = vst [vmem:[#allocation49_spill] sm:$0xff] %v10609_v52  ;;  %17020 = vst [vmem:[#allocation50_spill] sm:$0xff] %v10615_v38  ;;  %v1407_v31 = vpop.f32.mrf.mxu1  ;;  %v10645_v10 = vmax.f32 %v2072_v39, 0.0  ;;  %v10647_v12 = vmax.f32 %v2071_v32, 0.0 }
 0x1e1   : > { %v2085_v49 = vmax.f32 %v1392_v0, %v1404_v61  ;;  %v1246_v50 = vpop.f32.mrf.mxu0  ;;  %v2032_v0 = vmax.f32 %v1366_v36, %v1378_v22  ;;  %v10642_v33 = vmax.f32 %v2084_v46, 0.0  ;;  %v2020_v60 = vmax.f32 %v1362_v54, %v1374_v34 }
 0x1e2   : > { %v10632_v21 = vpop.f32.mrf.mxu1  ;;  %17025 = vst [vmem:[#allocation55_spill] sm:$0xff] %v10645_v10  ;;  %v2019_v61 = vmax.f32 %v1360_v18, %v1372_v9  ;;  %17026 = vst [vmem:[#allocation56_spill] sm:$0xff] %v10647_v12  ;;  %v2059_v6 = vmax.f32 %v2033_v2, 0.0  ;;  %v10657_v46 = vadd.f32 %v1407_v31, %v10215_v56  ;;  %v10663_v36 = vadd.f32 %v1246_v50, %v10144_v11 }
 0x1e3   : > { %17021 = vst [vmem:[#allocation51_spill] sm:$0xff] %v10632_v21  ;;  %v10636_v30 = vpop.f32.mrf.mxu0  ;;  %v10638_v62 = vmax.f32 %v2085_v49, 0.0  ;;  %17024 = vst [vmem:[#allocation54_spill] sm:$0xff] %v10642_v33  ;;  %v2058_v22 = vmax.f32 %v2032_v0, 0.0  ;;  %v2046_v34 = vmax.f32 %v2020_v60, 0.0 }
 0x1e4   : > { %17022 = vst [vmem:[#allocation52_spill] sm:$0xff] %v10636_v30  ;;  %v1413_v57 = vpop.f32.mrf.mxu1  ;;  %17028 = vst [vmem:[#allocation58_spill] sm:$0xff] %v10657_v46  ;;  %v2045_v39 = vmax.f32 %v2019_v61, 0.0 }
 0x1e5   : > { %17023 = vst [vmem:[#allocation53_spill] sm:$0xff] %v10638_v62  ;;  %v1252_v53 = vpop.f32.mrf.mxu0  ;;  %2629 = vmatprep.subr.mxu0 %v10638_v62  ;;  %17030 = vst [vmem:[#allocation60_spill] sm:$0xff] %v10663_v36  ;;  %v10677_v50 = vadd.f32 %v1413_v57, %v10175_v3 }
 0x1e6   : > { %v10649_v5 = vpop.f32.mrf.mxu1  ;;  %2630 = vmatpush1.msra.mxu0 %v10642_v33 }
 0x1e7   : > { %17027 = vst [vmem:[#allocation57_spill] sm:$0xff] %v10649_v5  ;;  %v10652_v49 = vpop.f32.mrf.mxu0  ;;  %2631 = vmatprep.subr.mxu0 %v10645_v10  ;;  %17033 = vst [vmem:[#allocation63_spill] sm:$0xff] %v10677_v50 }
 0x1e8   : > { %v1419_v58 = vpop.f32.mrf.mxu1  ;;  %2632 = vmatpush1.msra.mxu0 %v10647_v12 }
 0x1e9   : > { %v1258_v1 = vpop.f32.mrf.mxu0  ;;  %v10660_v32 = vadd.f32 %v1419_v58, %v10205_v45  ;;  %2633 = vmatprep.subr.mxu0 %v2059_v6  ;;  %v10683_v6 = vadd.f32 %v1252_v53, %v10121_v63 }
 0x1ea   : > { %v10666_v9 = vadd.f32 %v1258_v1, %v10137_v16  ;;  %v10668_v54 = vpop.f32.mrf.mxu1  ;;  %2634 = vmatpush1.msra.mxu0 %v2058_v22 }
 0x1eb   : > { %17029 = vst [vmem:[#allocation59_spill] sm:$0xff] %v10660_v32  ;;  %17032 = vst [vmem:[#allocation62_spill] sm:$0xff] %v10668_v54  ;;  %v10672_v2 = vpop.f32.mrf.mxu0  ;;  %2635 = vmatprep.subr.mxu0 %v2046_v34 }
 0x1ec   : > { %17031 = vst [vmem:[#allocation61_spill] sm:$0xff] %v10666_v9  ;;  %v1425_v0 = vpop.f32.mrf.mxu1  ;;  %2636 = vmatpush1.msra.mxu0 %v2045_v39  ;;  %17035 = vst [vmem:[#allocation65_spill] sm:$0xff] %v10683_v6 }
 0x1ed   : > { %v1264_v60 = vpop.f32.mrf.mxu0  ;;  %v10680_v61 = vadd.f32 %v1425_v0, %v10163_v19 }
 0x1ee   : > { %v10686_v22 = vadd.f32 %v1264_v60, %v10112_v59  ;;  %v10688_v58 = vpop.f32.mrf.mxu1 }
 0x1ef   : > { %17034 = vst [vmem:[#allocation64_spill] sm:$0xff] %v10680_v61  ;;  %17037 = vst [vmem:[#allocation67_spill] sm:$0xff] %v10688_v58  ;;  %v10692_v34 = vpop.f32.mrf.mxu0 }
 0x1f0   : > { %17036 = vst [vmem:[#allocation66_spill] sm:$0xff] %v10686_v22  ;;  %v1431_v39 = vpop.f32.mrf.mxu1 }
 0x1f1   : > { %v1270_v31 = vpop.f32.mrf.mxu0  ;;  %v10701_v62 = vadd.f32 %v1431_v39, %v10144_v11 }
 0x1f2   : > { %v10696_v0 = vpop.f32.mrf.mxu1 }
 0x1f3   : > { %17038 = vst [vmem:[#allocation68_spill] sm:$0xff] %v10696_v0  ;;  %v1272_v18 = vpop.f32.mrf.mxu0  ;;  %17040 = vst [vmem:[#allocation70_spill] sm:$0xff] %v10701_v62 }
 0x1f4   : > { %v1437_v53 = vpop.f32.mrf.mxu1 }
 0x1f5   : > { %v1276_v12 = vpop.f32.mrf.mxu0  ;;  %v10711_v21 = vadd.f32 %v1437_v53, %v10121_v63  ;;  %v1273_v53 = vadd.f32 %v1272_v18, %v10102_v7 }
 0x1f6   : > { %v10698_v10 = vpop.f32.mrf.mxu1  ;;  %v1277_v0 = vadd.f32 %v1276_v12, %v10089_v47 }
 0x1f7   : > { %17039 = vst [vmem:[#allocation69_spill] sm:$0xff] %v10698_v10  ;;  %v1278_v60 = vpop.f32.mrf.mxu0  ;;  %17043 = vst [vmem:[#allocation73_spill] sm:$0xff] %v10711_v21 }
 0x1f8   : > { %v1443_v33 = vpop.f32.mrf.mxu1  ;;  %v1279_v62 = vadd.f32 %v1278_v60, %v10089_v47 }
 0x1f9   : > { %v1282_v1 = vpop.f32.mrf.mxu0  ;;  %v10704_v32 = vadd.f32 %v1443_v33, %v10137_v16 }
 0x1fa   : > { %v10706_v46 = vpop.f32.mrf.mxu1 }
 0x1fb   : > { %17041 = vst [vmem:[#allocation71_spill] sm:$0xff] %v10704_v32  ;;  %17042 = vst [vmem:[#allocation72_spill] sm:$0xff] %v10706_v46  ;;  %v1284_v61 = vpop.f32.mrf.mxu0  ;;  %v1283_v46 = vadd.f32 %v1282_v1, %v10099_v14 }
 0x1fc   : > { %v1449_v50 = vpop.f32.mrf.mxu1  ;;  %v1285_v39 = vadd.f32 %v1284_v61, %v10099_v14  ;;  %v1271_v61 = vadd.f32 %v1270_v31, %v10102_v7 }
 0x1fd   : > { %v1288_v54 = vpop.f32.mrf.mxu0  ;;  %v10714_v5 = vadd.f32 %v1449_v50, %v10112_v59 }
 0x1fe   : > { %v1289_v58 = vadd.f32 %v1288_v54, %v10080_v44  ;;  %v10718_v33 = vpop.f32.mrf.mxu1  ;;  %v2252_v1 = vmax.f32 %v1271_v61, %v1283_v46 }
 0x1ff   : > { %17044 = vst [vmem:[#allocation74_spill] sm:$0xff] %v10714_v5  ;;  %17045 = vst [vmem:[#allocation75_spill] sm:$0xff] %v10718_v33  ;;  %v1290_v32 = vpop.f32.mrf.mxu0  ;;  %v2253_v33 = vmax.f32 %v1273_v53, %v1285_v39 }
 0x200   : > { %v1291_v50 = vadd.f32 %v1290_v32, %v10080_v44  ;;  %v1455_v10 = vpop.f32.mrf.mxu1  ;;  %v2265_v54 = vmax.f32 %v1277_v0, %v1289_v58  ;;  %v2278_v13 = vmax.f32 %v2252_v1, 0.0 }
 0x201   : > { %v10728_v28 = vpop.f32.mrf.mxu0  ;;  %v2279_v60 = vmax.f32 %v2253_v33, 0.0  ;;  %v1456_v1 = vadd.f32 %v1455_v10, %v10102_v7 }
 0x202   : > { %v2266_v12 = vmax.f32 %v1279_v62, %v1291_v50  ;;  %v1457_v8 = vpop.f32.mrf.mxu1  ;;  %v2291_v21 = vmax.f32 %v2265_v54, 0.0 }
 0x203   : > { %v10730_v52 = vpop.f32.mrf.mxu0 }
 0x204   : > { %v2292_v57 = vmax.f32 %v2266_v12, 0.0  ;;  %v1461_v5 = vpop.f32.mrf.mxu1 }
 0x205   : > { %v10732_v18 = vpop.f32.mrf.mxu0 }
 0x206   : > { %2548 = vmatprep.subr.mxu1 %v2292_v57  ;;  %v1463_v32 = vpop.f32.mrf.mxu1 }
 0x207   : > { %v10734_v9 = vpop.f32.mrf.mxu0  ;;  %2549 = vmatpush1.msra.mxu1 %v2291_v21  ;;  %v1462_v21 = vadd.f32 %v1461_v5, %v10089_v47  ;;  %v1464_v61 = vadd.f32 %v1463_v32, %v10089_v47 }
 0x208   : > { %2550 = vmatprep.subr.mxu1 %v2279_v60  ;;  %v1467_v31 = vpop.f32.mrf.mxu1 }
 0x209   : > { %v10736_v58 = vpop.f32.mrf.mxu0  ;;  %2551 = vmatpush1.msra.mxu1 %v2278_v13  ;;  %v1468_v53 = vadd.f32 %v1467_v31, %v10099_v14  ;;  %v1458_v13 = vadd.f32 %v1457_v8, %v10102_v7 }
 0x20a   : > { %v1469_v62 = vpop.f32.mrf.mxu1  ;;  %8204 = vmatmul.mubr.msk.f32.vlgmr.msra.gmra.mxu1 %vm677_vm2, %v10456_v43 }
 0x20b   : > { %v10740_v46 = vpop.f32.mrf.mxu0  ;;  %2590 = vmatprep.mubr.f32.mxu1 %v16963_v29  ;;  %v1470_v57 = vadd.f32 %v1469_v62, %v10099_v14  ;;  %v2254_v36 = vmax.f32 %v1456_v1, %v1468_v53 }
 0x20c   : > { %v1473_v0 = vpop.f32.mrf.mxu1 }
 0x20d   : > { %v1474_v39 = vadd.f32 %v1473_v0, %v10080_v44  ;;  %v1562_v33 = vpop.f32.mrf.mxu0  ;;  %v2255_v5 = vmax.f32 %v1458_v13, %v1470_v57 }
 0x20e   : > { %v1475_v50 = vpop.f32.mrf.mxu1  ;;  %8205 = vmatmul.mubr.msk.f32.gmra.mxu1 %vm677_vm2, %v10482_v48 }
 0x20f   : > { %v1476_v54 = vadd.f32 %v1475_v50, %v10080_v44  ;;  %v1564_v12 = vpop.f32.mrf.mxu0  ;;  %2596 = vmatprep.mubr.f32.mxu1 %v16963_v29  ;;  %v2267_v60 = vmax.f32 %v1462_v21, %v1474_v39  ;;  %v2281_v10 = vmax.f32 %v2255_v5, 0.0  ;;  %v2280_v21 = vmax.f32 %v2254_v36, 0.0 }
 0x210   : > { %v10754_v62 = vpop.f32.mrf.mxu1 }
 0x211   : > { %v2268_v31 = vmax.f32 %v1464_v61, %v1476_v54  ;;  %v1568_v0 = vpop.f32.mrf.mxu0  ;;  %v2293_v50 = vmax.f32 %v2267_v60, 0.0 }
 0x212   : > { %v10756_v22 = vpop.f32.mrf.mxu1  ;;  %8206 = vmatmul.mubr.msk.f32.gmra.mxu1 %vm677_vm2, %v10503_v37  ;;  %v1569_v55 = vadd.f32 %v1568_v0, %v10043_v25  ;;  %v1557_v0 = vadd.f32 %v10736_v58, %v10066_v41 }
 0x213   : > { %v2294_v8 = vmax.f32 %v2268_v31, 0.0  ;;  %v1570_v32 = vpop.f32.mrf.mxu0  ;;  %2602 = vmatprep.mubr.f32.mxu1 %v16963_v29 }
 0x214   : > { %v10761_v6 = vpop.f32.mrf.mxu1  ;;  %v1571_v4 = vadd.f32 %v1570_v32, %v10043_v25  ;;  %v1559_v32 = vadd.f32 %v10740_v46, %v10066_v41 }
 0x215   : > { %v1574_v39 = vpop.f32.mrf.mxu0  ;;  %2637 = vmatprep.subr.mxu0 %v2294_v8 }
 0x216   : > { %v10763_v57 = vpop.f32.mrf.mxu1  ;;  %2638 = vmatpush1.msra.mxu0 %v2293_v50  ;;  %8207 = vmatmul.mubr.msk.f32.gmra.mxu1 %vm677_vm2, %v10521_v35 }
 0x217   : > { %v1576_v53 = vpop.f32.mrf.mxu0  ;;  %2639 = vmatprep.subr.mxu0 %v2281_v10  ;;  %2762 = vmatprep.mubr.f32.mxu1 %v16963_v29 }
 0x218   : > { %v10768_v13 = vpop.f32.mrf.mxu1  ;;  %2640 = vmatpush1.msra.mxu0 %v2280_v21  ;;  %v1565_v21 = vadd.f32 %v1564_v12, %v10051_v26  ;;  %v1577_v17 = vadd.f32 %v1576_v53, %v10025_v20  ;;  %v1553_v12 = vadd.f32 %v10734_v9, %v10054_v27 }
 0x219   : > { %v1580_v61 = vpop.f32.mrf.mxu0  ;;  %8208 = vmatmul.mubr.msk.f32.vlgmr.msra.gmra.mxu0 %vm677_vm2, %v10456_v43  ;;  %v1575_v43 = vadd.f32 %v1574_v39, %v10025_v20 }
 0x21a   : > { %v10772_v54 = vpop.f32.mrf.mxu1  ;;  %2679 = vmatprep.mubr.f32.mxu0 %v16963_v29  ;;  %v1581_v50 = vadd.f32 %v1580_v61, %v10036_v24  ;;  %v2035_v9 = vmax.f32 %v1553_v12, %v1565_v21 }
 0x21b   : > { %v1582_v36 = vpop.f32.mrf.mxu0 }
 0x21c   : > { %v1747_v1 = vpop.f32.mrf.mxu1  ;;  %v1583_v5 = vadd.f32 %v1582_v36, %v10036_v24 }
 0x21d   : > { %v1586_v60 = vpop.f32.mrf.mxu0  ;;  %8209 = vmatmul.mubr.msk.f32.gmra.mxu0 %vm677_vm2, %v10482_v48 }
 0x21e   : > { %v1587_v31 = vadd.f32 %v1586_v60, %v10028_v23  ;;  %v10779_v8 = vpop.f32.mrf.mxu1  ;;  %2685 = vmatprep.mubr.f32.mxu0 %v16963_v29  ;;  %v1563_v60 = vadd.f32 %v1562_v33, %v10051_v26  ;;  %v2074_v39 = vmax.f32 %v1571_v4, %v1583_v5  ;;  %v1551_v33 = vadd.f32 %v10732_v18, %v10054_v27 }
 0x21f   : > { %v1588_v10 = vpop.f32.mrf.mxu0  ;;  %v1545_v4 = vadd.f32 %v10728_v28, %v10075_v40  ;;  %v2061_v28 = vmax.f32 %v2035_v9, 0.0 }
 0x220   : > { %v1589_v48 = vadd.f32 %v1588_v10, %v10028_v23  ;;  %v10788_v36 = vpop.f32.mrf.mxu1  ;;  %v2086_v30 = vmax.f32 %v1575_v43, %v1587_v31  ;;  %v2073_v31 = vmax.f32 %v1569_v55, %v1581_v50  ;;  %v10813_v55 = vmax.f32 %v2074_v39, 0.0 }
 0x221   : > { %v1592_v38 = vpop.f32.mrf.mxu0  ;;  %8210 = vmatmul.mubr.msk.f32.gmra.mxu0 %vm677_vm2, %v10503_v37  ;;  %v1547_v37 = vadd.f32 %v10730_v52, %v10075_v40  ;;  %v2021_v58 = vmax.f32 %v1545_v4, %v1557_v0 }
 0x222   : > { %v2087_v53 = vmax.f32 %v1577_v17, %v1589_v48  ;;  %v1755_v61 = vpop.f32.mrf.mxu1  ;;  %2691 = vmatprep.mubr.f32.mxu0 %v16963_v29  ;;  %v2034_v17 = vmax.f32 %v1551_v33, %v1563_v60  ;;  %v10809_v5 = vmax.f32 %v2086_v30, 0.0  ;;  %17048 = vst [vmem:[#allocation78_spill] sm:$0xff] %v10813_v55  ;;  %v10817_v50 = vmax.f32 %v2073_v31, 0.0 }
 0x223   : > { %v1594_v43 = vpop.f32.mrf.mxu0  ;;  %v2022_v18 = vmax.f32 %v1547_v37, %v1559_v32  ;;  %v10823_v32 = vadd.f32 %v1592_v38, %v10215_v56  ;;  %v2047_v33 = vmax.f32 %v2021_v58, 0.0  ;;  %v1748_v31 = vadd.f32 %v1747_v1, %v10051_v26 }
 0x224   : > { %v10805_v10 = vmax.f32 %v2087_v53, 0.0  ;;  %v1759_v46 = vpop.f32.mrf.mxu1  ;;  %17047 = vst [vmem:[#allocation77_spill] sm:$0xff] %v10809_v5  ;;  %17049 = vst [vmem:[#allocation79_spill] sm:$0xff] %v10817_v50  ;;  %v2060_v60 = vmax.f32 %v2034_v17, 0.0  ;;  %v10830_v37 = vadd.f32 %v1594_v43, %v10215_v56  ;;  %v1750_v17 = vadd.f32 %v10779_v8, %v10051_v26 }
 0x225   : > { %v1598_v48 = vpop.f32.mrf.mxu0  ;;  %8211 = vmatmul.mubr.msk.f32.gmra.mxu0 %vm677_vm2, %v10521_v35  ;;  %v2048_v12 = vmax.f32 %v2022_v18, 0.0  ;;  %17050 = vst [vmem:[#allocation80_spill] sm:$0xff] %v10823_v32  ;;  %v1760_v18 = vadd.f32 %v1759_v46, %v10025_v20  ;;  %v1754_v46 = vadd.f32 %v10788_v36, %v10043_v25  ;;  %v1738_v36 = vadd.f32 %v10763_v57, %v10054_v27 }
 0x226   : > { %17046 = vst [vmem:[#allocation76_spill] sm:$0xff] %v10805_v10  ;;  %2718 = vmatprep.subr.mxu1 %v10805_v10  ;;  %v1761_v52 = vpop.f32.mrf.mxu1  ;;  %2851 = vmatprep.mubr.f32.mxu0 %v16963_v29  ;;  %17052 = vst [vmem:[#allocation82_spill] sm:$0xff] %v10830_v37  ;;  %v10843_v43 = vadd.f32 %v1598_v48, %v10175_v3  ;;  %v1732_v57 = vadd.f32 %v10756_v22, %v10075_v40 }
 0x227   : > { %v1600_v21 = vpop.f32.mrf.mxu0  ;;  %2719 = vmatpush1.msra.mxu1 %v10809_v5 }
 0x228   : > { %2720 = vmatprep.subr.mxu1 %v10813_v55  ;;  %v1765_v30 = vpop.f32.mrf.mxu1  ;;  %17054 = vst [vmem:[#allocation84_spill] sm:$0xff] %v10843_v43  ;;  %v2037_v55 = vmax.f32 %v1738_v36, %v1750_v17 }
 0x229   : > { %v1604_v35 = vpop.f32.mrf.mxu0  ;;  %2721 = vmatpush1.msra.mxu1 %v10817_v50 }
 0x22a   : > { %v10826_v39 = vadd.f32 %v1604_v35, %v10205_v45  ;;  %2722 = vmatprep.subr.mxu1 %v2061_v28  ;;  %v1767_v53 = vpop.f32.mrf.mxu1 }
 0x22b   : > { %v1606_v0 = vpop.f32.mrf.mxu0  ;;  %2723 = vmatpush1.msra.mxu1 %v2060_v60  ;;  %v1768_v58 = vadd.f32 %v1767_v53, %v10036_v24  ;;  %v1766_v60 = vadd.f32 %v1765_v30, %v10036_v24  ;;  %v1756_v53 = vadd.f32 %v1755_v61, %v10043_v25  ;;  %v1744_v61 = vadd.f32 %v10772_v54, %v10066_v41 }
 0x22c   : > { %17051 = vst [vmem:[#allocation81_spill] sm:$0xff] %v10826_v39  ;;  %v10835_v4 = vadd.f32 %v1606_v0, %v10205_v45  ;;  %2724 = vmatprep.subr.mxu1 %v2048_v12  ;;  %v1771_v38 = vpop.f32.mrf.mxu1  ;;  %v1762_v0 = vadd.f32 %v1761_v52, %v10025_v20  ;;  %v1742_v30 = vadd.f32 %v10768_v13, %v10066_v41 }
 0x22d   : > { %v1610_v28 = vpop.f32.mrf.mxu0  ;;  %v1772_v1 = vadd.f32 %v1771_v38, %v10028_v23  ;;  %2725 = vmatpush1.msra.mxu1 %v2047_v33  ;;  %v10857_v38 = vadd.f32 %v1600_v21, %v10175_v3  ;;  %v2076_v52 = vmax.f32 %v1756_v53, %v1768_v58  ;;  %v1736_v21 = vadd.f32 %v10761_v6, %v10054_v27 }
 0x22e   : > { %17053 = vst [vmem:[#allocation83_spill] sm:$0xff] %v10835_v4  ;;  %v10849_v12 = vadd.f32 %v1610_v28, %v10163_v19  ;;  %v1773_v8 = vpop.f32.mrf.mxu1  ;;  %v1730_v58 = vadd.f32 %v10754_v62, %v10075_v40  ;;  %v2024_v13 = vmax.f32 %v1732_v57, %v1744_v61  ;;  %v2063_v62 = vmax.f32 %v2037_v55, 0.0 }
 0x22f   : > { %v1612_v33 = vpop.f32.mrf.mxu0  ;;  %v1774_v48 = vadd.f32 %v1773_v8, %v10028_v23  ;;  %v2088_v9 = vmax.f32 %v1760_v18, %v1772_v1  ;;  %v2075_v18 = vmax.f32 %v1754_v46, %v1766_v60  ;;  %v2036_v53 = vmax.f32 %v1736_v21, %v1748_v31 }
 0x230   : > { %17055 = vst [vmem:[#allocation85_spill] sm:$0xff] %v10849_v12  ;;  %v10862_v28 = vadd.f32 %v1612_v33, %v10163_v19  ;;  %v1777_v35 = vpop.f32.mrf.mxu1  ;;  %v10882_v60 = vmax.f32 %v2076_v52, 0.0  ;;  %v2023_v22 = vmax.f32 %v1730_v58, %v1742_v30  ;;  %v2050_v61 = vmax.f32 %v2024_v13, 0.0 }
 0x231   : > { %v2089_v50 = vmax.f32 %v1762_v0, %v1774_v48  ;;  %v1616_v8 = vpop.f32.mrf.mxu0  ;;  %v10880_v6 = vmax.f32 %v2088_v9, 0.0  ;;  %v2062_v9 = vmax.f32 %v2036_v53, 0.0  ;;  %v10894_v52 = vadd.f32 %v1777_v35, %v10215_v56 }
 0x232   : > { %17056 = vst [vmem:[#allocation86_spill] sm:$0xff] %v10862_v28  ;;  %v1779_v33 = vpop.f32.mrf.mxu1  ;;  %17059 = vst [vmem:[#allocation89_spill] sm:$0xff] %v10882_v60  ;;  %v10900_v57 = vadd.f32 %v1616_v8, %v10144_v11 }
 0x233   : > { %v10876_v5 = vmax.f32 %v2089_v50, 0.0  ;;  %v1618_v54 = vpop.f32.mrf.mxu0  ;;  %17058 = vst [vmem:[#allocation88_spill] sm:$0xff] %v10880_v6  ;;  %v10888_v50 = vmax.f32 %v2075_v18, 0.0  ;;  %17062 = vst [vmem:[#allocation92_spill] sm:$0xff] %v10894_v52  ;;  %v2049_v18 = vmax.f32 %v2023_v22, 0.0  ;;  %v10906_v53 = vadd.f32 %v1779_v33, %v10215_v56 }
 0x234   : > { %v1783_v0 = vpop.f32.mrf.mxu1  ;;  %v10914_v22 = vadd.f32 %v1618_v54, %v10144_v11 }
 0x235   : > { %17057 = vst [vmem:[#allocation87_spill] sm:$0xff] %v10876_v5  ;;  %v1622_v46 = vpop.f32.mrf.mxu0  ;;  %v10885_v48 = vadd.f32 %v1783_v0, %v10175_v3  ;;  %2807 = vmatprep.subr.mxu0 %v10876_v5  ;;  %17061 = vst [vmem:[#allocation91_spill] sm:$0xff] %v10888_v50 }
 0x236   : > { %v1785_v17 = vpop.f32.mrf.mxu1  ;;  %2808 = vmatpush1.msra.mxu0 %v10880_v6  ;;  %17064 = vst [vmem:[#allocation94_spill] sm:$0xff] %v10906_v53 }
 0x237   : > { %17060 = vst [vmem:[#allocation90_spill] sm:$0xff] %v10885_v48  ;;  %v1624_v31 = vpop.f32.mrf.mxu0  ;;  %2809 = vmatprep.subr.mxu0 %v10882_v60  ;;  %v10935_v35 = vadd.f32 %v1785_v17, %v10175_v3 }
 0x238   : > { %v1789_v36 = vpop.f32.mrf.mxu1  ;;  %2810 = vmatpush1.msra.mxu0 %v10888_v50 }
 0x239   : > { %v1628_v21 = vpop.f32.mrf.mxu0  ;;  %v10897_v30 = vadd.f32 %v1789_v36, %v10205_v45  ;;  %2811 = vmatprep.subr.mxu0 %v2063_v62  ;;  %17067 = vst [vmem:[#allocation97_spill] sm:$0xff] %v10935_v35 }
 0x23a   : > { %v10903_v55 = vadd.f32 %v1628_v21, %v10137_v16  ;;  %v1791_v58 = vpop.f32.mrf.mxu1  ;;  %2812 = vmatpush1.msra.mxu0 %v2062_v9 }
 0x23b   : > { %17063 = vst [vmem:[#allocation93_spill] sm:$0xff] %v10897_v30  ;;  %v1630_v0 = vpop.f32.mrf.mxu0  ;;  %v10911_v13 = vadd.f32 %v1791_v58, %v10205_v45  ;;  %2813 = vmatprep.subr.mxu0 %v2050_v61  ;;  %v10927_v61 = vadd.f32 %v1622_v46, %v10121_v63  ;;  %v10943_v46 = vadd.f32 %v1624_v31, %v10121_v63 }
 0x23c   : > { %v10919_v62 = vadd.f32 %v1630_v0, %v10137_v16  ;;  %v1795_v9 = vpop.f32.mrf.mxu1  ;;  %2814 = vmatpush1.msra.mxu0 %v2049_v18 }
 0x23d   : > { %17065 = vst [vmem:[#allocation95_spill] sm:$0xff] %v10911_v13  ;;  %v1634_v36 = vpop.f32.mrf.mxu0  ;;  %v10924_v21 = vadd.f32 %v1795_v9, %v10163_v19 }
 0x23e   : > { %v10932_v58 = vadd.f32 %v1634_v36, %v10112_v59  ;;  %v1797_v0 = vpop.f32.mrf.mxu1 }
 0x23f   : > { %17066 = vst [vmem:[#allocation96_spill] sm:$0xff] %v10924_v21  ;;  %v1636_v33 = vpop.f32.mrf.mxu0  ;;  %v10940_v9 = vadd.f32 %v1797_v0, %v10163_v19 }
 0x240   : > { %v10948_v36 = vadd.f32 %v1636_v33, %v10112_v59  ;;  %v1801_v8 = vpop.f32.mrf.mxu1 }
 0x241   : > { %17068 = vst [vmem:[#allocation98_spill] sm:$0xff] %v10940_v9  ;;  %v1640_v54 = vpop.f32.mrf.mxu0  ;;  %v10953_v18 = vadd.f32 %v1801_v8, %v10144_v11 }
 0x242   : > { %v1803_v50 = vpop.f32.mrf.mxu1 }
 0x243   : > { %17069 = vst [vmem:[#allocation99_spill] sm:$0xff] %v10953_v18  ;;  %v1642_v31 = vpop.f32.mrf.mxu0  ;;  %v10964_v8 = vadd.f32 %v1803_v50, %v10144_v11 }
 0x244   : > { %v1807_v60 = vpop.f32.mrf.mxu1 }
 0x245   : > { %v1646_v6 = vpop.f32.mrf.mxu0  ;;  %v10958_v1 = vadd.f32 %v1807_v60, %v10121_v63  ;;  %17072 = vst [vmem:[#allocation102_spill] sm:$0xff] %v10964_v8 }
 0x246   : > { %v1809_v33 = vpop.f32.mrf.mxu1 }
 0x247   : > { %17070 = vst [vmem:[#allocation100_spill] sm:$0xff] %v10958_v1  ;;  %v1648_v5 = vpop.f32.mrf.mxu0  ;;  %v10980_v0 = vadd.f32 %v1809_v33, %v10121_v63 }
 0x248   : > { %v1813_v30 = vpop.f32.mrf.mxu1 }
 0x249   : > { %v1652_v52 = vpop.f32.mrf.mxu0  ;;  %v10961_v17 = vadd.f32 %v1813_v30, %v10137_v16  ;;  %v1647_v30 = vadd.f32 %v1646_v6, %v10089_v47  ;;  %v1649_v6 = vadd.f32 %v1648_v5, %v10089_v47 }
 0x24a   : > { %v1815_v13 = vpop.f32.mrf.mxu1 }
 0x24b   : > { %17071 = vst [vmem:[#allocation101_spill] sm:$0xff] %v10961_v17  ;;  %v1654_v53 = vpop.f32.mrf.mxu0  ;;  %v10969_v21 = vadd.f32 %v1815_v13, %v10137_v16  ;;  %v1653_v13 = vadd.f32 %v1652_v52, %v10099_v14 }
 0x24c   : > { %v1819_v60 = vpop.f32.mrf.mxu1  ;;  %v1655_v50 = vadd.f32 %v1654_v53, %v10099_v14 }
 0x24d   : > { %17073 = vst [vmem:[#allocation103_spill] sm:$0xff] %v10969_v21  ;;  %v1658_v9 = vpop.f32.mrf.mxu0  ;;  %v10974_v35 = vadd.f32 %v1819_v60, %v10112_v59  ;;  %v1643_v60 = vadd.f32 %v1642_v31, %v10102_v7  ;;  %v1641_v21 = vadd.f32 %v1640_v54, %v10102_v7 }
 0x24e   : > { %v1659_v10 = vadd.f32 %v1658_v9, %v10080_v44  ;;  %v1821_v39 = vpop.f32.mrf.mxu1 }
 0x24f   : > { %17074 = vst [vmem:[#allocation104_spill] sm:$0xff] %v10974_v35  ;;  %v1660_v48 = vpop.f32.mrf.mxu0  ;;  %v10986_v18 = vadd.f32 %v1821_v39, %v10112_v59  ;;  %v2257_v32 = vmax.f32 %v1643_v60, %v1655_v50  ;;  %v2256_v1 = vmax.f32 %v1641_v21, %v1653_v13  ;;  %v10997_v21 = vld [vmem:[%s16707_s3] sm:$0xff] }
 0x250   : > { %v1661_v53 = vadd.f32 %v1660_v48, %v10080_v44  ;;  %v1825_v9 = vpop.f32.mrf.mxu1  ;;  %v2269_v33 = vmax.f32 %v1647_v30, %v1659_v10 }
 0x251   : > { %v9122_v8 = vpop.f32.mrf.mxu0  ;;  %v2283_v5 = vmax.f32 %v2257_v32, 0.0  ;;  %v2282_v43 = vmax.f32 %v2256_v1, 0.0  ;;  %v885_v32 = vadd.f32 %v10291_v42, %v10121_v63 }
 0x252   : > { %v2270_v17 = vmax.f32 %v1649_v6, %v1661_v53  ;;  %v1827_v35 = vpop.f32.mrf.mxu1  ;;  %v2295_v31 = vmax.f32 %v2269_v33, 0.0  ;;  %v1920_v50 = vadd.f32 %v9122_v8, %v10054_v27  ;;  %v11018_v27 = vld [vmem:[%s16707_s3 + $0x8] sm:$0xff] }
 0x253   : > { %v1914_v39 = vpop.f32.mrf.mxu0 }
 0x254   : > { %v2296_v4 = vmax.f32 %v2270_v17, 0.0  ;;  %v1831_v37 = vpop.f32.mrf.mxu1 }
 0x255   : > { %v9125_v12 = vpop.f32.mrf.mxu0  ;;  %v1832_v13 = vadd.f32 %v1831_v37, %v10089_v47  ;;  %v1828_v37 = vadd.f32 %v1827_v35, %v10102_v7  ;;  %v1915_v35 = vadd.f32 %v1914_v39, %v10075_v40 }
 0x256   : > { %2726 = vmatprep.subr.mxu1 %v2296_v4  ;;  %v1833_v48 = vpop.f32.mrf.mxu1  ;;  %v897_v4 = vadd.f32 %v10345_v15, %v10112_v59  ;;  %v1930_v33 = vadd.f32 %v9125_v12, %v10051_v26 }
 0x257   : > { %v1924_v28 = vpop.f32.mrf.mxu0  ;;  %2727 = vmatpush1.msra.mxu1 %v2295_v31  ;;  %v1834_v8 = vadd.f32 %v1833_v48, %v10089_v47 }
 0x258   : > { %2728 = vmatprep.subr.mxu1 %v2283_v5  ;;  %v1837_v10 = vpop.f32.mrf.mxu1  ;;  %v1925_v26 = vadd.f32 %v1924_v28, %v10066_v41  ;;  %v2038_v41 = vmax.f32 %v1920_v50, %v1930_v33 }
 0x259   : > { %v9128_v54 = vpop.f32.mrf.mxu0  ;;  %2729 = vmatpush1.msra.mxu1 %v2282_v43  ;;  %v1826_v43 = vadd.f32 %v1825_v9, %v10102_v7  ;;  %v1838_v31 = vadd.f32 %v1837_v10, %v10099_v14 }
 0x25a   : > { %v1839_v30 = vpop.f32.mrf.mxu1  ;;  %8212 = vmatmul.mubr.msk.f32.vlgmr.msra.gmra.mxu1 %vm677_vm2, %v10997_v21  ;;  %v1940_v42 = vadd.f32 %v9128_v54, %v10025_v20 }
 0x25b   : > { %v1934_v17 = vpop.f32.mrf.mxu0  ;;  %2768 = vmatprep.mubr.f32.mxu1 %v16963_v29  ;;  %v1840_v60 = vadd.f32 %v1839_v30, %v10099_v14  ;;  %v891_v30 = vadd.f32 %v10312_v51, %v10137_v16  ;;  %v2258_v28 = vmax.f32 %v1826_v43, %v1838_v31  ;;  %v2025_v43 = vmax.f32 %v1915_v35, %v1925_v26 }
 0x25c   : > { %v1843_v1 = vpop.f32.mrf.mxu1  ;;  %v2064_v31 = vmax.f32 %v2038_v41, 0.0  ;;  %v1267_v35 = vadd.f32 %v10692_v34, %v10112_v59  ;;  %v1255_v34 = vadd.f32 %v10652_v49, %v10121_v63 }
 0x25d   : > { %v1844_v6 = vadd.f32 %v1843_v1, %v10080_v44  ;;  %v9131_v53 = vpop.f32.mrf.mxu0  ;;  %v2259_v1 = vmax.f32 %v1828_v37, %v1840_v60  ;;  %v17077_v37 = vld [vmem:[#allocation30_spill] sm:$0xff] }
 0x25e   : > { %v1950_v15 = vadd.f32 %v9131_v53, %v10028_v23  ;;  %v1845_v5 = vpop.f32.mrf.mxu1  ;;  %8213 = vmatmul.mubr.msk.f32.gmra.mxu1 %vm677_vm2, %v11018_v27  ;;  %v1935_v23 = vadd.f32 %v1934_v17, %v10043_v25  ;;  %v11039_v25 = vld [vmem:[%s16707_s3 + $0x10] sm:$0xff]  ;;  %v2183_v17 = vmax.f32 %v885_v32, %v897_v4 }
 0x25f   : > { %v1846_v12 = vadd.f32 %v1845_v5, %v10080_v44  ;;  %v1944_v20 = vpop.f32.mrf.mxu0  ;;  %2774 = vmatprep.mubr.f32.mxu1 %v16963_v29  ;;  %v2271_v9 = vmax.f32 %v1832_v13, %v1844_v6  ;;  %v2285_v60 = vmax.f32 %v2259_v1, 0.0  ;;  %v17076_v4 = vld [vmem:[#allocation28_spill] sm:$0xff]  ;;  %v17082_v1 = vld [vmem:[#allocation19_spill] sm:$0xff] }
 0x260   : > { %v2090_v10 = vmax.f32 %v1940_v42, %v1950_v15  ;;  %v1945_v54 = vadd.f32 %v1944_v20, %v10036_v24  ;;  %v17075_v24 = vld [vmem:[#allocation21_spill] sm:$0xff]  ;;  %v2284_v42 = vmax.f32 %v2258_v28, 0.0  ;;  %v2209_v32 = vmax.f32 %v2183_v17, 0.0 }
 0x261   : > { %v2272_v48 = vmax.f32 %v1834_v8, %v1846_v12  ;;  %v11032_v53 = vpop.f32.mrf.mxu0  ;;  %v879_v40 = vadd.f32 %v17075_v24, %v10144_v11  ;;  %v2297_v50 = vmax.f32 %v2271_v9, 0.0  ;;  %v17078_v8 = vmax.f32 %v17076_v4, %v17077_v37  ;;  %v17080_v9 = vld [vmem:[#allocation24_spill] sm:$0xff]  ;;  %v17085_v24 = vld [vmem:[#allocation17_spill] sm:$0xff] }
 0x262   : > { %v11034_v5 = vmax.f32 %v2090_v10, 0.0  ;;  %v2077_v52 = vmax.f32 %v1935_v23, %v1945_v54  ;;  %8214 = vmatmul.mubr.msk.f32.gmra.mxu1 %vm677_vm2, %v11039_v25  ;;  %v17079_v23 = vld [vmem:[#allocation22_spill] sm:$0xff]  ;;  %v17092_v4 = vld [vmem:[#allocation13_spill] sm:$0xff] }
 0x263   : > { %v2298_v51 = vmax.f32 %v2272_v48, 0.0  ;;  %v11045_v39 = vpop.f32.mrf.mxu0  ;;  %2780 = vmatprep.mubr.f32.mxu1 %v16963_v29  ;;  %v2170_v33 = vmax.f32 %v879_v40, %v891_v30  ;;  %v2208_v26 = vmax.f32 %v17078_v8, 0.0  ;;  %v17081_v10 = vmax.f32 %v17079_v23, %v17080_v9  ;;  %v17083_v48 = vld [vmem:[#allocation20_spill] sm:$0xff]  ;;  %v17086_v40 = vld [vmem:[#allocation18_spill] sm:$0xff]  ;;  %v17094_v23 = vld [vmem:[#allocation9_spill] sm:$0xff] }
 0x264   : > { %v11048_v13 = vmax.f32 %v2077_v52, 0.0  ;;  %9150 = vmatprep.subr.mxu1 %v11034_v5  ;;  %v2051_v52 = vmax.f32 %v2025_v43, 0.0  ;;  %v17084_v41 = vmax.f32 %v17082_v1, %v17083_v48  ;;  %v17097_v1 = vld [vmem:[#allocation52_spill] sm:$0xff] }
 0x265   : > { %v11051_v6 = vpop.f32.mrf.mxu0  ;;  %9151 = vmatpush3.msra.mxu1 %v11034_v5  ;;  %2815 = vmatprep.subr.mxu0 %v2298_v51  ;;  %v2196_v20 = vmax.f32 %v2170_v33, 0.0  ;;  %v2195_v54 = vmax.f32 %v17081_v10, 0.0  ;;  %v17087_v51 = vmax.f32 %v17085_v24, %v17086_v40  ;;  %v17089_v33 = vld [vmem:[#allocation15_spill] sm:$0xff]  ;;  %v17095_v10 = vld [vmem:[#allocation10_spill] sm:$0xff]  ;;  %v1249_v48 = vadd.f32 %v17097_v1, %v10144_v11  ;;  %v17100_v40 = vld [vmem:[#allocation44_spill] sm:$0xff] }
 0x266   : > { %9152 = vmatprep.subr.mxu1 %v11048_v13  ;;  %2816 = vmatpush1.msra.mxu0 %v2297_v50  ;;  %v2157_v28 = vmax.f32 %v17084_v41, 0.0  ;;  %v11084_v50 = vld [vmem:[%s16707_s3 + $0x18] sm:$0xff]  ;;  %v17098_v41 = vld [vmem:[#allocation11_spill] sm:$0xff] }
 0x267   : > { %v11055_v15 = vpop.f32.mrf.mxu0  ;;  %9153 = vmatpush3.msra.mxu1 %v11048_v13  ;;  %2817 = vmatprep.subr.mxu0 %v2285_v60  ;;  %v2156_v17 = vmax.f32 %v17087_v51, 0.0  ;;  %v17088_v60 = vld [vmem:[#allocation16_spill] sm:$0xff]  ;;  %v1231_v51 = vadd.f32 %v17100_v40, %v10175_v3  ;;  %v17106_v1 = vld [vmem:[#allocation65_spill] sm:$0xff] }
 0x268   : > { %9154 = vmatprep.subr.mxu1 %v2064_v31  ;;  %2818 = vmatpush1.msra.mxu0 %v2284_v42 }
 0x269   : > { %v11061_v12 = vpop.f32.mrf.mxu0  ;;  %9155 = vmatpush3.msra.mxu1 %v2064_v31  ;;  %8216 = vmatmul.mubr.msk.f32.vlgmr.msra.gmra.mxu0 %vm677_vm2, %v10997_v21  ;;  %v17090_v31 = vmax.f32 %v17088_v60, %v17089_v33 }
 0x26a   : > { %9156 = vmatprep.subr.mxu1 %v2051_v52  ;;  %2981 = vmatprep.subr.mxu0 %v2209_v32  ;;  %v17091_v32 = vld [vmem:[#allocation14_spill] sm:$0xff] }
 0x26b   : > { %v11068_v30 = vpop.f32.mrf.mxu0  ;;  %9157 = vmatpush3.msra.mxu1 %v2051_v52  ;;  %2982 = vmatpush1.msra.mxu0 %v2208_v26  ;;  %v2144_v42 = vmax.f32 %v17090_v31, 0.0  ;;  %v17093_v37 = vmax.f32 %v17091_v32, %v17092_v4  ;;  %v2187_v26 = vmax.f32 %v1255_v34, %v1267_v35  ;;  %v17101_v34 = vld [vmem:[#allocation12_spill] sm:$0xff]  ;;  %v17103_v4 = vld [vmem:[#allocation47_spill] sm:$0xff] }
 0x26c   : > { %2983 = vmatprep.subr.mxu0 %v2196_v20  ;;  %2857 = vmatprep.mubr.f32.mxu0 %v16963_v29  ;;  %v1261_v20 = vadd.f32 %v10672_v2, %v10137_v16  ;;  %v17099_v2 = vld [vmem:[#allocation41_spill] sm:$0xff] }
 0x26d   : > { %v11079_v43 = vpop.f32.mrf.mxu0  ;;  %2984 = vmatpush1.msra.mxu0 %v2195_v54  ;;  %8215 = vmatmul.mubr.msk.f32.gmra.mxu1 %vm677_vm2, %v11084_v50  ;;  %v2143_v8 = vmax.f32 %v17093_v37, 0.0  ;;  %v17096_v54 = vld [vmem:[#allocation50_spill] sm:$0xff]  ;;  %v1082_v24 = vadd.f32 %v17099_v2, %v10112_v59  ;;  %v1237_v37 = vadd.f32 %v17103_v4, %v10205_v45  ;;  %v17113_v4 = vld [vmem:[#allocation48_spill] sm:$0xff] }
 0x26e   : > { %8217 = vmatmul.mubr.msk.f32.gmra.mxu0 %vm677_vm2, %v11018_v27  ;;  %2985 = vmatprep.subr.mxu0 %v2157_v28  ;;  %v1243_v35 = vadd.f32 %v17096_v54, %v10163_v19  ;;  %v2213_v28 = vmax.f32 %v2187_v26, 0.0  ;;  %v2174_v60 = vmax.f32 %v1249_v48, %v1261_v20  ;;  %v17107_v48 = vld [vmem:[#allocation66_spill] sm:$0xff] }
 0x26f   : > { %v11095_v52 = vpop.f32.mrf.mxu0  ;;  %2986 = vmatpush1.msra.mxu0 %v2156_v17  ;;  %2863 = vmatprep.mubr.f32.mxu0 %v16963_v29 }
 0x270   : > { %2987 = vmatprep.subr.mxu0 %v2144_v42  ;;  %9162 = vmatprep.mubr.msk.f32.mxu1 %vm677_vm2, %v10997_v21  ;;  %v17102_v42 = vld [vmem:[#allocation35_spill] sm:$0xff]  ;;  %v2135_v26 = vmax.f32 %v1231_v51, %v1243_v35  ;;  %v17109_v35 = vld [vmem:[#allocation60_spill] sm:$0xff] }
 0x271   : > { %v9146_v49 = vpop.f32.mrf.mxu0  ;;  %2988 = vmatpush1.msra.mxu0 %v2143_v8  ;;  %v1070_v32 = vadd.f32 %v17102_v42, %v10121_v63 }
 0x272   : > { %8218 = vmatmul.mubr.msk.f32.gmra.mxu0 %vm677_vm2, %v11039_v25  ;;  %2989 = vmatprep.subr.mxu0 %v17094_v23  ;;  %v2000_v33 = vadd.f32 %v9146_v49, %v10089_v47 }
 0x273   : > { %v1994_v9 = vpop.f32.mrf.mxu0  ;;  %2990 = vmatpush1.msra.mxu0 %v17095_v10  ;;  %2869 = vmatprep.mubr.f32.mxu0 %v16963_v29  ;;  %v17105_v10 = vld [vmem:[#allocation2_spill] sm:$0xff]  ;;  %v2185_v2 = vmax.f32 %v1070_v32, %v1082_v24  ;;  %v2161_v24 = vmax.f32 %v2135_v26, 0.0  ;;  %v17119_v26 = vld [vmem:[#allocation39_spill] sm:$0xff] }
 0x274   : > { %2991 = vmatprep.subr.mxu0 %v17098_v41  ;;  %v1995_v20 = vadd.f32 %v1994_v9, %v10102_v7  ;;  %v1225_v54 = vadd.f32 %v17105_v10, %v10215_v56  ;;  %v17108_v41 = vmax.f32 %v17106_v1, %v17107_v48  ;;  %v2200_v7 = vmax.f32 %v2174_v60, 0.0  ;;  %v17114_v60 = vld [vmem:[#allocation49_spill] sm:$0xff] }
 0x275   : > { %v9149_v17 = vpop.f32.mrf.mxu0  ;;  %2992 = vmatpush1.msra.mxu0 %v17101_v34 }
 0x276   : > { %v2010_v31 = vadd.f32 %v9149_v17, %v10080_v44  ;;  %8219 = vmatmul.mubr.msk.f32.gmra.mxu0 %vm677_vm2, %v11084_v50  ;;  %3159 = vmatprep.subr.mxu0 %v2213_v28  ;;  %v17104_v44 = vld [vmem:[#allocation38_spill] sm:$0xff]  ;;  %v2212_v28 = vmax.f32 %v17108_v41, 0.0  ;;  %v2122_v9 = vmax.f32 %v1225_v54, %v1237_v37  ;;  %v17115_v37 = vmax.f32 %v17113_v4, %v17114_v60 }
 0x277   : > { %v2004_v8 = vpop.f32.mrf.mxu0  ;;  %3025 = vmatprep.mubr.f32.mxu0 %v16963_v29  ;;  %v1076_v49 = vadd.f32 %v17104_v44, %v10137_v16  ;;  %v17117_v44 = vld [vmem:[#allocation46_spill] sm:$0xff]  ;;  %v17134_v60 = vmax.f32 %v10943_v46, %v10948_v36  ;;  %v17144_v46 = vld [vmem:[#allocation72_spill] sm:$0xff] }
 0x278   : > { %v2273_v23 = vmax.f32 %v2000_v33, %v2010_v31  ;;  %v2005_v47 = vadd.f32 %v2004_v8, %v10099_v14  ;;  %v17110_v14 = vld [vmem:[#allocation61_spill] sm:$0xff]  ;;  %v17112_v33 = vld [vmem:[#allocation34_spill] sm:$0xff]  ;;  %v2160_v8 = vmax.f32 %v17115_v37, 0.0  ;;  %v1446_v36 = vadd.f32 %v17144_v46, %v10137_v16 }
 0x279   : > { %v17111_v51 = vmax.f32 %v17109_v35, %v17110_v14  ;;  %v1064_v31 = vadd.f32 %v17112_v33, %v10144_v11  ;;  %v17127_v35 = vld [vmem:[#allocation33_spill] sm:$0xff]  ;;  %v2217_v37 = vmax.f32 %v17134_v60, 0.0 }
 0x27a   : > { %v2299_v40 = vmax.f32 %v2273_v23, 0.0  ;;  %v2260_v17 = vmax.f32 %v1995_v20, %v2005_v47  ;;  %8224 = vmatmul.mubr.msk.f32.vlgmr.msra.gmra.mxu0 %vm677_vm2, %v10997_v21  ;;  %v2211_v20 = vmax.f32 %v2185_v2, 0.0  ;;  %v2148_v23 = vmax.f32 %v2122_v9, 0.0  ;;  %v17116_v47 = vld [vmem:[#allocation45_spill] sm:$0xff]  ;;  %v17126_v9 = vld [vmem:[#allocation32_spill] sm:$0xff] }
 0x27b   : > { %v2199_v34 = vmax.f32 %v17111_v51, 0.0  ;;  %3160 = vmatpush1.msra.mxu0 %v2212_v28  ;;  %3031 = vmatprep.mubr.f32.mxu0 %v16963_v29  ;;  %v2172_v32 = vmax.f32 %v1064_v31, %v1076_v49  ;;  %v17118_v10 = vmax.f32 %v17116_v47, %v17117_v44  ;;  %v17120_v49 = vld [vmem:[#allocation40_spill] sm:$0xff]  ;;  %v17123_v2 = vld [vmem:[#allocation37_spill] sm:$0xff]  ;;  %v17128_v14 = vmax.f32 %v17126_v9, %v17127_v35  ;;  %v17131_v31 = vld [vmem:[#allocation31_spill] sm:$0xff] }
 0x27c   : > { %v2286_v42 = vmax.f32 %v2260_v17, 0.0  ;;  %3161 = vmatprep.subr.mxu0 %v2200_v7  ;;  %9158 = vmatprep.subr.mxu1 %v2299_v40  ;;  %v17121_v1 = vmax.f32 %v17119_v26, %v17120_v49  ;;  %v17122_v28 = vld [vmem:[#allocation36_spill] sm:$0xff]  ;;  %v17125_v7 = vld [vmem:[#allocation5_spill] sm:$0xff]  ;;  %v17138_v47 = vld [vmem:[#allocation27_spill] sm:$0xff]  ;;  %v17148_v35 = vmax.f32 %v10927_v61, %v10932_v58 }
 0x27d   : > { %3162 = vmatpush1.msra.mxu0 %v2199_v34  ;;  %9159 = vmatpush3.msra.mxu1 %v2299_v40  ;;  %v2147_v54 = vmax.f32 %v17118_v10, 0.0  ;;  %v2198_v41 = vmax.f32 %v2172_v32, 0.0  ;;  %v17124_v40 = vmax.f32 %v17122_v28, %v17123_v2  ;;  %v2159_v51 = vmax.f32 %v17128_v14, 0.0  ;;  %v17129_v34 = vld [vmem:[#allocation6_spill] sm:$0xff]  ;;  %v17130_v33 = vld [vmem:[#allocation29_spill] sm:$0xff]  ;;  %v17133_v32 = vld [vmem:[#allocation75_spill] sm:$0xff] }
 0x27e   : > { %3163 = vmatprep.subr.mxu0 %v2161_v24  ;;  %9160 = vmatprep.subr.mxu1 %v2286_v42  ;;  %v2210_v48 = vmax.f32 %v17121_v1, 0.0  ;;  %v1452_v4 = vadd.f32 %v17133_v32, %v10112_v59  ;;  %v17141_v26 = vld [vmem:[#allocation25_spill] sm:$0xff]  ;;  %v17145_v2 = vld [vmem:[#allocation68_spill] sm:$0xff]  ;;  %v2216_v14 = vmax.f32 %v17148_v35, 0.0  ;;  %v17153_v61 = vld [vmem:[#allocation3_spill] sm:$0xff]  ;;  %v1990_v35 = vadd.f32 %v11079_v43, %v10112_v59 }
 0x27f   : > { %8225 = vmatmul.mubr.msk.f32.gmra.mxu0 %vm677_vm2, %v11018_v27  ;;  %9161 = vmatpush3.msra.mxu1 %v2286_v42  ;;  %v2197_v17 = vmax.f32 %v17124_v40, 0.0  ;;  %v17132_v42 = vmax.f32 %v17130_v33, %v17131_v31  ;;  %v1434_v40 = vadd.f32 %v17145_v2, %v10144_v11  ;;  %v17150_v33 = vmax.f32 %v10914_v22, %v10919_v62  ;;  %v17154_v58 = vld [vmem:[#allocation62_spill] sm:$0xff] }
 0x280   : > { %3164 = vmatpush1.msra.mxu0 %v2160_v8  ;;  %3070 = vmatprep.subr.mxu1 %v2211_v20  ;;  %v17135_v8 = vld [vmem:[#allocation42_spill] sm:$0xff]  ;;  %v17136_v20 = vld [vmem:[#allocation43_spill] sm:$0xff]  ;;  %v1422_v60 = vadd.f32 %v17154_v58, %v10205_v45  ;;  %v17177_v58 = vld [vmem:[#allocation76_spill] sm:$0xff] }
 0x281   : > { %3165 = vmatprep.subr.mxu0 %v2148_v23  ;;  %9163 = vmatmul.mubr.msk.f32.vlgmr.msra.gmra.mxu1 %vm677_vm2, %v11018_v27  ;;  %v2158_v24 = vmax.f32 %v17132_v42, 0.0  ;;  %v17137_v23 = vld [vmem:[#allocation26_spill] sm:$0xff]  ;;  %v2204_v31 = vmax.f32 %v17150_v33, 0.0  ;;  %v17151_v42 = vld [vmem:[#allocation7_spill] sm:$0xff] }
 0x282   : > { %3166 = vmatpush1.msra.mxu0 %v2147_v54  ;;  %3037 = vmatprep.mubr.f32.mxu0 %v16963_v29  ;;  %v17139_v44 = vmax.f32 %v17137_v23, %v17138_v47  ;;  %v17140_v54 = vld [vmem:[#allocation23_spill] sm:$0xff] }
 0x283   : > { %3071 = vmatpush1.msra.mxu1 %v2210_v48  ;;  %3167 = vmatprep.subr.mxu0 %v17125_v7  ;;  %v17142_v49 = vmax.f32 %v17140_v54, %v17141_v26  ;;  %v17143_v48 = vld [vmem:[#allocation69_spill] sm:$0xff]  ;;  %v17147_v7 = vld [vmem:[#allocation67_spill] sm:$0xff] }
 0x284   : > { %8226 = vmatmul.mubr.msk.f32.gmra.mxu0 %vm677_vm2, %v11039_v25  ;;  %3072 = vmatprep.subr.mxu1 %v2198_v41  ;;  %v2146_v10 = vmax.f32 %v17139_v44, 0.0  ;;  %v1440_v41 = vadd.f32 %v17143_v48, %v10121_v63  ;;  %v1428_v9 = vadd.f32 %v17147_v7, %v10163_v19  ;;  %v17159_v44 = vld [vmem:[#allocation86_spill] sm:$0xff]  ;;  %v17161_v26 = vld [vmem:[#allocation51_spill] sm:$0xff] }
 0x285   : > { %3168 = vmatpush1.msra.mxu0 %v17129_v34  ;;  %3073 = vmatpush1.msra.mxu1 %v2197_v17  ;;  %v2145_v1 = vmax.f32 %v17142_v49, 0.0  ;;  %v17146_v17 = vld [vmem:[#allocation8_spill] sm:$0xff]  ;;  %v2176_v34 = vmax.f32 %v1434_v40, %v1446_v36  ;;  %v17166_v36 = vld [vmem:[#allocation71_spill] sm:$0xff]  ;;  %v17168_v40 = vld [vmem:[#allocation82_spill] sm:$0xff] }
 0x286   : > { %3169 = vmatprep.subr.mxu0 %v17135_v8  ;;  %3074 = vmatprep.subr.mxu1 %v2159_v51  ;;  %v2189_v28 = vmax.f32 %v1440_v41, %v1452_v4  ;;  %v17149_v51 = vld [vmem:[#allocation4_spill] sm:$0xff]  ;;  %v17156_v8 = vld [vmem:[#allocation73_spill] sm:$0xff] }
 0x287   : > { %3170 = vmatpush1.msra.mxu0 %v17136_v20  ;;  %3043 = vmatprep.mubr.f32.mxu0 %v16963_v29  ;;  %v17157_v20 = vld [vmem:[#allocation74_spill] sm:$0xff]  ;;  %v17162_v49 = vld [vmem:[#allocation84_spill] sm:$0xff] }
 0x288   : > { %3075 = vmatpush1.msra.mxu1 %v2158_v24  ;;  %3337 = vmatprep.subr.mxu0 %v2217_v37  ;;  %v17152_v24 = vld [vmem:[#allocation57_spill] sm:$0xff]  ;;  %v2215_v4 = vmax.f32 %v2189_v28, 0.0  ;;  %v17155_v37 = vmax.f32 %v10900_v57, %v10903_v55  ;;  %v17158_v23 = vmax.f32 %v17156_v8, %v17157_v20  ;;  %v1410_v57 = vadd.f32 %v17161_v26, %v10215_v56  ;;  %v17182_v8 = vld [vmem:[#allocation78_spill] sm:$0xff] }
 0x289   : > { %8227 = vmatmul.mubr.msk.f32.gmra.mxu0 %vm677_vm2, %v11084_v50  ;;  %3076 = vmatprep.subr.mxu1 %v2146_v10  ;;  %v1416_v32 = vadd.f32 %v17152_v24, %v10175_v3  ;;  %v17160_v10 = vmax.f32 %v10857_v38, %v17159_v44  ;;  %v2202_v55 = vmax.f32 %v2176_v34, 0.0  ;;  %v17165_v38 = vld [vmem:[#allocation70_spill] sm:$0xff]  ;;  %v17172_v34 = vld [vmem:[#allocation81_spill] sm:$0xff]  ;;  %v17175_v24 = vld [vmem:[#allocation64_spill] sm:$0xff]  ;;  %v1975_v44 = vadd.f32 %v11068_v30, %v10144_v11 }
 0x28a   : > { %9165 = vmatprep.mubr.msk.f32.mxu1 %vm677_vm2, %v11039_v25  ;;  %3077 = vmatpush1.msra.mxu1 %v2145_v1  ;;  %v2203_v22 = vmax.f32 %v17155_v37, 0.0  ;;  %v2214_v47 = vmax.f32 %v17158_v23, 0.0  ;;  %v17163_v1 = vld [vmem:[#allocation85_spill] sm:$0xff]  ;;  %v2124_v46 = vmax.f32 %v1410_v57, %v1422_v60  ;;  %v17167_v28 = vmax.f32 %v17165_v38, %v17166_v36  ;;  %v17178_v60 = vld [vmem:[#allocation58_spill] sm:$0xff]  ;;  %v17179_v37 = vld [vmem:[#allocation59_spill] sm:$0xff] }
 0x28b   : > { %9166 = vmatmul.mubr.msk.f32.gmra.mxu1 %vm677_vm2, %v11084_v50  ;;  %3078 = vmatprep.subr.mxu1 %v17146_v17  ;;  %v2137_v62 = vmax.f32 %v1416_v32, %v1428_v9  ;;  %v2165_v54 = vmax.f32 %v17160_v10, 0.0  ;;  %v17164_v48 = vmax.f32 %v17162_v49, %v17163_v1  ;;  %v17169_v17 = vld [vmem:[#allocation83_spill] sm:$0xff]  ;;  %v17183_v23 = vld [vmem:[#allocation53_spill] sm:$0xff]  ;;  %v1960_v26 = vadd.f32 %v11032_v53, %v10175_v3  ;;  %v17192_v49 = vld [vmem:[#allocation102_spill] sm:$0xff] }
 0x28c   : > { %3079 = vmatpush1.msra.mxu1 %v17149_v51  ;;  %3203 = vmatprep.mubr.f32.mxu0 %v16963_v29  ;;  %v2201_v2 = vmax.f32 %v17167_v28, 0.0  ;;  %v17170_v7 = vmax.f32 %v17168_v40, %v17169_v17  ;;  %v17171_v51 = vld [vmem:[#allocation80_spill] sm:$0xff]  ;;  %v2150_v59 = vmax.f32 %v2124_v46, 0.0  ;;  %v17184_v10 = vld [vmem:[#allocation79_spill] sm:$0xff]  ;;  %v1965_v11 = vadd.f32 %v11055_v15, %v10205_v45  ;;  %v17196_v46 = vld [vmem:[#allocation101_spill] sm:$0xff] }
 0x28d   : > { %3080 = vmatprep.subr.mxu1 %v17151_v42  ;;  %8232 = vmatmul.mubr.msk.f32.vlgmr.msra.gmra.mxu0 %vm677_vm2, %v10997_v21  ;;  %v2164_v41 = vmax.f32 %v17164_v48, 0.0  ;;  %v17173_v33 = vmax.f32 %v17171_v51, %v17172_v34  ;;  %v17174_v42 = vld [vmem:[#allocation63_spill] sm:$0xff]  ;;  %v1955_v3 = vadd.f32 %v11045_v39, %v10215_v56  ;;  %v17189_v45 = vld [vmem:[#allocation100_spill] sm:$0xff]  ;;  %v17198_v28 = vld [vmem:[#allocation97_spill] sm:$0xff] }
 0x28e   : > { %3338 = vmatpush1.msra.mxu0 %v2216_v14  ;;  %3081 = vmatpush1.msra.mxu1 %v17153_v61  ;;  %v2152_v9 = vmax.f32 %v17170_v7, 0.0  ;;  %v2163_v14 = vmax.f32 %v2137_v62, 0.0  ;;  %v17176_v32 = vmax.f32 %v17174_v42, %v17175_v24  ;;  %v1980_v61 = vadd.f32 %v11061_v12, %v10121_v63  ;;  %v17181_v63 = vld [vmem:[#allocation77_spill] sm:$0xff]  ;;  %v17193_v1 = vld [vmem:[#allocation103_spill] sm:$0xff]  ;;  %v17204_v34 = vld [vmem:[#allocation94_spill] sm:$0xff] }
 0x28f   : > { %3114 = vmatprep.mubr.f32.mxu1 %v16963_v29  ;;  %3339 = vmatprep.subr.mxu0 %v2204_v31  ;;  %v2151_v31 = vmax.f32 %v17173_v33, 0.0  ;;  %v1985_v12 = vadd.f32 %v11095_v52, %v10137_v16  ;;  %v17185_v16 = vld [vmem:[#allocation54_spill] sm:$0xff]  ;;  %v17186_v52 = vmax.f32 %v10980_v0, %v10986_v18  ;;  %v17190_v0 = vld [vmem:[#allocation104_spill] sm:$0xff]  ;;  %v17194_v48 = vmax.f32 %v17192_v49, %v17193_v1  ;;  %v17205_v33 = vld [vmem:[#allocation95_spill] sm:$0xff] }
 0x290   : > { %8228 = vmatmul.mubr.msk.f32.vlgmr.msra.gmra.mxu1 %vm677_vm2, %v10997_v21  ;;  %3248 = vmatprep.subr.mxu1 %v2215_v4  ;;  %v2162_v4 = vmax.f32 %v17176_v32, 0.0  ;;  %v2194_v43 = vmax.f32 %v1980_v61, %v1990_v35  ;;  %v17191_v53 = vmax.f32 %v17189_v45, %v17190_v0  ;;  %v17202_v35 = vld [vmem:[#allocation96_spill] sm:$0xff]  ;;  %v17208_v32 = vld [vmem:[#allocation93_spill] sm:$0xff] }
 0x291   : > { %3340 = vmatpush1.msra.mxu0 %v2203_v22  ;;  %3209 = vmatprep.mubr.f32.mxu0 %v16963_v29  ;;  %v17180_v22 = vmax.f32 %v17178_v60, %v17179_v37  ;;  %v2181_v57 = vmax.f32 %v1975_v44, %v1985_v12  ;;  %v2206_v56 = vmax.f32 %v17194_v48, 0.0  ;;  %v17207_v24 = vld [vmem:[#allocation92_spill] sm:$0xff] }
 0x292   : > { %3249 = vmatpush1.msra.mxu1 %v2214_v47  ;;  %3341 = vmatprep.subr.mxu0 %v2165_v54  ;;  %v2220_v20 = vmax.f32 %v2194_v43, 0.0  ;;  %v1970_v47 = vadd.f32 %v11051_v6, %v10163_v19  ;;  %v2219_v54 = vmax.f32 %v17186_v52, 0.0  ;;  %v17187_v19 = vld [vmem:[#allocation55_spill] sm:$0xff]  ;;  %v17188_v6 = vld [vmem:[#allocation56_spill] sm:$0xff]  ;;  %v2218_v15 = vmax.f32 %v17191_v53, 0.0 }
 0x293   : > { %8233 = vmatmul.mubr.msk.f32.gmra.mxu0 %vm677_vm2, %v11018_v27  ;;  %3250 = vmatprep.subr.mxu1 %v2202_v55  ;;  %v2149_v62 = vmax.f32 %v17180_v22, 0.0  ;;  %v2207_v18 = vmax.f32 %v2181_v57, 0.0  ;;  %v2129_v55 = vmax.f32 %v1955_v3, %v1965_v11  ;;  %v17211_v43 = vld [vmem:[#allocation88_spill] sm:$0xff] }
 0x294   : > { %3342 = vmatpush1.msra.mxu0 %v2164_v41  ;;  %3120 = vmatprep.mubr.f32.mxu1 %v16963_v29  ;;  %v2142_v30 = vmax.f32 %v1960_v26, %v1970_v47  ;;  %v17195_v41 = vld [vmem:[#allocation99_spill] sm:$0xff] }
 0x295   : > { %3251 = vmatpush1.msra.mxu1 %v2201_v2  ;;  %3343 = vmatprep.subr.mxu0 %v2152_v9  ;;  %v17197_v38 = vmax.f32 %v17195_v41, %v17196_v46  ;;  %v17199_v2 = vld [vmem:[#allocation98_spill] sm:$0xff]  ;;  %v2155_v7 = vmax.f32 %v2129_v55, 0.0  ;;  %v17235_v55 = vlaneseq }
 0x296   : > { %8229 = vmatmul.mubr.msk.f32.gmra.mxu1 %vm677_vm2, %v11018_v27  ;;  %3252 = vmatprep.subr.mxu1 %v2163_v14  ;;  %v2168_v39 = vmax.f32 %v2142_v30, 0.0  ;;  %v17200_v40 = vmax.f32 %v17198_v28, %v17199_v2  ;;  %v17201_v9 = vld [vmem:[#allocation90_spill] sm:$0xff] }
 0x297   : > { %3344 = vmatpush1.msra.mxu0 %v2151_v31  ;;  %3215 = vmatprep.mubr.f32.mxu0 %v16963_v29  ;;  %v2205_v36 = vmax.f32 %v17197_v38, 0.0  ;;  %v17203_v14 = vmax.f32 %v17201_v9, %v17202_v35  ;;  %v17206_v31 = vmax.f32 %v17204_v34, %v17205_v33  ;;  %v3787_v49 = vshrl.u32 %v17235_v55, 7  ;;  %v8252_v34 = vld [vmem:[%s16709_s5 + $0xd0] sm:$0xff]  ;;  %v8265_v33 = vld [vmem:[%s16709_s5 + $0x138] sm:$0xff] }
 0x298   : > { %3253 = vmatpush1.msra.mxu1 %v2162_v4  ;;  %3345 = vmatprep.subr.mxu0 %v17177_v58  ;;  %v2167_v17 = vmax.f32 %v17200_v40, 0.0  ;;  %v17209_v4 = vmax.f32 %v17207_v24, %v17208_v32  ;;  %v17212_v58 = vld [vmem:[#allocation89_spill] sm:$0xff] }
 0x299   : > { %8234 = vmatmul.mubr.msk.f32.gmra.mxu0 %vm677_vm2, %v11039_v25  ;;  %3254 = vmatprep.subr.mxu1 %v2150_v59  ;;  %v2166_v51 = vmax.f32 %v17203_v14, 0.0  ;;  %v2154_v42 = vmax.f32 %v17206_v31, 0.0  ;;  %v17210_v59 = vld [vmem:[#allocation87_spill] sm:$0xff]  ;;  %v11437_v41 = vsub.s32 0, %v3787_v49  ;;  %v11439_v46 = vsub.s32 1, %v3787_v49 }
 0x29a   : > { %3346 = vmatpush1.msra.mxu0 %v17181_v63  ;;  %3126 = vmatprep.mubr.f32.mxu1 %v16963_v29  ;;  %v2153_v61 = vmax.f32 %v17209_v4, 0.0  ;;  %v11441_v38 = vsub.s32 2, %v3787_v49  ;;  %v11444_v2 = vsub.s32 3, %v3787_v49  ;;  %v11451_v9 = vsub.s32 4, %v3787_v49 }
 0x29b   : > { %3255 = vmatpush1.msra.mxu1 %v2149_v62  ;;  %3347 = vmatprep.subr.mxu0 %v17182_v8  ;;  %v11453_v35 = vsub.s32 5, %v3787_v49  ;;  %v11455_v14 = vsub.s32 6, %v3787_v49  ;;  %v11470_v4 = vsub.s32 7, %v3787_v49  ;;  %v8304_v49 = vld [vmem:[%s16709_s5 + $0x270] sm:$0xff] }
 0x29c   : > { %8230 = vmatmul.mubr.msk.f32.gmra.mxu1 %vm677_vm2, %v11039_v25  ;;  %3256 = vmatprep.subr.mxu1 %v17183_v23 }
 0x29d   : > { %3348 = vmatpush1.msra.mxu0 %v17184_v10  ;;  %3221 = vmatprep.mubr.f32.mxu0 %v16963_v29 }
 0x29e   : > { %3257 = vmatpush1.msra.mxu1 %v17185_v16  ;;  %9168 = vmatprep.subr.mxu0 %v2220_v20 }
 0x29f   : > { %8235 = vmatmul.mubr.msk.f32.gmra.mxu0 %vm677_vm2, %v11084_v50  ;;  %3258 = vmatprep.subr.mxu1 %v17187_v19 }
 0x2a0   : > { %3132 = vmatprep.mubr.f32.mxu1 %v16963_v29  ;;  %3259 = vmatpush1.msra.mxu1 %v17188_v6 }
 0x2a1   : > { %8231 = vmatmul.mubr.msk.f32.gmra.mxu1 %vm677_vm2, %v11084_v50  ;;  %3426 = vmatprep.subr.mxu1 %v2219_v54 }
 0x2a2   : > { %3381 = vmatprep.mubr.f32.mxu0 %v16963_v29  ;;  %3292 = vmatprep.mubr.f32.mxu1 %v16963_v29 }
 0x2a3   : > { %8240 = vmatmul.mubr.msk.f32.vlgmr.msra.gmra.mxu0 %vm677_vm2, %v10997_v21 }
 0x2a4   : > { %9169 = vmatpush3.msra.mxu0 %v2220_v20  ;;  %3387 = vmatprep.mubr.f32.mxu0 %v16963_v29 }
 0x2a5   : > { %9170 = vmatprep.subr.mxu0 %v2207_v18  ;;  %8236 = vmatmul.mubr.msk.f32.vlgmr.msra.gmra.mxu1 %vm677_vm2, %v10997_v21 }
 0x2a6   : > { %3427 = vmatpush1.msra.mxu1 %v2218_v15  ;;  %9171 = vmatpush3.msra.mxu0 %v2207_v18 }
 0x2a7   : > { %3428 = vmatprep.subr.mxu1 %v2206_v56  ;;  %9172 = vmatprep.subr.mxu0 %v2168_v39 }
 0x2a8   : > { %8241 = vmatmul.mubr.msk.f32.gmra.mxu0 %vm677_vm2, %v11018_v27  ;;  %3429 = vmatpush1.msra.mxu1 %v2205_v36 }
 0x2a9   : > { %9173 = vmatpush3.msra.mxu0 %v2168_v39  ;;  %3298 = vmatprep.mubr.f32.mxu1 %v16963_v29  ;;  %v11435_v39 = vpop.permute.xlu1 %3638 }
 0x2aa   : > { %3430 = vmatprep.subr.mxu1 %v2167_v17  ;;  %9174 = vmatprep.subr.mxu0 %v2155_v7  ;;  %17236 = vst [vmem:[#allocation35_spill] sm:$0xff] %v11435_v39 }
 0x2ab   : > { %8237 = vmatmul.mubr.msk.f32.gmra.mxu1 %vm677_vm2, %v11018_v27  ;;  %9175 = vmatpush3.msra.mxu0 %v2155_v7  ;;  %v3760_v7 = vld [vmem:[%s16709_s5] sm:$0xff] }
 0x2ac   : > { %3431 = vmatpush1.msra.mxu1 %v2166_v51  ;;  %3393 = vmatprep.mubr.f32.mxu0 %v16963_v29  ;;  %v3773_v51 = vld [vmem:[%s16709_s5 + $0x68] sm:$0xff] }
 0x2ad   : > { %3432 = vmatprep.subr.mxu1 %v2154_v42  ;;  %9176 = vmatprep.subr.mxu0 %v11034_v5 }
 0x2ae   : > { %8242 = vmatmul.mubr.msk.f32.gmra.mxu0 %vm677_vm2, %v11039_v25  ;;  %3433 = vmatpush1.msra.mxu1 %v2153_v61 }
 0x2af   : > { %9177 = vmatpush3.msra.mxu0 %v11034_v5  ;;  %3304 = vmatprep.mubr.f32.mxu1 %v16963_v29  ;;  %v17213_v5 = vld [vmem:[#allocation91_spill] sm:$0xff] }
 0x2b0   : > { %3434 = vmatprep.subr.mxu1 %v17210_v59  ;;  %9178 = vmatprep.subr.mxu0 %v11048_v13  ;;  %v8278_v59 = vld [vmem:[%s16709_s5 + $0x1a0] sm:$0xff] }
 0x2b1   : > { %8238 = vmatmul.mubr.msk.f32.gmra.mxu1 %vm677_vm2, %v11039_v25  ;;  %9179 = vmatpush3.msra.mxu0 %v11048_v13  ;;  %v2408_v13 = vpop.f32.mrf.mxu1 }
 0x2b2   : > { %3435 = vmatpush1.msra.mxu1 %v17211_v43  ;;  %3399 = vmatprep.mubr.f32.mxu0 %v16963_v29  ;;  %v8291_v43 = vld [vmem:[%s16709_s5 + $0x208] sm:$0xff] }
 0x2b3   : > { %3436 = vmatprep.subr.mxu1 %v17212_v58  ;;  %8243 = vmatmul.mubr.msk.f32.gmra.mxu0 %vm677_vm2, %v11084_v50 }
 0x2b4   : > { %3437 = vmatpush1.msra.mxu1 %v17213_v5  ;;  %3310 = vmatprep.mubr.f32.mxu1 %v16963_v29 }
 0x2b5   : > { %8239 = vmatmul.mubr.msk.f32.gmra.mxu1 %vm677_vm2, %v11084_v50  ;;  %9180 = vmatprep.mubr.msk.f32.mxu0 %vm677_vm2, %v10997_v21 }
 0x2b6   : > { %3470 = vmatprep.mubr.f32.mxu1 %v16963_v29 }
 0x2b7   : > { %9181 = vmatmul.mubr.msk.f32.vlgmr.msra.gmra.mxu0 %vm677_vm2, %v11018_v27 }
 0x2b8   : > { %9183 = vmatprep.mubr.msk.f32.mxu0 %vm677_vm2, %v11039_v25 }
 0x2b9   : > { %8244 = vmatmul.mubr.msk.f32.vlgmr.msra.gmra.mxu1 %vm677_vm2, %v10997_v21  ;;  %v11368_v21 = vpop.f32.mrf.mxu1 }
 0x2ba   : > { %3476 = vmatprep.mubr.f32.mxu1 %v16963_v29 }
 0x2bb   : > { %9184 = vmatmul.mubr.msk.f32.gmra.mxu0 %vm677_vm2, %v11084_v50  ;;  %v11370_v60 = vpop.f32.mrf.mxu1 }
 0x2bd   : > { %8245 = vmatmul.mubr.msk.f32.gmra.mxu1 %vm677_vm2, %v11018_v27  ;;  %v11372_v37 = vpop.f32.mrf.mxu1 }
 0x2be   : > { %3482 = vmatprep.mubr.f32.mxu1 %v16963_v29 }
 0x2bf   : > { %v11374_v22 = vpop.f32.mrf.mxu1 }
 0x2c1   : > { %8246 = vmatmul.mubr.msk.f32.gmra.mxu1 %vm677_vm2, %v11039_v25  ;;  %v11378_v62 = vpop.f32.mrf.mxu1 }
 0x2c2   : > { %3488 = vmatprep.mubr.f32.mxu1 %v16963_v29 }
 0x2c3   : > { %v11382_v25 = vpop.f32.mrf.mxu1 }
 0x2c5   : > { %8247 = vmatmul.mubr.msk.f32.gmra.mxu1 %vm677_vm2, %v11084_v50  ;;  %v11386_v50 = vpop.f32.mrf.mxu1 }
 0x2c7   : > { %v11390_v8 = vpop.f32.mrf.mxu1 }
 0x2c9   : > { %v11394_v23 = vpop.f32.mrf.mxu1 }
 0x2cb   : > { %v11398_v44 = vpop.f32.mrf.mxu1 }
 0x2cd   : > { %v11402_v16 = vpop.f32.mrf.mxu1 }
 0x2ce   : > { %17221 = vst [vmem:[#allocation17_spill] sm:$0xff] %v11402_v16 }
 0x2cf   : > { %v11406_v54 = vpop.f32.mrf.mxu1 }
 0x2d0   : > { %17223 = vst [vmem:[#allocation16_spill] sm:$0xff] %v11406_v54 }
 0x2d1   : > { %v11410_v57 = vpop.f32.mrf.mxu1 }
 0x2d2   : > { %17225 = vst [vmem:[#allocation14_spill] sm:$0xff] %v11410_v57 }
 0x2d3   : > { %v11414_v11 = vpop.f32.mrf.mxu1 }
 0x2d4   : > { %17227 = vst [vmem:[#allocation9_spill] sm:$0xff] %v11414_v11 }
 0x2d5   : > { %v11420_v3 = vpop.f32.mrf.mxu1 }
 0x2d6   : > { %17230 = vst [vmem:[#allocation52_spill] sm:$0xff] %v11420_v3 }
 0x2d7   : > { %v11426_v0 = vpop.f32.mrf.mxu1 }
 0x2d9   : > { %v11376_v27 = vpop.f32.mrf.mxu0  ;;  %v11433_v1 = vpop.f32.mrf.mxu1 }
 0x2da   : > { %17214 = vst [vmem:[#allocation21_spill] sm:$0xff] %v11376_v27 }
 0x2db   : > { %v11380_v63 = vpop.f32.mrf.mxu0  ;;  %v11446_v40 = vpop.f32.mrf.mxu1 }
 0x2dc   : > { %17215 = vst [vmem:[#allocation28_spill] sm:$0xff] %v11380_v63 }
 0x2dd   : > { %v11384_v29 = vpop.f32.mrf.mxu0  ;;  %v11472_v61 = vpop.f32.mrf.mxu1 }
 0x2de   : > { %17216 = vst [vmem:[#allocation30_spill] sm:$0xff] %v11384_v29 }
 0x2df   : > { %v11388_v12 = vpop.f32.mrf.mxu0 }
 0x2e0   : > { %17217 = vst [vmem:[#allocation22_spill] sm:$0xff] %v11388_v12 }
 0x2e1   : > { %v11392_v20 = vpop.f32.mrf.mxu0 }
 0x2e2   : > { %17218 = vst [vmem:[#allocation24_spill] sm:$0xff] %v11392_v20 }
 0x2e3   : > { %v11396_v47 = vpop.f32.mrf.mxu0 }
 0x2e4   : > { %17219 = vst [vmem:[#allocation19_spill] sm:$0xff] %v11396_v47 }
 0x2e5   : > { %v11400_v10 = vpop.f32.mrf.mxu0 }
 0x2e6   : > { %17220 = vst [vmem:[#allocation20_spill] sm:$0xff] %v11400_v10 }
 0x2e7   : > { %v11404_v52 = vpop.f32.mrf.mxu0 }
 0x2e8   : > { %17222 = vst [vmem:[#allocation18_spill] sm:$0xff] %v11404_v52 }
 0x329   : > { %v11408_v26 = vpop.f32.mrf.mxu0 }
 0x32a   : > { %17224 = vst [vmem:[#allocation15_spill] sm:$0xff] %v11408_v26  ;;  %v8408_v26 = vld [vmem:[%s16709_s5 + $0x5b0] sm:$0xff] }
 0x32b   : > { %v11412_v19 = vpop.f32.mrf.mxu0 }
 0x32c   : > { %17226 = vst [vmem:[#allocation13_spill] sm:$0xff] %v11412_v19 }
 0x32e   : > { %v11416_v6 = vpop.f32.mrf.mxu0 }
 0x32f   : > { %17228 = vst [vmem:[#allocation10_spill] sm:$0xff] %v11416_v6 }
 0x330   : > { %v11418_v30 = vpop.f32.mrf.mxu0 }
 0x331   : > { %17229 = vst [vmem:[#allocation50_spill] sm:$0xff] %v11418_v30  ;;  %v8395_v30 = vld [vmem:[%s16709_s5 + $0x548] sm:$0xff] }
 0x332   : > { %v11422_v18 = vpop.f32.mrf.mxu0 }
 0x333   : > { %17231 = vst [vmem:[#allocation11_spill] sm:$0xff] %v11422_v18  ;;  %v11500_v18 = vpop.f32.mrf.mxu1 }
 0x334   : > { %v11424_v45 = vpop.f32.mrf.mxu0  ;;  %17237 = vst [vmem:[#allocation47_spill] sm:$0xff] %v11500_v18 }
 0x335   : > { %17232 = vst [vmem:[#allocation41_spill] sm:$0xff] %v11424_v45  ;;  %v8356_v45 = vld [vmem:[%s16709_s5 + $0x410] sm:$0xff] }
 0x336   : > { %v11428_v53 = vpop.f32.mrf.mxu0 }
 0x337   : > { %17233 = vst [vmem:[#allocation44_spill] sm:$0xff] %v11428_v53  ;;  %v8343_v53 = vld [vmem:[%s16709_s5 + $0x3a8] sm:$0xff] }
 0x338   : > { %v11430_v15 = vpop.f32.mrf.mxu0 }
 0x339   : > { %17234 = vst [vmem:[#allocation12_spill] sm:$0xff] %v11430_v15 }
 0x33a   : > { %v3027_v48 = vpop.f32.mrf.mxu0 }
 0x33b   : > { %v3580_v56 = vmax.f32 %v2408_v13, %v3027_v48 }
 0x33c   : > { %v3029_v28 = vpop.f32.mrf.mxu0 }
 0x33d   : > { %v3656_v36 = vadd.f32 %v11435_v39, %v3580_v56  ;;  %v3581_v31 = vmax.f32 %v11368_v21, %v3029_v28  ;;  %v8317_v56 = vld [vmem:[%s16709_s5 + $0x2d8] sm:$0xff] }
 0x33f   : > { %v3708_v17 = vmax.f32 %v3656_v36, 0.0  ;;  %v3033_v48 = vpop.f32.mrf.mxu0 }
 0x341   : > { %v3789_v42 = vrot.slane %v3708_v17, %v11437_v41  ;;  %v3920_v24 = vrot.slane %v3708_v17, %v11439_v46  ;;  %v4051_v32 = vrot.slane %v3708_v17, %v11441_v38  ;;  %v4182_v58 = vrot.slane %v3708_v17, %v11444_v2 }
 0x342   : > { %v4313_v36 = vrot.slane %v3708_v17, %v11451_v9  ;;  %v4444_v28 = vrot.slane %v3708_v17, %v11453_v35  ;;  %v4575_v15 = vrot.slane %v3708_v17, %v11455_v14 }
 0x343   : > { %v3838_v5 = vmul.f32 %v3789_v42, %v3760_v7  ;;  %v3851_v13 = vmul.f32 %v3789_v42, %v3773_v51  ;;  %v3969_v21 = vmul.f32 %v8252_v34, %v3920_v24  ;;  %v3982_v55 = vmul.f32 %v8265_v33, %v3920_v24  ;;  %v8330_v24 = vld [vmem:[%s16709_s5 + $0x340] sm:$0xff] }
 0x344   : > { %v3657_v7 = vadd.f32 %v11435_v39, %v3581_v31  ;;  %v4100_v33 = vmul.f32 %v8278_v59, %v4051_v32  ;;  %v4113_v42 = vmul.f32 %v8291_v43, %v4051_v32  ;;  %v8369_v31 = vld [vmem:[%s16709_s5 + $0x478] sm:$0xff]  ;;  %v8382_v32 = vld [vmem:[%s16709_s5 + $0x4e0] sm:$0xff]  ;;  %v4706_v59 = vrot.slane %v3708_v17, %v11470_v4 }
 0x345   : > { %v3995_v51 = vadd.f32 %v3969_v21, %v3838_v5  ;;  %v4008_v34 = vadd.f32 %v3982_v55, %v3851_v13  ;;  %v3593_v43 = vmax.f32 %v11370_v60, %v3033_v48  ;;  %v4231_v21 = vmul.f32 %v8304_v49, %v4182_v58  ;;  %v3761_v60 = vld [vmem:[%s16709_s5 + $0x8] sm:$0xff] }
 0x346   : > { %v4244_v55 = vmul.f32 %v8317_v56, %v4182_v58  ;;  %v4362_v6 = vmul.f32 %v8330_v24, %v4313_v36  ;;  %v4375_v52 = vmul.f32 %v8343_v53, %v4313_v36  ;;  %v4493_v19 = vmul.f32 %v8356_v45, %v4444_v28  ;;  %v3774_v56 = vld [vmem:[%s16709_s5 + $0x70] sm:$0xff]  ;;  %v8253_v45 = vld [vmem:[%s16709_s5 + $0xd8] sm:$0xff]  ;;  %v8266_v53 = vld [vmem:[%s16709_s5 + $0x140] sm:$0xff]  ;;  %v11528_v36 = vpop.f32.mrf.mxu1 }
 0x347   : > { %v4126_v5 = vadd.f32 %v4100_v33, %v3995_v51  ;;  %v4139_v13 = vadd.f32 %v4113_v42, %v4008_v34  ;;  %v3709_v10 = vmax.f32 %v3657_v7, 0.0  ;;  %v4506_v49 = vmul.f32 %v8369_v31, %v4444_v28  ;;  %17238 = vst [vmem:[#allocation38_spill] sm:$0xff] %v11528_v36  ;;  %v8279_v31 = vld [vmem:[%s16709_s5 + $0x1a8] sm:$0xff] }
 0x348   : > { %v4624_v58 = vmul.f32 %v8382_v32, %v4575_v15  ;;  %v4637_v7 = vmul.f32 %v8395_v30, %v4575_v15  ;;  %v4755_v24 = vmul.f32 %v8408_v26, %v4706_v59  ;;  %v8292_v32 = vld [vmem:[%s16709_s5 + $0x210] sm:$0xff]  ;;  %v11540_v30 = vpop.permute.xlu0 %3643  ;;  %v8421_v15 = vld [vmem:[%s16709_s5 + $0x618] sm:$0xff]  ;;  %v11553_v12 = vpop.f32.mrf.mxu1 }
 0x349   : > { %v4257_v17 = vadd.f32 %v4231_v21, %v4126_v5  ;;  %v4270_v48 = vadd.f32 %v4244_v55, %v4139_v13  ;;  %v3793_v51 = vrot.slane %v3709_v10, %v11437_v41  ;;  %v3924_v28 = vrot.slane %v3709_v10, %v11439_v46  ;;  %17239 = vst [vmem:[#allocation2_spill] sm:$0xff] %v11553_v12  ;;  %v8358_v12 = vld [vmem:[%s16709_s5 + $0x420] sm:$0xff] }
 0x34a   : > { %v4055_v34 = vrot.slane %v3709_v10, %v11441_v38  ;;  %v4186_v5 = vrot.slane %v3709_v10, %v11444_v2  ;;  %v4317_v47 = vrot.slane %v3709_v10, %v11451_v9  ;;  %v3669_v20 = vadd.f32 %v11540_v30, %v3593_v43  ;;  %v11566_v3 = vpop.f32.mrf.mxu1 }
 0x34b   : > { %v4388_v33 = vadd.f32 %v4362_v6, %v4257_v17  ;;  %v4401_v42 = vadd.f32 %v4375_v52, %v4270_v48  ;;  %v3839_v13 = vmul.f32 %v3793_v51, %v3761_v60  ;;  %v3852_v6 = vmul.f32 %v3793_v51, %v3774_v56  ;;  %v8305_v17 = vld [vmem:[%s16709_s5 + $0x278] sm:$0xff]  ;;  %v8318_v48 = vld [vmem:[%s16709_s5 + $0x2e0] sm:$0xff]  ;;  %v3035_v51 = vpop.f32.mrf.mxu0  ;;  %17240 = vst [vmem:[#allocation65_spill] sm:$0xff] %v11566_v3 }
 0x34c   : > { %v3970_v52 = vmul.f32 %v8253_v45, %v3924_v28  ;;  %v3983_v26 = vmul.f32 %v8266_v53, %v3924_v28  ;;  %v4101_v45 = vmul.f32 %v8279_v31, %v4055_v34  ;;  %v4114_v53 = vmul.f32 %v8292_v32, %v4055_v34  ;;  %v8357_v34 = vld [vmem:[%s16709_s5 + $0x418] sm:$0xff] }
 0x34d   : > { %v4519_v21 = vadd.f32 %v4493_v19, %v4388_v33  ;;  %v4532_v55 = vadd.f32 %v4506_v49, %v4401_v42  ;;  %v8331_v19 = vld [vmem:[%s16709_s5 + $0x348] sm:$0xff]  ;;  %v8344_v49 = vld [vmem:[%s16709_s5 + $0x3b0] sm:$0xff]  ;;  %v4768_v42 = vmul.f32 %v8421_v15, %v4706_v59  ;;  %v4448_v43 = vrot.slane %v3709_v10, %v11453_v35  ;;  %v8370_v59 = vld [vmem:[%s16709_s5 + $0x480] sm:$0xff] }
 0x34e   : > { %v3996_v60 = vadd.f32 %v3970_v52, %v3839_v13  ;;  %v4009_v56 = vadd.f32 %v3983_v26, %v3852_v6  ;;  %v4232_v13 = vmul.f32 %v8305_v17, %v4186_v5  ;;  %v4245_v6 = vmul.f32 %v8318_v48, %v4186_v5 }
 0x34f   : > { %v4650_v28 = vadd.f32 %v4624_v58, %v4519_v21  ;;  %v4663_v33 = vadd.f32 %v4637_v7, %v4532_v55  ;;  %v4363_v32 = vmul.f32 %v8331_v19, %v4317_v47  ;;  %v4376_v52 = vmul.f32 %v8344_v49, %v4317_v47  ;;  %v8383_v47 = vld [vmem:[%s16709_s5 + $0x4e8] sm:$0xff]  ;;  %v11600_v49 = vpop.f32.mrf.mxu1 }
 0x350   : > { %v4127_v29 = vadd.f32 %v4101_v45, %v3996_v60  ;;  %v4140_v63 = vadd.f32 %v4114_v53, %v4009_v56  ;;  %v3594_v26 = vmax.f32 %v11372_v37, %v3035_v51  ;;  %v4579_v15 = vrot.slane %v3709_v10, %v11455_v14  ;;  %v8473_v45 = vld [vmem:[%s16709_s5 + $0x7b8] sm:$0xff]  ;;  %17241 = vst [vmem:[#allocation66_spill] sm:$0xff] %v11600_v49 }
 0x351   : > { %v4781_v31 = vadd.f32 %v4755_v24, %v4650_v28  ;;  %v11572_v5 = vmax.f32 %v3669_v20, 0.0  ;;  %v4794_v21 = vadd.f32 %v4768_v42, %v4663_v33  ;;  %v4494_v55 = vmul.f32 %v8357_v34, %v4448_v43  ;;  %v8409_v20 = vld [vmem:[%s16709_s5 + $0x5b8] sm:$0xff]  ;;  %v8396_v28 = vld [vmem:[%s16709_s5 + $0x550] sm:$0xff] }
 0x352   : > { %v4258_v58 = vadd.f32 %v4232_v13, %v4127_v29  ;;  %v4271_v7 = vadd.f32 %v4245_v6, %v4140_v63  ;;  %v4710_v37 = vrot.slane %v3709_v10, %v11470_v4  ;;  %v8434_v63 = vld [vmem:[%s16709_s5 + $0x680] sm:$0xff]  ;;  %v8447_v29 = vld [vmem:[%s16709_s5 + $0x6e8] sm:$0xff]  ;;  %v8460_v10 = vld [vmem:[%s16709_s5 + $0x750] sm:$0xff]  ;;  %v4507_v56 = vmul.f32 %v8370_v59, %v4448_v43 }
 0x353   : > { %v4837_v48 = vrot.slane %v11572_v5, %v11437_v41  ;;  %v4968_v60 = vrot.slane %v11572_v5, %v11439_v46  ;;  %v5099_v53 = vrot.slane %v11572_v5, %v11441_v38  ;;  %v3670_v19 = vadd.f32 %v11540_v30, %v3594_v26  ;;  %v8486_v43 = vld [vmem:[%s16709_s5 + $0x820] sm:$0xff] }
 0x354   : > { %v4389_v24 = vadd.f32 %v4363_v32, %v4258_v58  ;;  %v4402_v17 = vadd.f32 %v4376_v52, %v4271_v7  ;;  %v4625_v33 = vmul.f32 %v8383_v47, %v4579_v15  ;;  %v4756_v34 = vmul.f32 %v8409_v20, %v4710_v37  ;;  %v8499_v52 = vld [vmem:[%s16709_s5 + $0x888] sm:$0xff]  ;;  %v8422_v20 = vld [vmem:[%s16709_s5 + $0x620] sm:$0xff] }
 0x355   : > { %v4886_v42 = vmul.f32 %v8434_v63, %v4837_v48  ;;  %v4899_v13 = vmul.f32 %v8447_v29, %v4837_v48  ;;  %v5017_v32 = vmul.f32 %v8460_v10, %v4968_v60  ;;  %v5230_v26 = vrot.slane %v11572_v5, %v11444_v2  ;;  %v8512_v29 = vld [vmem:[%s16709_s5 + $0x8f0] sm:$0xff] }
 0x356   : > { %v4520_v51 = vadd.f32 %v4494_v55, %v4389_v24  ;;  %v4533_v6 = vadd.f32 %v4507_v56, %v4402_v17  ;;  %v5030_v55 = vmul.f32 %v8473_v45, %v4968_v60  ;;  %v4638_v47 = vmul.f32 %v8396_v28, %v4579_v15  ;;  %v11618_v17 = vpop.f32.mrf.mxu1  ;;  %v8525_v15 = vld [vmem:[%s16709_s5 + $0x958] sm:$0xff]  ;;  %v8538_v56 = vld [vmem:[%s16709_s5 + $0x9c0] sm:$0xff] }
 0x357   : > { %v4912_v7 = vadd.f32 %v4886_v42, %v4781_v31  ;;  %v4925_v59 = vadd.f32 %v4899_v13, %v4794_v21  ;;  %v5148_v63 = vmul.f32 %v8486_v43, %v5099_v53  ;;  %v5361_v24 = vrot.slane %v11572_v5, %v11451_v9  ;;  %17242 = vst [vmem:[#allocation60_spill] sm:$0xff] %v11618_v17  ;;  %v3039_v13 = vpop.f32.mrf.mxu0 }
 0x358   : > { %v4651_v58 = vadd.f32 %v4625_v33, %v4520_v51  ;;  %v5161_v21 = vmul.f32 %v8499_v52, %v5099_v53  ;;  %v4664_v60 = vadd.f32 %v4638_v47, %v4533_v6  ;;  %v5492_v45 = vrot.slane %v11572_v5, %v11453_v35  ;;  %v11641_v52 = vpop.f32.mrf.mxu1 }
 0x359   : > { %v5043_v10 = vadd.f32 %v5017_v32, %v4912_v7  ;;  %v5056_v31 = vadd.f32 %v5030_v55, %v4925_v59  ;;  %v5279_v33 = vmul.f32 %v8512_v29, %v5230_v26  ;;  %v11631_v42 = vmax.f32 %v3670_v19, 0.0  ;;  %v8435_v32 = vld [vmem:[%s16709_s5 + $0x688] sm:$0xff]  ;;  %17243 = vst [vmem:[#allocation61_spill] sm:$0xff] %v11641_v52  ;;  %v8448_v7 = vld [vmem:[%s16709_s5 + $0x6f0] sm:$0xff] }
 0x35a   : > { %v4782_v48 = vadd.f32 %v4756_v34, %v4651_v58  ;;  %v4769_v43 = vmul.f32 %v8422_v20, %v4710_v37  ;;  %v5292_v53 = vmul.f32 %v8525_v15, %v5230_v26  ;;  %v8564_v34 = vld [vmem:[%s16709_s5 + $0xa90] sm:$0xff]  ;;  %v5623_v6 = vrot.slane %v11572_v5, %v11455_v14  ;;  %v8551_v19 = vld [vmem:[%s16709_s5 + $0xa28] sm:$0xff]  ;;  %v8590_v26 = vld [vmem:[%s16709_s5 + $0xb60] sm:$0xff] }
 0x35b   : > { %v5174_v51 = vadd.f32 %v5148_v63, %v5043_v10  ;;  %v5187_v28 = vadd.f32 %v5161_v21, %v5056_v31  ;;  %v5410_v37 = vmul.f32 %v8538_v56, %v5361_v24  ;;  %v4841_v59 = vrot.slane %v11631_v42, %v11437_v41  ;;  %v8461_v20 = vld [vmem:[%s16709_s5 + $0x758] sm:$0xff]  ;;  %v8616_v15 = vld [vmem:[%s16709_s5 + $0xc30] sm:$0xff] }
 0x35c   : > { %v4972_v55 = vrot.slane %v11631_v42, %v11439_v46  ;;  %v4795_v47 = vadd.f32 %v4769_v43, %v4664_v60  ;;  %v11658_v29 = vrot.slane %v11572_v5, %v11470_v4  ;;  %v3606_v10 = vmax.f32 %v11374_v22, %v3039_v13  ;;  %v11672_v43 = vpop.permute.xlu1 %3648  ;;  %v11674_v22 = vpop.f32.mrf.mxu1  ;;  %v8577_v13 = vld [vmem:[%s16709_s5 + $0xaf8] sm:$0xff] }
 0x35d   : > { %v5305_v58 = vadd.f32 %v5279_v33, %v5174_v51  ;;  %v5318_v63 = vadd.f32 %v5292_v53, %v5187_v28  ;;  %v5541_v21 = vmul.f32 %v8564_v34, %v5492_v45  ;;  %v4887_v56 = vmul.f32 %v8435_v32, %v4841_v59  ;;  %v8487_v33 = vld [vmem:[%s16709_s5 + $0x828] sm:$0xff]  ;;  %17244 = vst [vmem:[#allocation34_spill] sm:$0xff] %v11672_v43 }
 0x35e   : > { %v5103_v60 = vrot.slane %v11631_v42, %v11441_v38  ;;  %v5423_v51 = vmul.f32 %v8551_v19, %v5361_v24  ;;  %v5672_v28 = vmul.f32 %v8590_v26, %v5623_v6  ;;  %v4900_v5 = vmul.f32 %v8448_v7, %v4841_v59  ;;  %17245 = vst [vmem:[#allocation48_spill] sm:$0xff] %v11674_v22  ;;  %v8474_v24 = vld [vmem:[%s16709_s5 + $0x7c0] sm:$0xff]  ;;  %v8513_v7 = vld [vmem:[%s16709_s5 + $0x8f8] sm:$0xff] }
 0x35f   : > { %v5436_v31 = vadd.f32 %v5410_v37, %v5305_v58  ;;  %v4913_v34 = vadd.f32 %v4887_v56, %v4782_v48  ;;  %v5018_v32 = vmul.f32 %v8461_v20, %v4972_v55  ;;  %v5234_v58 = vrot.slane %v11631_v42, %v11444_v2 }
 0x360   : > { %v5449_v19 = vadd.f32 %v5423_v51, %v5318_v63  ;;  %v5803_v37 = vmul.f32 %v8616_v15, %v11658_v29  ;;  %v4926_v26 = vadd.f32 %v4900_v5, %v4795_v47  ;;  %v3682_v59 = vadd.f32 %v11672_v43, %v3606_v10  ;;  %v8539_v63 = vld [vmem:[%s16709_s5 + $0x9c8] sm:$0xff]  ;;  %v11694_v15 = vpop.f32.mrf.mxu1  ;;  %v8500_v10 = vld [vmem:[%s16709_s5 + $0x890] sm:$0xff] }
 0x361   : > { %v5567_v53 = vadd.f32 %v5541_v21, %v5436_v31  ;;  %v5044_v48 = vadd.f32 %v5018_v32, %v4913_v34  ;;  %v5149_v21 = vmul.f32 %v8487_v33, %v5103_v60  ;;  %v5365_v56 = vrot.slane %v11631_v42, %v11451_v9  ;;  %17246 = vst [vmem:[#allocation49_spill] sm:$0xff] %v11694_v15  ;;  %v8603_v47 = vld [vmem:[%s16709_s5 + $0xbc8] sm:$0xff] }
 0x362   : > { %v5554_v20 = vmul.f32 %v8577_v13, %v5492_v45  ;;  %v5031_v22 = vmul.f32 %v8474_v24, %v4972_v55  ;;  %v5280_v5 = vmul.f32 %v8513_v7, %v5234_v58  ;;  %v11704_v45 = vrot.slane %v11631_v42, %v11453_v35  ;;  %v3041_v55 = vpop.f32.mrf.mxu0 }
 0x363   : > { %v5698_v31 = vadd.f32 %v5672_v28, %v5567_v53  ;;  %v5175_v28 = vadd.f32 %v5149_v21, %v5044_v48  ;;  %v8565_v53 = vld [vmem:[%s16709_s5 + $0xa98] sm:$0xff]  ;;  %v5411_v24 = vmul.f32 %v8539_v63, %v5365_v56  ;;  %v11711_v32 = vrot.slane %v11631_v42, %v11455_v14  ;;  %v8591_v48 = vld [vmem:[%s16709_s5 + $0xb68] sm:$0xff]  ;;  %v11726_v21 = vpop.f32.mrf.mxu1 }
 0x364   : > { %v5580_v33 = vadd.f32 %v5554_v20, %v5449_v19  ;;  %v5057_v13 = vadd.f32 %v5031_v22, %v4926_v26  ;;  %v5685_v7 = vmul.f32 %v8603_v47, %v5623_v6  ;;  %v11720_v22 = vrot.slane %v11631_v42, %v11470_v4  ;;  %v8642_v19 = vld [vmem:[%s16709_s5 + $0xd00] sm:$0xff]  ;;  %17247 = vst [vmem:[#allocation45_spill] sm:$0xff] %v11726_v21  ;;  %v8629_v6 = vld [vmem:[%s16709_s5 + $0xc98] sm:$0xff] }
 0x365   : > { %v5829_v51 = vadd.f32 %v5803_v37, %v5698_v31  ;;  %v5306_v34 = vadd.f32 %v5280_v5, %v5175_v28  ;;  %v11713_v37 = vmax.f32 %v3682_v59, 0.0  ;;  %v5162_v31 = vmul.f32 %v8500_v10, %v5103_v60  ;;  %v8526_v60 = vld [vmem:[%s16709_s5 + $0x960] sm:$0xff]  ;;  %v8617_v20 = vld [vmem:[%s16709_s5 + $0xc38] sm:$0xff]  ;;  %v8668_v28 = vld [vmem:[%s16709_s5 + $0xdd0] sm:$0xff] }
 0x366   : > { %v3607_v26 = vmax.f32 %v11378_v62, %v3041_v55  ;;  %v5542_v42 = vmul.f32 %v8565_v53, %v11704_v45  ;;  %v5711_v47 = vadd.f32 %v5685_v7, %v5580_v33  ;;  %v5673_v55 = vmul.f32 %v8591_v48, %v11711_v32  ;;  %v8694_v33 = vld [vmem:[%s16709_s5 + $0xea0] sm:$0xff]  ;;  %v11756_v7 = vpop.f32.mrf.mxu1 }
 0x367   : > { %v5437_v59 = vadd.f32 %v5411_v24, %v5306_v34  ;;  %v5885_v62 = vrot.slane %v11713_v37, %v11437_v41  ;;  %v6016_v63 = vrot.slane %v11713_v37, %v11439_v46  ;;  %v5188_v10 = vadd.f32 %v5162_v31, %v5057_v13  ;;  %17248 = vst [vmem:[#allocation46_spill] sm:$0xff] %v11756_v7  ;;  %v8552_v31 = vld [vmem:[%s16709_s5 + $0xa30] sm:$0xff] }
 0x368   : > { %v11748_v34 = vrot.slane %v11713_v37, %v11441_v38  ;;  %v5816_v24 = vmul.f32 %v8629_v6, %v11658_v29  ;;  %v5293_v21 = vmul.f32 %v8526_v60, %v5234_v58  ;;  %v5804_v15 = vmul.f32 %v8617_v20, %v11720_v22  ;;  %v8655_v29 = vld [vmem:[%s16709_s5 + $0xd68] sm:$0xff] }
 0x369   : > { %v5568_v5 = vadd.f32 %v5542_v42, %v5437_v59  ;;  %v5934_v53 = vmul.f32 %v8642_v19, %v5885_v62  ;;  %v3683_v13 = vadd.f32 %v11672_v43, %v3607_v26  ;;  %v6065_v19 = vmul.f32 %v8668_v28, %v6016_v63  ;;  %v8720_v26 = vld [vmem:[%s16709_s5 + $0xf70] sm:$0xff] }
 0x36a   : > { %v11766_v6 = vrot.slane %v11713_v37, %v11444_v2  ;;  %v5842_v60 = vadd.f32 %v5816_v24, %v5711_v47  ;;  %v5319_v59 = vadd.f32 %v5293_v21, %v5188_v10  ;;  %v5947_v28 = vmul.f32 %v8655_v29, %v5885_v62  ;;  %v11786_v47 = vpop.f32.mrf.mxu1  ;;  %v8681_v10 = vld [vmem:[%s16709_s5 + $0xe38] sm:$0xff]  ;;  %v8772_v24 = vld [vmem:[%s16709_s5 + $0x1110] sm:$0xff] }
 0x36b   : > { %v5699_v48 = vadd.f32 %v5673_v55, %v5568_v5  ;;  %v5960_v58 = vadd.f32 %v5934_v53, %v5829_v51  ;;  %v6196_v5 = vmul.f32 %v8694_v33, %v11748_v34  ;;  %v11774_v55 = vrot.slane %v11713_v37, %v11451_v9  ;;  %v8746_v53 = vld [vmem:[%s16709_s5 + $0x1040] sm:$0xff]  ;;  %17249 = vst [vmem:[#allocation39_spill] sm:$0xff] %v11786_v47 }
 0x36c   : > { %v5424_v51 = vmul.f32 %v8552_v31, %v5365_v56  ;;  %v11781_v21 = vrot.slane %v11713_v37, %v11453_v35  ;;  %v6327_v62 = vmul.f32 %v8720_v26, %v11766_v6  ;;  %v11795_v33 = vmax.f32 %v3683_v13, 0.0  ;;  %v3045_v31 = vpop.f32.mrf.mxu0  ;;  %v8604_v26 = vld [vmem:[%s16709_s5 + $0xbd0] sm:$0xff]  ;;  %v8798_v13 = vld [vmem:[%s16709_s5 + $0x11e0] sm:$0xff]  ;;  %v11832_v17 = vpop.f32.mrf.mxu1 }
 0x36d   : > { %v5830_v42 = vadd.f32 %v5804_v15, %v5699_v48  ;;  %v6091_v20 = vadd.f32 %v6065_v19, %v5960_v58  ;;  %v8578_v15 = vld [vmem:[%s16709_s5 + $0xb00] sm:$0xff]  ;;  %v5973_v29 = vadd.f32 %v5947_v28, %v5842_v60  ;;  %v11799_v58 = vrot.slane %v11713_v37, %v11455_v14  ;;  %v8643_v19 = vld [vmem:[%s16709_s5 + $0xd08] sm:$0xff]  ;;  %17250 = vst [vmem:[#allocation40_spill] sm:$0xff] %v11832_v17 }
 0x36e   : > { %v5450_v48 = vadd.f32 %v5424_v51, %v5319_v59  ;;  %v11813_v60 = vrot.slane %v11795_v33, %v11437_v41  ;;  %v11817_v59 = vrot.slane %v11795_v33, %v11439_v46  ;;  %v5555_v51 = vmul.f32 %v8578_v15, %v11704_v45  ;;  %v3047_v15 = vpop.f32.mrf.mxu0 }
 0x36f   : > { %v6222_v56 = vadd.f32 %v6196_v5, %v6091_v20  ;;  %v6458_v5 = vmul.f32 %v8746_v53, %v11774_v55  ;;  %v6078_v28 = vmul.f32 %v8681_v10, %v6016_v63  ;;  %v6589_v47 = vmul.f32 %v8772_v24, %v11781_v21  ;;  %v8669_v53 = vld [vmem:[%s16709_s5 + $0xdd8] sm:$0xff] }
 0x370   : > { %v11830_v52 = vrot.slane %v11713_v37, %v11470_v4  ;;  %v5935_v45 = vmul.f32 %v8643_v19, %v11813_v60  ;;  %v11837_v63 = vrot.slane %v11795_v33, %v11441_v38  ;;  %v5581_v10 = vadd.f32 %v5555_v51, %v5450_v48  ;;  %v8824_v37 = vld [vmem:[%s16709_s5 + $0x12b0] sm:$0xff]  ;;  %v11847_v19 = vpop.permute.xlu0 %3653 }
 0x371   : > { %v6353_v20 = vadd.f32 %v6327_v62, %v6222_v56  ;;  %v3619_v56 = vmax.f32 %v11382_v25, %v3045_v31  ;;  %v8707_v62 = vld [vmem:[%s16709_s5 + $0xf08] sm:$0xff]  ;;  %v5686_v25 = vmul.f32 %v8604_v26, %v11711_v32  ;;  %v6104_v24 = vadd.f32 %v6078_v28, %v5973_v29  ;;  %17251 = vst [vmem:[#allocation36_spill] sm:$0xff] %v11847_v19  ;;  %v8721_v29 = vld [vmem:[%s16709_s5 + $0xf78] sm:$0xff] }
 0x372   : > { %v6720_v31 = vmul.f32 %v8798_v13, %v11799_v58  ;;  %v5961_v17 = vadd.f32 %v5935_v45, %v5830_v42  ;;  %v6066_v27 = vmul.f32 %v8669_v53, %v11817_v59  ;;  %v11852_v32 = vrot.slane %v11795_v33, %v11444_v2  ;;  %v8630_v42 = vld [vmem:[%s16709_s5 + $0xca0] sm:$0xff] }
 0x373   : > { %v6484_v7 = vadd.f32 %v6458_v5, %v6353_v20  ;;  %v8695_v20 = vld [vmem:[%s16709_s5 + $0xea8] sm:$0xff]  ;;  %v6209_v48 = vmul.f32 %v8707_v62, %v11748_v34  ;;  %v11860_v26 = vrot.slane %v11795_v33, %v11451_v9  ;;  %v3695_v13 = vadd.f32 %v11847_v19, %v3619_v56  ;;  %v8733_v34 = vld [vmem:[%s16709_s5 + $0xfd8] sm:$0xff]  ;;  %v11875_v62 = vpop.f32.mrf.mxu1 }
 0x374   : > { %v6851_v51 = vmul.f32 %v8824_v37, %v11830_v52  ;;  %v6092_v28 = vadd.f32 %v6066_v27, %v5961_v17  ;;  %v6197_v53 = vmul.f32 %v8695_v20, %v11837_v63  ;;  %v8747_v56 = vld [vmem:[%s16709_s5 + $0x1048] sm:$0xff]  ;;  %17252 = vst [vmem:[#allocation37_spill] sm:$0xff] %v11875_v62  ;;  %v5712_v45 = vadd.f32 %v5686_v25, %v5581_v10  ;;  %v8773_v10 = vld [vmem:[%s16709_s5 + $0x1118] sm:$0xff] }
 0x375   : > { %v6615_v5 = vadd.f32 %v6589_v47, %v6484_v7  ;;  %v3620_v7 = vmax.f32 %v11386_v50, %v3047_v15  ;;  %v3205_v50 = vpop.f32.mrf.mxu0  ;;  %v6235_v15 = vadd.f32 %v6209_v48, %v6104_v24  ;;  %v6328_v11 = vmul.f32 %v8721_v29, %v11852_v32  ;;  %v11882_v27 = vpop.f32.mrf.mxu1  ;;  %v8759_v24 = vld [vmem:[%s16709_s5 + $0x10a8] sm:$0xff] }
 0x376   : > { %v6223_v3 = vadd.f32 %v6197_v53, %v6092_v28  ;;  %17253 = vst [vmem:[#allocation5_spill] sm:$0xff] %v11882_v27  ;;  %v5817_v17 = vmul.f32 %v8630_v42, %v11720_v22  ;;  %v6340_v37 = vmul.f32 %v8733_v34, %v11766_v6  ;;  %v6459_v20 = vmul.f32 %v8747_v56, %v11860_v26  ;;  %v8825_v56 = vld [vmem:[%s16709_s5 + $0x12b8] sm:$0xff] }
 0x377   : > { %v6746_v47 = vadd.f32 %v6720_v31, %v6615_v5  ;;  %v11880_v31 = vrot.slane %v11795_v33, %v11453_v35  ;;  %v3584_v25 = vmax.f32 %v11426_v0, %v3205_v50  ;;  %v8656_v5 = vld [vmem:[%s16709_s5 + $0xd70] sm:$0xff]  ;;  %v11899_v22 = vrot.slane %v11795_v33, %v11455_v14  ;;  %v8799_v0 = vld [vmem:[%s16709_s5 + $0x11e8] sm:$0xff] }
 0x378   : > { %v6354_v48 = vadd.f32 %v6328_v11, %v6223_v3  ;;  %v11901_v6 = vmax.f32 %v3695_v13, 0.0  ;;  %v3696_v29 = vadd.f32 %v11847_v19, %v3620_v7  ;;  %v5843_v42 = vadd.f32 %v5817_v17, %v5712_v45  ;;  %v11919_v7 = vpop.f32.mrf.mxu1 }
 0x379   : > { %v6877_v49 = vadd.f32 %v6851_v51, %v6746_v47  ;;  %v6366_v34 = vadd.f32 %v6340_v37, %v6235_v15  ;;  %v8850_v47 = vld [vmem:[%s16709_s5 + $0x1380] sm:$0xff]  ;;  %v6590_v11 = vmul.f32 %v8773_v10, %v11880_v31  ;;  %v11913_v3 = vrot.slane %v11795_v33, %v11470_v4  ;;  %17255 = vst [vmem:[#allocation33_spill] sm:$0xff] %v11919_v7  ;;  %v8785_v33 = vld [vmem:[%s16709_s5 + $0x1178] sm:$0xff] }
 0x37a   : > { %17254 = vst [vmem:[#allocation32_spill] sm:$0xff] %v11901_v6  ;;  %v6485_v51 = vadd.f32 %v6459_v20, %v6354_v48  ;;  %v11917_v13 = vrot.slane %v11901_v6, %v11437_v41  ;;  %v6471_v28 = vmul.f32 %v8759_v24, %v11774_v55  ;;  %v5948_v53 = vmul.f32 %v8656_v5, %v11813_v60  ;;  %v3116_v55 = vpop.f32.mrf.mxu1  ;;  %v8682_v60 = vld [vmem:[%s16709_s5 + $0xe40] sm:$0xff] }
 0x37b   : > { %v11926_v50 = vmax.f32 %v3696_v29, 0.0  ;;  %v6721_v15 = vmul.f32 %v8799_v0, %v11899_v22  ;;  %v3660_v37 = vadd.f32 %v11435_v39, %v3584_v25  ;;  %v6852_v5 = vmul.f32 %v8825_v56, %v11913_v3  ;;  %v8851_v29 = vld [vmem:[%s16709_s5 + $0x1388] sm:$0xff] }
 0x37c   : > { %v6616_v45 = vadd.f32 %v6590_v11, %v6485_v51  ;;  %v6982_v17 = vmul.f32 %v8850_v47, %v11917_v13  ;;  %v6497_v20 = vadd.f32 %v6471_v28, %v6366_v34  ;;  %v5974_v10 = vadd.f32 %v5948_v53, %v5843_v42  ;;  %v8811_v42 = vld [vmem:[%s16709_s5 + $0x1248] sm:$0xff]  ;;  %v8708_v28 = vld [vmem:[%s16709_s5 + $0xf10] sm:$0xff]  ;;  %v3764_v53 = vld [vmem:[%s16709_s5 + $0x20] sm:$0xff] }
 0x37d   : > { %17256 = vst [vmem:[#allocation6_spill] sm:$0xff] %v11926_v50  ;;  %v6602_v0 = vmul.f32 %v8785_v33, %v11781_v21  ;;  %v11946_v25 = vrot.slane %v11926_v50, %v11437_v41  ;;  %v3582_v34 = vmax.f32 %v11390_v8, %v3116_v55  ;;  %v6079_v47 = vmul.f32 %v8682_v60, %v11817_v59  ;;  %v8256_v8 = vld [vmem:[%s16709_s5 + $0xf0] sm:$0xff] }
 0x37e   : > { %v6747_v24 = vadd.f32 %v6721_v15, %v6616_v45  ;;  %v11938_v48 = vadd.f32 %v6982_v17, %v6877_v49  ;;  %v3712_v51 = vmax.f32 %v3660_v37, 0.0  ;;  %v6733_v45 = vmul.f32 %v8811_v42, %v11799_v58  ;;  %v8282_v17 = vld [vmem:[%s16709_s5 + $0x1c0] sm:$0xff] }
 0x37f   : > { %v6628_v11 = vadd.f32 %v6602_v0, %v6497_v20  ;;  %v6983_v21 = vmul.f32 %v8851_v29, %v11946_v25  ;;  %v6105_v56 = vadd.f32 %v6079_v47, %v5974_v10  ;;  %v3658_v55 = vadd.f32 %v11435_v39, %v3582_v34  ;;  %v8837_v20 = vld [vmem:[%s16709_s5 + $0x1318] sm:$0xff]  ;;  %v8734_v29 = vld [vmem:[%s16709_s5 + $0xfe0] sm:$0xff]  ;;  %v8308_v0 = vld [vmem:[%s16709_s5 + $0x290] sm:$0xff] }
 0x380   : > { %17257 = vst [vmem:[#allocation29_spill] sm:$0xff] %v11938_v48  ;;  %v6878_v49 = vadd.f32 %v6852_v5, %v6747_v24  ;;  %v11964_v59 = vrot.slane %v3712_v51, %v11437_v41  ;;  %v11967_v33 = vrot.slane %v3712_v51, %v11439_v46  ;;  %v11976_v37 = vrot.slane %v3712_v51, %v11441_v38  ;;  %v8786_v42 = vld [vmem:[%s16709_s5 + $0x1180] sm:$0xff]  ;;  %v8812_v47 = vld [vmem:[%s16709_s5 + $0x1250] sm:$0xff] }
 0x381   : > { %v6210_v60 = vmul.f32 %v8708_v28, %v11837_v63  ;;  %v11986_v24 = vrot.slane %v3712_v51, %v11444_v2  ;;  %v6759_v5 = vadd.f32 %v6733_v45, %v6628_v11  ;;  %v8760_v63 = vld [vmem:[%s16709_s5 + $0x10b0] sm:$0xff]  ;;  %v12005_v28 = vrot.slane %v3712_v51, %v11451_v9 }
 0x382   : > { %v11970_v15 = vadd.f32 %v6983_v21, %v6878_v49  ;;  %v3842_v10 = vmul.f32 %v11964_v59, %v3764_v53  ;;  %v3973_v58 = vmul.f32 %v8256_v8, %v11967_v33  ;;  %v4104_v11 = vmul.f32 %v8282_v17, %v11976_v37  ;;  %v8334_v53 = vld [vmem:[%s16709_s5 + $0x360] sm:$0xff]  ;;  %v3207_v17 = vpop.f32.mrf.mxu0  ;;  %v8412_v48 = vld [vmem:[%s16709_s5 + $0x5d0] sm:$0xff] }
 0x383   : > { %v6236_v34 = vadd.f32 %v6210_v60, %v6105_v56  ;;  %v6864_v21 = vmul.f32 %v8837_v20, %v11830_v52  ;;  %v12011_v8 = vmax.f32 %v3658_v55, 0.0  ;;  %v6341_v56 = vmul.f32 %v8734_v29, %v11852_v32  ;;  %v8838_v32 = vld [vmem:[%s16709_s5 + $0x1320] sm:$0xff]  ;;  %v8360_v55 = vld [vmem:[%s16709_s5 + $0x430] sm:$0xff] }
 0x384   : > { %17258 = vst [vmem:[#allocation31_spill] sm:$0xff] %v11970_v15  ;;  %v3999_v49 = vadd.f32 %v3973_v58, %v3842_v10  ;;  %v4235_v60 = vmul.f32 %v8308_v0, %v11986_v24  ;;  %v12016_v10 = vrot.slane %v3712_v51, %v11453_v35  ;;  %v6472_v15 = vmul.f32 %v8760_v63, %v11860_v26  ;;  %v3762_v26 = vld [vmem:[%s16709_s5 + $0x10] sm:$0xff] }
 0x385   : > { %v12018_v58 = vadd.f32 %v6864_v21, %v6759_v5  ;;  %v6603_v52 = vmul.f32 %v8786_v42, %v11880_v31  ;;  %v12023_v20 = vmul.f32 %v8812_v47, %v11899_v22  ;;  %v6367_v29 = vadd.f32 %v6341_v56, %v6236_v34  ;;  %v8254_v31 = vld [vmem:[%s16709_s5 + $0xe0] sm:$0xff]  ;;  %v12041_v22 = vpop.f32.mrf.mxu1 }
 0x386   : > { %v4130_v45 = vadd.f32 %v4104_v11, %v3999_v49  ;;  %v4366_v5 = vmul.f32 %v8334_v53, %v12005_v28  ;;  %v12033_v49 = vrot.slane %v3712_v51, %v11455_v14  ;;  %v8386_v34 = vld [vmem:[%s16709_s5 + $0x500] sm:$0xff]  ;;  %v12048_v63 = vrot.slane %v12011_v8, %v11437_v41 }
 0x387   : > { %v12052_v42 = vrot.slane %v12011_v8, %v11439_v46  ;;  %v12056_v47 = vrot.slane %v12011_v8, %v11441_v38  ;;  %v3585_v11 = vmax.f32 %v11433_v1, %v3207_v17  ;;  %v12060_v21 = vmul.f32 %v8838_v32, %v11913_v3 }
 0x388   : > { %v4261_v0 = vadd.f32 %v4235_v60, %v4130_v45  ;;  %v4497_v56 = vmul.f32 %v8360_v55, %v12016_v10  ;;  %v12064_v45 = vrot.slane %v3712_v51, %v11470_v4  ;;  %v8280_v60 = vld [vmem:[%s16709_s5 + $0x1b0] sm:$0xff]  ;;  %v3840_v27 = vmul.f32 %v12048_v63, %v3762_v26  ;;  %v8863_v26 = vld [vmem:[%s16709_s5 + $0x13e8] sm:$0xff] }
 0x389   : > { %v3971_v1 = vmul.f32 %v8254_v31, %v12052_v42  ;;  %v12076_v3 = vrot.slane %v12011_v8, %v11444_v2  ;;  %v6498_v17 = vadd.f32 %v6472_v15, %v6367_v29  ;;  %v12082_v32 = vrot.slane %v11901_v6, %v11439_v46  ;;  %v8889_v31 = vld [vmem:[%s16709_s5 + $0x14b8] sm:$0xff] }
 0x38a   : > { %v4392_v53 = vadd.f32 %v4366_v5, %v4261_v0  ;;  %v4628_v0 = vmul.f32 %v8386_v34, %v12033_v49  ;;  %v8306_v5 = vld [vmem:[%s16709_s5 + $0x280] sm:$0xff]  ;;  %v4102_v29 = vmul.f32 %v8280_v60, %v12056_v47  ;;  %v3661_v34 = vadd.f32 %v11435_v39, %v3585_v11 }
 0x38b   : > { %17259 = vst [vmem:[#allocation75_spill] sm:$0xff] %v12082_v32  ;;  %v3997_v15 = vadd.f32 %v3971_v1, %v3840_v27  ;;  %v12105_v51 = vrot.slane %v11901_v6, %v11441_v38  ;;  %v4759_v62 = vmul.f32 %v8412_v48, %v12064_v45  ;;  %v8332_v27 = vld [vmem:[%s16709_s5 + $0x350] sm:$0xff]  ;;  %v12113_v60 = vrot.slane %v12011_v8, %v11453_v35  ;;  %v3777_v48 = vld [vmem:[%s16709_s5 + $0x88] sm:$0xff] }
 0x38c   : > { %v4523_v55 = vadd.f32 %v4497_v56, %v4392_v53  ;;  %v12097_v53 = vrot.slane %v12011_v8, %v11451_v9  ;;  %v8915_v56 = vld [vmem:[%s16709_s5 + $0x1588] sm:$0xff]  ;;  %v12117_v11 = vrot.slane %v11901_v6, %v11444_v2  ;;  %v12121_v1 = vrot.slane %v11901_v6, %v11451_v9 }
 0x38d   : > { %17260 = vst [vmem:[#allocation42_spill] sm:$0xff] %v12105_v51  ;;  %v4233_v19 = vmul.f32 %v8306_v5, %v12076_v3  ;;  %v6995_v57 = vmul.f32 %v8863_v26, %v11917_v13  ;;  %v12135_v6 = vmul.f32 %v8889_v31, %v12082_v32  ;;  %v12144_v5 = vmax.f32 %v3661_v34, 0.0 }
 0x38e   : > { %v4654_v7 = vadd.f32 %v4628_v0, %v4523_v55  ;;  %17261 = vst [vmem:[#allocation43_spill] sm:$0xff] %v12117_v11  ;;  %17262 = vst [vmem:[#allocation26_spill] sm:$0xff] %v12121_v1  ;;  %v8269_v55 = vld [vmem:[%s16709_s5 + $0x158] sm:$0xff]  ;;  %v4128_v0 = vadd.f32 %v4102_v29, %v3997_v15  ;;  %v6629_v11 = vadd.f32 %v6603_v52, %v6498_v17 }
 0x38f   : > { %17263 = vst [vmem:[#allocation27_spill] sm:$0xff] %v12135_v6  ;;  %v4364_v43 = vmul.f32 %v8332_v27, %v12097_v53  ;;  %v12142_v15 = vrot.slane %v12011_v8, %v11455_v14  ;;  %v12147_v29 = vmul.f32 %v8915_v56, %v12105_v51  ;;  %v3855_v52 = vmul.f32 %v11964_v59, %v3777_v48  ;;  %v8283_v48 = vld [vmem:[%s16709_s5 + $0x1c8] sm:$0xff] }
 0x390   : > { %v12137_v1 = vadd.f32 %v4759_v62, %v4654_v7  ;;  %v4259_v36 = vadd.f32 %v4233_v19, %v4128_v0  ;;  %v3986_v13 = vmul.f32 %v8269_v55, %v11967_v33  ;;  %v4495_v17 = vmul.f32 %v8358_v12, %v12113_v60  ;;  %v8384_v19 = vld [vmem:[%s16709_s5 + $0x4f0] sm:$0xff]  ;;  %v3765_v62 = vld [vmem:[%s16709_s5 + $0x28] sm:$0xff]  ;;  %v8257_v12 = vld [vmem:[%s16709_s5 + $0xf8] sm:$0xff] }
 0x391   : > { %17264 = vst [vmem:[#allocation23_spill] sm:$0xff] %v12147_v29  ;;  %v12160_v26 = vrot.slane %v12011_v8, %v11470_v4  ;;  %v3809_v59 = vrot.slane %v12144_v5, %v11437_v41  ;;  %v3940_v33 = vrot.slane %v12144_v5, %v11439_v46  ;;  %v6760_v31 = vadd.f32 %v12023_v20, %v6629_v11  ;;  %v8410_v8 = vld [vmem:[%s16709_s5 + $0x5c0] sm:$0xff]  ;;  %v8295_v51 = vld [vmem:[%s16709_s5 + $0x228] sm:$0xff] }
 0x392   : > { %v4390_v7 = vadd.f32 %v4364_v43, %v4259_v36  ;;  %v12171_v34 = vadd.f32 %v6995_v57, %v12018_v58  ;;  %v12175_v36 = vrot.slane %v11926_v50, %v11439_v46  ;;  %v3775_v43 = vld [vmem:[%s16709_s5 + $0x78] sm:$0xff]  ;;  %v4071_v56 = vrot.slane %v12144_v5, %v11441_v38  ;;  %v8267_v57 = vld [vmem:[%s16709_s5 + $0x148] sm:$0xff] }
 0x393   : > { %v12187_v20 = vrot.slane %v11926_v50, %v11441_v38  ;;  %v4626_v27 = vmul.f32 %v8384_v19, %v12142_v15  ;;  %v3843_v11 = vmul.f32 %v3809_v59, %v3765_v62  ;;  %v12198_v55 = vrot.slane %v11926_v50, %v11444_v2  ;;  %v8270_v19 = vld [vmem:[%s16709_s5 + $0x160] sm:$0xff] }
 0x394   : > { %17265 = vst [vmem:[#allocation25_spill] sm:$0xff] %v12171_v34  ;;  %17266 = vst [vmem:[#allocation69_spill] sm:$0xff] %v12175_v36  ;;  %v4521_v58 = vadd.f32 %v4495_v17, %v4390_v7  ;;  %v4012_v0 = vadd.f32 %v3986_v13, %v3855_v52  ;;  %v3778_v17 = vld [vmem:[%s16709_s5 + $0x90] sm:$0xff]  ;;  %v3974_v62 = vmul.f32 %v8257_v12, %v3940_v33  ;;  %v8309_v13 = vld [vmem:[%s16709_s5 + $0x298] sm:$0xff] }
 0x395   : > { %17267 = vst [vmem:[#allocation72_spill] sm:$0xff] %v12187_v20  ;;  %17268 = vst [vmem:[#allocation68_spill] sm:$0xff] %v12198_v55  ;;  %v4202_v7 = vrot.slane %v12144_v5, %v11444_v2  ;;  %v3853_v32 = vmul.f32 %v12048_v63, %v3775_v43  ;;  %v4757_v52 = vmul.f32 %v8410_v8, %v12160_v26  ;;  %v8321_v12 = vld [vmem:[%s16709_s5 + $0x2f8] sm:$0xff]  ;;  %v8347_v63 = vld [vmem:[%s16709_s5 + $0x3c8] sm:$0xff] }
 0x396   : > { %v4652_v55 = vadd.f32 %v4626_v27, %v4521_v58  ;;  %v17269_v29 = vmax.f32 %v11394_v23, %v12041_v22  ;;  %v3984_v43 = vmul.f32 %v8267_v57, %v12052_v42  ;;  %v4000_v8 = vadd.f32 %v3974_v62, %v3843_v11  ;;  %v8293_v42 = vld [vmem:[%s16709_s5 + $0x218] sm:$0xff]  ;;  %v8387_v62 = vld [vmem:[%s16709_s5 + $0x508] sm:$0xff] }
 0x397   : > { %v4105_v58 = vmul.f32 %v8283_v48, %v4071_v56  ;;  %v12229_v27 = vrot.slane %v12144_v5, %v11451_v9  ;;  %v4117_v23 = vmul.f32 %v8295_v51, %v11976_v37  ;;  %v3987_v34 = vmul.f32 %v8270_v19, %v3940_v33 }
 0x398   : > { %v3659_v6 = vadd.f32 %v11435_v39, %v17269_v29  ;;  %v12232_v22 = vadd.f32 %v4757_v52, %v4652_v55  ;;  %v3856_v29 = vmul.f32 %v3809_v59, %v3778_v17  ;;  %v8335_v39 = vld [vmem:[%s16709_s5 + $0x368] sm:$0xff]  ;;  %v12238_v20 = vadd.f32 %v12060_v21, %v6760_v31  ;;  %v8361_v21 = vld [vmem:[%s16709_s5 + $0x438] sm:$0xff]  ;;  %v8296_v55 = vld [vmem:[%s16709_s5 + $0x230] sm:$0xff] }
 0x399   : > { %v4131_v57 = vadd.f32 %v4105_v58, %v4000_v8  ;;  %v4236_v11 = vmul.f32 %v8309_v13, %v4202_v7  ;;  %v12245_v37 = vrot.slane %v12144_v5, %v11453_v35  ;;  %v4143_v51 = vadd.f32 %v4117_v23, %v4012_v0  ;;  %v8319_v13 = vld [vmem:[%s16709_s5 + $0x2e8] sm:$0xff]  ;;  %v8322_v58 = vld [vmem:[%s16709_s5 + $0x300] sm:$0xff]  ;;  %v8413_v23 = vld [vmem:[%s16709_s5 + $0x5d8] sm:$0xff] }
 0x39a   : > { %17270 = vst [vmem:[#allocation8_spill] sm:$0xff] %v12238_v20  ;;  %v4248_v59 = vmul.f32 %v8321_v12, %v11986_v24  ;;  %v4379_v33 = vmul.f32 %v8347_v63, %v12005_v28  ;;  %v12252_v31 = vmax.f32 %v3659_v6, 0.0  ;;  %v4010_v48 = vadd.f32 %v3984_v43, %v3853_v32  ;;  %v3763_v24 = vld [vmem:[%s16709_s5 + $0x18] sm:$0xff]  ;;  %v8255_v6 = vld [vmem:[%s16709_s5 + $0xe8] sm:$0xff] }
 0x39b   : > { %v4262_v17 = vadd.f32 %v4236_v11, %v4131_v57  ;;  %v4367_v19 = vmul.f32 %v8335_v39, %v12229_v27  ;;  %v12260_v0 = vrot.slane %v12144_v5, %v11455_v14  ;;  %v4115_v28 = vmul.f32 %v8293_v42, %v12056_v47  ;;  %v8281_v63 = vld [vmem:[%s16709_s5 + $0x1b8] sm:$0xff] }
 0x39c   : > { %v4013_v32 = vadd.f32 %v3987_v34, %v3856_v29  ;;  %v12274_v39 = vrot.slane %v12252_v31, %v11437_v41  ;;  %v12278_v52 = vrot.slane %v12252_v31, %v11439_v46  ;;  %v4498_v47 = vmul.f32 %v8361_v21, %v12245_v37 }
 0x39d   : > { %v4393_v12 = vadd.f32 %v4367_v19, %v4262_v17  ;;  %v12286_v34 = vrot.slane %v12144_v5, %v11470_v4  ;;  %v12293_v43 = vrot.slane %v12252_v31, %v11441_v38  ;;  %v4118_v8 = vmul.f32 %v8296_v55, %v4071_v56  ;;  %v8307_v55 = vld [vmem:[%s16709_s5 + $0x288] sm:$0xff]  ;;  %v3211_v17 = vpop.f32.mrf.mxu0 }
 0x39e   : > { %v3841_v5 = vmul.f32 %v12274_v39, %v3763_v24  ;;  %v3972_v29 = vmul.f32 %v8255_v6, %v12278_v52  ;;  %v12305_v42 = vrot.slane %v12252_v31, %v11444_v2  ;;  %v4274_v57 = vadd.f32 %v4248_v59, %v4143_v51  ;;  %v8333_v51 = vld [vmem:[%s16709_s5 + $0x358] sm:$0xff] }
 0x39f   : > { %v4141_v11 = vadd.f32 %v4115_v28, %v4010_v48  ;;  %v4524_v21 = vadd.f32 %v4498_v47, %v4393_v12  ;;  %v4629_v56 = vmul.f32 %v8387_v62, %v12260_v0  ;;  %v4246_v19 = vmul.f32 %v8319_v13, %v12076_v3  ;;  %v8373_v3 = vld [vmem:[%s16709_s5 + $0x498] sm:$0xff]  ;;  %v3122_v12 = vpop.f32.mrf.mxu1 }
 0x3a0   : > { %v4144_v20 = vadd.f32 %v4118_v8, %v4013_v32  ;;  %v3998_v24 = vadd.f32 %v3972_v29, %v3841_v5  ;;  %v4103_v6 = vmul.f32 %v8281_v63, %v12293_v43  ;;  %v4249_v54 = vmul.f32 %v8322_v58, %v4202_v7  ;;  %v8345_v48 = vld [vmem:[%s16709_s5 + $0x3b8] sm:$0xff]  ;;  %v8348_v7 = vld [vmem:[%s16709_s5 + $0x3d0] sm:$0xff]  ;;  %v8399_v5 = vld [vmem:[%s16709_s5 + $0x568] sm:$0xff] }
 0x3a1   : > { %v4655_v18 = vadd.f32 %v4629_v56, %v4524_v21  ;;  %v4760_v16 = vmul.f32 %v8413_v23, %v12286_v34  ;;  %v12319_v59 = vrot.slane %v12252_v31, %v11451_v9  ;;  %v4234_v32 = vmul.f32 %v8307_v55, %v12305_v42  ;;  %v8359_v23 = vld [vmem:[%s16709_s5 + $0x428] sm:$0xff] }
 0x3a2   : > { %v4129_v28 = vadd.f32 %v4103_v6, %v3998_v24  ;;  %v12333_v62 = vrot.slane %v12252_v31, %v11453_v35  ;;  %v3597_v13 = vmax.f32 %v11446_v40, %v3211_v17  ;;  %v12338_v47 = vrot.slane %v11926_v50, %v11451_v9  ;;  %v8371_v40 = vld [vmem:[%s16709_s5 + $0x488] sm:$0xff] }
 0x3a3   : > { %v4405_v63 = vadd.f32 %v4379_v33, %v4274_v57  ;;  %v4272_v8 = vadd.f32 %v4246_v19, %v4141_v11  ;;  %v12340_v58 = vadd.f32 %v4760_v16, %v4655_v18  ;;  %v4275_v29 = vadd.f32 %v4249_v54, %v4144_v20  ;;  %v8385_v11 = vld [vmem:[%s16709_s5 + $0x4f8] sm:$0xff]  ;;  %v8374_v54 = vld [vmem:[%s16709_s5 + $0x4a0] sm:$0xff] }
 0x3a4   : > { %17271 = vst [vmem:[#allocation67_spill] sm:$0xff] %v12338_v47  ;;  %v4260_v21 = vadd.f32 %v4234_v32, %v4129_v28  ;;  %v4365_v56 = vmul.f32 %v8333_v51, %v12319_v59  ;;  %v12354_v16 = vrot.slane %v12252_v31, %v11455_v14  ;;  %v4510_v18 = vmul.f32 %v8373_v3, %v12016_v10  ;;  %v3776_v20 = vld [vmem:[%s16709_s5 + $0x80] sm:$0xff]  ;;  %v8268_v10 = vld [vmem:[%s16709_s5 + $0x150] sm:$0xff]  ;;  %v8411_v3 = vld [vmem:[%s16709_s5 + $0x5c8] sm:$0xff] }
 0x3a5   : > { %v4377_v33 = vmul.f32 %v8345_v48, %v12097_v53  ;;  %v4380_v57 = vmul.f32 %v8348_v7, %v12229_v27  ;;  %v3595_v55 = vmax.f32 %v11398_v44, %v3122_v12  ;;  %v4496_v27 = vmul.f32 %v8359_v23, %v12333_v62  ;;  %v8864_v48 = vld [vmem:[%s16709_s5 + $0x13f0] sm:$0xff]  ;;  %v8425_v23 = vld [vmem:[%s16709_s5 + $0x638] sm:$0xff] }
 0x3a6   : > { %v4391_v53 = vadd.f32 %v4365_v56, %v4260_v21  ;;  %v12375_v17 = vrot.slane %v12252_v31, %v11470_v4  ;;  %v3673_v44 = vadd.f32 %v11540_v30, %v3597_v13  ;;  %v4536_v19 = vadd.f32 %v4510_v18, %v4405_v63  ;;  %v8890_v31 = vld [vmem:[%s16709_s5 + $0x14c0] sm:$0xff]  ;;  %v8284_v47 = vld [vmem:[%s16709_s5 + $0x1d0] sm:$0xff] }
 0x3a7   : > { %v4641_v24 = vmul.f32 %v8399_v5, %v12033_v49  ;;  %v4403_v6 = vadd.f32 %v4377_v33, %v4272_v8  ;;  %v4508_v51 = vmul.f32 %v8371_v40, %v12113_v60  ;;  %v4406_v7 = vadd.f32 %v4380_v57, %v4275_v29  ;;  %v8438_v63 = vld [vmem:[%s16709_s5 + $0x6a0] sm:$0xff]  ;;  %v8397_v5 = vld [vmem:[%s16709_s5 + $0x558] sm:$0xff]  ;;  %v8464_v57 = vld [vmem:[%s16709_s5 + $0x770] sm:$0xff] }
 0x3a8   : > { %v4522_v28 = vadd.f32 %v4496_v27, %v4391_v53  ;;  %v4627_v32 = vmul.f32 %v8385_v11, %v12354_v16  ;;  %v12390_v49 = vmax.f32 %v3673_v44, 0.0  ;;  %v4511_v60 = vmul.f32 %v8374_v54, %v12245_v37  ;;  %v8400_v37 = vld [vmem:[%s16709_s5 + $0x570] sm:$0xff]  ;;  %v8423_v11 = vld [vmem:[%s16709_s5 + $0x628] sm:$0xff]  ;;  %v8294_v54 = vld [vmem:[%s16709_s5 + $0x220] sm:$0xff] }
 0x3a9   : > { %v3854_v13 = vmul.f32 %v12274_v39, %v3776_v20  ;;  %v3985_v12 = vmul.f32 %v8268_v10, %v12278_v52  ;;  %v3671_v8 = vadd.f32 %v11540_v30, %v3595_v55  ;;  %v4758_v52 = vmul.f32 %v8411_v3, %v12375_v17 }
 0x3aa   : > { %v4653_v39 = vadd.f32 %v4627_v32, %v4522_v28  ;;  %v12411_v40 = vrot.slane %v12390_v49, %v11437_v41  ;;  %v12415_v29 = vrot.slane %v12390_v49, %v11439_v46  ;;  %v12418_v21 = vmul.f32 %v8864_v48, %v11946_v25  ;;  %v8516_v32 = vld [vmem:[%s16709_s5 + $0x910] sm:$0xff] }
 0x3ab   : > { %v12421_v56 = vmul.f32 %v8890_v31, %v12175_v36  ;;  %v4667_v18 = vadd.f32 %v4641_v24, %v4536_v19  ;;  %v4534_v33 = vadd.f32 %v4508_v51, %v4403_v6  ;;  %v4537_v55 = vadd.f32 %v4511_v60, %v4406_v7  ;;  %v8490_v19 = vld [vmem:[%s16709_s5 + $0x840] sm:$0xff] }
 0x3ac   : > { %v12432_v25 = vadd.f32 %v4758_v52, %v4653_v39  ;;  %v4890_v20 = vmul.f32 %v8438_v63, %v12411_v40  ;;  %v12437_v10 = vrot.slane %v12390_v49, %v11441_v38  ;;  %v4772_v53 = vmul.f32 %v8425_v23, %v12064_v45  ;;  %v8426_v6 = vld [vmem:[%s16709_s5 + $0x640] sm:$0xff] }
 0x3ad   : > { %17272 = vst [vmem:[#allocation4_spill] sm:$0xff] %v12421_v56  ;;  %v4639_v27 = vmul.f32 %v8397_v5, %v12142_v15  ;;  %v4642_v44 = vmul.f32 %v8400_v37, %v12260_v0  ;;  %v12445_v24 = vmax.f32 %v3671_v8, 0.0  ;;  %v4011_v51 = vadd.f32 %v3985_v12, %v3854_v13  ;;  %v3213_v15 = vpop.f32.mrf.mxu0  ;;  %v8542_v8 = vld [vmem:[%s16709_s5 + $0x9e0] sm:$0xff]  ;;  %v8325_v56 = vld [vmem:[%s16709_s5 + $0x318] sm:$0xff] }
 0x3ae   : > { %v4916_v3 = vadd.f32 %v4890_v20, %v12137_v1  ;;  %v5021_v48 = vmul.f32 %v8464_v57, %v12415_v29  ;;  %v12454_v45 = vrot.slane %v12390_v49, %v11444_v2  ;;  %v12456_v0 = vadd.f32 %v4772_v53, %v4667_v18  ;;  %v8320_v1 = vld [vmem:[%s16709_s5 + $0x2f0] sm:$0xff]  ;;  %v8346_v53 = vld [vmem:[%s16709_s5 + $0x3c0] sm:$0xff] }
 0x3af   : > { %v4665_v31 = vadd.f32 %v4639_v27, %v4534_v33  ;;  %v4770_v7 = vmul.f32 %v8423_v11, %v12160_v26  ;;  %v4116_v28 = vmul.f32 %v8294_v54, %v12293_v43  ;;  %v4668_v60 = vadd.f32 %v4642_v44, %v4537_v55  ;;  %v8436_v26 = vld [vmem:[%s16709_s5 + $0x690] sm:$0xff]  ;;  %v8462_v33 = vld [vmem:[%s16709_s5 + $0x760] sm:$0xff] }
 0x3b0   : > { %v5047_v13 = vadd.f32 %v5021_v48, %v4916_v3  ;;  %v5152_v12 = vmul.f32 %v8490_v19, %v12437_v10  ;;  %v12469_v63 = vrot.slane %v12390_v49, %v11451_v9  ;;  %v4773_v43 = vmul.f32 %v8426_v6, %v12286_v34  ;;  %v8488_v19 = vld [vmem:[%s16709_s5 + $0x830] sm:$0xff]  ;;  %v8594_v3 = vld [vmem:[%s16709_s5 + $0xb80] sm:$0xff] }
 0x3b1   : > { %v12480_v23 = vrot.slane %v12445_v24, %v11437_v41  ;;  %v12484_v5 = vrot.slane %v12445_v24, %v11439_v46  ;;  %v3598_v37 = vmax.f32 %v11472_v61, %v3213_v15  ;;  %v4142_v39 = vadd.f32 %v4116_v28, %v4011_v51  ;;  %v8568_v61 = vld [vmem:[%s16709_s5 + $0xab0] sm:$0xff]  ;;  %v8398_v51 = vld [vmem:[%s16709_s5 + $0x560] sm:$0xff] }
 0x3b2   : > { %v5178_v52 = vadd.f32 %v5152_v12, %v5047_v13  ;;  %v5283_v18 = vmul.f32 %v8516_v32, %v12454_v45  ;;  %v12490_v34 = vrot.slane %v12390_v49, %v11453_v35  ;;  %v12495_v57 = vadd.f32 %v4770_v7, %v4665_v31  ;;  %v8372_v6 = vld [vmem:[%s16709_s5 + $0x490] sm:$0xff] }
 0x3b3   : > { %v4247_v11 = vmul.f32 %v8320_v1, %v12305_v42  ;;  %v4888_v55 = vmul.f32 %v8436_v26, %v12480_v23  ;;  %v12504_v54 = vrot.slane %v12445_v24, %v11441_v38  ;;  %v12506_v20 = vadd.f32 %v4773_v43, %v4668_v60  ;;  %v8620_v12 = vld [vmem:[%s16709_s5 + $0xc50] sm:$0xff] }
 0x3b4   : > { %v5309_v27 = vadd.f32 %v5283_v18, %v5178_v52  ;;  %v5414_v44 = vmul.f32 %v8542_v8, %v12469_v63  ;;  %v12514_v42 = vrot.slane %v12390_v49, %v11455_v14  ;;  %v5019_v15 = vmul.f32 %v8462_v33, %v12484_v5  ;;  %v8540_v33 = vld [vmem:[%s16709_s5 + $0x9d0] sm:$0xff] }
 0x3b5   : > { %v4914_v48 = vadd.f32 %v4888_v55, %v12232_v22  ;;  %v12532_v31 = vrot.slane %v12445_v24, %v11444_v2  ;;  %v3674_v7 = vadd.f32 %v11540_v30, %v3598_v37  ;;  %v4273_v28 = vadd.f32 %v4247_v11, %v4142_v39  ;;  %v8514_v22 = vld [vmem:[%s16709_s5 + $0x900] sm:$0xff]  ;;  %v3124_v37 = vpop.f32.mrf.mxu1  ;;  %v8451_v11 = vld [vmem:[%s16709_s5 + $0x708] sm:$0xff] }
 0x3b6   : > { %v5440_v32 = vadd.f32 %v5414_v44, %v5309_v27  ;;  %v5545_v60 = vmul.f32 %v8568_v61, %v12490_v34  ;;  %v12538_v1 = vrot.slane %v12390_v49, %v11470_v4  ;;  %v4378_v13 = vmul.f32 %v8346_v53, %v12319_v59  ;;  %v8424_v59 = vld [vmem:[%s16709_s5 + $0x630] sm:$0xff]  ;;  %v3217_v53 = vpop.f32.mrf.mxu0 }
 0x3b7   : > { %v5045_v26 = vadd.f32 %v5019_v15, %v4914_v48  ;;  %v5150_v43 = vmul.f32 %v8488_v19, %v12504_v54  ;;  %v12550_v8 = vrot.slane %v12445_v24, %v11451_v9  ;;  %v4509_v49 = vmul.f32 %v8372_v6, %v12333_v62  ;;  %v8566_v6 = vld [vmem:[%s16709_s5 + $0xaa0] sm:$0xff] }
 0x3b8   : > { %v4640_v39 = vmul.f32 %v8398_v51, %v12354_v16  ;;  %v5571_v52 = vadd.f32 %v5545_v60, %v5440_v32  ;;  %v5676_v18 = vmul.f32 %v8594_v3, %v12514_v42  ;;  %v5281_v62 = vmul.f32 %v8514_v22, %v12532_v31  ;;  %v17273_v51 = vld [vmem:[#allocation17_spill] sm:$0xff] }
 0x3b9   : > { %v5176_v61 = vadd.f32 %v5150_v43, %v5045_v26  ;;  %v12567_v16 = vrot.slane %v12445_v24, %v11453_v35  ;;  %v12569_v55 = vmax.f32 %v3674_v7, 0.0  ;;  %v4404_v27 = vadd.f32 %v4378_v13, %v4273_v28  ;;  %v3128_v28 = vpop.f32.mrf.mxu1  ;;  %v8592_v13 = vld [vmem:[%s16709_s5 + $0xb70] sm:$0xff]  ;;  %v17274_v26 = vld [vmem:[#allocation47_spill] sm:$0xff] }
 0x3ba   : > { %v5702_v44 = vadd.f32 %v5676_v18, %v5571_v52  ;;  %v5807_v19 = vmul.f32 %v8620_v12, %v12538_v1  ;;  %v3596_v3 = vmax.f32 %v17273_v51, %v3124_v37  ;;  %v12577_v48 = vmul.f32 %v8424_v59, %v12375_v17  ;;  %v8439_v12 = vld [vmem:[%s16709_s5 + $0x6a8] sm:$0xff]  ;;  %v8449_v37 = vld [vmem:[%s16709_s5 + $0x6f8] sm:$0xff] }
 0x3bb   : > { %v5307_v15 = vadd.f32 %v5281_v62, %v5176_v61  ;;  %v5412_v32 = vmul.f32 %v8540_v33, %v12550_v8  ;;  %v12582_v7 = vrot.slane %v12445_v24, %v11455_v14  ;;  %v4903_v60 = vmul.f32 %v8451_v11, %v12411_v40  ;;  %v8477_v40 = vld [vmem:[%s16709_s5 + $0x7d8] sm:$0xff] }
 0x3bc   : > { %v12585_v22 = vadd.f32 %v5807_v19, %v5702_v44  ;;  %v12592_v17 = vrot.slane %v12445_v24, %v11470_v4  ;;  %v3610_v43 = vmax.f32 %v17274_v26, %v3217_v53  ;;  %v5543_v52 = vmul.f32 %v8566_v6, %v12567_v16  ;;  %v8618_v24 = vld [vmem:[%s16709_s5 + $0xc40] sm:$0xff]  ;;  %v8465_v62 = vld [vmem:[%s16709_s5 + $0x778] sm:$0xff]  ;;  %v17275_v44 = vld [vmem:[#allocation16_spill] sm:$0xff] }
 0x3bd   : > { %v5438_v59 = vadd.f32 %v5412_v32, %v5307_v15  ;;  %v4857_v18 = vrot.slane %v12569_v55, %v11437_v41  ;;  %v4988_v33 = vrot.slane %v12569_v55, %v11439_v46  ;;  %v4535_v11 = vadd.f32 %v4509_v49, %v4404_v27 }
 0x3be   : > { %v4929_v61 = vadd.f32 %v4903_v60, %v12456_v0  ;;  %v3672_v53 = vadd.f32 %v11540_v30, %v3596_v3  ;;  %v3608_v19 = vmax.f32 %v17275_v44, %v3128_v28  ;;  %v5674_v51 = vmul.f32 %v8592_v13, %v12582_v7  ;;  %v8503_v0 = vld [vmem:[%s16709_s5 + $0x8a8] sm:$0xff]  ;;  %v17276_v60 = vld [vmem:[#allocation34_spill] sm:$0xff]  ;;  %v8517_v44 = vld [vmem:[%s16709_s5 + $0x918] sm:$0xff] }
 0x3bf   : > { %v5569_v6 = vadd.f32 %v5543_v52, %v5438_v59  ;;  %v4891_v15 = vmul.f32 %v8439_v12, %v4857_v18  ;;  %v12621_v32 = vrot.slane %v12569_v55, %v11441_v38  ;;  %v5034_v49 = vmul.f32 %v8477_v40, %v12415_v29  ;;  %v8491_v28 = vld [vmem:[%s16709_s5 + $0x848] sm:$0xff]  ;;  %v8529_v12 = vld [vmem:[%s16709_s5 + $0x978] sm:$0xff] }
 0x3c0   : > { %v4901_v27 = vmul.f32 %v8449_v37, %v12480_v23  ;;  %v5805_v3 = vmul.f32 %v8618_v24, %v12592_v17  ;;  %v12633_v13 = vadd.f32 %v17276_v60, %v3610_v43  ;;  %v8475_v29 = vld [vmem:[%s16709_s5 + $0x7c8] sm:$0xff]  ;;  %v8452_v23 = vld [vmem:[%s16709_s5 + $0x710] sm:$0xff]  ;;  %v5022_v37 = vmul.f32 %v8465_v62, %v4988_v33 }
 0x3c1   : > { %v5700_v26 = vadd.f32 %v5674_v51, %v5569_v6  ;;  %v4917_v40 = vadd.f32 %v4891_v15, %v12340_v58  ;;  %v12647_v43 = vrot.slane %v12569_v55, %v11444_v2  ;;  %v12649_v59 = vadd.f32 %v4640_v39, %v4535_v11 }
 0x3c2   : > { %v5060_v52 = vadd.f32 %v5034_v49, %v4929_v61  ;;  %v4927_v24 = vadd.f32 %v4901_v27, %v12495_v57  ;;  %v12656_v6 = vadd.f32 %v17276_v60, %v3608_v19  ;;  %v5153_v62 = vmul.f32 %v8491_v28, %v12621_v32  ;;  %v8543_v19 = vld [vmem:[%s16709_s5 + $0x9e8] sm:$0xff]  ;;  %v8501_v27 = vld [vmem:[%s16709_s5 + $0x898] sm:$0xff] }
 0x3c3   : > { %v12658_v51 = vadd.f32 %v5805_v3, %v5700_v26  ;;  %v5048_v58 = vadd.f32 %v5022_v37, %v4917_v40  ;;  %v12663_v15 = vrot.slane %v12569_v55, %v11451_v9  ;;  %v5165_v39 = vmul.f32 %v8503_v0, %v12437_v10  ;;  %v8555_v49 = vld [vmem:[%s16709_s5 + $0xa48] sm:$0xff]  ;;  %v8478_v10 = vld [vmem:[%s16709_s5 + $0x7e0] sm:$0xff] }
 0x3c4   : > { %v5296_v57 = vmul.f32 %v8529_v12, %v12454_v45  ;;  %v5032_v11 = vmul.f32 %v8475_v29, %v12484_v5  ;;  %v4904_v61 = vmul.f32 %v8452_v23, %v4857_v18  ;;  %v5284_v5 = vmul.f32 %v8517_v44, %v12647_v43  ;;  %v8569_v29 = vld [vmem:[%s16709_s5 + $0xab8] sm:$0xff]  ;;  %v8595_v37 = vld [vmem:[%s16709_s5 + $0xb88] sm:$0xff] }
 0x3c5   : > { %v5179_v45 = vadd.f32 %v5153_v62, %v5048_v58  ;;  %v12683_v18 = vrot.slane %v12569_v55, %v11453_v35  ;;  %v12685_v0 = vmax.f32 %v3672_v53, 0.0  ;;  %v5191_v3 = vadd.f32 %v5165_v39, %v5060_v52  ;;  %v8437_v23 = vld [vmem:[%s16709_s5 + $0x698] sm:$0xff]  ;;  %v8463_v39 = vld [vmem:[%s16709_s5 + $0x768] sm:$0xff] }
 0x3c6   : > { %v5058_v28 = vadd.f32 %v5032_v11, %v4927_v24  ;;  %v4930_v12 = vadd.f32 %v4904_v61, %v12506_v20  ;;  %v12693_v26 = vrot.slane %v12569_v55, %v11455_v14  ;;  %v5415_v53 = vmul.f32 %v8543_v19, %v12663_v15  ;;  %v8527_v11 = vld [vmem:[%s16709_s5 + $0x968] sm:$0xff]  ;;  %v8504_v61 = vld [vmem:[%s16709_s5 + $0x8b0] sm:$0xff] }
 0x3c7   : > { %v5310_v40 = vadd.f32 %v5284_v5, %v5179_v45  ;;  %v12704_v20 = vrot.slane %v12685_v0, %v11437_v41  ;;  %v12708_v52 = vrot.slane %v12685_v0, %v11439_v46  ;;  %v5427_v24 = vmul.f32 %v8555_v49, %v12469_v63  ;;  %v8489_v5 = vld [vmem:[%s16709_s5 + $0x838] sm:$0xff] }
 0x3c8   : > { %v5163_v44 = vmul.f32 %v8501_v27, %v12504_v54  ;;  %v5035_v58 = vmul.f32 %v8478_v10, %v4988_v33  ;;  %v12714_v62 = vrot.slane %v12569_v55, %v11470_v4  ;;  %v5546_v54 = vmul.f32 %v8569_v29, %v12683_v18  ;;  %v8621_v55 = vld [vmem:[%s16709_s5 + $0xc58] sm:$0xff] }
 0x3c9   : > { %v5441_v63 = vadd.f32 %v5415_v53, %v5310_v40  ;;  %v4889_v33 = vmul.f32 %v8437_v23, %v12704_v20  ;;  %v12732_v19 = vrot.slane %v12685_v0, %v11441_v38  ;;  %v5322_v49 = vadd.f32 %v5296_v57, %v5191_v3 }
 0x3ca   : > { %v5189_v27 = vadd.f32 %v5163_v44, %v5058_v28  ;;  %v5061_v10 = vadd.f32 %v5035_v58, %v4930_v12  ;;  %v5677_v45 = vmul.f32 %v8595_v37, %v12693_v26  ;;  %v5020_v53 = vmul.f32 %v8463_v39, %v12708_v52  ;;  %v8515_v28 = vld [vmem:[%s16709_s5 + $0x908] sm:$0xff]  ;;  %v8553_v37 = vld [vmem:[%s16709_s5 + $0xa38] sm:$0xff] }
 0x3cb   : > { %v5572_v29 = vadd.f32 %v5546_v54, %v5441_v63  ;;  %v4915_v40 = vadd.f32 %v4889_v33, %v12432_v25  ;;  %v12742_v23 = vrot.slane %v12685_v0, %v11444_v2  ;;  %v5294_v36 = vmul.f32 %v8527_v11, %v12532_v31  ;;  %v8581_v25 = vld [vmem:[%s16709_s5 + $0xb18] sm:$0xff]  ;;  %v8530_v31 = vld [vmem:[%s16709_s5 + $0x980] sm:$0xff] }
 0x3cc   : > { %v5166_v57 = vmul.f32 %v8504_v61, %v12621_v32  ;;  %v5808_v3 = vmul.f32 %v8621_v55, %v12714_v62  ;;  %v12751_v12 = vmax.f32 %v12633_v13, 0.0  ;;  %v5151_v58 = vmul.f32 %v8489_v5, %v12732_v19  ;;  %v8541_v54 = vld [vmem:[%s16709_s5 + $0x9d8] sm:$0xff] }
 0x3cd   : > { %v5703_v32 = vadd.f32 %v5677_v45, %v5572_v29  ;;  %v5046_v44 = vadd.f32 %v5020_v53, %v4915_v40  ;;  %v12765_v13 = vrot.slane %v12685_v0, %v11451_v9  ;;  %v4797_v39 = vadd.f32 %v12577_v48, %v12649_v59  ;;  %v8593_v40 = vld [vmem:[%s16709_s5 + $0xb78] sm:$0xff] }
 0x3ce   : > { %v5453_v11 = vadd.f32 %v5427_v24, %v5322_v49  ;;  %v5320_v61 = vadd.f32 %v5294_v36, %v5189_v27  ;;  %v5192_v63 = vadd.f32 %v5166_v57, %v5061_v10  ;;  %v5282_v45 = vmul.f32 %v8515_v28, %v12742_v23  ;;  %v8579_v36 = vld [vmem:[%s16709_s5 + $0xb08] sm:$0xff] }
 0x3cf   : > { %v12772_v55 = vadd.f32 %v5808_v3, %v5703_v32  ;;  %v5177_v33 = vadd.f32 %v5151_v58, %v5046_v44  ;;  %v12777_v5 = vrot.slane %v12685_v0, %v11453_v35  ;;  %v5558_v29 = vmul.f32 %v8581_v25, %v12490_v34  ;;  %v8567_v24 = vld [vmem:[%s16709_s5 + $0xaa8] sm:$0xff]  ;;  %v8646_v34 = vld [vmem:[%s16709_s5 + $0xd20] sm:$0xff] }
 0x3d0   : > { %v5425_v48 = vmul.f32 %v8553_v37, %v12550_v8  ;;  %v5297_v59 = vmul.f32 %v8530_v31, %v12647_v43  ;;  %v12790_v49 = vrot.slane %v12685_v0, %v11455_v14  ;;  %v8556_v8 = vld [vmem:[%s16709_s5 + $0xa50] sm:$0xff]  ;;  %v8450_v43 = vld [vmem:[%s16709_s5 + $0x700] sm:$0xff]  ;;  %v5413_v10 = vmul.f32 %v8541_v54, %v12765_v13  ;;  %v8619_v58 = vld [vmem:[%s16709_s5 + $0xc48] sm:$0xff] }
 0x3d1   : > { %v5308_v27 = vadd.f32 %v5282_v45, %v5177_v33  ;;  %v12807_v53 = vrot.slane %v12751_v12, %v11437_v41  ;;  %v12811_v57 = vrot.slane %v12751_v12, %v11439_v46  ;;  %v5584_v3 = vadd.f32 %v5558_v29, %v5453_v11  ;;  %v8672_v31 = vld [vmem:[%s16709_s5 + $0xdf0] sm:$0xff]  ;;  %v8698_v29 = vld [vmem:[%s16709_s5 + $0xec0] sm:$0xff] }
 0x3d2   : > { %v5451_v28 = vadd.f32 %v5425_v48, %v5320_v61  ;;  %v5323_v25 = vadd.f32 %v5297_v59, %v5192_v63  ;;  %v12815_v37 = vrot.slane %v12685_v0, %v11470_v4  ;;  %v5544_v44 = vmul.f32 %v8567_v24, %v12777_v5  ;;  %v8607_v0 = vld [vmem:[%s16709_s5 + $0xbe8] sm:$0xff]  ;;  %v8605_v48 = vld [vmem:[%s16709_s5 + $0xbd8] sm:$0xff]  ;;  %v8582_v59 = vld [vmem:[%s16709_s5 + $0xb20] sm:$0xff] }
 0x3d3   : > { %v5439_v32 = vadd.f32 %v5413_v10, %v5308_v27  ;;  %v5938_v54 = vmul.f32 %v8646_v34, %v12807_v53  ;;  %v12827_v11 = vrot.slane %v12751_v12, %v11441_v38  ;;  %v5556_v61 = vmul.f32 %v8579_v36, %v12567_v16  ;;  %v8476_v16 = vld [vmem:[%s16709_s5 + $0x7d0] sm:$0xff] }
 0x3d4   : > { %v5428_v63 = vmul.f32 %v8556_v8, %v12663_v15  ;;  %v4902_v33 = vmul.f32 %v8450_v43, %v12704_v20  ;;  %v5675_v45 = vmul.f32 %v8593_v40, %v12790_v49  ;;  %v6069_v36 = vmul.f32 %v8672_v31, %v12811_v57  ;;  %v8724_v10 = vld [vmem:[%s16709_s5 + $0xf90] sm:$0xff] }
 0x3d5   : > { %v5570_v15 = vadd.f32 %v5544_v44, %v5439_v32  ;;  %v5964_v20 = vadd.f32 %v5938_v54, %v12585_v22  ;;  %v12852_v24 = vrot.slane %v12751_v12, %v11444_v2  ;;  %v5582_v34 = vadd.f32 %v5556_v61, %v5451_v28  ;;  %v8916_v40 = vld [vmem:[%s16709_s5 + $0x1590] sm:$0xff]  ;;  %v8633_v28 = vld [vmem:[%s16709_s5 + $0xcb8] sm:$0xff]  ;;  %v8750_v61 = vld [vmem:[%s16709_s5 + $0x1060] sm:$0xff] }
 0x3d6   : > { %v5454_v8 = vadd.f32 %v5428_v63, %v5323_v25  ;;  %v4928_v43 = vadd.f32 %v4902_v33, %v4797_v39  ;;  %v5806_v27 = vmul.f32 %v8619_v58, %v12815_v37  ;;  %v6200_v31 = vmul.f32 %v8698_v29, %v12827_v11  ;;  %v8631_v63 = vld [vmem:[%s16709_s5 + $0xca8] sm:$0xff] }
 0x3d7   : > { %v5701_v22 = vadd.f32 %v5675_v45, %v5570_v15  ;;  %v6095_v32 = vadd.f32 %v6069_v36, %v5964_v20  ;;  %v12864_v44 = vrot.slane %v12751_v12, %v11451_v9  ;;  %v5689_v39 = vmul.f32 %v8607_v0, %v12514_v42  ;;  %v8608_v42 = vld [vmem:[%s16709_s5 + $0xbf0] sm:$0xff] }
 0x3d8   : > { %v5687_v25 = vmul.f32 %v8605_v48, %v12582_v7  ;;  %v5559_v58 = vmul.f32 %v8582_v59, %v12683_v18  ;;  %v5033_v54 = vmul.f32 %v8476_v16, %v12708_v52  ;;  %v8502_v7 = vld [vmem:[%s16709_s5 + $0x8a0] sm:$0xff]  ;;  %v6331_v52 = vmul.f32 %v8724_v10, %v12852_v24  ;;  %v17277_v45 = vld [vmem:[#allocation72_spill] sm:$0xff] }
 0x3d9   : > { %v12885_v0 = vadd.f32 %v5806_v27, %v5701_v22  ;;  %v6226_v18 = vadd.f32 %v6200_v31, %v6095_v32  ;;  %v12890_v33 = vrot.slane %v12751_v12, %v11453_v35  ;;  %v12893_v29 = vmul.f32 %v8916_v40, %v17277_v45  ;;  %v8776_v15 = vld [vmem:[%s16709_s5 + $0x1130] sm:$0xff]  ;;  %v3219_v31 = vpop.f32.mrf.mxu0 }
 0x3da   : > { %v5715_v48 = vadd.f32 %v5689_v39, %v5584_v3  ;;  %v5585_v59 = vadd.f32 %v5559_v58, %v5454_v8  ;;  %v5059_v16 = vadd.f32 %v5033_v54, %v4928_v43  ;;  %v5713_v20 = vadd.f32 %v5687_v25, %v5582_v34  ;;  %v8644_v8 = vld [vmem:[%s16709_s5 + $0xd10] sm:$0xff]  ;;  %v8634_v34 = vld [vmem:[%s16709_s5 + $0xcc0] sm:$0xff] }
 0x3db   : > { %17278 = vst [vmem:[#allocation7_spill] sm:$0xff] %v12893_v29  ;;  %v6357_v36 = vadd.f32 %v6331_v52, %v6226_v18  ;;  %v6462_v27 = vmul.f32 %v8750_v61, %v12864_v44  ;;  %v12900_v10 = vmax.f32 %v12656_v6, 0.0  ;;  %v5820_v22 = vmul.f32 %v8633_v28, %v12538_v1  ;;  %v8528_v6 = vld [vmem:[%s16709_s5 + $0x970] sm:$0xff]  ;;  %v8554_v1 = vld [vmem:[%s16709_s5 + $0xa40] sm:$0xff] }
 0x3dc   : > { %v5818_v32 = vmul.f32 %v8631_v63, %v12592_v17  ;;  %v5690_v40 = vmul.f32 %v8608_v42, %v12693_v26  ;;  %v5164_v3 = vmul.f32 %v8502_v7, %v12732_v19  ;;  %v6593_v26 = vmul.f32 %v8776_v15, %v12890_v33  ;;  %v17279_v39 = vld [vmem:[#allocation8_spill] sm:$0xff]  ;;  %v8670_v63 = vld [vmem:[%s16709_s5 + $0xde0] sm:$0xff] }
 0x3dd   : > { %v6488_v17 = vadd.f32 %v6462_v27, %v6357_v36  ;;  %v5893_v19 = vrot.slane %v12900_v10, %v11437_v41  ;;  %v6024_v43 = vrot.slane %v12900_v10, %v11439_v46  ;;  %v12925_v28 = vadd.f32 %v12418_v21, %v17279_v39  ;;  %v8580_v61 = vld [vmem:[%s16709_s5 + $0xb10] sm:$0xff]  ;;  %v8606_v7 = vld [vmem:[%s16709_s5 + $0xbe0] sm:$0xff]  ;;  %v8659_v21 = vld [vmem:[%s16709_s5 + $0xd88] sm:$0xff] }
 0x3de   : > { %v5846_v25 = vadd.f32 %v5820_v22, %v5715_v48  ;;  %v5716_v58 = vadd.f32 %v5690_v40, %v5585_v59  ;;  %v5190_v54 = vadd.f32 %v5164_v3, %v5059_v16  ;;  %v5844_v42 = vadd.f32 %v5818_v32, %v5713_v20  ;;  %v8657_v20 = vld [vmem:[%s16709_s5 + $0xd78] sm:$0xff]  ;;  %v8696_v36 = vld [vmem:[%s16709_s5 + $0xeb0] sm:$0xff]  ;;  %v17282_v27 = vld [vmem:[#allocation38_spill] sm:$0xff]  ;;  %v3130_v3 = vpop.f32.mrf.mxu1 }
 0x3df   : > { %17280 = vst [vmem:[#allocation57_spill] sm:$0xff] %v12925_v28  ;;  %v12939_v18 = vadd.f32 %v6593_v26, %v6488_v17  ;;  %v5936_v52 = vmul.f32 %v8644_v8, %v5893_v19  ;;  %v12943_v48 = vrot.slane %v12900_v10, %v11441_v38  ;;  %v5821_v59 = vmul.f32 %v8634_v34, %v12714_v62  ;;  %v8632_v62 = vld [vmem:[%s16709_s5 + $0xcb0] sm:$0xff]  ;;  %v8711_v17 = vld [vmem:[%s16709_s5 + $0xf28] sm:$0xff] }
 0x3e0   : > { %v5295_v16 = vmul.f32 %v8528_v6, %v12742_v23  ;;  %v5426_v15 = vmul.f32 %v8554_v1, %v12765_v13  ;;  %v3611_v22 = vmax.f32 %v17282_v27, %v3219_v31  ;;  %v5557_v32 = vmul.f32 %v8580_v61, %v12777_v5  ;;  %v8722_v1 = vld [vmem:[%s16709_s5 + $0xf80] sm:$0xff]  ;;  %v8748_v61 = vld [vmem:[%s16709_s5 + $0x1050] sm:$0xff] }
 0x3e1   : > { %17281 = vst [vmem:[#allocation3_spill] sm:$0xff] %v12939_v18  ;;  %v5962_v23 = vadd.f32 %v5936_v52, %v12658_v51  ;;  %v6067_v40 = vmul.f32 %v8670_v63, %v6024_v43  ;;  %v12962_v13 = vrot.slane %v12900_v10, %v11444_v2  ;;  %v12964_v8 = vadd.f32 %v5821_v59, %v5716_v58  ;;  %v8685_v51 = vld [vmem:[%s16709_s5 + $0xe58] sm:$0xff]  ;;  %v17283_v63 = vld [vmem:[#allocation14_spill] sm:$0xff] }
 0x3e2   : > { %v5321_v34 = vadd.f32 %v5295_v16, %v5190_v54  ;;  %v12967_v6 = vmul.f32 %v8606_v7, %v12790_v49  ;;  %v5951_v5 = vmul.f32 %v8659_v21, %v12807_v53  ;;  %v5949_v26 = vmul.f32 %v8657_v20, %v5893_v19  ;;  %v8683_v54 = vld [vmem:[%s16709_s5 + $0xe48] sm:$0xff] }
 0x3e3   : > { %v6093_v31 = vadd.f32 %v6067_v40, %v5962_v23  ;;  %v6198_v39 = vmul.f32 %v8696_v36, %v12943_v48  ;;  %v12982_v49 = vrot.slane %v12900_v10, %v11451_v9  ;;  %v12985_v53 = vmul.f32 %v8632_v62, %v12815_v37  ;;  %v8774_v36 = vld [vmem:[%s16709_s5 + $0x1120] sm:$0xff]  ;;  %v8763_v40 = vld [vmem:[%s16709_s5 + $0x10c8] sm:$0xff] }
 0x3e4   : > { %v5977_v58 = vadd.f32 %v5951_v5, %v5846_v25  ;;  %v3687_v19 = vadd.f32 %v17276_v60, %v3611_v22  ;;  %v3609_v7 = vmax.f32 %v17283_v63, %v3130_v3  ;;  %v5975_v21 = vadd.f32 %v5949_v26, %v5844_v42  ;;  %v8737_v42 = vld [vmem:[%s16709_s5 + $0xff8] sm:$0xff]  ;;  %v8800_v3 = vld [vmem:[%s16709_s5 + $0x11f0] sm:$0xff] }
 0x3e5   : > { %v6224_v52 = vadd.f32 %v6198_v39, %v6093_v31  ;;  %v6329_v59 = vmul.f32 %v8722_v1, %v12962_v13  ;;  %v12998_v37 = vrot.slane %v12900_v10, %v11453_v35  ;;  %v5452_v25 = vadd.f32 %v5426_v15, %v5321_v34  ;;  %v8673_v39 = vld [vmem:[%s16709_s5 + $0xdf8] sm:$0xff] }
 0x3e6   : > { %v6082_v16 = vmul.f32 %v8685_v51, %v12811_v57  ;;  %v6213_v20 = vmul.f32 %v8711_v17, %v12827_v11  ;;  %v13005_v27 = vmax.f32 %v3687_v19, 0.0  ;;  %v6080_v22 = vmul.f32 %v8683_v54, %v6024_v43  ;;  %v8647_v57 = vld [vmem:[%s16709_s5 + $0xd28] sm:$0xff]  ;;  %v8709_v43 = vld [vmem:[%s16709_s5 + $0xf18] sm:$0xff] }
 0x3e7   : > { %v6355_v62 = vadd.f32 %v6329_v59, %v6224_v52  ;;  %v6460_v23 = vmul.f32 %v8748_v61, %v12982_v49  ;;  %v13013_v15 = vrot.slane %v12900_v10, %v11455_v14  ;;  %v3685_v1 = vadd.f32 %v17276_v60, %v3609_v7  ;;  %v8826_v61 = vld [vmem:[%s16709_s5 + $0x12c0] sm:$0xff]  ;;  %v8660_v59 = vld [vmem:[%s16709_s5 + $0xd90] sm:$0xff] }
 0x3e8   : > { %v6108_v11 = vadd.f32 %v6082_v16, %v5977_v58  ;;  %v5905_v34 = vrot.slane %v13005_v27, %v11437_v41  ;;  %v6036_v5 = vrot.slane %v13005_v27, %v11439_v46  ;;  %v6106_v51 = vadd.f32 %v6080_v22, %v5975_v21 }
 0x3e9   : > { %v6486_v17 = vadd.f32 %v6460_v23, %v6355_v62  ;;  %v6591_v26 = vmul.f32 %v8774_v36, %v12998_v37  ;;  %v13035_v31 = vrot.slane %v12900_v10, %v11470_v4  ;;  %v5583_v58 = vadd.f32 %v5557_v32, %v5452_v25  ;;  %v8735_v32 = vld [vmem:[%s16709_s5 + $0xfe8] sm:$0xff]  ;;  %v8725_v23 = vld [vmem:[%s16709_s5 + $0xf98] sm:$0xff] }
 0x3ea   : > { %v6344_v54 = vmul.f32 %v8737_v42, %v12852_v24  ;;  %v5939_v19 = vmul.f32 %v8647_v57, %v5905_v34  ;;  %v13046_v63 = vrot.slane %v13005_v27, %v11441_v38  ;;  %v6475_v7 = vmul.f32 %v8763_v40, %v12864_v44  ;;  %v8699_v24 = vld [vmem:[%s16709_s5 + $0xec8] sm:$0xff] }
 0x3eb   : > { %v6211_v10 = vmul.f32 %v8709_v43, %v12943_v48  ;;  %v6617_v21 = vadd.f32 %v6591_v26, %v6486_v17  ;;  %v6722_v52 = vmul.f32 %v8800_v3, %v13013_v15  ;;  %v6070_v44 = vmul.f32 %v8673_v39, %v6036_v5  ;;  %v8789_v17 = vld [vmem:[%s16709_s5 + $0x1198] sm:$0xff] }
 0x3ec   : > { %v5965_v25 = vadd.f32 %v5939_v19, %v12772_v55  ;;  %v13063_v48 = vrot.slane %v13005_v27, %v11444_v2  ;;  %v13065_v16 = vmax.f32 %v3685_v1, 0.0  ;;  %v6239_v36 = vadd.f32 %v6213_v20, %v6108_v11  ;;  %v8761_v26 = vld [vmem:[%s16709_s5 + $0x10b8] sm:$0xff] }
 0x3ed   : > { %v6237_v42 = vadd.f32 %v6211_v10, %v6106_v51  ;;  %v6748_v22 = vadd.f32 %v6722_v52, %v6617_v21  ;;  %v6853_v62 = vmul.f32 %v8826_v61, %v13035_v31  ;;  %v5714_v57 = vadd.f32 %v12967_v6, %v5583_v58  ;;  %v8751_v6 = vld [vmem:[%s16709_s5 + $0x1068] sm:$0xff]  ;;  %v8645_v51 = vld [vmem:[%s16709_s5 + $0xd18] sm:$0xff] }
 0x3ee   : > { %v6096_v40 = vadd.f32 %v6070_v44, %v5965_v25  ;;  %v6201_v55 = vmul.f32 %v8699_v24, %v13046_v63  ;;  %v13075_v43 = vrot.slane %v13005_v27, %v11451_v9  ;;  %v13079_v20 = vrot.slane %v12751_v12, %v11455_v14  ;;  %v8671_v24 = vld [vmem:[%s16709_s5 + $0xde8] sm:$0xff] }
 0x3ef   : > { %v6342_v11 = vmul.f32 %v8735_v32, %v12962_v13  ;;  %v13082_v3 = vadd.f32 %v6853_v62, %v6748_v22  ;;  %v5952_v1 = vmul.f32 %v8660_v59, %v5905_v34  ;;  %v8686_v13 = vld [vmem:[%s16709_s5 + $0xe60] sm:$0xff]  ;;  %v6332_v39 = vmul.f32 %v8725_v23, %v13063_v48  ;;  %v8815_v32 = vld [vmem:[%s16709_s5 + $0x1268] sm:$0xff]  ;;  %v8841_v59 = vld [vmem:[%s16709_s5 + $0x1338] sm:$0xff] }
 0x3f0   : > { %17284 = vst [vmem:[#allocation62_spill] sm:$0xff] %v13079_v20  ;;  %v6227_v34 = vadd.f32 %v6201_v55, %v6096_v40  ;;  %v5897_v58 = vrot.slane %v13065_v16, %v11437_v41  ;;  %v6028_v61 = vrot.slane %v13065_v16, %v11439_v46  ;;  %v6370_v19 = vadd.f32 %v6344_v54, %v6239_v36  ;;  %v8697_v23 = vld [vmem:[%s16709_s5 + $0xeb8] sm:$0xff]  ;;  %v8787_v40 = vld [vmem:[%s16709_s5 + $0x1188] sm:$0xff] }
 0x3f1   : > { %17285 = vst [vmem:[#allocation73_spill] sm:$0xff] %v13082_v3  ;;  %v13106_v10 = vrot.slane %v12751_v12, %v11470_v4  ;;  %v6368_v21 = vadd.f32 %v6342_v11, %v6237_v42  ;;  %v5978_v52 = vadd.f32 %v5952_v1, %v12964_v8  ;;  %v6463_v25 = vmul.f32 %v8751_v6, %v13075_v43  ;;  %v3223_v8 = vpop.f32.mrf.mxu0  ;;  %v8658_v11 = vld [vmem:[%s16709_s5 + $0xd80] sm:$0xff] }
 0x3f2   : > { %v6358_v54 = vadd.f32 %v6332_v39, %v6227_v34  ;;  %v5937_v12 = vmul.f32 %v8645_v51, %v5897_v58  ;;  %v13121_v44 = vrot.slane %v13065_v16, %v11441_v38  ;;  %v5845_v36 = vadd.f32 %v12985_v53, %v5714_v57 }
 0x3f3   : > { %17286 = vst [vmem:[#allocation74_spill] sm:$0xff] %v13106_v10  ;;  %v6606_v42 = vmul.f32 %v8789_v17, %v12890_v33  ;;  %v6473_v22 = vmul.f32 %v8761_v26, %v12982_v49  ;;  %v6083_v62 = vmul.f32 %v8686_v13, %v6036_v5  ;;  %v6068_v33 = vmul.f32 %v8671_v24, %v6028_v61  ;;  %v3134_v5 = vpop.f32.mrf.mxu1  ;;  %v8712_v17 = vld [vmem:[%s16709_s5 + $0xf30] sm:$0xff]  ;;  %v13159_v39 = vpop.f32.mrf.mxu0  ;;  %v8749_v24 = vld [vmem:[%s16709_s5 + $0x1058] sm:$0xff] }
 0x3f4   : > { %v13132_v55 = vadd.f32 %v6463_v25, %v6358_v54  ;;  %v5963_v53 = vadd.f32 %v5937_v12, %v12885_v0  ;;  %v13140_v49 = vrot.slane %v13065_v16, %v11444_v2  ;;  %v6501_v57 = vadd.f32 %v6475_v7, %v6370_v19  ;;  %v8723_v0 = vld [vmem:[%s16709_s5 + $0xf88] sm:$0xff]  ;;  %v17291_v54 = vld [vmem:[#allocation9_spill] sm:$0xff] }
 0x3f5   : > { %v13143_v1 = vmul.f32 %v8815_v32, %v13079_v20  ;;  %v13146_v6 = vmul.f32 %v8841_v59, %v13106_v10  ;;  %v6499_v51 = vadd.f32 %v6473_v22, %v6368_v21  ;;  %v6109_v26 = vadd.f32 %v6083_v62, %v5978_v52  ;;  %v17290_v32 = vld [vmem:[#allocation2_spill] sm:$0xff]  ;;  %v8813_v25 = vld [vmem:[%s16709_s5 + $0x1258] sm:$0xff]  ;;  %v8684_v22 = vld [vmem:[%s16709_s5 + $0xe50] sm:$0xff] }
 0x3f6   : > { %17287 = vst [vmem:[#allocation86_spill] sm:$0xff] %v13132_v55  ;;  %v6094_v13 = vadd.f32 %v6068_v33, %v5963_v53  ;;  %v6199_v34 = vmul.f32 %v8697_v23, %v13121_v44  ;;  %v13157_v7 = vrot.slane %v13065_v16, %v11451_v9  ;;  %v6604_v19 = vmul.f32 %v8787_v40, %v12998_v37  ;;  %v13177_v23 = vpop.f32.mrf.mxu1  ;;  %v8775_v53 = vld [vmem:[%s16709_s5 + $0x1128] sm:$0xff]  ;;  %v17293_v33 = vld [vmem:[#allocation65_spill] sm:$0xff] }
 0x3f7   : > { %17288 = vst [vmem:[#allocation51_spill] sm:$0xff] %v13143_v1  ;;  %17289 = vst [vmem:[#allocation84_spill] sm:$0xff] %v13146_v6  ;;  %v5950_v21 = vmul.f32 %v8658_v11, %v5897_v58  ;;  %v3623_v59 = vmax.f32 %v17290_v32, %v3223_v8  ;;  %v3621_v52 = vmax.f32 %v17291_v54, %v3134_v5  ;;  %v8738_v11 = vld [vmem:[%s16709_s5 + $0x1000] sm:$0xff]  ;;  %v3383_v54 = vpop.f32.mrf.mxu0  ;;  %v8403_v6 = vld [vmem:[%s16709_s5 + $0x588] sm:$0xff] }
 0x3f8   : > { %v6214_v12 = vmul.f32 %v8712_v17, %v13046_v63  ;;  %v6225_v37 = vadd.f32 %v6199_v34, %v6094_v13  ;;  %v6330_v58 = vmul.f32 %v8723_v0, %v13140_v49  ;;  %v6552_v62 = vrot.slane %v13065_v16, %v11453_v35  ;;  %v8839_v17 = vld [vmem:[%s16709_s5 + $0x1328] sm:$0xff]  ;;  %v8801_v34 = vld [vmem:[%s16709_s5 + $0x11f8] sm:$0xff] }
 0x3f9   : > { %v13179_v8 = vadd.f32 %v6606_v42, %v6501_v57  ;;  %v6630_v40 = vadd.f32 %v6604_v19, %v6499_v51  ;;  %v5976_v63 = vadd.f32 %v5950_v21, %v5845_v36  ;;  %v6461_v57 = vmul.f32 %v8749_v24, %v13157_v7  ;;  %v17294_v19 = vld [vmem:[#allocation36_spill] sm:$0xff] }
 0x3fa   : > { %v6240_v0 = vadd.f32 %v6214_v12, %v6109_v26  ;;  %v6356_v42 = vadd.f32 %v6330_v58, %v6225_v37  ;;  %v6683_v51 = vrot.slane %v13065_v16, %v11455_v14  ;;  %v6735_v36 = vmul.f32 %v8813_v25, %v13013_v15  ;;  %v8710_v12 = vld [vmem:[%s16709_s5 + $0xf20] sm:$0xff]  ;;  %v3294_v25 = vpop.f32.mrf.mxu1 }
 0x3fb   : > { %17292 = vst [vmem:[#allocation85_spill] sm:$0xff] %v13179_v8  ;;  %v6081_v13 = vmul.f32 %v8684_v22, %v6028_v61  ;;  %v3699_v21 = vadd.f32 %v17294_v19, %v3623_v59  ;;  %v3697_v32 = vadd.f32 %v17294_v19, %v3621_v52  ;;  %v6345_v26 = vmul.f32 %v8738_v11, %v13063_v48  ;;  %v8764_v59 = vld [vmem:[%s16709_s5 + $0x10d0] sm:$0xff]  ;;  %v8777_v48 = vld [vmem:[%s16709_s5 + $0x1138] sm:$0xff]  ;;  %v8519_v8 = vld [vmem:[%s16709_s5 + $0x928] sm:$0xff] }
 0x3fc   : > { %v6560_v24 = vrot.slane %v13005_v27, %v11453_v35  ;;  %v6487_v15 = vadd.f32 %v6461_v57, %v6356_v42  ;;  %v6592_v61 = vmul.f32 %v8775_v53, %v6552_v62  ;;  %v6761_v22 = vadd.f32 %v6735_v36, %v6630_v40  ;;  %v8790_v40 = vld [vmem:[%s16709_s5 + $0x11a0] sm:$0xff]  ;;  %v8816_v57 = vld [vmem:[%s16709_s5 + $0x1270] sm:$0xff] }
 0x3fd   : > { %v6866_v37 = vmul.f32 %v8839_v17, %v13035_v31  ;;  %v13216_v52 = vrot.slane %v13005_v27, %v11455_v14  ;;  %v6107_v58 = vadd.f32 %v6081_v13, %v5976_v63  ;;  %v6371_v11 = vadd.f32 %v6345_v26, %v6240_v0  ;;  %v17296_v17 = vld [vmem:[#allocation66_spill] sm:$0xff]  ;;  %v17299_v63 = vld [vmem:[#allocation21_spill] sm:$0xff] }
 0x3fe   : > { %v6618_v53 = vadd.f32 %v6592_v61, %v6487_v15  ;;  %v6723_v31 = vmul.f32 %v8801_v34, %v6683_v51  ;;  %v3588_v42 = vmax.f32 %v17296_v17, %v3383_v54  ;;  %v6212_v36 = vmul.f32 %v8710_v12, %v13121_v44  ;;  %v8736_v34 = vld [vmem:[%s16709_s5 + $0xff0] sm:$0xff]  ;;  %v8762_v54 = vld [vmem:[%s16709_s5 + $0x10c0] sm:$0xff] }
 0x3ff   : > { %17295 = vst [vmem:[#allocation70_spill] sm:$0xff] %v13216_v52  ;;  %v13226_v5 = vmax.f32 %v3699_v21, 0.0  ;;  %v13228_v3 = vmax.f32 %v3697_v32, 0.0  ;;  %v3586_v0 = vmax.f32 %v17299_v63, %v3294_v25  ;;  %v6476_v13 = vmul.f32 %v8764_v59, %v13075_v43  ;;  %v8788_v44 = vld [vmem:[%s16709_s5 + $0x1190] sm:$0xff]  ;;  %v17302_v32 = vld [vmem:[#allocation35_spill] sm:$0xff]  ;;  %v8814_v25 = vld [vmem:[%s16709_s5 + $0x1260] sm:$0xff] }
 0x400   : > { %v13232_v26 = vmul.f32 %v8777_v48, %v6560_v24  ;;  %v13243_v21 = vadd.f32 %v6723_v31, %v6618_v53  ;;  %v3664_v12 = vadd.f32 %v17302_v32, %v3588_v42  ;;  %v13246_v15 = vadd.f32 %v6866_v37, %v6761_v22 }
 0x401   : > { %17297 = vst [vmem:[#allocation71_spill] sm:$0xff] %v13226_v5  ;;  %17298 = vst [vmem:[#allocation82_spill] sm:$0xff] %v13228_v3  ;;  %v13248_v43 = vmul.f32 %v8790_v40, %v6560_v24  ;;  %v6238_v61 = vadd.f32 %v6212_v36, %v6107_v58  ;;  %v13255_v59 = vrot.slane %v13065_v16, %v11470_v4  ;;  %v8840_v24 = vld [vmem:[%s16709_s5 + $0x1330] sm:$0xff] }
 0x402   : > { %17300 = vst [vmem:[#allocation83_spill] sm:$0xff] %v13232_v26  ;;  %17301 = vst [vmem:[#allocation80_spill] sm:$0xff] %v13243_v21  ;;  %v13257_v48 = vadd.f32 %v6476_v13, %v6371_v11  ;;  %v13260_v53 = vmul.f32 %v8816_v57, %v13216_v52  ;;  %v13264_v22 = vrot.slane %v13005_v27, %v11470_v4  ;;  %v3716_v37 = vmax.f32 %v3664_v12, 0.0  ;;  %v3768_v11 = vld [vmem:[%s16709_s5 + $0x40] sm:$0xff]  ;;  %v8260_v27 = vld [vmem:[%s16709_s5 + $0x110] sm:$0xff] }
 0x403   : > { %17303 = vst [vmem:[#allocation81_spill] sm:$0xff] %v13246_v15  ;;  %17304 = vst [vmem:[#allocation63_spill] sm:$0xff] %v13248_v43  ;;  %v6343_v58 = vmul.f32 %v8736_v34, %v13140_v49  ;;  %v6474_v40 = vmul.f32 %v8762_v54, %v13157_v7  ;;  %v13271_v16 = vmul.f32 %v8788_v44, %v6552_v62  ;;  %v3385_v62 = vpop.f32.mrf.mxu0  ;;  %v8865_v13 = vld [vmem:[%s16709_s5 + $0x13f8] sm:$0xff]  ;;  %v17312_v34 = vld [vmem:[#allocation52_spill] sm:$0xff] }
 0x404   : > { %17305 = vst [vmem:[#allocation64_spill] sm:$0xff] %v13255_v59  ;;  %17306 = vst [vmem:[#allocation76_spill] sm:$0xff] %v13257_v48  ;;  %v3662_v31 = vadd.f32 %v17302_v32, %v3586_v0  ;;  %v13280_v17 = vmul.f32 %v8814_v25, %v6683_v51  ;;  %v3821_v42 = vrot.slane %v3716_v37, %v11437_v41  ;;  %v8286_v0 = vld [vmem:[%s16709_s5 + $0x1e0] sm:$0xff]  ;;  %v8891_v52 = vld [vmem:[%s16709_s5 + $0x14c8] sm:$0xff] }
 0x405   : > { %17307 = vst [vmem:[#allocation58_spill] sm:$0xff] %v13260_v53  ;;  %17308 = vst [vmem:[#allocation59_spill] sm:$0xff] %v13264_v22  ;;  %v3952_v49 = vrot.slane %v3716_v37, %v11439_v46  ;;  %v13285_v7 = vrot.slane %v3716_v37, %v11441_v38  ;;  %v6369_v57 = vadd.f32 %v6343_v58, %v6238_v61  ;;  %v8312_v58 = vld [vmem:[%s16709_s5 + $0x2b0] sm:$0xff]  ;;  %v8297_v53 = vld [vmem:[%s16709_s5 + $0x238] sm:$0xff] }
 0x406   : > { %v13288_v36 = vmul.f32 %v8840_v24, %v13255_v59  ;;  %v13292_v63 = vrot.slane %v13226_v5, %v11437_v41  ;;  %v13296_v51 = vrot.slane %v13228_v3, %v11437_v41  ;;  %v3622_v54 = vmax.f32 %v17312_v34, %v13177_v23  ;;  %v17315_v23 = vld [vmem:[#allocation60_spill] sm:$0xff] }
 0x407   : > { %v3846_v44 = vmul.f32 %v3821_v42, %v3768_v11  ;;  %v3977_v12 = vmul.f32 %v8260_v27, %v3952_v49  ;;  %v13307_v61 = vrot.slane %v3716_v37, %v11444_v2  ;;  %v13311_v25 = vrot.slane %v13226_v5, %v11439_v46  ;;  %v8264_v48 = vld [vmem:[%s16709_s5 + $0x130] sm:$0xff] }
 0x408   : > { %17309 = vst [vmem:[#allocation77_spill] sm:$0xff] %v13288_v36  ;;  %17310 = vst [vmem:[#allocation78_spill] sm:$0xff] %v13292_v63  ;;  %v13315_v24 = vrot.slane %v13228_v3, %v11439_v46  ;;  %v13320_v45 = vmax.f32 %v3662_v31, 0.0  ;;  %v3589_v11 = vmax.f32 %v17315_v23, %v3385_v62  ;;  %v13325_v27 = vrot.slane %v13228_v3, %v11441_v38 }
 0x409   : > { %17311 = vst [vmem:[#allocation53_spill] sm:$0xff] %v13296_v51  ;;  %17313 = vst [vmem:[#allocation79_spill] sm:$0xff] %v13311_v25  ;;  %v4003_v34 = vadd.f32 %v3977_v12, %v3846_v44  ;;  %v4108_v21 = vmul.f32 %v8286_v0, %v13285_v7  ;;  %v13329_v59 = vrot.slane %v3716_v37, %v11451_v9  ;;  %v8338_v0 = vld [vmem:[%s16709_s5 + $0x380] sm:$0xff] }
 0x40a   : > { %17314 = vst [vmem:[#allocation54_spill] sm:$0xff] %v13315_v24  ;;  %17316 = vst [vmem:[#allocation55_spill] sm:$0xff] %v13325_v27  ;;  %v6500_v10 = vadd.f32 %v6474_v40, %v6369_v57  ;;  %v13332_v18 = vmul.f32 %v8865_v13, %v13296_v51  ;;  %v13336_v31 = vrot.slane %v13228_v3, %v11444_v2  ;;  %v3781_v40 = vld [vmem:[%s16709_s5 + $0xa8] sm:$0xff] }
 0x40b   : > { %v17319_v62 = vmax.f32 %v17293_v33, %v13159_v39  ;;  %v3698_v44 = vadd.f32 %v17294_v19, %v3622_v54  ;;  %v4134_v57 = vadd.f32 %v4108_v21, %v4003_v34  ;;  %v4239_v13 = vmul.f32 %v8312_v58, %v13307_v61  ;;  %v3766_v39 = vld [vmem:[%s16709_s5 + $0x30] sm:$0xff]  ;;  %v8258_v33 = vld [vmem:[%s16709_s5 + $0x100] sm:$0xff]  ;;  %v8273_v54 = vld [vmem:[%s16709_s5 + $0x178] sm:$0xff] }
 0x40c   : > { %17317 = vst [vmem:[#allocation56_spill] sm:$0xff] %v13332_v18  ;;  %17318 = vst [vmem:[#allocation100_spill] sm:$0xff] %v13336_v31  ;;  %v13351_v12 = vrot.slane %v3716_v37, %v11453_v35  ;;  %v8364_v21 = vld [vmem:[%s16709_s5 + $0x450] sm:$0xff]  ;;  %v13367_v58 = vrot.slane %v13320_v45, %v11437_v41  ;;  %v13371_v34 = vrot.slane %v13320_v45, %v11439_v46 }
 0x40d   : > { %v3700_v23 = vadd.f32 %v17294_v19, %v17319_v62  ;;  %v13375_v62 = vrot.slane %v13320_v45, %v11441_v38  ;;  %v3665_v51 = vadd.f32 %v17302_v32, %v3589_v11  ;;  %v4265_v20 = vadd.f32 %v4239_v13, %v4134_v57  ;;  %v8390_v11 = vld [vmem:[%s16709_s5 + $0x520] sm:$0xff] }
 0x40e   : > { %v4370_v26 = vmul.f32 %v8338_v0, %v13329_v59  ;;  %v13383_v55 = vrot.slane %v3716_v37, %v11455_v14  ;;  %v13386_v50 = vrot.slane %v3716_v37, %v11470_v4  ;;  %v3859_v3 = vmul.f32 %v3821_v42, %v3781_v40  ;;  %v8310_v42 = vld [vmem:[%s16709_s5 + $0x2a0] sm:$0xff] }
 0x40f   : > { %v3844_v31 = vmul.f32 %v13367_v58, %v3766_v39  ;;  %v3975_v57 = vmul.f32 %v8258_v33, %v13371_v34  ;;  %v13398_v0 = vrot.slane %v13320_v45, %v11444_v2  ;;  %v3990_v13 = vmul.f32 %v8273_v54, %v3952_v49  ;;  %v8416_v33 = vld [vmem:[%s16709_s5 + $0x5f0] sm:$0xff] }
 0x410   : > { %v4396_v37 = vadd.f32 %v4370_v26, %v4265_v20  ;;  %v4501_v29 = vmul.f32 %v8364_v21, %v13351_v12  ;;  %v13406_v40 = vrot.slane %v13320_v45, %v11451_v9  ;;  %v13409_v39 = vmul.f32 %v8891_v52, %v13315_v24  ;;  %v8336_v26 = vld [vmem:[%s16709_s5 + $0x370] sm:$0xff] }
 0x411   : > { %v4001_v27 = vadd.f32 %v3975_v57, %v3844_v31  ;;  %v4106_v20 = vmul.f32 %v8284_v47, %v13375_v62  ;;  %v13418_v49 = vmax.f32 %v3665_v51, 0.0  ;;  %v6631_v54 = vadd.f32 %v13271_v16, %v6500_v10  ;;  %v8299_v31 = vld [vmem:[%s16709_s5 + $0x248] sm:$0xff] }
 0x412   : > { %17320 = vst [vmem:[#allocation104_spill] sm:$0xff] %v13409_v39  ;;  %v13421_v21 = vmax.f32 %v3700_v23, 0.0  ;;  %v4527_v5 = vadd.f32 %v4501_v29, %v4396_v37  ;;  %v4632_v52 = vmul.f32 %v8390_v11, %v13383_v55  ;;  %v13424_v24 = vmax.f32 %v3698_v44, 0.0  ;;  %v3296_v39 = vpop.f32.mrf.mxu1  ;;  %v8362_v44 = vld [vmem:[%s16709_s5 + $0x440] sm:$0xff]  ;;  %v3769_v37 = vld [vmem:[%s16709_s5 + $0x48] sm:$0xff] }
 0x413   : > { %v4132_v47 = vadd.f32 %v4106_v20, %v4001_v27  ;;  %v4237_v57 = vmul.f32 %v8310_v42, %v13398_v0  ;;  %v13432_v51 = vrot.slane %v13320_v45, %v11453_v35  ;;  %v4016_v10 = vadd.f32 %v3990_v13, %v3859_v3 }
 0x414   : > { %17321 = vst [vmem:[#allocation102_spill] sm:$0xff] %v13421_v21  ;;  %17322 = vst [vmem:[#allocation103_spill] sm:$0xff] %v13424_v24  ;;  %v4658_v16 = vadd.f32 %v4632_v52, %v4527_v5  ;;  %v4763_v29 = vmul.f32 %v8416_v33, %v13386_v50  ;;  %v4368_v23 = vmul.f32 %v8336_v26, %v13406_v40  ;;  %v8261_v5 = vld [vmem:[%s16709_s5 + $0x118] sm:$0xff]  ;;  %v8388_v26 = vld [vmem:[%s16709_s5 + $0x510] sm:$0xff] }
 0x415   : > { %v4263_v11 = vadd.f32 %v4237_v57, %v4132_v47  ;;  %v13441_v27 = vrot.slane %v13320_v45, %v11455_v14  ;;  %v3825_v3 = vrot.slane %v13418_v49, %v11437_v41  ;;  %v3956_v13 = vrot.slane %v13418_v49, %v11439_v46  ;;  %v17324_v52 = vld [vmem:[#allocation28_spill] sm:$0xff] }
 0x416   : > { %v13455_v42 = vrot.slane %v13421_v21, %v11437_v41  ;;  %v4121_v33 = vmul.f32 %v8299_v31, %v13285_v7  ;;  %v13458_v20 = vadd.f32 %v4763_v29, %v4658_v16  ;;  %v3587_v47 = vmax.f32 %v17324_v52, %v3296_v39  ;;  %v8287_v29 = vld [vmem:[%s16709_s5 + $0x1e8] sm:$0xff] }
 0x417   : > { %v13465_v57 = vadd.f32 %v13280_v17, %v6631_v54  ;;  %v4394_v28 = vadd.f32 %v4368_v23, %v4263_v11  ;;  %v4499_v25 = vmul.f32 %v8362_v44, %v13432_v51  ;;  %v13473_v7 = vrot.slane %v13320_v45, %v11470_v4  ;;  %v8414_v17 = vld [vmem:[%s16709_s5 + $0x5e0] sm:$0xff]  ;;  %v13494_v11 = vpop.f32.mrf.mxu0  ;;  %v8271_v21 = vld [vmem:[%s16709_s5 + $0x168] sm:$0xff] }
 0x418   : > { %17323 = vst [vmem:[#allocation99_spill] sm:$0xff] %v13455_v42  ;;  %v13477_v31 = vrot.slane %v13424_v24, %v11437_v41  ;;  %v4147_v16 = vadd.f32 %v4121_v33, %v4016_v10  ;;  %v3847_v39 = vmul.f32 %v3825_v3, %v3769_v37  ;;  %v3978_v54 = vmul.f32 %v8261_v5, %v3956_v13  ;;  %v13496_v33 = vpop.f32.mrf.mxu1  ;;  %v17330_v42 = vld [vmem:[#allocation30_spill] sm:$0xff] }
 0x419   : > { %17325 = vst [vmem:[#allocation101_spill] sm:$0xff] %v13465_v57  ;;  %v4525_v23 = vadd.f32 %v4499_v25, %v4394_v28  ;;  %v4630_v44 = vmul.f32 %v8388_v26, %v13441_v27  ;;  %v13488_v45 = vrot.slane %v13418_v49, %v11441_v38  ;;  %v13492_v10 = vrot.slane %v13418_v49, %v11444_v2  ;;  %v3779_v25 = vld [vmem:[%s16709_s5 + $0x98] sm:$0xff] }
 0x41a   : > { %17326 = vst [vmem:[#allocation97_spill] sm:$0xff] %v13477_v31  ;;  %v13500_v37 = vrot.slane %v13424_v24, %v11439_v46  ;;  %v4252_v28 = vmul.f32 %v8325_v56, %v13307_v61  ;;  %v4004_v5 = vadd.f32 %v3978_v54, %v3847_v39  ;;  %v8313_v26 = vld [vmem:[%s16709_s5 + $0x2b8] sm:$0xff]  ;;  %v3663_v52 = vadd.f32 %v17302_v32, %v3587_v47  ;;  %v3782_v56 = vld [vmem:[%s16709_s5 + $0xb0] sm:$0xff]  ;;  %v8274_v61 = vld [vmem:[%s16709_s5 + $0x180] sm:$0xff] }
 0x41b   : > { %v4656_v18 = vadd.f32 %v4630_v44, %v4525_v23  ;;  %v4109_v39 = vmul.f32 %v8287_v29, %v13488_v45  ;;  %v13523_v47 = vrot.slane %v13418_v49, %v11451_v9  ;;  %v13527_v54 = vrot.slane %v13424_v24, %v11441_v38  ;;  %v8339_v23 = vld [vmem:[%s16709_s5 + $0x388] sm:$0xff]  ;;  %v17329_v29 = vld [vmem:[#allocation61_spill] sm:$0xff] }
 0x41c   : > { %17327 = vst [vmem:[#allocation98_spill] sm:$0xff] %v13500_v37  ;;  %v4761_v37 = vmul.f32 %v8414_v17, %v13473_v7  ;;  %v8351_v17 = vld [vmem:[%s16709_s5 + $0x3e8] sm:$0xff]  ;;  %v13537_v44 = vrot.slane %v13418_v49, %v11453_v35  ;;  %v3601_v15 = vmax.f32 %v17329_v29, %v13494_v11  ;;  %v4278_v24 = vadd.f32 %v4252_v28, %v4147_v16  ;;  %v8365_v11 = vld [vmem:[%s16709_s5 + $0x458] sm:$0xff] }
 0x41d   : > { %17328 = vst [vmem:[#allocation90_spill] sm:$0xff] %v13527_v54  ;;  %v8377_v54 = vld [vmem:[%s16709_s5 + $0x4b8] sm:$0xff]  ;;  %v4135_v57 = vadd.f32 %v4109_v39, %v4004_v5  ;;  %v4240_v22 = vmul.f32 %v8313_v26, %v13492_v10  ;;  %v3857_v29 = vmul.f32 %v13367_v58, %v3779_v25  ;;  %v3988_v16 = vmul.f32 %v8271_v21, %v13371_v34 }
 0x41e   : > { %v13549_v36 = vadd.f32 %v4761_v37, %v4656_v18  ;;  %v3860_v28 = vmul.f32 %v3825_v3, %v3782_v56  ;;  %v3991_v63 = vmul.f32 %v8274_v61, %v3956_v13  ;;  %v4371_v18 = vmul.f32 %v8339_v23, %v13523_v47  ;;  %v3767_v3 = vld [vmem:[%s16709_s5 + $0x38] sm:$0xff]  ;;  %v8300_v56 = vld [vmem:[%s16709_s5 + $0x250] sm:$0xff] }
 0x41f   : > { %v4266_v1 = vadd.f32 %v4240_v22, %v4135_v57  ;;  %v13563_v37 = vrot.slane %v13418_v49, %v11455_v14  ;;  %v13565_v5 = vmax.f32 %v3663_v52, 0.0  ;;  %v4383_v26 = vmul.f32 %v8351_v17, %v13329_v59  ;;  %v8391_v22 = vld [vmem:[%s16709_s5 + $0x528] sm:$0xff]  ;;  %v8417_v61 = vld [vmem:[%s16709_s5 + $0x5f8] sm:$0xff] }
 0x420   : > { %v4514_v58 = vmul.f32 %v8377_v54, %v13351_v12  ;;  %v13570_v34 = vmul.f32 %v8403_v6, %v13383_v55  ;;  %v4502_v21 = vmul.f32 %v8365_v11, %v13537_v44  ;;  %v13581_v57 = vrot.slane %v13418_v49, %v11470_v4  ;;  %v3780_v55 = vld [vmem:[%s16709_s5 + $0xa0] sm:$0xff]  ;;  %v8259_v59 = vld [vmem:[%s16709_s5 + $0x108] sm:$0xff]  ;;  %v8272_v12 = vld [vmem:[%s16709_s5 + $0x170] sm:$0xff] }
 0x421   : > { %v4397_v13 = vadd.f32 %v4371_v18, %v4266_v1  ;;  %v3817_v6 = vrot.slane %v13565_v5, %v11437_v41  ;;  %v3948_v1 = vrot.slane %v13565_v5, %v11439_v46  ;;  %v4409_v49 = vadd.f32 %v4383_v26, %v4278_v24  ;;  %v8429_v54 = vld [vmem:[%s16709_s5 + $0x658] sm:$0xff]  ;;  %v8323_v11 = vld [vmem:[%s16709_s5 + $0x308] sm:$0xff] }
 0x422   : > { %v4014_v25 = vadd.f32 %v3988_v16, %v3857_v29  ;;  %v4119_v52 = vmul.f32 %v8297_v53, %v13375_v62  ;;  %v4079_v39 = vrot.slane %v13565_v5, %v11441_v38  ;;  %v4017_v17 = vadd.f32 %v3991_v63, %v3860_v28  ;;  %v8285_v62 = vld [vmem:[%s16709_s5 + $0x1d8] sm:$0xff] }
 0x423   : > { %v4528_v24 = vadd.f32 %v4502_v21, %v4397_v13  ;;  %v4633_v23 = vmul.f32 %v8391_v22, %v13563_v37  ;;  %v3845_v53 = vmul.f32 %v3817_v6, %v3767_v3  ;;  %v3858_v29 = vmul.f32 %v3817_v6, %v3780_v55  ;;  %v8311_v22 = vld [vmem:[%s16709_s5 + $0x2a8] sm:$0xff]  ;;  %v8349_v55 = vld [vmem:[%s16709_s5 + $0x3d8] sm:$0xff] }
 0x424   : > { %v3976_v16 = vmul.f32 %v8259_v59, %v3948_v1  ;;  %v3989_v18 = vmul.f32 %v8272_v12, %v3948_v1  ;;  %v4210_v26 = vrot.slane %v13565_v5, %v11444_v2  ;;  %v4122_v63 = vmul.f32 %v8300_v56, %v13488_v45  ;;  %v8326_v45 = vld [vmem:[%s16709_s5 + $0x320] sm:$0xff] }
 0x425   : > { %v4659_v28 = vadd.f32 %v4633_v23, %v4528_v24  ;;  %v4764_v21 = vmul.f32 %v8417_v61, %v13581_v57  ;;  %v3677_v3 = vadd.f32 %v11540_v30, %v3601_v15  ;;  %v13624_v13 = vmul.f32 %v8429_v54, %v13386_v50  ;;  %v8298_v61 = vld [vmem:[%s16709_s5 + $0x240] sm:$0xff]  ;;  %v8337_v54 = vld [vmem:[%s16709_s5 + $0x378] sm:$0xff] }
 0x426   : > { %v4002_v6 = vadd.f32 %v3976_v16, %v3845_v53  ;;  %v4107_v59 = vmul.f32 %v8285_v62, %v4079_v39  ;;  %v13634_v12 = vrot.slane %v13565_v5, %v11451_v9  ;;  %v4145_v1 = vadd.f32 %v4119_v52, %v4014_v25 }
 0x427   : > { %v4250_v15 = vmul.f32 %v8323_v11, %v13398_v0  ;;  %v4148_v56 = vadd.f32 %v4122_v63, %v4017_v17  ;;  %v13637_v50 = vadd.f32 %v4764_v21, %v4659_v28  ;;  %v4015_v24 = vadd.f32 %v3989_v18, %v3858_v29  ;;  %v8363_v17 = vld [vmem:[%s16709_s5 + $0x448] sm:$0xff]  ;;  %v8352_v28 = vld [vmem:[%s16709_s5 + $0x3f0] sm:$0xff]  ;;  %v8389_v21 = vld [vmem:[%s16709_s5 + $0x518] sm:$0xff] }
 0x428   : > { %v4133_v23 = vadd.f32 %v4107_v59, %v4002_v6  ;;  %v4238_v53 = vmul.f32 %v8311_v22, %v4210_v26  ;;  %v13647_v62 = vrot.slane %v13565_v5, %v11453_v35  ;;  %v4540_v25 = vadd.f32 %v4514_v58, %v4409_v49  ;;  %v8375_v29 = vld [vmem:[%s16709_s5 + $0x4a8] sm:$0xff] }
 0x429   : > { %v4381_v0 = vmul.f32 %v8349_v55, %v13406_v40  ;;  %v4253_v52 = vmul.f32 %v8326_v45, %v13492_v10  ;;  %v13654_v11 = vmax.f32 %v3677_v3, 0.0  ;;  %v4120_v16 = vmul.f32 %v8298_v61, %v4079_v39  ;;  %v8442_v40 = vld [vmem:[%s16709_s5 + $0x6c0] sm:$0xff]  ;;  %v8324_v39 = vld [vmem:[%s16709_s5 + $0x310] sm:$0xff]  ;;  %v8415_v61 = vld [vmem:[%s16709_s5 + $0x5e8] sm:$0xff] }
 0x42a   : > { %v4264_v18 = vadd.f32 %v4238_v53, %v4133_v23  ;;  %v4369_v63 = vmul.f32 %v8337_v54, %v13634_v12  ;;  %v13662_v58 = vrot.slane %v13565_v5, %v11455_v14  ;;  %v4276_v10 = vadd.f32 %v4250_v15, %v4145_v1  ;;  %v8468_v1 = vld [vmem:[%s16709_s5 + $0x790] sm:$0xff] }
 0x42b   : > { %v4279_v49 = vadd.f32 %v4253_v52, %v4148_v56  ;;  %v13678_v22 = vrot.slane %v13654_v11, %v11437_v41  ;;  %v13682_v3 = vrot.slane %v13654_v11, %v11439_v46  ;;  %v4146_v55 = vadd.f32 %v4120_v16, %v4015_v24 }
 0x42c   : > { %v4395_v45 = vadd.f32 %v4369_v63, %v4264_v18  ;;  %v4500_v6 = vmul.f32 %v8363_v17, %v13647_v62  ;;  %v13687_v59 = vrot.slane %v13565_v5, %v11470_v4  ;;  %v4671_v15 = vadd.f32 %v13570_v34, %v4540_v25  ;;  %v8378_v25 = vld [vmem:[%s16709_s5 + $0x4c0] sm:$0xff] }
 0x42d   : > { %v4512_v56 = vmul.f32 %v8375_v29, %v13432_v51  ;;  %v4894_v54 = vmul.f32 %v8442_v40, %v13678_v22  ;;  %v13700_v24 = vrot.slane %v13654_v11, %v11441_v38  ;;  %v4384_v5 = vmul.f32 %v8352_v28, %v13523_v47  ;;  %v8494_v51 = vld [vmem:[%s16709_s5 + $0x860] sm:$0xff] }
 0x42e   : > { %v4251_v23 = vmul.f32 %v8324_v39, %v4210_v26  ;;  %v4526_v53 = vadd.f32 %v4500_v6, %v4395_v45  ;;  %v4631_v52 = vmul.f32 %v8389_v21, %v13662_v58  ;;  %v4407_v34 = vadd.f32 %v4381_v0, %v4276_v10  ;;  %v8350_v17 = vld [vmem:[%s16709_s5 + $0x3e0] sm:$0xff]  ;;  %v8401_v0 = vld [vmem:[%s16709_s5 + $0x578] sm:$0xff]  ;;  %v8520_v10 = vld [vmem:[%s16709_s5 + $0x930] sm:$0xff] }
 0x42f   : > { %v4920_v29 = vadd.f32 %v4894_v54, %v13458_v20  ;;  %v5025_v47 = vmul.f32 %v8468_v1, %v13682_v3  ;;  %v13717_v26 = vrot.slane %v13654_v11, %v11444_v2  ;;  %v4410_v16 = vadd.f32 %v4384_v5, %v4279_v49  ;;  %v8427_v20 = vld [vmem:[%s16709_s5 + $0x648] sm:$0xff]  ;;  %v8546_v54 = vld [vmem:[%s16709_s5 + $0xa00] sm:$0xff] }
 0x430   : > { %v4277_v18 = vadd.f32 %v4251_v23, %v4146_v55  ;;  %v4657_v63 = vadd.f32 %v4631_v52, %v4526_v53  ;;  %v4762_v40 = vmul.f32 %v8415_v61, %v13687_v59  ;;  %v5156_v39 = vmul.f32 %v8494_v51, %v13700_v24  ;;  %v8572_v51 = vld [vmem:[%s16709_s5 + $0xad0] sm:$0xff] }
 0x431   : > { %v5051_v28 = vadd.f32 %v5025_v47, %v4920_v29  ;;  %v13732_v21 = vrot.slane %v13654_v11, %v11451_v9  ;;  %v17331_v49 = vmax.f32 %v17330_v42, %v13496_v33  ;;  %v4802_v45 = vadd.f32 %v13624_v13, %v4671_v15  ;;  %v8404_v42 = vld [vmem:[%s16709_s5 + $0x590] sm:$0xff]  ;;  %v3391_v15 = vpop.f32.mrf.mxu0 }
 0x432   : > { %v4515_v6 = vmul.f32 %v8378_v25, %v13537_v44  ;;  %v4382_v1 = vmul.f32 %v8350_v17, %v13634_v12  ;;  %v13741_v61 = vadd.f32 %v4762_v40, %v4657_v63  ;;  %v4643_v5 = vmul.f32 %v8401_v0, %v13441_v27  ;;  %v8376_v33 = vld [vmem:[%s16709_s5 + $0x4b0] sm:$0xff]  ;;  %v8455_v25 = vld [vmem:[%s16709_s5 + $0x728] sm:$0xff]  ;;  %v8598_v0 = vld [vmem:[%s16709_s5 + $0xba0] sm:$0xff] }
 0x433   : > { %v3675_v55 = vadd.f32 %v11540_v30, %v17331_v49  ;;  %v5182_v13 = vadd.f32 %v5156_v39, %v5051_v28  ;;  %v5287_v44 = vmul.f32 %v8520_v10, %v13717_v26  ;;  %v13756_v12 = vrot.slane %v13654_v11, %v11453_v35  ;;  %v17332_v63 = vld [vmem:[#allocation48_spill] sm:$0xff] }
 0x434   : > { %v4538_v23 = vadd.f32 %v4512_v56, %v4407_v34  ;;  %v4774_v53 = vmul.f32 %v8427_v20, %v13473_v7  ;;  %v4541_v27 = vadd.f32 %v4515_v6, %v4410_v16  ;;  %v4408_v52 = vadd.f32 %v4382_v1, %v4277_v18  ;;  %v8440_v18 = vld [vmem:[%s16709_s5 + $0x6b0] sm:$0xff]  ;;  %v8466_v1 = vld [vmem:[%s16709_s5 + $0x780] sm:$0xff] }
 0x435   : > { %v5313_v17 = vadd.f32 %v5287_v44, %v5182_v13  ;;  %v5418_v29 = vmul.f32 %v8546_v54, %v13732_v21  ;;  %v13768_v47 = vrot.slane %v13654_v11, %v11455_v14  ;;  %v13770_v56 = vmax.f32 %v3675_v55, 0.0  ;;  %v8624_v20 = vld [vmem:[%s16709_s5 + $0xc70] sm:$0xff]  ;;  %v8430_v54 = vld [vmem:[%s16709_s5 + $0x660] sm:$0xff] }
 0x436   : > { %v4646_v7 = vmul.f32 %v8404_v42, %v13563_v37  ;;  %v4513_v34 = vmul.f32 %v8376_v33, %v13647_v62  ;;  %v13779_v16 = vrot.slane %v13654_v11, %v11470_v4  ;;  %v3602_v40 = vmax.f32 %v17332_v63, %v3391_v15  ;;  %v8402_v37 = vld [vmem:[%s16709_s5 + $0x580] sm:$0xff]  ;;  %v8481_v42 = vld [vmem:[%s16709_s5 + $0x7f8] sm:$0xff] }
 0x437   : > { %v5444_v10 = vadd.f32 %v5418_v29, %v5313_v17  ;;  %v5549_v62 = vmul.f32 %v8572_v51, %v13756_v12  ;;  %v13794_v11 = vrot.slane %v13770_v56, %v11437_v41  ;;  %v13798_v28 = vrot.slane %v13770_v56, %v11439_v46  ;;  %v8428_v51 = vld [vmem:[%s16709_s5 + $0x650] sm:$0xff]  ;;  %v8518_v63 = vld [vmem:[%s16709_s5 + $0x920] sm:$0xff] }
 0x438   : > { %v4669_v39 = vadd.f32 %v4643_v5, %v4538_v23  ;;  %v4672_v49 = vadd.f32 %v4646_v7, %v4541_v27  ;;  %v4539_v55 = vadd.f32 %v4513_v34, %v4408_v52  ;;  %v4907_v6 = vmul.f32 %v8455_v25, %v13678_v22  ;;  %v8492_v27 = vld [vmem:[%s16709_s5 + $0x850] sm:$0xff] }
 0x439   : > { %v5575_v33 = vadd.f32 %v5549_v62, %v5444_v10  ;;  %v5680_v13 = vmul.f32 %v8598_v0, %v13768_v47  ;;  %v4892_v5 = vmul.f32 %v8440_v18, %v13794_v11  ;;  %v13814_v22 = vrot.slane %v13770_v56, %v11441_v38 }
 0x43a   : > { %v4644_v44 = vmul.f32 %v8402_v37, %v13662_v58  ;;  %v4933_v15 = vadd.f32 %v4907_v6, %v4802_v45  ;;  %v5811_v23 = vmul.f32 %v8624_v20, %v13779_v16  ;;  %v3678_v52 = vadd.f32 %v11540_v30, %v3602_v40  ;;  %v3302_v45 = vpop.f32.mrf.mxu1  ;;  %v8533_v40 = vld [vmem:[%s16709_s5 + $0x998] sm:$0xff] }
 0x43b   : > { %v5706_v25 = vadd.f32 %v5680_v13, %v5575_v33  ;;  %v4918_v17 = vadd.f32 %v4892_v5, %v13549_v36  ;;  %v5023_v29 = vmul.f32 %v8466_v1, %v13798_v28  ;;  %v13829_v58 = vrot.slane %v13770_v56, %v11444_v2  ;;  %v8507_v36 = vld [vmem:[%s16709_s5 + $0x8c8] sm:$0xff] }
 0x43c   : > { %v4800_v7 = vadd.f32 %v4774_v53, %v4669_v39  ;;  %v4777_v34 = vmul.f32 %v8430_v54, %v13581_v57  ;;  %v4670_v0 = vadd.f32 %v4644_v44, %v4539_v55  ;;  %v5038_v18 = vmul.f32 %v8481_v42, %v13682_v3  ;;  %v8544_v39 = vld [vmem:[%s16709_s5 + $0x9f0] sm:$0xff]  ;;  %v17333_v55 = vld [vmem:[#allocation22_spill] sm:$0xff]  ;;  %v8559_v1 = vld [vmem:[%s16709_s5 + $0xa68] sm:$0xff] }
 0x43d   : > { %v13842_v37 = vadd.f32 %v5811_v23, %v5706_v25  ;;  %v5049_v53 = vadd.f32 %v5023_v29, %v4918_v17  ;;  %v5154_v57 = vmul.f32 %v8492_v27, %v13814_v22  ;;  %v13847_v3 = vrot.slane %v13770_v56, %v11451_v9  ;;  %v8585_v44 = vld [vmem:[%s16709_s5 + $0xb38] sm:$0xff]  ;;  %v8443_v27 = vld [vmem:[%s16709_s5 + $0x6c8] sm:$0xff]  ;;  %v8456_v25 = vld [vmem:[%s16709_s5 + $0x730] sm:$0xff] }
 0x43e   : > { %v4803_v10 = vadd.f32 %v4777_v34, %v4672_v49  ;;  %v4775_v62 = vmul.f32 %v8428_v51, %v13687_v59  ;;  %v5064_v20 = vadd.f32 %v5038_v18, %v4933_v15  ;;  %v3600_v6 = vmax.f32 %v17333_v55, %v3302_v45  ;;  %v8570_v15 = vld [vmem:[%s16709_s5 + $0xac0] sm:$0xff]  ;;  %v8596_v51 = vld [vmem:[%s16709_s5 + $0xb90] sm:$0xff]  ;;  %v8469_v18 = vld [vmem:[%s16709_s5 + $0x798] sm:$0xff] }
 0x43f   : > { %v5180_v54 = vadd.f32 %v5154_v57, %v5049_v53  ;;  %v5285_v42 = vmul.f32 %v8518_v63, %v13829_v58  ;;  %v13860_v33 = vrot.slane %v13770_v56, %v11453_v35  ;;  %v13862_v49 = vmax.f32 %v3678_v52, 0.0  ;;  %v8622_v53 = vld [vmem:[%s16709_s5 + $0xc60] sm:$0xff]  ;;  %v8495_v55 = vld [vmem:[%s16709_s5 + $0x868] sm:$0xff] }
 0x440   : > { %v13864_v59 = vadd.f32 %v4775_v62, %v4670_v0  ;;  %v5169_v13 = vmul.f32 %v8507_v36, %v13700_v24  ;;  %v5300_v5 = vmul.f32 %v8533_v40, %v13717_v26  ;;  %v13876_v23 = vrot.slane %v13770_v56, %v11455_v14  ;;  %v8453_v24 = vld [vmem:[%s16709_s5 + $0x718] sm:$0xff] }
 0x441   : > { %v5311_v26 = vadd.f32 %v5285_v42, %v5180_v54  ;;  %v5416_v52 = vmul.f32 %v8544_v39, %v13847_v3  ;;  %v4873_v17 = vrot.slane %v13862_v49, %v11437_v41  ;;  %v5004_v29 = vrot.slane %v13862_v49, %v11439_v46 }
 0x442   : > { %v5195_v45 = vadd.f32 %v5169_v13, %v5064_v20  ;;  %v13896_v34 = vmul.f32 %v8559_v1, %v13732_v21  ;;  %v13900_v0 = vrot.slane %v13770_v56, %v11470_v4  ;;  %v3676_v63 = vadd.f32 %v11540_v30, %v3600_v6  ;;  %v8479_v6 = vld [vmem:[%s16709_s5 + $0x7e8] sm:$0xff] }
 0x443   : > { %v5442_v36 = vadd.f32 %v5416_v52, %v5311_v26  ;;  %v5547_v40 = vmul.f32 %v8570_v15, %v13860_v33  ;;  %v4895_v57 = vmul.f32 %v8443_v27, %v4873_v17  ;;  %v5135_v21 = vrot.slane %v13862_v49, %v11441_v38  ;;  %v8521_v27 = vld [vmem:[%s16709_s5 + $0x938] sm:$0xff]  ;;  %v13935_v26 = vpop.f32.mrf.mxu0 }
 0x444   : > { %v13913_v56 = vmul.f32 %v8585_v44, %v13756_v12  ;;  %v4905_v62 = vmul.f32 %v8453_v24, %v13794_v11  ;;  %v5678_v20 = vmul.f32 %v8596_v51, %v13876_v23  ;;  %v4908_v39 = vmul.f32 %v8456_v25, %v4873_v17  ;;  %v8482_v12 = vld [vmem:[%s16709_s5 + $0x800] sm:$0xff]  ;;  %v13941_v17 = vpop.f32.mrf.mxu1 }
 0x445   : > { %v5573_v1 = vadd.f32 %v5547_v40, %v5442_v36  ;;  %v4921_v54 = vadd.f32 %v4895_v57, %v13637_v50  ;;  %v5026_v42 = vmul.f32 %v8469_v18, %v5004_v29  ;;  %v5266_v11 = vrot.slane %v13862_v49, %v11444_v2  ;;  %v8505_v40 = vld [vmem:[%s16709_s5 + $0x8b8] sm:$0xff] }
 0x446   : > { %v4931_v13 = vadd.f32 %v4905_v62, %v4800_v7  ;;  %v5809_v44 = vmul.f32 %v8622_v53, %v13900_v0  ;;  %v4934_v15 = vadd.f32 %v4908_v39, %v4803_v10  ;;  %v13933_v24 = vmax.f32 %v3676_v63, 0.0  ;;  %v8547_v63 = vld [vmem:[%s16709_s5 + $0xa08] sm:$0xff]  ;;  %v17334_v57 = vld [vmem:[#allocation49_spill] sm:$0xff]  ;;  %v8480_v62 = vld [vmem:[%s16709_s5 + $0x7f0] sm:$0xff] }
 0x447   : > { %v5704_v50 = vadd.f32 %v5678_v20, %v5573_v1  ;;  %v5052_v52 = vadd.f32 %v5026_v42, %v4921_v54  ;;  %v5157_v51 = vmul.f32 %v8495_v55, %v5135_v21  ;;  %v13939_v25 = vrot.slane %v13862_v49, %v11451_v9  ;;  %v8454_v1 = vld [vmem:[%s16709_s5 + $0x720] sm:$0xff]  ;;  %v17335_v54 = vld [vmem:[#allocation24_spill] sm:$0xff] }
 0x448   : > { %v13943_v7 = vadd.f32 %v5300_v5, %v5195_v45  ;;  %v5036_v10 = vmul.f32 %v8479_v6, %v13798_v28  ;;  %v5039_v18 = vmul.f32 %v8482_v12, %v5004_v29  ;;  %v13951_v36 = vrot.slane %v13862_v49, %v11453_v35  ;;  %v8508_v5 = vld [vmem:[%s16709_s5 + $0x8d0] sm:$0xff]  ;;  %v8573_v45 = vld [vmem:[%s16709_s5 + $0xad8] sm:$0xff] }
 0x449   : > { %v13956_v53 = vadd.f32 %v5809_v44, %v5704_v50  ;;  %v5183_v28 = vadd.f32 %v5157_v51, %v5052_v52  ;;  %v5288_v29 = vmul.f32 %v8521_v27, %v5266_v11  ;;  %v13968_v55 = vrot.slane %v13862_v49, %v11455_v14  ;;  %v8441_v6 = vld [vmem:[%s16709_s5 + $0x6b8] sm:$0xff] }
 0x44a   : > { %v5062_v20 = vadd.f32 %v5036_v10, %v4931_v13  ;;  %v5065_v39 = vadd.f32 %v5039_v18, %v4934_v15  ;;  %v5419_v44 = vmul.f32 %v8547_v63, %v13939_v25  ;;  %v8599_v13 = vld [vmem:[%s16709_s5 + $0xba8] sm:$0xff]  ;;  %v4865_v15 = vrot.slane %v13933_v24, %v11437_v41 }
 0x44b   : > { %v5314_v42 = vadd.f32 %v5288_v29, %v5183_v28  ;;  %v4996_v27 = vrot.slane %v13933_v24, %v11439_v46  ;;  %v5167_v50 = vmul.f32 %v8505_v40, %v13814_v22  ;;  %v5170_v52 = vmul.f32 %v8508_v5, %v5135_v21  ;;  %v8467_v18 = vld [vmem:[%s16709_s5 + $0x788] sm:$0xff]  ;;  %v8534_v28 = vld [vmem:[%s16709_s5 + $0x9a0] sm:$0xff]  ;;  %v8625_v21 = vld [vmem:[%s16709_s5 + $0xc78] sm:$0xff] }
 0x44c   : > { %v5550_v51 = vmul.f32 %v8573_v45, %v13951_v36  ;;  %v13990_v10 = vrot.slane %v13862_v49, %v11470_v4  ;;  %v8531_v63 = vld [vmem:[%s16709_s5 + $0x988] sm:$0xff]  ;;  %v4893_v40 = vmul.f32 %v8441_v6, %v4865_v15  ;;  %v4906_v49 = vmul.f32 %v8454_v1, %v4865_v15 }
 0x44d   : > { %v5445_v22 = vadd.f32 %v5419_v44, %v5314_v42  ;;  %v5127_v5 = vrot.slane %v13933_v24, %v11441_v38  ;;  %v5193_v29 = vadd.f32 %v5167_v50, %v5062_v20  ;;  %v5196_v45 = vadd.f32 %v5170_v52, %v5065_v39  ;;  %v8493_v42 = vld [vmem:[%s16709_s5 + $0x858] sm:$0xff]  ;;  %v14017_v39 = vpop.f32.mrf.mxu0 }
 0x44e   : > { %v5681_v12 = vmul.f32 %v8599_v13, %v13968_v55  ;;  %v5258_v44 = vrot.slane %v13933_v24, %v11444_v2  ;;  %v4919_v1 = vadd.f32 %v4893_v40, %v13741_v61  ;;  %v4932_v15 = vadd.f32 %v4906_v49, %v13864_v59  ;;  %v8557_v61 = vld [vmem:[%s16709_s5 + $0xa58] sm:$0xff]  ;;  %v8560_v59 = vld [vmem:[%s16709_s5 + $0xa70] sm:$0xff] }
 0x44f   : > { %v5576_v6 = vadd.f32 %v5550_v51, %v5445_v22  ;;  %v5024_v20 = vmul.f32 %v8467_v18, %v4996_v27  ;;  %v5298_v13 = vmul.f32 %v8531_v63, %v13829_v58  ;;  %v5301_v50 = vmul.f32 %v8534_v28, %v5266_v11  ;;  %v8506_v18 = vld [vmem:[%s16709_s5 + $0x8c0] sm:$0xff]  ;;  %v17336_v49 = vld [vmem:[#allocation45_spill] sm:$0xff] }
 0x450   : > { %v5812_v52 = vmul.f32 %v8625_v21, %v13990_v10  ;;  %v14026_v43 = vrot.slane %v13933_v24, %v11451_v9  ;;  %v5037_v11 = vmul.f32 %v8480_v62, %v4996_v27  ;;  %v5155_v63 = vmul.f32 %v8493_v42, %v5127_v5  ;;  %v8545_v21 = vld [vmem:[%s16709_s5 + $0x9f8] sm:$0xff] }
 0x451   : > { %v5707_v58 = vadd.f32 %v5681_v12, %v5576_v6  ;;  %v5050_v51 = vadd.f32 %v5024_v20, %v4919_v1  ;;  %v5324_v28 = vadd.f32 %v5298_v13, %v5193_v29  ;;  %v5327_v22 = vadd.f32 %v5301_v50, %v5196_v45  ;;  %v8571_v13 = vld [vmem:[%s16709_s5 + $0xac8] sm:$0xff] }
 0x452   : > { %v14042_v40 = vrot.slane %v13933_v24, %v11453_v35  ;;  %v3615_v12 = vmax.f32 %v17336_v49, %v14017_v39  ;;  %v5063_v27 = vadd.f32 %v5037_v11, %v4932_v15  ;;  %v5286_v1 = vmul.f32 %v8519_v8, %v5258_v44  ;;  %v8583_v39 = vld [vmem:[%s16709_s5 + $0xb28] sm:$0xff]  ;;  %v8586_v8 = vld [vmem:[%s16709_s5 + $0xb40] sm:$0xff] }
 0x453   : > { %v14046_v62 = vadd.f32 %v5812_v52, %v5707_v58  ;;  %v5181_v6 = vadd.f32 %v5155_v63, %v5050_v51  ;;  %v5457_v29 = vadd.f32 %v13896_v34, %v13943_v7  ;;  %v5429_v45 = vmul.f32 %v8557_v61, %v13847_v3  ;;  %v8532_v34 = vld [vmem:[%s16709_s5 + $0x990] sm:$0xff]  ;;  %v8597_v61 = vld [vmem:[%s16709_s5 + $0xb98] sm:$0xff]  ;;  %v8611_v49 = vld [vmem:[%s16709_s5 + $0xc08] sm:$0xff] }
 0x454   : > { %v5432_v42 = vmul.f32 %v8560_v59, %v13939_v25  ;;  %v5168_v20 = vmul.f32 %v8506_v18, %v5127_v5  ;;  %v5417_v25 = vmul.f32 %v8545_v21, %v14026_v43  ;;  %v14067_v7 = vrot.slane %v13933_v24, %v11455_v14  ;;  %v8650_v21 = vld [vmem:[%s16709_s5 + $0xd40] sm:$0xff] }
 0x455   : > { %v5312_v3 = vadd.f32 %v5286_v1, %v5181_v6  ;;  %v17337_v5 = vmax.f32 %v17334_v57, %v13935_v26  ;;  %v5455_v50 = vadd.f32 %v5429_v45, %v5324_v28  ;;  %v14078_v59 = vrot.slane %v13933_v24, %v11470_v4  ;;  %v8623_v57 = vld [vmem:[%s16709_s5 + $0xc68] sm:$0xff]  ;;  %v8866_v24 = vld [vmem:[%s16709_s5 + $0x1400] sm:$0xff] }
 0x456   : > { %v5458_v52 = vadd.f32 %v5432_v42, %v5327_v22  ;;  %v17338_v58 = vmax.f32 %v17335_v54, %v13941_v17  ;;  %v5194_v51 = vadd.f32 %v5168_v20, %v5063_v27  ;;  %v5548_v26 = vmul.f32 %v8571_v13, %v14042_v40  ;;  %v8609_v27 = vld [vmem:[%s16709_s5 + $0xbf8] sm:$0xff]  ;;  %v8558_v45 = vld [vmem:[%s16709_s5 + $0xa60] sm:$0xff]  ;;  %v8676_v20 = vld [vmem:[%s16709_s5 + $0xe10] sm:$0xff] }
 0x457   : > { %v3690_v15 = vadd.f32 %v17276_v60, %v17337_v5  ;;  %v5443_v18 = vadd.f32 %v5417_v25, %v5312_v3  ;;  %v5588_v28 = vadd.f32 %v13913_v56, %v5457_v29  ;;  %v5560_v17 = vmul.f32 %v8583_v39, %v13860_v33  ;;  %v8612_v56 = vld [vmem:[%s16709_s5 + $0xc10] sm:$0xff] }
 0x458   : > { %v3688_v11 = vadd.f32 %v17276_v60, %v17338_v58  ;;  %v5563_v54 = vmul.f32 %v8586_v8, %v13951_v36  ;;  %v5299_v22 = vmul.f32 %v8532_v34, %v5258_v44  ;;  %v5679_v36 = vmul.f32 %v8597_v61, %v14067_v7 }
 0x459   : > { %v14088_v63 = vmax.f32 %v3690_v15, 0.0  ;;  %v5574_v33 = vadd.f32 %v5548_v26, %v5443_v18  ;;  %v5586_v1 = vadd.f32 %v5560_v17, %v5455_v50  ;;  %v5810_v42 = vmul.f32 %v8623_v57, %v14078_v59 }
 0x45a   : > { %v5589_v29 = vadd.f32 %v5563_v54, %v5458_v52  ;;  %v14124_v13 = vmax.f32 %v3688_v11, 0.0  ;;  %v5325_v39 = vadd.f32 %v5299_v22, %v5194_v51  ;;  %v3691_v3 = vadd.f32 %v17276_v60, %v3615_v12  ;;  %v8637_v52 = vld [vmem:[%s16709_s5 + $0xcd8] sm:$0xff]  ;;  %v3308_v51 = vpop.f32.mrf.mxu1  ;;  %v8674_v22 = vld [vmem:[%s16709_s5 + $0xe00] sm:$0xff] }
 0x45b   : > { %17339 = vst [vmem:[#allocation96_spill] sm:$0xff] %v14088_v63  ;;  %v14111_v44 = vrot.slane %v14088_v63, %v11437_v41  ;;  %v14115_v6 = vrot.slane %v14088_v63, %v11439_v46  ;;  %v5705_v8 = vadd.f32 %v5679_v36, %v5574_v33  ;;  %v14129_v25 = vmul.f32 %v8866_v24, %v13477_v31  ;;  %v3401_v24 = vpop.f32.mrf.mxu0  ;;  %v17343_v33 = vld [vmem:[#allocation19_spill] sm:$0xff] }
 0x45c   : > { %v5693_v5 = vmul.f32 %v8611_v49, %v13768_v47  ;;  %v5691_v15 = vmul.f32 %v8609_v27, %v13876_v23  ;;  %v5694_v50 = vmul.f32 %v8612_v56, %v13968_v55  ;;  %v5430_v61 = vmul.f32 %v8558_v45, %v14026_v43  ;;  %v8648_v47 = vld [vmem:[%s16709_s5 + $0xd30] sm:$0xff]  ;;  %v8635_v55 = vld [vmem:[%s16709_s5 + $0xcc8] sm:$0xff]  ;;  %v8638_v43 = vld [vmem:[%s16709_s5 + $0xce0] sm:$0xff] }
 0x45d   : > { %v5942_v34 = vmul.f32 %v8650_v21, %v14111_v44  ;;  %17340 = vst [vmem:[#allocation94_spill] sm:$0xff] %v14129_v25  ;;  %v14138_v58 = vadd.f32 %v5810_v42, %v5705_v8  ;;  %v6073_v12 = vmul.f32 %v8676_v20, %v14115_v6  ;;  %v5909_v26 = vrot.slane %v14124_v13, %v11437_v41  ;;  %v8700_v42 = vld [vmem:[%s16709_s5 + $0xed0] sm:$0xff]  ;;  %v17344_v20 = vld [vmem:[#allocation46_spill] sm:$0xff]  ;;  %v17359_v31 = vld [vmem:[#allocation15_spill] sm:$0xff] }
 0x45e   : > { %v5719_v23 = vadd.f32 %v5693_v5, %v5588_v28  ;;  %v5717_v18 = vadd.f32 %v5691_v15, %v5586_v1  ;;  %v14158_v57 = vrot.slane %v14124_v13, %v11439_v46  ;;  %v5720_v28 = vadd.f32 %v5694_v50, %v5589_v29  ;;  %v8651_v5 = vld [vmem:[%s16709_s5 + $0xd48] sm:$0xff] }
 0x45f   : > { %v5968_v11 = vadd.f32 %v5942_v34, %v13842_v37  ;;  %v8584_v37 = vld [vmem:[%s16709_s5 + $0xb30] sm:$0xff]  ;;  %v5456_v17 = vadd.f32 %v5430_v61, %v5325_v39  ;;  %v14165_v21 = vmax.f32 %v3691_v3, 0.0  ;;  %v5824_v49 = vmul.f32 %v8637_v52, %v13779_v16  ;;  %v3312_v16 = vpop.f32.mrf.mxu1  ;;  %v8610_v34 = vld [vmem:[%s16709_s5 + $0xc00] sm:$0xff]  ;;  %v8661_v61 = vld [vmem:[%s16709_s5 + $0xd98] sm:$0xff] }
 0x460   : > { %v5940_v27 = vmul.f32 %v8648_v47, %v5909_v26  ;;  %v14170_v56 = vrot.slane %v14124_v13, %v11441_v38  ;;  %v3613_v36 = vmax.f32 %v17343_v33, %v3308_v51  ;;  %v5822_v1 = vmul.f32 %v8635_v55, %v13900_v0  ;;  %v8636_v0 = vld [vmem:[%s16709_s5 + $0xcd0] sm:$0xff] }
 0x461   : > { %v14160_v54 = vadd.f32 %v6073_v12, %v5968_v11  ;;  %17342 = vst [vmem:[#allocation92_spill] sm:$0xff] %v14165_v21  ;;  %v5825_v29 = vmul.f32 %v8638_v43, %v13990_v10  ;;  %v5561_v45 = vmul.f32 %v8584_v37, %v14042_v40  ;;  %v3627_v39 = vmax.f32 %v17344_v20, %v3401_v24  ;;  %v8663_v12 = vld [vmem:[%s16709_s5 + $0xda8] sm:$0xff] }
 0x462   : > { %v5850_v8 = vadd.f32 %v5824_v49, %v5719_v23  ;;  %v5966_v10 = vadd.f32 %v5940_v27, %v13956_v53  ;;  %v6071_v40 = vmul.f32 %v8674_v22, %v14158_v57  ;;  %v6302_v3 = vrot.slane %v14124_v13, %v11444_v2  ;;  %v8726_v53 = vld [vmem:[%s16709_s5 + $0xfa0] sm:$0xff] }
 0x463   : > { %17341 = vst [vmem:[#allocation95_spill] sm:$0xff] %v14160_v54  ;;  %v5848_v15 = vadd.f32 %v5822_v1, %v5717_v18  ;;  %v14193_v50 = vadd.f32 %v5825_v29, %v5720_v28  ;;  %v5587_v52 = vadd.f32 %v5561_v45, %v5456_v17  ;;  %v14203_v11 = vrot.slane %v14165_v21, %v11437_v41  ;;  %v17345_v18 = vld [vmem:[#allocation20_spill] sm:$0xff]  ;;  %v8689_v17 = vld [vmem:[%s16709_s5 + $0xe78] sm:$0xff]  ;;  %v8687_v29 = vld [vmem:[%s16709_s5 + $0xe68] sm:$0xff] }
 0x464   : > { %v6097_v47 = vadd.f32 %v6071_v40, %v5966_v10  ;;  %v6202_v51 = vmul.f32 %v8700_v42, %v14170_v56  ;;  %v3689_v23 = vadd.f32 %v17276_v60, %v3613_v36  ;;  %v3625_v55 = vmax.f32 %v17345_v18, %v3312_v16  ;;  %v8741_v10 = vld [vmem:[%s16709_s5 + $0x1018] sm:$0xff] }
 0x465   : > { %v5692_v43 = vmul.f32 %v8610_v34, %v14067_v7  ;;  %v5823_v37 = vmul.f32 %v8636_v0, %v14078_v59  ;;  %v5943_v24 = vmul.f32 %v8651_v5, %v14203_v11  ;;  %v14215_v28 = vadd.f32 %v17294_v19, %v3627_v39  ;;  %v8702_v59 = vld [vmem:[%s16709_s5 + $0xee0] sm:$0xff]  ;;  %v14247_v34 = vpop.f32.mrf.mxu1 }
 0x466   : > { %v6179_v22 = vrot.slane %v14088_v63, %v11441_v38  ;;  %v5953_v49 = vmul.f32 %v8661_v61, %v5909_v26  ;;  %v6228_v27 = vadd.f32 %v6202_v51, %v6097_v47  ;;  %v6333_v33 = vmul.f32 %v8726_v53, %v6302_v3  ;;  %v8715_v26 = vld [vmem:[%s16709_s5 + $0xf48] sm:$0xff]  ;;  %v8713_v61 = vld [vmem:[%s16709_s5 + $0xf38] sm:$0xff] }
 0x467   : > { %v5718_v36 = vadd.f32 %v5692_v43, %v5587_v52  ;;  %v5955_v7 = vmul.f32 %v8663_v12, %v14111_v44  ;;  %v6310_v1 = vrot.slane %v14088_v63, %v11444_v2  ;;  %v14232_v45 = vadd.f32 %v5943_v24, %v14046_v62  ;;  %v8728_v44 = vld [vmem:[%s16709_s5 + $0xfb0] sm:$0xff]  ;;  %v14264_v52 = vpop.f32.mrf.mxu0  ;;  %v8739_v53 = vld [vmem:[%s16709_s5 + $0x1008] sm:$0xff] }
 0x468   : > { %v5979_v42 = vadd.f32 %v5953_v49, %v5848_v15  ;;  %v14240_v20 = vadd.f32 %v6333_v33, %v6228_v27  ;;  %v14242_v39 = vmax.f32 %v3689_v23, 0.0  ;;  %v14245_v16 = vadd.f32 %v17294_v19, %v3625_v55  ;;  %v8649_v15 = vld [vmem:[%s16709_s5 + $0xd38] sm:$0xff]  ;;  %v8675_v55 = vld [vmem:[%s16709_s5 + $0xe08] sm:$0xff]  ;;  %v3472_v27 = vpop.f32.mrf.mxu1 }
 0x469   : > { %17346 = vst [vmem:[#allocation93_spill] sm:$0xff] %v14232_v45  ;;  %v5981_v62 = vadd.f32 %v5955_v7, %v5850_v8  ;;  %v6086_v0 = vmul.f32 %v8689_v17, %v14115_v6  ;;  %v14255_v40 = vrot.slane %v14088_v63, %v11451_v9  ;;  %v14259_v5 = vrot.slane %v14088_v63, %v11453_v35  ;;  %v8752_v17 = vld [vmem:[%s16709_s5 + $0x1070] sm:$0xff] }
 0x46a   : > { %17347 = vst [vmem:[#allocation87_spill] sm:$0xff] %v14240_v20  ;;  %17348 = vst [vmem:[#allocation88_spill] sm:$0xff] %v14242_v39  ;;  %v14266_v8 = vmul.f32 %v8702_v59, %v6179_v22  ;;  %v6084_v6 = vmul.f32 %v8687_v29, %v14158_v57  ;;  %v5913_v12 = vrot.slane %v14242_v39, %v11437_v41  ;;  %v9182_v29 = vpop.f32.mrf.mxu0  ;;  %v3474_v54 = vpop.f32.mrf.mxu1 }
 0x46b   : > { %17349 = vst [vmem:[#allocation89_spill] sm:$0xff] %v14255_v40  ;;  %17350 = vst [vmem:[#allocation91_spill] sm:$0xff] %v14259_v5  ;;  %v6044_v47 = vrot.slane %v14242_v39, %v11439_v46  ;;  %v5849_v51 = vadd.f32 %v5823_v37, %v5718_v36  ;;  %v14279_v23 = vmul.f32 %v8715_v26, %v6179_v22  ;;  %v8765_v37 = vld [vmem:[%s16709_s5 + $0x10d8] sm:$0xff]  ;;  %v8791_v26 = vld [vmem:[%s16709_s5 + $0x11a8] sm:$0xff] }
 0x46c   : > { %17351 = vst [vmem:[#allocation17_spill] sm:$0xff] %v14266_v8  ;;  %v14281_v18 = vmul.f32 %v8728_v44, %v6310_v1  ;;  %v6433_v57 = vrot.slane %v14124_v13, %v11451_v9  ;;  %v14288_v43 = vmul.f32 %v8741_v10, %v6310_v1  ;;  %v6110_v24 = vadd.f32 %v6084_v6, %v5979_v42  ;;  %v8701_v1 = vld [vmem:[%s16709_s5 + $0xed8] sm:$0xff]  ;;  %v8662_v42 = vld [vmem:[%s16709_s5 + $0xda0] sm:$0xff]  ;;  %v3561_v8 = vpop.f32.mrf.mxu0 }
 0x46d   : > { %v5941_v22 = vmul.f32 %v8649_v15, %v5913_v12  ;;  %v14298_v49 = vrot.slane %v14242_v39, %v11441_v38  ;;  %v14300_v33 = vadd.f32 %v6086_v0, %v5981_v62  ;;  %v6215_v36 = vmul.f32 %v8713_v61, %v14170_v56  ;;  %v8664_v56 = vld [vmem:[%s16709_s5 + $0xdb0] sm:$0xff]  ;;  %v8677_v61 = vld [vmem:[%s16709_s5 + $0xe18] sm:$0xff]  ;;  %v8290_v5 = vld [vmem:[%s16709_s5 + $0x200] sm:$0xff] }
 0x46e   : > { %17352 = vst [vmem:[#allocation47_spill] sm:$0xff] %v14281_v18  ;;  %17353 = vst [vmem:[#allocation16_spill] sm:$0xff] %v14288_v43  ;;  %v6346_v7 = vmul.f32 %v8739_v53, %v6302_v3  ;;  %v14305_v59 = vrot.slane %v14124_v13, %v11453_v35  ;;  %v14315_v44 = vrot.slane %v14124_v13, %v11455_v14  ;;  %v8690_v53 = vld [vmem:[%s16709_s5 + $0xe80] sm:$0xff] }
 0x46f   : > { %v6052_v3 = vrot.slane %v14165_v21, %v11439_v46  ;;  %v5967_v62 = vadd.f32 %v5941_v22, %v14138_v58  ;;  %v6072_v0 = vmul.f32 %v8675_v55, %v6044_v47  ;;  %v14326_v10 = vmul.f32 %v8752_v17, %v6433_v57 }
 0x470   : > { %17354 = vst [vmem:[#allocation34_spill] sm:$0xff] %v14305_v59  ;;  %17355 = vst [vmem:[#allocation8_spill] sm:$0xff] %v14315_v44  ;;  %v14328_v15 = vmul.f32 %v8765_v37, %v6433_v57  ;;  %v14332_v6 = vrot.slane %v14124_v13, %v11470_v4  ;;  %v3590_v20 = vmax.f32 %v17359_v31, %v3472_v27  ;;  %v17360_v57 = vld [vmem:[#allocation40_spill] sm:$0xff] }
 0x471   : > { %17356 = vst [vmem:[#allocation38_spill] sm:$0xff] %v14326_v10  ;;  %v6241_v58 = vadd.f32 %v6215_v36, %v6110_v24  ;;  %v6098_v55 = vadd.f32 %v6072_v0, %v5967_v62  ;;  %v6203_v17 = vmul.f32 %v8701_v1, %v14298_v49  ;;  %v3605_v37 = vmax.f32 %v17360_v57, %v9182_v29  ;;  %v8703_v24 = vld [vmem:[%s16709_s5 + $0xee8] sm:$0xff]  ;;  %v8688_v27 = vld [vmem:[%s16709_s5 + $0xe70] sm:$0xff]  ;;  %v17367_v0 = vld [vmem:[#allocation37_spill] sm:$0xff] }
 0x472   : > { %17357 = vst [vmem:[#allocation14_spill] sm:$0xff] %v14328_v15  ;;  %17358 = vst [vmem:[#allocation2_spill] sm:$0xff] %v14332_v6  ;;  %v14344_v22 = vmul.f32 %v8791_v26, %v14305_v59  ;;  %v5956_v13 = vmul.f32 %v8664_v56, %v14203_v11  ;;  %v6183_v10 = vrot.slane %v14165_v21, %v11441_v38  ;;  %v17364_v11 = vld [vmem:[#allocation39_spill] sm:$0xff]  ;;  %v8716_v29 = vld [vmem:[%s16709_s5 + $0xf50] sm:$0xff] }
 0x473   : > { %v5954_v18 = vmul.f32 %v8662_v42, %v5913_v12  ;;  %v14349_v45 = vmul.f32 %v8677_v61, %v6052_v3  ;;  %v14351_v31 = vmul.f32 %v8690_v53, %v6052_v3  ;;  %v14359_v36 = vadd.f32 %v6203_v17, %v6098_v55  ;;  %v17368_v61 = vld [vmem:[#allocation13_spill] sm:$0xff]  ;;  %v8418_v15 = vld [vmem:[%s16709_s5 + $0x600] sm:$0xff] }
 0x474   : > { %17361 = vst [vmem:[#allocation9_spill] sm:$0xff] %v14344_v22  ;;  %v3628_v1 = vmax.f32 %v17364_v11, %v14264_v52  ;;  %v14364_v12 = vadd.f32 %v5956_v13, %v14193_v50  ;;  %v14371_v26 = vrot.slane %v14165_v21, %v11444_v2  ;;  %v3666_v3 = vadd.f32 %v17302_v32, %v3590_v20  ;;  %v8714_v20 = vld [vmem:[%s16709_s5 + $0xf40] sm:$0xff]  ;;  %v3785_v22 = vld [vmem:[%s16709_s5 + $0xc8] sm:$0xff] }
 0x475   : > { %17362 = vst [vmem:[#allocation65_spill] sm:$0xff] %v14349_v45  ;;  %17363 = vst [vmem:[#allocation36_spill] sm:$0xff] %v14359_v36  ;;  %v5980_v56 = vadd.f32 %v5954_v18, %v5849_v51  ;;  %v14374_v42 = vadd.f32 %v6346_v7, %v6241_v58  ;;  %v3681_v62 = vadd.f32 %v11540_v30, %v3605_v37  ;;  %v8753_v37 = vld [vmem:[%s16709_s5 + $0x1078] sm:$0xff]  ;;  %v8766_v13 = vld [vmem:[%s16709_s5 + $0x10e0] sm:$0xff] }
 0x476   : > { %17365 = vst [vmem:[#allocation66_spill] sm:$0xff] %v14371_v26  ;;  %v3592_v52 = vmax.f32 %v17367_v0, %v3561_v8  ;;  %v3591_v50 = vmax.f32 %v17368_v61, %v3474_v54  ;;  %v14379_v53 = vmul.f32 %v8703_v24, %v6183_v10  ;;  %v14383_v55 = vrot.slane %v14165_v21, %v11451_v9  ;;  %v8727_v54 = vld [vmem:[%s16709_s5 + $0xfa8] sm:$0xff]  ;;  %v8740_v8 = vld [vmem:[%s16709_s5 + $0x1010] sm:$0xff] }
 0x477   : > { %17366 = vst [vmem:[#allocation21_spill] sm:$0xff] %v14374_v42  ;;  %v6085_v17 = vmul.f32 %v8688_v27, %v6044_v47  ;;  %v6306_v51 = vrot.slane %v14242_v39, %v11444_v2  ;;  %v14387_v18 = vmul.f32 %v8716_v29, %v6183_v10  ;;  %v6437_v47 = vrot.slane %v14242_v39, %v11451_v9  ;;  %v17371_v10 = vld [vmem:[#allocation18_spill] sm:$0xff] }
 0x478   : > { %17369 = vst [vmem:[#allocation35_spill] sm:$0xff] %v14379_v53  ;;  %17370 = vst [vmem:[#allocation52_spill] sm:$0xff] %v14383_v55  ;;  %v3704_v7 = vadd.f32 %v17294_v19, %v3628_v1  ;;  %v3626_v58 = vmax.f32 %v17371_v10, %v14247_v34  ;;  %v14410_v24 = vmax.f32 %v14215_v28, 0.0  ;;  %v14413_v27 = vmax.f32 %v14245_v16, 0.0  ;;  %v14415_v1 = vpop.f32.mrf.mxu0  ;;  %v8329_v55 = vld [vmem:[%s16709_s5 + $0x338] sm:$0xff] }
 0x479   : > { %v6111_v57 = vadd.f32 %v6085_v17, %v5980_v56  ;;  %v3718_v11 = vmax.f32 %v3666_v3, 0.0  ;;  %v14419_v34 = vrot.slane %v14242_v39, %v11453_v35  ;;  %v14421_v29 = vmax.f32 %v3681_v62, 0.0  ;;  %v3770_v3 = vld [vmem:[%s16709_s5 + $0x50] sm:$0xff] }
 0x47a   : > { %17372 = vst [vmem:[#allocation60_spill] sm:$0xff] %v14410_v24  ;;  %17373 = vst [vmem:[#allocation28_spill] sm:$0xff] %v14413_v27  ;;  %v3668_v56 = vadd.f32 %v17302_v32, %v3592_v52  ;;  %v3667_v0 = vadd.f32 %v17302_v32, %v3591_v50  ;;  %v6216_v61 = vmul.f32 %v8714_v20, %v14298_v49  ;;  %v14441_v52 = vmax.f32 %v3704_v7, 0.0  ;;  %v3783_v49 = vld [vmem:[%s16709_s5 + $0xb8] sm:$0xff]  ;;  %v8262_v50 = vld [vmem:[%s16709_s5 + $0x120] sm:$0xff]  ;;  %v14460_v7 = vpop.f32.mrf.mxu1 }
 0x47b   : > { %17374 = vst [vmem:[#allocation61_spill] sm:$0xff] %v14419_v34  ;;  %v14426_v28 = vmul.f32 %v8727_v54, %v6306_v51  ;;  %v14428_v17 = vmul.f32 %v8740_v8, %v6306_v51  ;;  %v14432_v16 = vrot.slane %v14242_v39, %v11455_v14  ;;  %v14437_v62 = vmul.f32 %v8753_v37, %v6437_v47  ;;  %v8275_v51 = vld [vmem:[%s16709_s5 + $0x188] sm:$0xff]  ;;  %v8340_v39 = vld [vmem:[%s16709_s5 + $0x390] sm:$0xff] }
 0x47c   : > { %v14439_v10 = vmul.f32 %v8766_v13, %v6437_v47  ;;  %17380 = vst [vmem:[#allocation45_spill] sm:$0xff] %v14441_v52  ;;  %v14444_v32 = vadd.f32 %v17294_v19, %v3626_v58  ;;  %v14455_v20 = vadd.f32 %v6216_v61, %v6111_v57  ;;  %v3829_v54 = vrot.slane %v3718_v11, %v11437_v41  ;;  %v14462_v58 = vpop.f32.mrf.mxu0  ;;  %v8288_v13 = vld [vmem:[%s16709_s5 + $0x1f0] sm:$0xff]  ;;  %v8301_v52 = vld [vmem:[%s16709_s5 + $0x258] sm:$0xff]  ;;  %v8303_v34 = vld [vmem:[%s16709_s5 + $0x268] sm:$0xff] }
 0x47d   : > { %17375 = vst [vmem:[#allocation30_spill] sm:$0xff] %v14426_v28  ;;  %17376 = vst [vmem:[#allocation48_spill] sm:$0xff] %v14428_v17  ;;  %v3960_v8 = vrot.slane %v3718_v11, %v11439_v46  ;;  %v4091_v47 = vrot.slane %v3718_v11, %v11441_v38  ;;  %v14466_v37 = vrot.slane %v14421_v29, %v11437_v41  ;;  %v14472_v61 = vmax.f32 %v3668_v56, 0.0  ;;  %v8314_v56 = vld [vmem:[%s16709_s5 + $0x2c0] sm:$0xff] }
 0x47e   : > { %17377 = vst [vmem:[#allocation22_spill] sm:$0xff] %v14432_v16  ;;  %17378 = vst [vmem:[#allocation49_spill] sm:$0xff] %v14437_v62  ;;  %v4222_v57 = vrot.slane %v3718_v11, %v11444_v2  ;;  %v14474_v59 = vmax.f32 %v3667_v0, 0.0  ;;  %v8446_v62 = vld [vmem:[%s16709_s5 + $0x6e0] sm:$0xff]  ;;  %v3848_v28 = vmul.f32 %v3829_v54, %v3770_v3  ;;  %v3861_v36 = vmul.f32 %v3829_v54, %v3783_v49  ;;  %v8327_v0 = vld [vmem:[%s16709_s5 + $0x328] sm:$0xff] }
 0x47f   : > { %17379 = vst [vmem:[#allocation24_spill] sm:$0xff] %v14439_v10  ;;  %v3979_v53 = vmul.f32 %v8262_v50, %v3960_v8  ;;  %v3992_v45 = vmul.f32 %v8275_v51, %v3960_v8  ;;  %v14481_v25 = vrot.slane %v14421_v29, %v11439_v46  ;;  %v4353_v3 = vrot.slane %v3718_v11, %v11451_v9  ;;  %v17381_v49 = vld [vmem:[#allocation10_spill] sm:$0xff]  ;;  %v17382_v51 = vld [vmem:[#allocation33_spill] sm:$0xff] }
 0x480   : > { %v14499_v8 = vrot.slane %v14421_v29, %v11441_v38  ;;  %v4110_v6 = vmul.f32 %v8288_v13, %v4091_v47  ;;  %v14505_v16 = vmul.f32 %v8446_v62, %v14466_v37  ;;  %v8353_v50 = vld [vmem:[%s16709_s5 + $0x3f8] sm:$0xff]  ;;  %v14511_v54 = vrot.slane %v3718_v11, %v11453_v35 }
 0x481   : > { %v4005_v24 = vadd.f32 %v3979_v53, %v3848_v28  ;;  %v4018_v27 = vadd.f32 %v3992_v45, %v3861_v36  ;;  %v14514_v44 = vrot.slane %v3718_v11, %v11455_v14  ;;  %v14517_v45 = vrot.slane %v3718_v11, %v11470_v4  ;;  %v3772_v36 = vld [vmem:[%s16709_s5 + $0x60] sm:$0xff]  ;;  %v8277_v11 = vld [vmem:[%s16709_s5 + $0x198] sm:$0xff] }
 0x482   : > { %v4123_v53 = vmul.f32 %v8301_v52, %v4091_v47  ;;  %v4241_v62 = vmul.f32 %v8314_v56, %v4222_v57  ;;  %v4254_v13 = vmul.f32 %v8327_v0, %v4222_v57  ;;  %v4372_v63 = vmul.f32 %v8340_v39, %v4353_v3  ;;  %v8366_v52 = vld [vmem:[%s16709_s5 + $0x460] sm:$0xff] }
 0x483   : > { %v4136_v28 = vadd.f32 %v4110_v6, %v4005_v24  ;;  %v8392_v6 = vld [vmem:[%s16709_s5 + $0x530] sm:$0xff]  ;;  %v3837_v24 = vrot.slane %v14472_v61, %v11437_v41  ;;  %v3968_v47 = vrot.slane %v14472_v61, %v11439_v46  ;;  %v4099_v57 = vrot.slane %v14472_v61, %v11441_v38 }
 0x484   : > { %v4149_v56 = vadd.f32 %v4123_v53, %v4018_v27  ;;  %v4385_v39 = vmul.f32 %v8353_v50, %v4353_v3  ;;  %v4230_v10 = vrot.slane %v14472_v61, %v11444_v2  ;;  %v4503_v50 = vmul.f32 %v8366_v52, %v14511_v54  ;;  %v8355_v52 = vld [vmem:[%s16709_s5 + $0x408] sm:$0xff] }
 0x485   : > { %v4267_v0 = vadd.f32 %v4241_v62, %v4136_v28  ;;  %v3850_v42 = vmul.f32 %v3837_v24, %v3772_v36  ;;  %v3863_v21 = vmul.f32 %v3837_v24, %v3785_v22  ;;  %v3981_v27 = vmul.f32 %v8264_v48, %v3968_v47  ;;  %v8316_v62 = vld [vmem:[%s16709_s5 + $0x2d0] sm:$0xff] }
 0x486   : > { %v3994_v53 = vmul.f32 %v8277_v11, %v3968_v47  ;;  %v4634_v28 = vmul.f32 %v8392_v6, %v14514_v44  ;;  %v4361_v40 = vrot.slane %v14472_v61, %v11451_v9  ;;  %v4112_v48 = vmul.f32 %v8290_v5, %v4099_v57 }
 0x487   : > { %v4398_v3 = vadd.f32 %v4372_v63, %v4267_v0  ;;  %v4007_v36 = vadd.f32 %v3981_v27, %v3850_v42  ;;  %v4125_v11 = vmul.f32 %v8303_v34, %v4099_v57  ;;  %v8342_v63 = vld [vmem:[%s16709_s5 + $0x3a0] sm:$0xff]  ;;  %v4280_v6 = vadd.f32 %v4254_v13, %v4149_v56  ;;  %v8368_v34 = vld [vmem:[%s16709_s5 + $0x470] sm:$0xff]  ;;  %v8381_v57 = vld [vmem:[%s16709_s5 + $0x4d8] sm:$0xff] }
 0x488   : > { %v4020_v22 = vadd.f32 %v3994_v53, %v3863_v21  ;;  %v4765_v47 = vmul.f32 %v8418_v15, %v14517_v45  ;;  %v4492_v0 = vrot.slane %v14472_v61, %v11453_v35  ;;  %v4243_v21 = vmul.f32 %v8316_v62, %v4230_v10  ;;  %v8394_v15 = vld [vmem:[%s16709_s5 + $0x540] sm:$0xff]  ;;  %v8276_v62 = vld [vmem:[%s16709_s5 + $0x190] sm:$0xff] }
 0x489   : > { %v4529_v24 = vadd.f32 %v4503_v50, %v4398_v3  ;;  %v4138_v43 = vadd.f32 %v4112_v48, %v4007_v36  ;;  %v4256_v5 = vmul.f32 %v8329_v55, %v4230_v10  ;;  %v4374_v13 = vmul.f32 %v8342_v63, %v4361_v40  ;;  %v3771_v55 = vld [vmem:[%s16709_s5 + $0x58] sm:$0xff]  ;;  %v3784_v50 = vld [vmem:[%s16709_s5 + $0xc0] sm:$0xff] }
 0x48a   : > { %v4151_v42 = vadd.f32 %v4125_v11, %v4020_v22  ;;  %v4387_v56 = vmul.f32 %v8355_v52, %v4361_v40  ;;  %v4623_v53 = vrot.slane %v14472_v61, %v11455_v14  ;;  %v3833_v40 = vrot.slane %v14474_v59, %v11437_v41 }
 0x48b   : > { %v4660_v27 = vadd.f32 %v4634_v28, %v4529_v24  ;;  %v4269_v10 = vadd.f32 %v4243_v21, %v4138_v43  ;;  %v8263_v28 = vld [vmem:[%s16709_s5 + $0x128] sm:$0xff]  ;;  %v3964_v36 = vrot.slane %v14474_v59, %v11439_v46  ;;  %v4411_v43 = vadd.f32 %v4385_v39, %v4280_v6 }
 0x48c   : > { %v4282_v3 = vadd.f32 %v4256_v5, %v4151_v42  ;;  %v4505_v48 = vmul.f32 %v8368_v34, %v4492_v0  ;;  %v4518_v11 = vmul.f32 %v8381_v57, %v4492_v0  ;;  %v8407_v24 = vld [vmem:[%s16709_s5 + $0x5a8] sm:$0xff]  ;;  %v4636_v42 = vmul.f32 %v8394_v15, %v4623_v53  ;;  %v8420_v5 = vld [vmem:[%s16709_s5 + $0x610] sm:$0xff]  ;;  %v8289_v0 = vld [vmem:[%s16709_s5 + $0x1f8] sm:$0xff] }
 0x48d   : > { %v14600_v22 = vadd.f32 %v4765_v47, %v4660_v27  ;;  %v4400_v63 = vadd.f32 %v4374_v13, %v4269_v10  ;;  %v4754_v21 = vrot.slane %v14472_v61, %v11470_v4  ;;  %v3849_v17 = vmul.f32 %v3833_v40, %v3771_v55  ;;  %v8302_v34 = vld [vmem:[%s16709_s5 + $0x260] sm:$0xff]  ;;  %v8379_v61 = vld [vmem:[%s16709_s5 + $0x4c8] sm:$0xff] }
 0x48e   : > { %v4413_v52 = vadd.f32 %v4387_v56, %v4282_v3  ;;  %v3862_v39 = vmul.f32 %v3833_v40, %v3784_v50  ;;  %v3980_v6 = vmul.f32 %v8263_v28, %v3964_v36  ;;  %v3993_v47 = vmul.f32 %v8276_v62, %v3964_v36  ;;  %v8315_v56 = vld [vmem:[%s16709_s5 + $0x2c8] sm:$0xff]  ;;  %v8328_v50 = vld [vmem:[%s16709_s5 + $0x330] sm:$0xff]  ;;  %v8433_v36 = vld [vmem:[%s16709_s5 + $0x678] sm:$0xff] }
 0x48f   : > { %v4531_v57 = vadd.f32 %v4505_v48, %v4400_v63  ;;  %v4095_v13 = vrot.slane %v14474_v59, %v11441_v38  ;;  %v4226_v15 = vrot.slane %v14474_v59, %v11444_v2  ;;  %v4649_v55 = vmul.f32 %v8407_v24, %v4623_v53  ;;  %v8472_v28 = vld [vmem:[%s16709_s5 + $0x7b0] sm:$0xff] }
 0x490   : > { %v4544_v27 = vadd.f32 %v4518_v11, %v4413_v52  ;;  %v4006_v10 = vadd.f32 %v3980_v6, %v3849_v17  ;;  %v4019_v3 = vadd.f32 %v3993_v47, %v3862_v39  ;;  %v4357_v40 = vrot.slane %v14474_v59, %v11451_v9  ;;  %v8341_v11 = vld [vmem:[%s16709_s5 + $0x398] sm:$0xff] }
 0x491   : > { %v4662_v62 = vadd.f32 %v4636_v42, %v4531_v57  ;;  %v4767_v48 = vmul.f32 %v8420_v5, %v4754_v21  ;;  %v4111_v53 = vmul.f32 %v8289_v0, %v4095_v13  ;;  %v4124_v17 = vmul.f32 %v8302_v34, %v4095_v13  ;;  %v8498_v42 = vld [vmem:[%s16709_s5 + $0x880] sm:$0xff]  ;;  %v8405_v5 = vld [vmem:[%s16709_s5 + $0x598] sm:$0xff] }
 0x492   : > { %v4516_v63 = vmul.f32 %v8379_v61, %v14511_v54  ;;  %v4675_v52 = vadd.f32 %v4649_v55, %v4544_v27  ;;  %v4242_v24 = vmul.f32 %v8315_v56, %v4226_v15  ;;  %v4488_v39 = vrot.slane %v14474_v59, %v11453_v35  ;;  %v8354_v54 = vld [vmem:[%s16709_s5 + $0x400] sm:$0xff]  ;;  %v8367_v56 = vld [vmem:[%s16709_s5 + $0x468] sm:$0xff] }
 0x493   : > { %v4793_v6 = vadd.f32 %v4767_v48, %v4662_v62  ;;  %v4137_v47 = vadd.f32 %v4111_v53, %v4006_v10  ;;  %v4150_v0 = vadd.f32 %v4124_v17, %v4019_v3  ;;  %v4255_v34 = vmul.f32 %v8328_v50, %v4226_v15  ;;  %v8459_v55 = vld [vmem:[%s16709_s5 + $0x748] sm:$0xff]  ;;  %v8380_v17 = vld [vmem:[%s16709_s5 + $0x4d0] sm:$0xff] }
 0x494   : > { %v5029_v61 = vmul.f32 %v8472_v28, %v14481_v25  ;;  %v4542_v57 = vadd.f32 %v4516_v63, %v4411_v43  ;;  %v4780_v27 = vmul.f32 %v8433_v36, %v4754_v21  ;;  %v4373_v13 = vmul.f32 %v8341_v11, %v4357_v40  ;;  %v8393_v36 = vld [vmem:[%s16709_s5 + $0x538] sm:$0xff]  ;;  %v8431_v48 = vld [vmem:[%s16709_s5 + $0x668] sm:$0xff] }
 0x495   : > { %v4924_v10 = vadd.f32 %v14505_v16, %v4793_v6  ;;  %v4268_v15 = vadd.f32 %v4242_v24, %v4137_v47  ;;  %v4281_v3 = vadd.f32 %v4255_v34, %v4150_v0  ;;  %v4619_v50 = vrot.slane %v14474_v59, %v11455_v14  ;;  %v8419_v24 = vld [vmem:[%s16709_s5 + $0x608] sm:$0xff]  ;;  %v3480_v6 = vpop.f32.mrf.mxu1  ;;  %v8485_v34 = vld [vmem:[%s16709_s5 + $0x818] sm:$0xff] }
 0x496   : > { %v5160_v28 = vmul.f32 %v8498_v42, %v14499_v8  ;;  %v4647_v43 = vmul.f32 %v8405_v5, %v14514_v44  ;;  %v4806_v21 = vadd.f32 %v4780_v27, %v4675_v52  ;;  %v4386_v62 = vmul.f32 %v8354_v54, %v4357_v40 }
 0x497   : > { %v5055_v16 = vadd.f32 %v5029_v61, %v4924_v10  ;;  %v4399_v53 = vadd.f32 %v4373_v13, %v4268_v15  ;;  %v4504_v11 = vmul.f32 %v8367_v56, %v4488_v39  ;;  %v14675_v44 = vrot.slane %v14474_v59, %v11470_v4  ;;  %v8457_v10 = vld [vmem:[%s16709_s5 + $0x738] sm:$0xff] }
 0x498   : > { %v4911_v40 = vmul.f32 %v8459_v55, %v14466_v37  ;;  %v14680_v63 = vrot.slane %v14421_v29, %v11444_v2  ;;  %v4673_v52 = vadd.f32 %v4647_v43, %v4542_v57  ;;  %v17383_v42 = vmax.f32 %v17381_v49, %v14460_v7  ;;  %v8511_v49 = vld [vmem:[%s16709_s5 + $0x8e8] sm:$0xff]  ;;  %v8444_v55 = vld [vmem:[%s16709_s5 + $0x6d0] sm:$0xff] }
 0x499   : > { %v14689_v47 = vadd.f32 %v5160_v28, %v5055_v16  ;;  %v4412_v59 = vadd.f32 %v4386_v62, %v4281_v3  ;;  %v4530_v0 = vadd.f32 %v4504_v11, %v4399_v53  ;;  %v4635_v37 = vmul.f32 %v8393_v36, %v4619_v50  ;;  %v8406_v28 = vld [vmem:[%s16709_s5 + $0x5a0] sm:$0xff] }
 0x49a   : > { %v3679_v5 = vadd.f32 %v11540_v30, %v17383_v42  ;;  %v14696_v54 = vrot.slane %v14421_v29, %v11451_v9  ;;  %v4778_v61 = vmul.f32 %v8431_v48, %v14517_v45  ;;  %v4517_v57 = vmul.f32 %v8380_v17, %v4488_v39  ;;  %v17385_v45 = vld [vmem:[#allocation50_spill] sm:$0xff]  ;;  %v8483_v17 = vld [vmem:[%s16709_s5 + $0x808] sm:$0xff] }
 0x49b   : > { %17384 = vst [vmem:[#allocation19_spill] sm:$0xff] %v14689_v47  ;;  %v4937_v27 = vadd.f32 %v4911_v40, %v4806_v21  ;;  %v4661_v13 = vadd.f32 %v4635_v37, %v4530_v0  ;;  %v4766_v56 = vmul.f32 %v8419_v24, %v14675_v44  ;;  %v3604_v39 = vmax.f32 %v17385_v45, %v3480_v6  ;;  %v8470_v53 = vld [vmem:[%s16709_s5 + $0x7a0] sm:$0xff]  ;;  %v8563_v40 = vld [vmem:[%s16709_s5 + $0xa88] sm:$0xff]  ;;  %v8509_v0 = vld [vmem:[%s16709_s5 + $0x8d8] sm:$0xff] }
 0x49c   : > { %v14699_v7 = vmax.f32 %v3679_v5, 0.0  ;;  %v14714_v15 = vrot.slane %v14421_v29, %v11453_v35  ;;  %v4804_v3 = vadd.f32 %v4778_v61, %v4673_v52  ;;  %v5042_v62 = vmul.f32 %v8485_v34, %v14481_v25  ;;  %v8537_v25 = vld [vmem:[%s16709_s5 + $0x9b8] sm:$0xff]  ;;  %v14745_v5 = vpop.f32.mrf.mxu1  ;;  %v8432_v61 = vld [vmem:[%s16709_s5 + $0x670] sm:$0xff] }
 0x49d   : > { %v14726_v36 = vrot.slane %v14421_v29, %v11455_v14  ;;  %v4543_v48 = vadd.f32 %v4517_v57, %v4412_v59  ;;  %v14728_v16 = vadd.f32 %v4766_v56, %v4661_v13  ;;  %v5173_v11 = vmul.f32 %v8511_v49, %v14499_v8  ;;  %v8496_v8 = vld [vmem:[%s16709_s5 + $0x870] sm:$0xff] }
 0x49e   : > { %v4877_v43 = vrot.slane %v14699_v7, %v11437_v41  ;;  %v5008_v21 = vrot.slane %v14699_v7, %v11439_v46  ;;  %v5139_v42 = vrot.slane %v14699_v7, %v11441_v38  ;;  %v5068_v6 = vadd.f32 %v5042_v62, %v4937_v27 }
 0x49f   : > { %v4648_v59 = vmul.f32 %v8406_v28, %v4619_v50  ;;  %v5270_v37 = vrot.slane %v14699_v7, %v11444_v2  ;;  %v3680_v34 = vadd.f32 %v11540_v30, %v3604_v39  ;;  %v14761_v13 = vmul.f32 %v8537_v25, %v14680_v63  ;;  %v8522_v30 = vld [vmem:[%s16709_s5 + $0x940] sm:$0xff]  ;;  %v8535_v28 = vld [vmem:[%s16709_s5 + $0x9a8] sm:$0xff] }
 0x4a0   : > { %v4896_v52 = vmul.f32 %v8444_v55, %v4877_v43  ;;  %v4909_v24 = vmul.f32 %v8457_v10, %v4877_v43  ;;  %v5027_v49 = vmul.f32 %v8470_v53, %v5008_v21  ;;  %v5040_v27 = vmul.f32 %v8483_v17, %v5008_v21  ;;  %v3486_v43 = vpop.f32.mrf.mxu1  ;;  %v17386_v17 = vld [vmem:[#allocation11_spill] sm:$0xff] }
 0x4a1   : > { %v14764_v56 = vmul.f32 %v8563_v40, %v14696_v54  ;;  %v4674_v55 = vadd.f32 %v4648_v59, %v4543_v48  ;;  %v5401_v10 = vrot.slane %v14699_v7, %v11451_v9  ;;  %v14774_v21 = vadd.f32 %v5173_v11, %v5068_v6  ;;  %v8548_v48 = vld [vmem:[%s16709_s5 + $0xa10] sm:$0xff]  ;;  %v8561_v11 = vld [vmem:[%s16709_s5 + $0xa78] sm:$0xff]  ;;  %v8574_v59 = vld [vmem:[%s16709_s5 + $0xae0] sm:$0xff] }
 0x4a2   : > { %v4922_v57 = vadd.f32 %v4896_v52, %v14600_v22  ;;  %v4935_v50 = vadd.f32 %v4909_v24, %v4804_v3  ;;  %v5158_v22 = vmul.f32 %v8496_v8, %v5139_v42  ;;  %v5171_v3 = vmul.f32 %v8509_v0, %v5139_v42  ;;  %v8458_v0 = vld [vmem:[%s16709_s5 + $0x740] sm:$0xff] }
 0x4a3   : > { %v4779_v62 = vmul.f32 %v8432_v61, %v14675_v44  ;;  %v5532_v53 = vrot.slane %v14699_v7, %v11453_v35  ;;  %v3616_v25 = vmax.f32 %v17386_v17, %v14745_v5  ;;  %v5289_v24 = vmul.f32 %v8522_v30, %v5270_v37  ;;  %v8445_v5 = vld [vmem:[%s16709_s5 + $0x6d8] sm:$0xff] }
 0x4a4   : > { %v5053_v45 = vadd.f32 %v5027_v49, %v4922_v57  ;;  %v5066_v39 = vadd.f32 %v5040_v27, %v4935_v50  ;;  %v14787_v42 = vmax.f32 %v3680_v34, 0.0  ;;  %v5302_v6 = vmul.f32 %v8535_v28, %v5270_v37  ;;  %v17387_v61 = vld [vmem:[#allocation41_spill] sm:$0xff]  ;;  %v8587_v37 = vld [vmem:[%s16709_s5 + $0xb48] sm:$0xff]  ;;  %v8600_v49 = vld [vmem:[%s16709_s5 + $0xbb0] sm:$0xff] }
 0x4a5   : > { %v4805_v44 = vadd.f32 %v4779_v62, %v4674_v55  ;;  %v5663_v8 = vrot.slane %v14699_v7, %v11455_v14  ;;  %v3617_v34 = vmax.f32 %v17387_v61, %v3486_v43  ;;  %v5420_v50 = vmul.f32 %v8548_v48, %v5401_v10  ;;  %v8471_v55 = vld [vmem:[%s16709_s5 + $0x7a8] sm:$0xff]  ;;  %v8626_v48 = vld [vmem:[%s16709_s5 + $0xc80] sm:$0xff] }
 0x4a6   : > { %v5184_v40 = vadd.f32 %v5158_v22, %v5053_v45  ;;  %v5197_v52 = vadd.f32 %v5171_v3, %v5066_v39  ;;  %v4881_v27 = vrot.slane %v14787_v42, %v11437_v41  ;;  %v5012_v30 = vrot.slane %v14787_v42, %v11439_v46  ;;  %v8484_v3 = vld [vmem:[%s16709_s5 + $0x810] sm:$0xff] }
 0x4a7   : > { %v5433_v39 = vmul.f32 %v8561_v11, %v5401_v10  ;;  %v14816_v22 = vrot.slane %v14699_v7, %v11470_v4  ;;  %v5143_v28 = vrot.slane %v14787_v42, %v11441_v38  ;;  %v5551_v62 = vmul.f32 %v8574_v59, %v5532_v53  ;;  %v8497_v7 = vld [vmem:[%s16709_s5 + $0x878] sm:$0xff]  ;;  %v8510_v11 = vld [vmem:[%s16709_s5 + $0x8e0] sm:$0xff] }
 0x4a8   : > { %v5315_v57 = vadd.f32 %v5289_v24, %v5184_v40  ;;  %v5328_v45 = vadd.f32 %v5302_v6, %v5197_v52  ;;  %v4897_v17 = vmul.f32 %v8445_v5, %v4881_v27  ;;  %v4910_v40 = vmul.f32 %v8458_v0, %v4881_v27  ;;  %v8523_v0 = vld [vmem:[%s16709_s5 + $0x948] sm:$0xff] }
 0x4a9   : > { %v5564_v10 = vmul.f32 %v8587_v37, %v5532_v53  ;;  %v5682_v52 = vmul.f32 %v8600_v49, %v5663_v8  ;;  %v5028_v24 = vmul.f32 %v8471_v55, %v5012_v30  ;;  %v5274_v6 = vrot.slane %v14787_v42, %v11444_v2  ;;  %v8536_v49 = vld [vmem:[%s16709_s5 + $0x9b0] sm:$0xff] }
 0x4aa   : > { %v5446_v43 = vadd.f32 %v5420_v50, %v5315_v57  ;;  %v4923_v61 = vadd.f32 %v4897_v17, %v14728_v16  ;;  %v4936_v57 = vadd.f32 %v4910_v40, %v4805_v44  ;;  %v5041_v5 = vmul.f32 %v8484_v3, %v5012_v30  ;;  %v8549_v30 = vld [vmem:[%s16709_s5 + $0xa18] sm:$0xff] }
 0x4ab   : > { %v5459_v50 = vadd.f32 %v5433_v39, %v5328_v45  ;;  %v5813_v53 = vmul.f32 %v8626_v48, %v14816_v22  ;;  %v5159_v37 = vmul.f32 %v8497_v7, %v5143_v28  ;;  %v5405_v27 = vrot.slane %v14787_v42, %v11451_v9  ;;  %v8562_v45 = vld [vmem:[%s16709_s5 + $0xa80] sm:$0xff] }
 0x4ac   : > { %v5577_v59 = vadd.f32 %v5551_v62, %v5446_v43  ;;  %v5054_v43 = vadd.f32 %v5028_v24, %v4923_v61  ;;  %v5067_v16 = vadd.f32 %v5041_v5, %v4936_v57  ;;  %v5172_v44 = vmul.f32 %v8510_v11, %v5143_v28  ;;  %v8613_v28 = vld [vmem:[%s16709_s5 + $0xc18] sm:$0xff]  ;;  %v8575_v24 = vld [vmem:[%s16709_s5 + $0xae8] sm:$0xff]  ;;  %v8588_v61 = vld [vmem:[%s16709_s5 + $0xb50] sm:$0xff] }
 0x4ad   : > { %v5290_v3 = vmul.f32 %v8523_v0, %v5274_v6  ;;  %v5536_v39 = vrot.slane %v14787_v42, %v11453_v35  ;;  %v3692_v62 = vadd.f32 %v17276_v60, %v3616_v25  ;;  %v3693_v48 = vadd.f32 %v17276_v60, %v3617_v34 }
 0x4ae   : > { %v5708_v55 = vadd.f32 %v5682_v52, %v5577_v59  ;;  %v5185_v40 = vadd.f32 %v5159_v37, %v5054_v43  ;;  %v5198_v7 = vadd.f32 %v5172_v44, %v5067_v16  ;;  %v5303_v52 = vmul.f32 %v8536_v49, %v5274_v6 }
 0x4af   : > { %v5590_v11 = vadd.f32 %v5564_v10, %v5459_v50  ;;  %v17389_v59 = vmax.f32 %v17382_v51, %v14462_v58  ;;  %v5421_v34 = vmul.f32 %v8549_v30, %v5405_v27  ;;  %v5330_v57 = vadd.f32 %v14761_v13, %v14774_v21  ;;  %v8614_v58 = vld [vmem:[%s16709_s5 + $0xc20] sm:$0xff]  ;;  %v8589_v13 = vld [vmem:[%s16709_s5 + $0xb58] sm:$0xff]  ;;  %v8639_v21 = vld [vmem:[%s16709_s5 + $0xce8] sm:$0xff] }
 0x4b0   : > { %v14857_v17 = vadd.f32 %v5813_v53, %v5708_v55  ;;  %v5316_v5 = vadd.f32 %v5290_v3, %v5185_v40  ;;  %v5329_v6 = vadd.f32 %v5303_v52, %v5198_v7  ;;  %v5434_v0 = vmul.f32 %v8562_v45, %v5405_v27  ;;  %v8640_v30 = vld [vmem:[%s16709_s5 + $0xcf0] sm:$0xff]  ;;  %v8615_v45 = vld [vmem:[%s16709_s5 + $0xc28] sm:$0xff]  ;;  %v3490_v52 = vpop.f32.mrf.mxu1 }
 0x4b1   : > { %v3694_v25 = vadd.f32 %v17276_v60, %v17389_v59  ;;  %v5667_v53 = vrot.slane %v14787_v42, %v11455_v14  ;;  %v5695_v10 = vmul.f32 %v8613_v28, %v5663_v8  ;;  %v5552_v50 = vmul.f32 %v8575_v24, %v5536_v39  ;;  %v8601_v60 = vld [vmem:[%s16709_s5 + $0xbb8] sm:$0xff] }
 0x4b2   : > { %17388 = vst [vmem:[#allocation46_spill] sm:$0xff] %v14857_v17  ;;  %v14879_v51 = vmax.f32 %v3692_v62, 0.0  ;;  %v14881_v37 = vmax.f32 %v3693_v48, 0.0  ;;  %v5447_v8 = vadd.f32 %v5421_v34, %v5316_v5  ;;  %v5460_v49 = vadd.f32 %v5434_v0, %v5329_v6  ;;  %v17390_v24 = vld [vmem:[#allocation5_spill] sm:$0xff] }
 0x4b3   : > { %v5565_v27 = vmul.f32 %v8588_v61, %v5536_v39  ;;  %v14891_v55 = vrot.slane %v14787_v42, %v11470_v4  ;;  %v5802_v43 = vrot.slane %v14421_v29, %v11470_v4  ;;  %v5721_v16 = vadd.f32 %v5695_v10, %v5590_v11  ;;  %v8641_v29 = vld [vmem:[%s16709_s5 + $0xcf8] sm:$0xff]  ;;  %v8666_v61 = vld [vmem:[%s16709_s5 + $0xdc0] sm:$0xff] }
 0x4b4   : > { %v14895_v44 = vmax.f32 %v3694_v25, 0.0  ;;  %v5461_v3 = vadd.f32 %v14764_v56, %v5330_v57  ;;  %v5578_v39 = vadd.f32 %v5552_v50, %v5447_v8  ;;  %v5683_v42 = vmul.f32 %v8601_v60, %v5667_v53  ;;  %v8524_v57 = vld [vmem:[%s16709_s5 + $0x950] sm:$0xff] }
 0x4b5   : > { %v5591_v62 = vadd.f32 %v5565_v27, %v5460_v49  ;;  %v5696_v48 = vmul.f32 %v8614_v58, %v5667_v53  ;;  %v5566_v28 = vmul.f32 %v8589_v13, %v14714_v15  ;;  %v5826_v40 = vmul.f32 %v8639_v21, %v14816_v22  ;;  %v8665_v22 = vld [vmem:[%s16709_s5 + $0xdb8] sm:$0xff]  ;;  %v8667_v13 = vld [vmem:[%s16709_s5 + $0xdc8] sm:$0xff]  ;;  %v8576_v21 = vld [vmem:[%s16709_s5 + $0xaf0] sm:$0xff]  ;;  %v3492_v27 = vpop.f32.mrf.mxu1 }
 0x4b6   : > { %v14911_v7 = vrot.slane %v14879_v51, %v11437_v41  ;;  %v14915_v56 = vrot.slane %v14881_v37, %v11437_v41  ;;  %v3631_v11 = vmax.f32 %v17390_v24, %v14415_v1  ;;  %v14919_v59 = vadd.f32 %v5683_v42, %v5578_v39  ;;  %v8550_v1 = vld [vmem:[%s16709_s5 + $0xa20] sm:$0xff]  ;;  %v8692_v42 = vld [vmem:[%s16709_s5 + $0xe90] sm:$0xff]  ;;  %v8693_v24 = vld [vmem:[%s16709_s5 + $0xe98] sm:$0xff] }
 0x4b7   : > { %v5722_v25 = vadd.f32 %v5696_v48, %v5591_v62  ;;  %v5827_v34 = vmul.f32 %v8640_v30, %v14891_v55  ;;  %v5697_v5 = vmul.f32 %v8615_v45, %v14726_v36  ;;  %v5852_v6 = vadd.f32 %v5826_v40, %v5721_v16  ;;  %v8691_v62 = vld [vmem:[%s16709_s5 + $0xe88] sm:$0xff] }
 0x4b8   : > { %17391 = vst [vmem:[#allocation20_spill] sm:$0xff] %v14919_v59  ;;  %v14937_v0 = vrot.slane %v14895_v44, %v11437_v41  ;;  %v5592_v53 = vadd.f32 %v5566_v28, %v5461_v3  ;;  %v14940_v10 = vmax.f32 %v14444_v32, 0.0  ;;  %v5828_v50 = vmul.f32 %v8641_v29, %v5802_v43 }
 0x4b9   : > { %v6056_v60 = vrot.slane %v14879_v51, %v11439_v46  ;;  %v5853_v58 = vadd.f32 %v5827_v34, %v5722_v25  ;;  %v5957_v8 = vmul.f32 %v8665_v22, %v14911_v7  ;;  %v5958_v49 = vmul.f32 %v8666_v61, %v14915_v56  ;;  %v17399_v34 = vld [vmem:[#allocation44_spill] sm:$0xff] }
 0x4ba   : > { %17392 = vst [vmem:[#allocation15_spill] sm:$0xff] %v14937_v0  ;;  %v14954_v32 = vrot.slane %v14881_v37, %v11439_v46  ;;  %v5723_v16 = vadd.f32 %v5697_v5, %v5592_v53  ;;  %v14957_v30 = vmul.f32 %v8524_v57, %v14680_v63  ;;  %v14960_v3 = vmul.f32 %v8550_v1, %v14696_v54  ;;  %v8602_v63 = vld [vmem:[%s16709_s5 + $0xbc0] sm:$0xff]  ;;  %v8628_v54 = vld [vmem:[%s16709_s5 + $0xc90] sm:$0xff]  ;;  %v8627_v1 = vld [vmem:[%s16709_s5 + $0xc88] sm:$0xff] }
 0x4bb   : > { %v3707_v45 = vadd.f32 %v17294_v19, %v3631_v11  ;;  %v14965_v39 = vrot.slane %v14895_v44, %v11439_v46  ;;  %v5959_v28 = vmul.f32 %v8667_v13, %v14937_v0  ;;  %v5983_v29 = vadd.f32 %v5957_v8, %v5852_v6  ;;  %v17400_v61 = vld [vmem:[#allocation12_spill] sm:$0xff]  ;;  %v8717_v13 = vld [vmem:[%s16709_s5 + $0xf58] sm:$0xff] }
 0x4bc   : > { %17393 = vst [vmem:[#allocation40_spill] sm:$0xff] %v14954_v32  ;;  %17394 = vst [vmem:[#allocation39_spill] sm:$0xff] %v14957_v30  ;;  %v5854_v48 = vadd.f32 %v5828_v50, %v5723_v16  ;;  %v5984_v40 = vadd.f32 %v5958_v49, %v5853_v58  ;;  %v14984_v11 = vmul.f32 %v8576_v21, %v14714_v15  ;;  %v8718_v21 = vld [vmem:[%s16709_s5 + $0xf60] sm:$0xff] }
 0x4bd   : > { %17395 = vst [vmem:[#allocation37_spill] sm:$0xff] %v14960_v3  ;;  %17396 = vst [vmem:[#allocation13_spill] sm:$0xff] %v14965_v39  ;;  %v14988_v25 = vrot.slane %v14879_v51, %v11441_v38  ;;  %v3629_v22 = vmax.f32 %v17399_v34, %v3490_v52  ;;  %v3630_v57 = vmax.f32 %v17400_v61, %v3492_v27  ;;  %v15016_v49 = vmax.f32 %v3707_v45, 0.0  ;;  %v8744_v61 = vld [vmem:[%s16709_s5 + $0x1030] sm:$0xff] }
 0x4be   : > { %17397 = vst [vmem:[#allocation18_spill] sm:$0xff] %v14984_v11  ;;  %v6088_v5 = vmul.f32 %v8691_v62, %v6056_v60  ;;  %v14997_v6 = vrot.slane %v14881_v37, %v11441_v38  ;;  %v5985_v53 = vadd.f32 %v5959_v28, %v5854_v48  ;;  %v6089_v15 = vmul.f32 %v8692_v42, %v14954_v32  ;;  %v8719_v42 = vld [vmem:[%s16709_s5 + $0xf68] sm:$0xff]  ;;  %v17440_v11 = vld [vmem:[#allocation85_spill] sm:$0xff] }
 0x4bf   : > { %17398 = vst [vmem:[#allocation10_spill] sm:$0xff] %v14988_v25  ;;  %v15001_v50 = vmul.f32 %v8602_v63, %v14726_v36  ;;  %v15003_v58 = vmul.f32 %v8628_v54, %v5802_v43  ;;  %v6090_v52 = vmul.f32 %v8693_v24, %v14965_v39  ;;  %v15014_v8 = vrot.slane %v14895_v44, %v11441_v38  ;;  %v8652_v36 = vld [vmem:[%s16709_s5 + $0xd50] sm:$0xff]  ;;  %v8678_v43 = vld [vmem:[%s16709_s5 + $0xe20] sm:$0xff] }
 0x4c0   : > { %17401 = vst [vmem:[#allocation33_spill] sm:$0xff] %v14997_v6  ;;  %v6113_v27 = vadd.f32 %v14351_v31, %v14364_v12  ;;  %v6114_v16 = vadd.f32 %v6088_v5, %v5983_v29  ;;  %v6115_v62 = vadd.f32 %v6089_v15, %v5984_v40  ;;  %v15030_v45 = vmul.f32 %v8627_v1, %v14891_v55  ;;  %v8653_v31 = vld [vmem:[%s16709_s5 + $0xd58] sm:$0xff]  ;;  %v8742_v55 = vld [vmem:[%s16709_s5 + $0x1020] sm:$0xff] }
 0x4c1   : > { %17402 = vst [vmem:[#allocation50_spill] sm:$0xff] %v15001_v50  ;;  %17403 = vst [vmem:[#allocation11_spill] sm:$0xff] %v15003_v58  ;;  %v3705_v63 = vadd.f32 %v17294_v19, %v3629_v22  ;;  %v3706_v54 = vadd.f32 %v17294_v19, %v3630_v57  ;;  %v6116_v48 = vadd.f32 %v6090_v52, %v5985_v53  ;;  %v8743_v22 = vld [vmem:[%s16709_s5 + $0x1028] sm:$0xff]  ;;  %v8745_v53 = vld [vmem:[%s16709_s5 + $0x1038] sm:$0xff] }
 0x4c2   : > { %17404 = vst [vmem:[#allocation41_spill] sm:$0xff] %v15014_v8  ;;  %17405 = vst [vmem:[#allocation5_spill] sm:$0xff] %v15030_v45  ;;  %v15036_v28 = vrot.slane %v14879_v51, %v11444_v2  ;;  %v6219_v12 = vmul.f32 %v8717_v13, %v14988_v25  ;;  %v6220_v29 = vmul.f32 %v8718_v21, %v14997_v6 }
 0x4c3   : > { %v15048_v19 = vrot.slane %v14881_v37, %v11444_v2  ;;  %v15051_v40 = vmul.f32 %v8652_v36, %v14911_v7  ;;  %v15053_v24 = vmul.f32 %v8678_v43, %v6056_v60  ;;  %v6221_v34 = vmul.f32 %v8719_v42, %v15014_v8 }
 0x4c4   : > { %17406 = vst [vmem:[#allocation44_spill] sm:$0xff] %v15036_v28  ;;  %v15064_v57 = vrot.slane %v14895_v44, %v11444_v2  ;;  %v6243_v7 = vadd.f32 %v14279_v23, %v14300_v33  ;;  %v6244_v60 = vadd.f32 %v14387_v18, %v6113_v27  ;;  %v6245_v1 = vadd.f32 %v6219_v12, %v6114_v16  ;;  %v8767_v33 = vld [vmem:[%s16709_s5 + $0x10e8] sm:$0xff]  ;;  %v8768_v18 = vld [vmem:[%s16709_s5 + $0x10f0] sm:$0xff] }
 0x4c5   : > { %17407 = vst [vmem:[#allocation12_spill] sm:$0xff] %v15048_v19  ;;  %17408 = vst [vmem:[#allocation105_spill] sm:$0xff] %v15051_v40  ;;  %v6246_v5 = vadd.f32 %v6220_v29, %v6115_v62  ;;  %v15073_v15 = vmul.f32 %v8653_v31, %v14915_v56  ;;  %v15075_v52 = vmax.f32 %v3705_v63, 0.0  ;;  %v6247_v13 = vadd.f32 %v6221_v34, %v6116_v48  ;;  %v17414_v62 = vld [vmem:[#allocation48_spill] sm:$0xff]  ;;  %v8769_v63 = vld [vmem:[%s16709_s5 + $0x10f8] sm:$0xff] }
 0x4c6   : > { %17409 = vst [vmem:[#allocation106_spill] sm:$0xff] %v15053_v24  ;;  %17410 = vst [vmem:[#allocation107_spill] sm:$0xff] %v15064_v57  ;;  %v6349_v21 = vmul.f32 %v8742_v55, %v14371_v26  ;;  %v6350_v36 = vmul.f32 %v8743_v22, %v15036_v28  ;;  %v6351_v23 = vmul.f32 %v8744_v61, %v15048_v19  ;;  %v15094_v27 = vmax.f32 %v3706_v54, 0.0  ;;  %v8770_v48 = vld [vmem:[%s16709_s5 + $0x1100] sm:$0xff]  ;;  %v17416_v12 = vld [vmem:[#allocation16_spill] sm:$0xff] }
 0x4c7   : > { %17411 = vst [vmem:[#allocation108_spill] sm:$0xff] %v15073_v15  ;;  %v15088_v56 = vrot.slane %v14879_v51, %v11451_v9  ;;  %v15092_v43 = vrot.slane %v14881_v37, %v11451_v9  ;;  %v6352_v16 = vmul.f32 %v8745_v53, %v15064_v57  ;;  %v6373_v42 = vadd.f32 %v17414_v62, %v14455_v20  ;;  %v8771_v20 = vld [vmem:[%s16709_s5 + $0x1108] sm:$0xff]  ;;  %v17417_v61 = vld [vmem:[#allocation89_spill] sm:$0xff]  ;;  %v17418_v62 = vld [vmem:[#allocation52_spill] sm:$0xff] }
 0x4c8   : > { %v15107_v31 = vrot.slane %v14895_v44, %v11451_v9  ;;  %v6374_v54 = vadd.f32 %v17416_v12, %v6243_v7  ;;  %v6375_v29 = vadd.f32 %v6349_v21, %v6244_v60  ;;  %v6376_v55 = vadd.f32 %v6350_v36, %v6245_v1  ;;  %v17419_v19 = vld [vmem:[#allocation92_spill] sm:$0xff]  ;;  %v8793_v1 = vld [vmem:[%s16709_s5 + $0x11b8] sm:$0xff]  ;;  %v17441_v24 = vld [vmem:[#allocation51_spill] sm:$0xff] }
 0x4c9   : > { %17412 = vst [vmem:[#allocation109_spill] sm:$0xff] %v15088_v56  ;;  %17413 = vst [vmem:[#allocation110_spill] sm:$0xff] %v15092_v43  ;;  %v6377_v34 = vadd.f32 %v6351_v23, %v6246_v5  ;;  %v6378_v22 = vadd.f32 %v6352_v16, %v6247_v13  ;;  %v6479_v53 = vmul.f32 %v8767_v33, %v17417_v61  ;;  %v8792_v60 = vld [vmem:[%s16709_s5 + $0x11b0] sm:$0xff]  ;;  %v8794_v5 = vld [vmem:[%s16709_s5 + $0x11c0] sm:$0xff] }
 0x4ca   : > { %17415 = vst [vmem:[#allocation48_spill] sm:$0xff] %v15107_v31  ;;  %v6480_v57 = vmul.f32 %v8768_v18, %v17418_v62  ;;  %v15117_v28 = vrot.slane %v17419_v19, %v11453_v35  ;;  %v6481_v26 = vmul.f32 %v8769_v63, %v15088_v56  ;;  %v6482_v7 = vmul.f32 %v8770_v48, %v15092_v43  ;;  %v17423_v23 = vld [vmem:[#allocation21_spill] sm:$0xff]  ;;  %v17424_v33 = vld [vmem:[#allocation14_spill] sm:$0xff]  ;;  %v17425_v16 = vld [vmem:[#allocation24_spill] sm:$0xff] }
 0x4cb   : > { %v15132_v13 = vrot.slane %v14879_v51, %v11453_v35  ;;  %v15136_v21 = vrot.slane %v14881_v37, %v11453_v35  ;;  %v6483_v36 = vmul.f32 %v8771_v20, %v15107_v31  ;;  %v6503_v18 = vadd.f32 %v17424_v33, %v17423_v23  ;;  %v8795_v48 = vld [vmem:[%s16709_s5 + $0x11c8] sm:$0xff]  ;;  %v8796_v12 = vld [vmem:[%s16709_s5 + $0x11d0] sm:$0xff]  ;;  %v17427_v33 = vld [vmem:[#allocation61_spill] sm:$0xff] }
 0x4cc   : > { %17420 = vst [vmem:[#allocation16_spill] sm:$0xff] %v15117_v28  ;;  %v6504_v63 = vadd.f32 %v17425_v16, %v6373_v42  ;;  %v15150_v43 = vrot.slane %v14895_v44, %v11453_v35  ;;  %v6505_v56 = vadd.f32 %v6479_v53, %v6374_v54  ;;  %v6506_v62 = vadd.f32 %v6480_v57, %v6375_v29  ;;  %v8797_v42 = vld [vmem:[%s16709_s5 + $0x11d8] sm:$0xff]  ;;  %v17428_v61 = vld [vmem:[#allocation91_spill] sm:$0xff]  ;;  %v17429_v57 = vld [vmem:[#allocation96_spill] sm:$0xff] }
 0x4cd   : > { %17421 = vst [vmem:[#allocation92_spill] sm:$0xff] %v15132_v13  ;;  %17422 = vst [vmem:[#allocation111_spill] sm:$0xff] %v15136_v21  ;;  %v6507_v20 = vadd.f32 %v6481_v26, %v6376_v55  ;;  %v6508_v31 = vadd.f32 %v6482_v7, %v6377_v34  ;;  %v6509_v23 = vadd.f32 %v6483_v36, %v6378_v22  ;;  %v8819_v26 = vld [vmem:[%s16709_s5 + $0x1288] sm:$0xff]  ;;  %v8817_v34 = vld [vmem:[%s16709_s5 + $0x1278] sm:$0xff] }
 0x4ce   : > { %17426 = vst [vmem:[#allocation21_spill] sm:$0xff] %v15150_v43  ;;  %v6609_v16 = vmul.f32 %v8792_v60, %v17427_v33  ;;  %v6610_v8 = vmul.f32 %v8793_v1, %v17428_v61  ;;  %v6611_v6 = vmul.f32 %v8794_v5, %v15117_v28  ;;  %v6612_v25 = vmul.f32 %v8795_v48, %v15132_v13  ;;  %v8818_v22 = vld [vmem:[%s16709_s5 + $0x1280] sm:$0xff]  ;;  %v8820_v53 = vld [vmem:[%s16709_s5 + $0x1290] sm:$0xff]  ;;  %v17436_v36 = vld [vmem:[#allocation63_spill] sm:$0xff] }
 0x4cf   : > { %v6613_v39 = vmul.f32 %v8796_v12, %v15136_v21  ;;  %v15165_v54 = vrot.slane %v17429_v57, %v11455_v14  ;;  %v15169_v29 = vrot.slane %v17419_v19, %v11455_v14  ;;  %v6614_v55 = vmul.f32 %v8797_v42, %v15150_v43  ;;  %v17435_v5 = vld [vmem:[#allocation76_spill] sm:$0xff]  ;;  %v17437_v12 = vld [vmem:[#allocation9_spill] sm:$0xff]  ;;  %v8822_v28 = vld [vmem:[%s16709_s5 + $0x12a0] sm:$0xff] }
 0x4d0   : > { %v15183_v7 = vrot.slane %v14879_v51, %v11455_v14  ;;  %v15187_v60 = vrot.slane %v14881_v37, %v11455_v14  ;;  %v15191_v1 = vrot.slane %v14895_v44, %v11455_v14  ;;  %v6633_v48 = vadd.f32 %v17436_v36, %v17435_v5  ;;  %v8821_v13 = vld [vmem:[%s16709_s5 + $0x1298] sm:$0xff]  ;;  %v8823_v61 = vld [vmem:[%s16709_s5 + $0x12a8] sm:$0xff]  ;;  %v17438_v36 = vld [vmem:[#allocation8_spill] sm:$0xff] }
 0x4d1   : > { %17430 = vst [vmem:[#allocation14_spill] sm:$0xff] %v15165_v54  ;;  %17431 = vst [vmem:[#allocation24_spill] sm:$0xff] %v15169_v29  ;;  %v6634_v42 = vadd.f32 %v17437_v12, %v6503_v18  ;;  %v6635_v43 = vadd.f32 %v6609_v16, %v6504_v63  ;;  %v6636_v21 = vadd.f32 %v6610_v8, %v6505_v56  ;;  %v17439_v63 = vld [vmem:[#allocation22_spill] sm:$0xff] }
 0x4d2   : > { %17432 = vst [vmem:[#allocation96_spill] sm:$0xff] %v15183_v7  ;;  %17433 = vst [vmem:[#allocation112_spill] sm:$0xff] %v15187_v60  ;;  %v6637_v33 = vadd.f32 %v6611_v6, %v6506_v62  ;;  %v6638_v32 = vadd.f32 %v6612_v25, %v6507_v20  ;;  %v6639_v0 = vadd.f32 %v6613_v39, %v6508_v31  ;;  %v8842_v39 = vld [vmem:[%s16709_s5 + $0x1340] sm:$0xff]  ;;  %v8843_v25 = vld [vmem:[%s16709_s5 + $0x1348] sm:$0xff] }
 0x4d3   : > { %17434 = vst [vmem:[#allocation113_spill] sm:$0xff] %v15191_v1  ;;  %v6640_v5 = vadd.f32 %v6614_v55, %v6509_v23  ;;  %v6739_v18 = vmul.f32 %v8817_v34, %v17438_v36  ;;  %v6740_v8 = vmul.f32 %v8818_v22, %v17439_v63  ;;  %v6741_v56 = vmul.f32 %v8819_v26, %v15165_v54  ;;  %v8845_v31 = vld [vmem:[%s16709_s5 + $0x1358] sm:$0xff]  ;;  %v17442_v62 = vld [vmem:[#allocation88_spill] sm:$0xff]  ;;  %v17465_v63 = vld [vmem:[#allocation78_spill] sm:$0xff] }
 0x4d4   : > { %v6742_v16 = vmul.f32 %v8820_v53, %v15169_v29  ;;  %v6743_v12 = vmul.f32 %v8821_v13, %v15183_v7  ;;  %v6744_v58 = vmul.f32 %v8822_v28, %v15187_v60  ;;  %v6745_v50 = vmul.f32 %v8823_v61, %v15191_v1  ;;  %v17447_v13 = vld [vmem:[#allocation58_spill] sm:$0xff]  ;;  %v8844_v26 = vld [vmem:[%s16709_s5 + $0x1350] sm:$0xff] }
 0x4d5   : > { %v6763_v6 = vadd.f32 %v17441_v24, %v17440_v11  ;;  %v15225_v28 = vrot.slane %v17442_v62, %v11470_v4  ;;  %v15229_v61 = vrot.slane %v17429_v57, %v11470_v4  ;;  %v15233_v11 = vrot.slane %v17419_v19, %v11470_v4  ;;  %v8846_v57 = vld [vmem:[%s16709_s5 + $0x1360] sm:$0xff]  ;;  %v8847_v19 = vld [vmem:[%s16709_s5 + $0x1368] sm:$0xff] }
 0x4d6   : > { %v15237_v24 = vrot.slane %v14879_v51, %v11470_v4  ;;  %v6764_v20 = vadd.f32 %v17447_v13, %v6633_v48  ;;  %v6765_v23 = vadd.f32 %v6739_v18, %v6634_v42  ;;  %v15251_v55 = vrot.slane %v14881_v37, %v11470_v4  ;;  %v8848_v42 = vld [vmem:[%s16709_s5 + $0x1370] sm:$0xff]  ;;  %v8849_v18 = vld [vmem:[%s16709_s5 + $0x1378] sm:$0xff]  ;;  %v17450_v37 = vld [vmem:[#allocation59_spill] sm:$0xff] }
 0x4d7   : > { %17443 = vst [vmem:[#allocation76_spill] sm:$0xff] %v15225_v28  ;;  %17444 = vst [vmem:[#allocation63_spill] sm:$0xff] %v15229_v61  ;;  %v15255_v51 = vrot.slane %v14895_v44, %v11470_v4  ;;  %v6766_v34 = vadd.f32 %v6740_v8, %v6635_v43  ;;  %v6767_v22 = vadd.f32 %v6741_v56, %v6636_v21  ;;  %v17451_v60 = vld [vmem:[#allocation2_spill] sm:$0xff]  ;;  %v17452_v56 = vld [vmem:[#allocation101_spill] sm:$0xff] }
 0x4d8   : > { %17445 = vst [vmem:[#allocation9_spill] sm:$0xff] %v15233_v11  ;;  %17446 = vst [vmem:[#allocation85_spill] sm:$0xff] %v15237_v24  ;;  %v6768_v53 = vadd.f32 %v6742_v16, %v6637_v33  ;;  %v6769_v48 = vadd.f32 %v6743_v12, %v6638_v32  ;;  %v6770_v62 = vadd.f32 %v6744_v58, %v6639_v0  ;;  %v17453_v16 = vld [vmem:[#allocation77_spill] sm:$0xff]  ;;  %v8867_v12 = vld [vmem:[%s16709_s5 + $0x1408] sm:$0xff] }
 0x4d9   : > { %17448 = vst [vmem:[#allocation51_spill] sm:$0xff] %v15251_v55  ;;  %17449 = vst [vmem:[#allocation88_spill] sm:$0xff] %v15255_v51  ;;  %v6771_v13 = vadd.f32 %v6745_v50, %v6640_v5  ;;  %v6869_v1 = vmul.f32 %v8842_v39, %v17450_v37  ;;  %v6870_v7 = vmul.f32 %v8843_v25, %v17451_v60  ;;  %v17454_v50 = vld [vmem:[#allocation84_spill] sm:$0xff]  ;;  %v8869_v25 = vld [vmem:[%s16709_s5 + $0x1418] sm:$0xff] }
 0x4da   : > { %v6871_v44 = vmul.f32 %v8844_v26, %v15225_v28  ;;  %v6872_v43 = vmul.f32 %v8845_v31, %v15229_v61  ;;  %v6873_v32 = vmul.f32 %v8846_v57, %v15233_v11  ;;  %v6874_v21 = vmul.f32 %v8847_v19, %v15237_v24  ;;  %v8868_v39 = vld [vmem:[%s16709_s5 + $0x1410] sm:$0xff]  ;;  %v8870_v57 = vld [vmem:[%s16709_s5 + $0x1420] sm:$0xff]  ;;  %v8871_v19 = vld [vmem:[%s16709_s5 + $0x1428] sm:$0xff] }
 0x4db   : > { %v6875_v33 = vmul.f32 %v8848_v42, %v15251_v55  ;;  %v6876_v8 = vmul.f32 %v8849_v18, %v15255_v51  ;;  %v6893_v0 = vadd.f32 %v17453_v16, %v17452_v56  ;;  %v6894_v58 = vadd.f32 %v17454_v50, %v6763_v6  ;;  %v17455_v31 = vld [vmem:[#allocation28_spill] sm:$0xff]  ;;  %v17460_v18 = vld [vmem:[#allocation45_spill] sm:$0xff]  ;;  %v8874_v60 = vld [vmem:[%s16709_s5 + $0x1440] sm:$0xff] }
 0x4dc   : > { %v6895_v5 = vadd.f32 %v6869_v1, %v6764_v20  ;;  %v15285_v26 = vrot.slane %v17455_v31, %v11437_v41  ;;  %v15289_v6 = vrot.slane %v14940_v10, %v11437_v41  ;;  %v17458_v1 = vld [vmem:[#allocation60_spill] sm:$0xff]  ;;  %v15306_v56 = vrot.slane %v17460_v18, %v11437_v41  ;;  %v8873_v28 = vld [vmem:[%s16709_s5 + $0x1438] sm:$0xff]  ;;  %v8875_v37 = vld [vmem:[%s16709_s5 + $0x1448] sm:$0xff] }
 0x4dd   : > { %v15293_v20 = vrot.slane %v17458_v1, %v11437_v41  ;;  %v8872_v42 = vld [vmem:[%s16709_s5 + $0x1430] sm:$0xff]  ;;  %v15310_v16 = vrot.slane %v15075_v52, %v11437_v41  ;;  %v15314_v50 = vrot.slane %v15094_v27, %v11437_v41  ;;  %v15318_v51 = vrot.slane %v15016_v49, %v11437_v41 }
 0x4de   : > { %17456 = vst [vmem:[#allocation58_spill] sm:$0xff] %v15285_v26  ;;  %17457 = vst [vmem:[#allocation101_spill] sm:$0xff] %v15289_v6  ;;  %v6896_v55 = vadd.f32 %v6870_v7, %v6765_v23  ;;  %v6897_v24 = vadd.f32 %v6871_v44, %v6766_v34  ;;  %v6898_v11 = vadd.f32 %v6872_v43, %v6767_v22  ;;  %v17466_v23 = vld [vmem:[#allocation99_spill] sm:$0xff] }
 0x4df   : > { %17459 = vst [vmem:[#allocation77_spill] sm:$0xff] %v15293_v20  ;;  %17461 = vst [vmem:[#allocation84_spill] sm:$0xff] %v15306_v56  ;;  %v6899_v61 = vadd.f32 %v6873_v32, %v6768_v53  ;;  %v6900_v29 = vadd.f32 %v6874_v21, %v6769_v48  ;;  %v6901_v54 = vadd.f32 %v6875_v33, %v6770_v62  ;;  %v17467_v62 = vld [vmem:[#allocation81_spill] sm:$0xff]  ;;  %v17469_v33 = vld [vmem:[#allocation94_spill] sm:$0xff] }
 0x4e0   : > { %17462 = vst [vmem:[#allocation28_spill] sm:$0xff] %v15310_v16  ;;  %17463 = vst [vmem:[#allocation60_spill] sm:$0xff] %v15314_v50  ;;  %v6902_v41 = vadd.f32 %v6876_v8, %v6771_v13  ;;  %v6999_v7 = vmul.f32 %v8867_v12, %v17465_v63  ;;  %v7000_v34 = vmul.f32 %v8868_v39, %v17466_v23  ;;  %v17468_v13 = vld [vmem:[#allocation56_spill] sm:$0xff] }
 0x4e1   : > { %17464 = vst [vmem:[#allocation45_spill] sm:$0xff] %v15318_v51  ;;  %v7001_v22 = vmul.f32 %v8869_v25, %v15285_v26  ;;  %v7002_v53 = vmul.f32 %v8870_v57, %v15289_v6  ;;  %v7003_v44 = vmul.f32 %v8871_v19, %v15293_v20  ;;  %v7004_v43 = vmul.f32 %v8872_v42, %v15306_v56  ;;  %v8892_v57 = vld [vmem:[%s16709_s5 + $0x14d0] sm:$0xff]  ;;  %v8897_v42 = vld [vmem:[%s16709_s5 + $0x14f8] sm:$0xff] }
 0x4e2   : > { %v7005_v32 = vmul.f32 %v8873_v28, %v15310_v16  ;;  %v7006_v36 = vmul.f32 %v8874_v60, %v15314_v50  ;;  %v7007_v48 = vmul.f32 %v8875_v37, %v15318_v51  ;;  %v7023_v21 = vadd.f32 %v17468_v13, %v17467_v62  ;;  %v8893_v28 = vld [vmem:[%s16709_s5 + $0x14d8] sm:$0xff]  ;;  %v8894_v60 = vld [vmem:[%s16709_s5 + $0x14e0] sm:$0xff]  ;;  %v8899_v16 = vld [vmem:[%s16709_s5 + $0x1508] sm:$0xff] }
 0x4e3   : > { %v7024_v8 = vadd.f32 %v17469_v33, %v6893_v0  ;;  %v7025_v12 = vadd.f32 %v6999_v7, %v6894_v58  ;;  %v7026_v39 = vadd.f32 %v7000_v34, %v6895_v5  ;;  %v7027_v25 = vadd.f32 %v7001_v22, %v6896_v55  ;;  %v17470_v37 = vld [vmem:[#allocation102_spill] sm:$0xff]  ;;  %v8895_v58 = vld [vmem:[%s16709_s5 + $0x14e8] sm:$0xff]  ;;  %v8896_v5 = vld [vmem:[%s16709_s5 + $0x14f0] sm:$0xff] }
 0x4e4   : > { %v15352_v19 = vrot.slane %v17470_v37, %v11439_v46  ;;  %v15356_v0 = vrot.slane %v17455_v31, %v11439_v46  ;;  %v15360_v55 = vrot.slane %v14940_v10, %v11439_v46  ;;  %v15373_v7 = vrot.slane %v17458_v1, %v11439_v46  ;;  %v8898_v50 = vld [vmem:[%s16709_s5 + $0x1500] sm:$0xff]  ;;  %v8900_v56 = vld [vmem:[%s16709_s5 + $0x1510] sm:$0xff] }
 0x4e5   : > { %v15377_v34 = vrot.slane %v17460_v18, %v11439_v46  ;;  %v15381_v22 = vrot.slane %v15075_v52, %v11439_v46  ;;  %v15385_v62 = vrot.slane %v15094_v27, %v11439_v46  ;;  %v7028_v13 = vadd.f32 %v7002_v53, %v6897_v24  ;;  %v17479_v53 = vld [vmem:[#allocation98_spill] sm:$0xff] }
 0x4e6   : > { %17471 = vst [vmem:[#allocation81_spill] sm:$0xff] %v15352_v19  ;;  %17472 = vst [vmem:[#allocation56_spill] sm:$0xff] %v15356_v0  ;;  %v7029_v33 = vadd.f32 %v7003_v44, %v6898_v11  ;;  %v7030_v51 = vadd.f32 %v7004_v43, %v6899_v61  ;;  %v15398_v20 = vrot.slane %v15016_v49, %v11439_v46  ;;  %v8901_v61 = vld [vmem:[%s16709_s5 + $0x1518] sm:$0xff]  ;;  %v17480_v43 = vld [vmem:[#allocation79_spill] sm:$0xff] }
 0x4e7   : > { %17473 = vst [vmem:[#allocation94_spill] sm:$0xff] %v15360_v55  ;;  %17474 = vst [vmem:[#allocation102_spill] sm:$0xff] %v15373_v7  ;;  %v7031_v6 = vadd.f32 %v7005_v32, %v6900_v29  ;;  %v7032_v24 = vadd.f32 %v7006_v36, %v6901_v54  ;;  %v7033_v11 = vadd.f32 %v7007_v48, %v6902_v41  ;;  %v17481_v32 = vld [vmem:[#allocation25_spill] sm:$0xff]  ;;  %v17482_v48 = vld [vmem:[#allocation27_spill] sm:$0xff] }
 0x4e8   : > { %17475 = vst [vmem:[#allocation114_spill] sm:$0xff] %v15377_v34  ;;  %17476 = vst [vmem:[#allocation115_spill] sm:$0xff] %v15381_v22  ;;  %v7129_v44 = vmul.f32 %v8892_v57, %v17479_v53  ;;  %v7130_v26 = vmul.f32 %v8893_v28, %v17480_v43  ;;  %v7131_v23 = vmul.f32 %v8894_v60, %v15352_v19  ;;  %v17483_v28 = vld [vmem:[#allocation57_spill] sm:$0xff]  ;;  %v17484_v43 = vld [vmem:[#allocation4_spill] sm:$0xff] }
 0x4e9   : > { %17477 = vst [vmem:[#allocation116_spill] sm:$0xff] %v15385_v62  ;;  %17478 = vst [vmem:[#allocation117_spill] sm:$0xff] %v15398_v20  ;;  %v7132_v63 = vmul.f32 %v8895_v58, %v15356_v0  ;;  %v7133_v15 = vmul.f32 %v8896_v5, %v15360_v55  ;;  %v7134_v46 = vmul.f32 %v8897_v42, %v15373_v7  ;;  %v17485_v19 = vld [vmem:[#allocation104_spill] sm:$0xff]  ;;  %v17497_v53 = vld [vmem:[#allocation90_spill] sm:$0xff] }
 0x4ea   : > { %v7135_v29 = vmul.f32 %v8898_v50, %v15377_v34  ;;  %v7136_v54 = vmul.f32 %v8899_v16, %v15381_v22  ;;  %v7137_v36 = vmul.f32 %v8900_v56, %v15385_v62  ;;  %v7138_v41 = vmul.f32 %v8901_v61, %v15398_v20  ;;  %v8917_v16 = vld [vmem:[%s16709_s5 + $0x1598] sm:$0xff]  ;;  %v8919_v56 = vld [vmem:[%s16709_s5 + $0x15a8] sm:$0xff]  ;;  %v8920_v50 = vld [vmem:[%s16709_s5 + $0x15b0] sm:$0xff] }
 0x4eb   : > { %v7152_v57 = vadd.f32 %v17482_v48, %v17481_v32  ;;  %v7153_v60 = vadd.f32 %v17484_v43, %v17483_v28  ;;  %v7154_v58 = vadd.f32 %v17485_v19, %v7023_v21  ;;  %v7155_v0 = vadd.f32 %v7129_v44, %v7024_v8  ;;  %v17486_v61 = vld [vmem:[#allocation71_spill] sm:$0xff]  ;;  %v8922_v8 = vld [vmem:[%s16709_s5 + $0x15c0] sm:$0xff]  ;;  %v8924_v32 = vld [vmem:[%s16709_s5 + $0x15d0] sm:$0xff] }
 0x4ec   : > { %v7156_v5 = vadd.f32 %v7130_v26, %v7025_v12  ;;  %v7157_v55 = vadd.f32 %v7131_v23, %v7026_v39  ;;  %v7158_v42 = vadd.f32 %v7132_v63, %v7027_v25  ;;  %v7159_v7 = vadd.f32 %v7133_v15, %v7028_v13  ;;  %v8918_v26 = vld [vmem:[%s16709_s5 + $0x15a0] sm:$0xff]  ;;  %v8921_v23 = vld [vmem:[%s16709_s5 + $0x15b8] sm:$0xff]  ;;  %v8923_v43 = vld [vmem:[%s16709_s5 + $0x15c8] sm:$0xff] }
 0x4ed   : > { %v15429_v21 = vrot.slane %v17486_v61, %v11441_v38  ;;  %v15433_v63 = vrot.slane %v17470_v37, %v11441_v38  ;;  %v15437_v15 = vrot.slane %v17455_v31, %v11441_v38  ;;  %v15450_v12 = vrot.slane %v14940_v10, %v11441_v38  ;;  %v8925_v48 = vld [vmem:[%s16709_s5 + $0x15d8] sm:$0xff]  ;;  %v8926_v20 = vld [vmem:[%s16709_s5 + $0x15e0] sm:$0xff]  ;;  %v8927_v62 = vld [vmem:[%s16709_s5 + $0x15e8] sm:$0xff] }
 0x4ee   : > { %v15454_v39 = vrot.slane %v17458_v1, %v11441_v38  ;;  %v15458_v25 = vrot.slane %v17460_v18, %v11441_v38  ;;  %v15462_v19 = vrot.slane %v15075_v52, %v11441_v38  ;;  %v7160_v13 = vadd.f32 %v7134_v46, %v7029_v33  ;;  %v17496_v22 = vld [vmem:[#allocation55_spill] sm:$0xff] }
 0x4ef   : > { %17487 = vst [vmem:[#allocation25_spill] sm:$0xff] %v15429_v21  ;;  %17488 = vst [vmem:[#allocation27_spill] sm:$0xff] %v15433_v63  ;;  %v7161_v44 = vadd.f32 %v7135_v29, %v7030_v51  ;;  %v15475_v28 = vrot.slane %v15094_v27, %v11441_v38  ;;  %v15479_v33 = vrot.slane %v15016_v49, %v11441_v38 }
 0x4f0   : > { %17489 = vst [vmem:[#allocation57_spill] sm:$0xff] %v15437_v15  ;;  %17490 = vst [vmem:[#allocation4_spill] sm:$0xff] %v15450_v12  ;;  %v7162_v51 = vadd.f32 %v7136_v54, %v7031_v6  ;;  %v7163_v46 = vadd.f32 %v7137_v36, %v7032_v24  ;;  %v7164_v29 = vadd.f32 %v7138_v41, %v7033_v11 }
 0x4f1   : > { %17491 = vst [vmem:[#allocation104_spill] sm:$0xff] %v15454_v39  ;;  %17492 = vst [vmem:[#allocation71_spill] sm:$0xff] %v15458_v25  ;;  %v7259_v34 = vmul.f32 %v8917_v16, %v17496_v22  ;;  %v7260_v3 = vmul.f32 %v8918_v26, %v17497_v53  ;;  %v7261_v40 = vmul.f32 %v8919_v56, %v15429_v21  ;;  %v17498_v22 = vld [vmem:[#allocation23_spill] sm:$0xff] }
 0x4f2   : > { %17493 = vst [vmem:[#allocation118_spill] sm:$0xff] %v15462_v19  ;;  %17494 = vst [vmem:[#allocation119_spill] sm:$0xff] %v15475_v28  ;;  %v7262_v38 = vmul.f32 %v8920_v50, %v15433_v63  ;;  %v7263_v6 = vmul.f32 %v8921_v23, %v15437_v15  ;;  %v7264_v24 = vmul.f32 %v8922_v8, %v15450_v12  ;;  %v17499_v53 = vld [vmem:[#allocation7_spill] sm:$0xff] }
 0x4f3   : > { %17495 = vst [vmem:[#allocation120_spill] sm:$0xff] %v15479_v33  ;;  %v7265_v11 = vmul.f32 %v8923_v43, %v15454_v39  ;;  %v7266_v54 = vmul.f32 %v8924_v32, %v15458_v25  ;;  %v7267_v36 = vmul.f32 %v8925_v48, %v15462_v19  ;;  %v7268_v41 = vmul.f32 %v8926_v20, %v15475_v28  ;;  %v8941_v32 = vld [vmem:[%s16709_s5 + $0x1658] sm:$0xff]  ;;  %v8942_v20 = vld [vmem:[%s16709_s5 + $0x1660] sm:$0xff]  ;;  %v17512_v28 = vld [vmem:[#allocation68_spill] sm:$0xff] }
 0x4f4   : > { %v7269_v16 = vmul.f32 %v8927_v62, %v15479_v33  ;;  %v7283_v26 = vadd.f32 %v17498_v22, %v7152_v57  ;;  %v7284_v56 = vadd.f32 %v17499_v53, %v7153_v60  ;;  %v7285_v21 = vadd.f32 %v7259_v34, %v7154_v58  ;;  %v8943_v22 = vld [vmem:[%s16709_s5 + $0x1668] sm:$0xff]  ;;  %v8944_v53 = vld [vmem:[%s16709_s5 + $0x1670] sm:$0xff] }
 0x4f5   : > { %v7286_v50 = vadd.f32 %v7260_v3, %v7155_v0  ;;  %v7287_v63 = vadd.f32 %v7261_v40, %v7156_v5  ;;  %v7288_v23 = vadd.f32 %v7262_v38, %v7157_v55  ;;  %v7289_v15 = vadd.f32 %v7263_v6, %v7158_v42  ;;  %v8945_v3 = vld [vmem:[%s16709_s5 + $0x1678] sm:$0xff]  ;;  %v8946_v40 = vld [vmem:[%s16709_s5 + $0x1680] sm:$0xff]  ;;  %v17500_v0 = vld [vmem:[#allocation103_spill] sm:$0xff] }
 0x4f6   : > { %v7290_v8 = vadd.f32 %v7264_v24, %v7159_v7  ;;  %v7291_v12 = vadd.f32 %v7265_v11, %v7160_v13  ;;  %v7292_v43 = vadd.f32 %v7266_v54, %v7161_v44  ;;  %v15517_v55 = vrot.slane %v17500_v0, %v11444_v2  ;;  %v8947_v57 = vld [vmem:[%s16709_s5 + $0x1688] sm:$0xff]  ;;  %v8948_v60 = vld [vmem:[%s16709_s5 + $0x1690] sm:$0xff]  ;;  %v8949_v38 = vld [vmem:[%s16709_s5 + $0x1698] sm:$0xff] }
 0x4f7   : > { %v15521_v7 = vrot.slane %v17486_v61, %v11444_v2  ;;  %v15525_v34 = vrot.slane %v17470_v37, %v11444_v2  ;;  %v15529_v62 = vrot.slane %v17455_v31, %v11444_v2  ;;  %v15542_v58 = vrot.slane %v14940_v10, %v11444_v2  ;;  %v8950_v6 = vld [vmem:[%s16709_s5 + $0x16a0] sm:$0xff]  ;;  %v8951_v24 = vld [vmem:[%s16709_s5 + $0x16a8] sm:$0xff]  ;;  %v8952_v54 = vld [vmem:[%s16709_s5 + $0x16b0] sm:$0xff] }
 0x4f8   : > { %17501 = vst [vmem:[#allocation23_spill] sm:$0xff] %v15517_v55  ;;  %v15546_v5 = vrot.slane %v17458_v1, %v11444_v2  ;;  %v15550_v42 = vrot.slane %v17460_v18, %v11444_v2  ;;  %v15554_v13 = vrot.slane %v15075_v52, %v11444_v2  ;;  %v7293_v44 = vadd.f32 %v7267_v36, %v7162_v51  ;;  %v8953_v36 = vld [vmem:[%s16709_s5 + $0x16b8] sm:$0xff]  ;;  %v17513_v25 = vld [vmem:[#allocation100_spill] sm:$0xff] }
 0x4f9   : > { %17502 = vst [vmem:[#allocation7_spill] sm:$0xff] %v15521_v7  ;;  %17503 = vst [vmem:[#allocation103_spill] sm:$0xff] %v15525_v34  ;;  %v7294_v48 = vadd.f32 %v7268_v41, %v7163_v46  ;;  %v15567_v11 = vrot.slane %v15094_v27, %v11444_v2  ;;  %v15571_v51 = vrot.slane %v15016_v49, %v11444_v2  ;;  %v17511_v41 = vld [vmem:[#allocation43_spill] sm:$0xff] }
 0x4fa   : > { %17504 = vst [vmem:[#allocation121_spill] sm:$0xff] %v15529_v62  ;;  %17505 = vst [vmem:[#allocation122_spill] sm:$0xff] %v15542_v58  ;;  %v7295_v46 = vadd.f32 %v7269_v16, %v7164_v29  ;;  %v7388_v33 = vmul.f32 %v8941_v32, %v17511_v41  ;;  %v7389_v19 = vmul.f32 %v8942_v20, %v17512_v28 }
 0x4fb   : > { %17506 = vst [vmem:[#allocation123_spill] sm:$0xff] %v15546_v5  ;;  %17507 = vst [vmem:[#allocation124_spill] sm:$0xff] %v15550_v42  ;;  %v7390_v39 = vmul.f32 %v8943_v22, %v17513_v25  ;;  %v7391_v17 = vmul.f32 %v8944_v53, %v15517_v55  ;;  %v7392_v2 = vmul.f32 %v8945_v3, %v15521_v7 }
 0x4fc   : > { %17508 = vst [vmem:[#allocation125_spill] sm:$0xff] %v15554_v13  ;;  %17509 = vst [vmem:[#allocation126_spill] sm:$0xff] %v15567_v11  ;;  %v7393_v29 = vmul.f32 %v8946_v40, %v15525_v34  ;;  %v7394_v16 = vmul.f32 %v8947_v57, %v15529_v62  ;;  %v7395_v45 = vmul.f32 %v8948_v60, %v15542_v58 }
 0x4fd   : > { %17510 = vst [vmem:[#allocation127_spill] sm:$0xff] %v15571_v51  ;;  %v7396_v59 = vmul.f32 %v8949_v38, %v15546_v5  ;;  %v7397_v30 = vmul.f32 %v8950_v6, %v15550_v42  ;;  %v7398_v32 = vmul.f32 %v8951_v24, %v15554_v13  ;;  %v7399_v20 = vmul.f32 %v8952_v54, %v15567_v11  ;;  %v8967_v38 = vld [vmem:[%s16709_s5 + $0x1728] sm:$0xff]  ;;  %v8968_v6 = vld [vmem:[%s16709_s5 + $0x1730] sm:$0xff]  ;;  %v17526_v11 = vld [vmem:[#allocation26_spill] sm:$0xff] }
 0x4fe   : > { %v7400_v22 = vmul.f32 %v8953_v36, %v15571_v51  ;;  %v7414_v25 = vadd.f32 %v7388_v33, %v7283_v26  ;;  %v7415_v53 = vadd.f32 %v7389_v19, %v7284_v56  ;;  %v7416_v55 = vadd.f32 %v7390_v39, %v7285_v21  ;;  %v8969_v19 = vld [vmem:[%s16709_s5 + $0x1738] sm:$0xff]  ;;  %v8976_v24 = vld [vmem:[%s16709_s5 + $0x1770] sm:$0xff]  ;;  %v8979_v51 = vld [vmem:[%s16709_s5 + $0x1788] sm:$0xff] }
 0x4ff   : > { %v7417_v3 = vadd.f32 %v7391_v17, %v7286_v50  ;;  %v7418_v7 = vadd.f32 %v7392_v2, %v7287_v63  ;;  %v7419_v40 = vadd.f32 %v7393_v29, %v7288_v23  ;;  %v7420_v34 = vadd.f32 %v7394_v16, %v7289_v15  ;;  %v8970_v17 = vld [vmem:[%s16709_s5 + $0x1740] sm:$0xff]  ;;  %v8971_v15 = vld [vmem:[%s16709_s5 + $0x1748] sm:$0xff]  ;;  %v8973_v39 = vld [vmem:[%s16709_s5 + $0x1758] sm:$0xff] }
 0x500   : > { %v7421_v57 = vadd.f32 %v7395_v45, %v7290_v8  ;;  %v7422_v62 = vadd.f32 %v7396_v59, %v7291_v12  ;;  %v7423_v60 = vadd.f32 %v7397_v30, %v7292_v43  ;;  %v17514_v45 = vld [vmem:[#allocation82_spill] sm:$0xff]  ;;  %v15610_v30 = vrot.slane %v17500_v0, %v11451_v9  ;;  %v8972_v12 = vld [vmem:[%s16709_s5 + $0x1750] sm:$0xff]  ;;  %v8975_v43 = vld [vmem:[%s16709_s5 + $0x1768] sm:$0xff] }
 0x501   : > { %v15606_v59 = vrot.slane %v17514_v45, %v11451_v9  ;;  %v15614_v21 = vrot.slane %v17486_v61, %v11451_v9  ;;  %v15618_v63 = vrot.slane %v17470_v37, %v11451_v9  ;;  %v15631_v33 = vrot.slane %v17455_v31, %v11451_v9  ;;  %v8974_v8 = vld [vmem:[%s16709_s5 + $0x1760] sm:$0xff]  ;;  %v8977_v16 = vld [vmem:[%s16709_s5 + $0x1778] sm:$0xff]  ;;  %v17527_v42 = vld [vmem:[#allocation67_spill] sm:$0xff] }
 0x502   : > { %17516 = vst [vmem:[#allocation128_spill] sm:$0xff] %v15610_v30  ;;  %v15635_v26 = vrot.slane %v14940_v10, %v11451_v9  ;;  %v15639_v56 = vrot.slane %v17458_v1, %v11451_v9  ;;  %v15643_v50 = vrot.slane %v17460_v18, %v11451_v9  ;;  %v7424_v23 = vadd.f32 %v7398_v32, %v7293_v44  ;;  %v8978_v32 = vld [vmem:[%s16709_s5 + $0x1780] sm:$0xff] }
 0x503   : > { %17515 = vst [vmem:[#allocation82_spill] sm:$0xff] %v15606_v59  ;;  %17517 = vst [vmem:[#allocation129_spill] sm:$0xff] %v15614_v21  ;;  %v15656_v54 = vrot.slane %v15075_v52, %v11451_v9  ;;  %v15660_v36 = vrot.slane %v15094_v27, %v11451_v9  ;;  %v15664_v44 = vrot.slane %v15016_v49, %v11451_v9 }
 0x504   : > { %17518 = vst [vmem:[#allocation130_spill] sm:$0xff] %v15618_v63  ;;  %17519 = vst [vmem:[#allocation131_spill] sm:$0xff] %v15631_v33  ;;  %v7425_v2 = vadd.f32 %v7399_v20, %v7294_v48  ;;  %v7426_v29 = vadd.f32 %v7400_v22, %v7295_v46  ;;  %v7519_v13 = vmul.f32 %v8967_v38, %v17526_v11 }
 0x505   : > { %17520 = vst [vmem:[#allocation132_spill] sm:$0xff] %v15635_v26  ;;  %17521 = vst [vmem:[#allocation133_spill] sm:$0xff] %v15639_v56  ;;  %v7520_v5 = vmul.f32 %v8968_v6, %v17527_v42  ;;  %v7521_v9 = vmul.f32 %v8969_v19, %v15606_v59  ;;  %v7522_v48 = vmul.f32 %v8970_v17, %v15610_v30 }
 0x506   : > { %17522 = vst [vmem:[#allocation134_spill] sm:$0xff] %v15643_v50  ;;  %17523 = vst [vmem:[#allocation135_spill] sm:$0xff] %v15656_v54  ;;  %v7523_v46 = vmul.f32 %v8971_v15, %v15614_v21  ;;  %v7524_v20 = vmul.f32 %v8972_v12, %v15618_v63  ;;  %v7525_v22 = vmul.f32 %v8973_v39, %v15631_v33 }
 0x507   : > { %17524 = vst [vmem:[#allocation136_spill] sm:$0xff] %v15660_v36  ;;  %17525 = vst [vmem:[#allocation137_spill] sm:$0xff] %v15664_v44  ;;  %v7526_v58 = vmul.f32 %v8974_v8, %v15635_v26  ;;  %v7527_v28 = vmul.f32 %v8975_v43, %v15639_v56  ;;  %v7528_v41 = vmul.f32 %v8976_v24, %v15643_v50  ;;  %v8993_v43 = vld [vmem:[%s16709_s5 + $0x17f8] sm:$0xff]  ;;  %v8994_v24 = vld [vmem:[%s16709_s5 + $0x1800] sm:$0xff] }
 0x508   : > { %v7529_v38 = vmul.f32 %v8977_v16, %v15656_v54  ;;  %v7530_v6 = vmul.f32 %v8978_v32, %v15660_v36  ;;  %v7531_v19 = vmul.f32 %v8979_v51, %v15664_v44  ;;  %v7545_v59 = vadd.f32 %v7519_v13, %v7414_v25  ;;  %v17528_v51 = vld [vmem:[#allocation32_spill] sm:$0xff]  ;;  %v9003_v44 = vld [vmem:[%s16709_s5 + $0x1848] sm:$0xff] }
 0x509   : > { %v7546_v17 = vadd.f32 %v7520_v5, %v7415_v53  ;;  %v7547_v30 = vadd.f32 %v7521_v9, %v7416_v55  ;;  %v7548_v15 = vadd.f32 %v7522_v48, %v7417_v3  ;;  %v7549_v21 = vadd.f32 %v7523_v46, %v7418_v7  ;;  %v17529_v55 = vld [vmem:[#allocation6_spill] sm:$0xff] }
 0x50a   : > { %v7550_v12 = vadd.f32 %v7524_v20, %v7419_v40  ;;  %v7551_v63 = vadd.f32 %v7525_v22, %v7420_v34  ;;  %v7552_v39 = vadd.f32 %v7526_v58, %v7421_v57  ;;  %v7553_v33 = vadd.f32 %v7527_v28, %v7422_v62  ;;  %v8995_v34 = vld [vmem:[%s16709_s5 + $0x1808] sm:$0xff]  ;;  %v8996_v62 = vld [vmem:[%s16709_s5 + $0x1810] sm:$0xff]  ;;  %v8997_v58 = vld [vmem:[%s16709_s5 + $0x1818] sm:$0xff] }
 0x50b   : > { %v7554_v8 = vadd.f32 %v7528_v41, %v7423_v60  ;;  %v15696_v25 = vrot.slane %v17528_v51, %v11453_v35  ;;  %v15700_v7 = vrot.slane %v17529_v55, %v11453_v35  ;;  %v15704_v28 = vrot.slane %v17514_v45, %v11453_v35  ;;  %v8998_v3 = vld [vmem:[%s16709_s5 + $0x1820] sm:$0xff]  ;;  %v8999_v40 = vld [vmem:[%s16709_s5 + $0x1828] sm:$0xff]  ;;  %v9000_v57 = vld [vmem:[%s16709_s5 + $0x1830] sm:$0xff] }
 0x50c   : > { %v15717_v5 = vrot.slane %v17500_v0, %v11453_v35  ;;  %v15721_v13 = vrot.slane %v17486_v61, %v11453_v35  ;;  %v15725_v41 = vrot.slane %v17470_v37, %v11453_v35  ;;  %v15729_v53 = vrot.slane %v17455_v31, %v11453_v35  ;;  %v9001_v20 = vld [vmem:[%s16709_s5 + $0x1838] sm:$0xff]  ;;  %v9002_v22 = vld [vmem:[%s16709_s5 + $0x1840] sm:$0xff] }
 0x50d   : > { %17530 = vst [vmem:[#allocation32_spill] sm:$0xff] %v15704_v28  ;;  %v15742_v60 = vrot.slane %v14940_v10, %v11453_v35  ;;  %v15746_v16 = vrot.slane %v17458_v1, %v11453_v35  ;;  %v15750_v32 = vrot.slane %v17460_v18, %v11453_v35  ;;  %v15754_v9 = vrot.slane %v15075_v52, %v11453_v35 }
 0x50e   : > { %17531 = vst [vmem:[#allocation6_spill] sm:$0xff] %v15717_v5  ;;  %17532 = vst [vmem:[#allocation138_spill] sm:$0xff] %v15721_v13  ;;  %v7555_v48 = vadd.f32 %v7529_v38, %v7424_v23  ;;  %v7556_v46 = vadd.f32 %v7530_v6, %v7425_v2  ;;  %v15767_v36 = vrot.slane %v15094_v27, %v11453_v35  ;;  %v9004_v38 = vld [vmem:[%s16709_s5 + $0x1850] sm:$0xff]  ;;  %v9005_v6 = vld [vmem:[%s16709_s5 + $0x1858] sm:$0xff] }
 0x50f   : > { %17533 = vst [vmem:[#allocation139_spill] sm:$0xff] %v15725_v41  ;;  %17534 = vst [vmem:[#allocation140_spill] sm:$0xff] %v15729_v53  ;;  %v15771_v23 = vrot.slane %v15016_v49, %v11453_v35  ;;  %v7557_v2 = vadd.f32 %v7531_v19, %v7426_v29  ;;  %v7650_v54 = vmul.f32 %v8993_v43, %v15696_v25 }
 0x510   : > { %17535 = vst [vmem:[#allocation141_spill] sm:$0xff] %v15742_v60  ;;  %17536 = vst [vmem:[#allocation142_spill] sm:$0xff] %v15746_v16  ;;  %v7651_v50 = vmul.f32 %v8994_v24, %v15700_v7  ;;  %v7652_v56 = vmul.f32 %v8995_v34, %v15704_v28  ;;  %v7653_v26 = vmul.f32 %v8996_v62, %v15717_v5 }
 0x511   : > { %17537 = vst [vmem:[#allocation143_spill] sm:$0xff] %v15750_v32  ;;  %17538 = vst [vmem:[#allocation144_spill] sm:$0xff] %v15754_v9  ;;  %v7654_v35 = vmul.f32 %v8997_v58, %v15721_v13  ;;  %v7655_v29 = vmul.f32 %v8998_v3, %v15725_v41  ;;  %v7656_v19 = vmul.f32 %v8999_v40, %v15729_v53  ;;  %v9048_v41 = vld [vmem:[%s16709_s5 + $0x19b0] sm:$0xff] }
 0x512   : > { %17539 = vst [vmem:[#allocation145_spill] sm:$0xff] %v15767_v36  ;;  %17540 = vst [vmem:[#allocation146_spill] sm:$0xff] %v15771_v23  ;;  %v7657_v11 = vmul.f32 %v9000_v57, %v15742_v60  ;;  %v7658_v42 = vmul.f32 %v9001_v20, %v15746_v16  ;;  %v7659_v47 = vmul.f32 %v9002_v22, %v15750_v32 }
 0x513   : > { %v7660_v43 = vmul.f32 %v9003_v44, %v15754_v9  ;;  %v7661_v24 = vmul.f32 %v9004_v38, %v15767_v36  ;;  %v7662_v34 = vmul.f32 %v9005_v6, %v15771_v23  ;;  %v7676_v28 = vadd.f32 %v7650_v54, %v7545_v59  ;;  %v9025_v6 = vld [vmem:[%s16709_s5 + $0x18f8] sm:$0xff]  ;;  %v9047_v23 = vld [vmem:[%s16709_s5 + $0x19a8] sm:$0xff]  ;;  %v9028_v36 = vld [vmem:[%s16709_s5 + $0x1910] sm:$0xff] }
 0x514   : > { %v7677_v62 = vadd.f32 %v7651_v50, %v7546_v17  ;;  %v7678_v5 = vadd.f32 %v7652_v56, %v7547_v30  ;;  %v7679_v58 = vadd.f32 %v7653_v26, %v7548_v15  ;;  %v15792_v13 = vadd.f32 %v7654_v35, %v7549_v21  ;;  %v9020_v30 = vld [vmem:[%s16709_s5 + $0x18d0] sm:$0xff]  ;;  %v9022_v50 = vld [vmem:[%s16709_s5 + $0x18e0] sm:$0xff] }
 0x515   : > { %v15794_v3 = vadd.f32 %v7655_v29, %v7550_v12  ;;  %v15796_v40 = vadd.f32 %v7656_v19, %v7551_v63  ;;  %v15798_v57 = vadd.f32 %v7657_v11, %v7552_v39  ;;  %v15800_v20 = vadd.f32 %v7658_v42, %v7553_v33  ;;  %v9021_v33 = vld [vmem:[%s16709_s5 + $0x18d8] sm:$0xff]  ;;  %v9023_v39 = vld [vmem:[%s16709_s5 + $0x18e8] sm:$0xff]  ;;  %v9026_v35 = vld [vmem:[%s16709_s5 + $0x1900] sm:$0xff] }
 0x516   : > { %v15804_v44 = vrot.slane %v17529_v55, %v11455_v14  ;;  %v15806_v22 = vadd.f32 %v7659_v47, %v7554_v8  ;;  %v15808_v59 = vadd.f32 %v7660_v43, %v7555_v48  ;;  %v15815_v21 = vrot.slane %v17528_v51, %v11455_v14  ;;  %v9019_v47 = vld [vmem:[%s16709_s5 + $0x18c8] sm:$0xff]  ;;  %v9024_v8 = vld [vmem:[%s16709_s5 + $0x18f0] sm:$0xff]  ;;  %v9046_v43 = vld [vmem:[%s16709_s5 + $0x19a0] sm:$0xff] }
 0x517   : > { %v15819_v42 = vrot.slane %v17514_v45, %v11455_v14  ;;  %v15821_v11 = vadd.f32 %v7661_v24, %v7556_v46  ;;  %v15823_v63 = vadd.f32 %v7662_v34, %v7557_v2  ;;  %v15833_v26 = vrot.slane %v17500_v0, %v11455_v14  ;;  %v9027_v34 = vld [vmem:[%s16709_s5 + $0x1908] sm:$0xff] }
 0x518   : > { %v15837_v56 = vrot.slane %v17486_v61, %v11455_v14  ;;  %v15844_v54 = vrot.slane %v17470_v37, %v11455_v14  ;;  %v15848_v17 = vrot.slane %v17455_v31, %v11455_v14  ;;  %v15852_v15 = vrot.slane %v14940_v10, %v11455_v14 }
 0x519   : > { %17541 = vst [vmem:[#allocation147_spill] sm:$0xff] %v15833_v26  ;;  %v15856_v12 = vrot.slane %v17458_v1, %v11455_v14  ;;  %v15866_v48 = vrot.slane %v17460_v18, %v11455_v14  ;;  %v15870_v46 = vrot.slane %v15075_v52, %v11455_v14  ;;  %v7782_v2 = vmul.f32 %v9020_v30, %v15804_v44 }
 0x51a   : > { %17542 = vst [vmem:[#allocation148_spill] sm:$0xff] %v15848_v17  ;;  %17543 = vst [vmem:[#allocation149_spill] sm:$0xff] %v15852_v15  ;;  %v15875_v38 = vrot.slane %v17529_v55, %v11470_v4  ;;  %v7781_v29 = vmul.f32 %v9019_v47, %v15815_v21  ;;  %v7783_v19 = vmul.f32 %v9021_v33, %v15819_v42 }
 0x51b   : > { %v15890_v55 = vrot.slane %v17528_v51, %v11470_v4  ;;  %v15894_v24 = vrot.slane %v17514_v45, %v11470_v4  ;;  %v15901_v30 = vrot.slane %v15094_v27, %v11455_v14  ;;  %v15905_v47 = vrot.slane %v15016_v49, %v11455_v14  ;;  %v9045_v45 = vld [vmem:[%s16709_s5 + $0x1998] sm:$0xff] }
 0x51c   : > { %v7784_v33 = vmul.f32 %v9022_v50, %v15833_v26  ;;  %v7808_v51 = vadd.f32 %v7782_v2, %v7677_v62  ;;  %v9029_v14 = vld [vmem:[%s16709_s5 + $0x1918] sm:$0xff]  ;;  %v9030_v62 = vld [vmem:[%s16709_s5 + $0x1920] sm:$0xff]  ;;  %v7785_v50 = vmul.f32 %v9023_v39, %v15837_v56  ;;  %v7807_v2 = vadd.f32 %v7781_v29, %v7676_v28  ;;  %v9031_v28 = vld [vmem:[%s16709_s5 + $0x1928] sm:$0xff] }
 0x51d   : > { %v7809_v9 = vadd.f32 %v7783_v19, %v7678_v5  ;;  %v15926_v32 = vrot.slane %v17500_v0, %v11470_v4  ;;  %v7786_v16 = vmul.f32 %v9024_v8, %v15844_v54  ;;  %v7787_v60 = vmul.f32 %v9025_v6, %v15848_v17 }
 0x51e   : > { %v7788_v53 = vmul.f32 %v9026_v35, %v15852_v15  ;;  %v7913_v26 = vmul.f32 %v9046_v43, %v15875_v38  ;;  %v7789_v5 = vmul.f32 %v9027_v34, %v15856_v12  ;;  %v7810_v0 = vadd.f32 %v7784_v33, %v7679_v58 }
 0x51f   : > { %v7912_v39 = vmul.f32 %v9045_v45, %v15890_v55  ;;  %v7914_v8 = vmul.f32 %v9047_v23, %v15894_v24  ;;  %v7790_v6 = vmul.f32 %v9028_v36, %v15866_v48  ;;  %v7791_v35 = vmul.f32 %v9029_v14, %v15870_v46  ;;  %v17546_v45 = vld [vmem:[#allocation20_spill] sm:$0xff]  ;;  %v17547_v14 = vld [vmem:[#allocation5_spill] sm:$0xff] }
 0x520   : > { %v7792_v29 = vmul.f32 %v9030_v62, %v15901_v30  ;;  %v7939_v19 = vadd.f32 %v7913_v26, %v7808_v51  ;;  %v15946_v43 = vrot.slane %v17486_v61, %v11470_v4  ;;  %v7915_v15 = vmul.f32 %v9048_v41, %v15926_v32  ;;  %v9049_v26 = vld [vmem:[%s16709_s5 + $0x19b8] sm:$0xff] }
 0x521   : > { %v7938_v17 = vadd.f32 %v7912_v39, %v7807_v2  ;;  %v7940_v34 = vadd.f32 %v7914_v8, %v7809_v9  ;;  %v15950_v58 = vmul.f32 %v9031_v28, %v15905_v47  ;;  %v7811_v23 = vadd.f32 %v7785_v50, %v15792_v13  ;;  %v17549_v50 = vld [vmem:[#allocation105_spill] sm:$0xff]  ;;  %v9052_v28 = vld [vmem:[%s16709_s5 + $0x19d0] sm:$0xff] }
 0x522   : > { %v7812_v36 = vadd.f32 %v7786_v16, %v15794_v3  ;;  %v7813_v33 = vadd.f32 %v7787_v60, %v15796_v40  ;;  %v15960_v61 = vrot.slane %v17470_v37, %v11470_v4  ;;  %v15964_v41 = vrot.slane %v17455_v31, %v11470_v4  ;;  %v9050_v60 = vld [vmem:[%s16709_s5 + $0x19c0] sm:$0xff]  ;;  %v9051_v16 = vld [vmem:[%s16709_s5 + $0x19c8] sm:$0xff]  ;;  %v17551_v8 = vld [vmem:[#allocation108_spill] sm:$0xff] }
 0x523   : > { %v7941_v9 = vadd.f32 %v7915_v15, %v7810_v0  ;;  %v7967_v51 = vadd.f32 %v7939_v19, %v7938_v17  ;;  %v7814_v13 = vadd.f32 %v7788_v53, %v15798_v57  ;;  %v17544_v3 = vld [vmem:[#allocation19_spill] sm:$0xff]  ;;  %v5840_v62 = vadd.f32 %v17547_v14, %v17546_v45  ;;  %v17548_v31 = vld [vmem:[#allocation46_spill] sm:$0xff]  ;;  %v17550_v0 = vld [vmem:[#allocation37_spill] sm:$0xff] }
 0x524   : > { %v17545_v40 = vld [vmem:[#allocation39_spill] sm:$0xff]  ;;  %v5970_v15 = vadd.f32 %v17549_v50, %v17548_v31  ;;  %v7815_v17 = vadd.f32 %v7789_v5, %v15800_v20  ;;  %v15982_v53 = vrot.slane %v14940_v10, %v11470_v4  ;;  %v7916_v57 = vmul.f32 %v9049_v26, %v15946_v43  ;;  %v17554_v14 = vld [vmem:[#allocation106_spill] sm:$0xff] }
 0x525   : > { %v5317_v37 = vadd.f32 %v17545_v40, %v17544_v3  ;;  %v7968_v2 = vadd.f32 %v7967_v51, %v7940_v34  ;;  %v5971_v19 = vadd.f32 %v17551_v8, %v5840_v62  ;;  %v17552_v3 = vld [vmem:[#allocation93_spill] sm:$0xff]  ;;  %v7917_v10 = vmul.f32 %v9050_v60, %v15960_v61  ;;  %v17555_v31 = vld [vmem:[#allocation18_spill] sm:$0xff]  ;;  %v17556_v50 = vld [vmem:[#allocation95_spill] sm:$0xff] }
 0x526   : > { %v17553_v40 = vld [vmem:[#allocation65_spill] sm:$0xff]  ;;  %v15993_v20 = vadd.f32 %v17554_v14, %v5970_v15  ;;  %v7918_v5 = vmul.f32 %v9051_v16, %v15964_v41  ;;  %v7942_v26 = vadd.f32 %v7916_v57, %v7811_v23  ;;  %v15999_v51 = vrot.slane %v17458_v1, %v11470_v4  ;;  %v17558_v8 = vld [vmem:[#allocation35_spill] sm:$0xff]  ;;  %v8654_v23 = vld [vmem:[%s16709_s5 + $0xd60] sm:$0xff] }
 0x527   : > { %v5448_v39 = vadd.f32 %v17550_v0, %v5317_v37  ;;  %v6100_v45 = vadd.f32 %v17553_v40, %v17552_v3  ;;  %v7969_v34 = vadd.f32 %v7968_v2, %v7941_v9  ;;  %v17557_v62 = vld [vmem:[#allocation17_spill] sm:$0xff]  ;;  %v7919_v15 = vmul.f32 %v9052_v28, %v15982_v53  ;;  %v9054_v2 = vld [vmem:[%s16709_s5 + $0x19e0] sm:$0xff] }
 0x528   : > { %v6230_v0 = vadd.f32 %v17557_v62, %v17556_v50  ;;  %v7943_v40 = vadd.f32 %v7917_v10, %v7812_v36  ;;  %v7944_v60 = vadd.f32 %v7918_v5, %v7813_v33  ;;  %v7816_v1 = vadd.f32 %v7790_v6, %v15806_v22  ;;  %v9053_v9 = vld [vmem:[%s16709_s5 + $0x19d8] sm:$0xff]  ;;  %v17561_v36 = vld [vmem:[#allocation50_spill] sm:$0xff]  ;;  %v17562_v6 = vld [vmem:[#allocation36_spill] sm:$0xff] }
 0x529   : > { %v5579_v37 = vadd.f32 %v17555_v31, %v5448_v39  ;;  %v16005_v3 = vadd.f32 %v17558_v8, %v6100_v45  ;;  %v7970_v14 = vadd.f32 %v7969_v34, %v7942_v26  ;;  %v16017_v16 = vrot.slane %v17460_v18, %v11470_v4  ;;  %v17563_v39 = vld [vmem:[#allocation30_spill] sm:$0xff]  ;;  %v17564_v10 = vld [vmem:[#allocation47_spill] sm:$0xff]  ;;  %v9056_v62 = vld [vmem:[%s16709_s5 + $0x19f0] sm:$0xff] }
 0x52a   : > { %v16021_v57 = vrot.slane %v15075_v52, %v11470_v4  ;;  %v7945_v28 = vadd.f32 %v7919_v15, %v7814_v13  ;;  %v6360_v45 = vadd.f32 %v17563_v39, %v17562_v6  ;;  %v16030_v5 = vadd.f32 %v17564_v10, %v6230_v0  ;;  %v9055_v52 = vld [vmem:[%s16709_s5 + $0x19e8] sm:$0xff]  ;;  %v8680_v15 = vld [vmem:[%s16709_s5 + $0xe30] sm:$0xff]  ;;  %v17573_v39 = vld [vmem:[#allocation34_spill] sm:$0xff] }
 0x52b   : > { %17559 = vst [vmem:[#allocation19_spill] sm:$0xff] %v16017_v16  ;;  %v5710_v33 = vadd.f32 %v17561_v36, %v5579_v37  ;;  %v7971_v22 = vadd.f32 %v7970_v14, %v7943_v40  ;;  %v7817_v18 = vadd.f32 %v7791_v35, %v15808_v59  ;;  %v16038_v26 = vrot.slane %v15094_v27, %v11470_v4  ;;  %v17566_v34 = vld [vmem:[#allocation11_spill] sm:$0xff]  ;;  %v8778_v59 = vld [vmem:[%s16709_s5 + $0x1140] sm:$0xff]  ;;  %v17571_v36 = vld [vmem:[#allocation49_spill] sm:$0xff] }
 0x52c   : > { %17560 = vst [vmem:[#allocation39_spill] sm:$0xff] %v16021_v57  ;;  %v17567_v13 = vld [vmem:[#allocation15_spill] sm:$0xff]  ;;  %v7818_v35 = vadd.f32 %v7792_v29, %v15821_v11  ;;  %v16054_v27 = vrot.slane %v15016_v49, %v11470_v4  ;;  %v7920_v0 = vmul.f32 %v9053_v9, %v15999_v51  ;;  %v7921_v40 = vmul.f32 %v9054_v2, %v16017_v16  ;;  %v17570_v11 = vld [vmem:[#allocation38_spill] sm:$0xff]  ;;  %v9057_v4 = vld [vmem:[%s16709_s5 + $0x19f8] sm:$0xff] }
 0x52d   : > { %17565 = vst [vmem:[#allocation20_spill] sm:$0xff] %v16038_v26  ;;  %v5841_v31 = vadd.f32 %v17566_v34, %v5710_v33  ;;  %v5946_v37 = vmul.f32 %v8654_v23, %v17567_v13  ;;  %v8679_v50 = vld [vmem:[%s16709_s5 + $0xe28] sm:$0xff]  ;;  %v7972_v8 = vadd.f32 %v7971_v22, %v7944_v60  ;;  %v16064_v33 = vadd.f32 %v17571_v36, %v6360_v45  ;;  %v17572_v22 = vld [vmem:[#allocation40_spill] sm:$0xff] }
 0x52e   : > { %17568 = vst [vmem:[#allocation5_spill] sm:$0xff] %v16054_v27  ;;  %v17569_v23 = vld [vmem:[#allocation87_spill] sm:$0xff]  ;;  %v7922_v49 = vmul.f32 %v9055_v52, %v16021_v57  ;;  %v7946_v60 = vadd.f32 %v7920_v0, %v7815_v17  ;;  %v6076_v6 = vmul.f32 %v8679_v50, %v17572_v22  ;;  %v6595_v10 = vmul.f32 %v8778_v59, %v17573_v39  ;;  %v8704_v13 = vld [vmem:[%s16709_s5 + $0xef0] sm:$0xff]  ;;  %v8705_v17 = vld [vmem:[%s16709_s5 + $0xef8] sm:$0xff] }
 0x52f   : > { %v5972_v14 = vadd.f32 %v5946_v37, %v5841_v31  ;;  %v6490_v29 = vadd.f32 %v17570_v11, %v17569_v23  ;;  %v7973_v9 = vadd.f32 %v7972_v8, %v7945_v28  ;;  %v7819_v2 = vadd.f32 %v15950_v58, %v15823_v63  ;;  %v17574_v31 = vld [vmem:[#allocation13_spill] sm:$0xff]  ;;  %v8802_v28 = vld [vmem:[%s16709_s5 + $0x1200] sm:$0xff]  ;;  %v8803_v63 = vld [vmem:[%s16709_s5 + $0x1208] sm:$0xff] }
 0x530   : > { %v7923_v34 = vmul.f32 %v9056_v62, %v16038_v26  ;;  %v6077_v45 = vmul.f32 %v8680_v15, %v17574_v31  ;;  %v7947_v58 = vadd.f32 %v7921_v40, %v7816_v1  ;;  %v7948_v52 = vadd.f32 %v7922_v49, %v7817_v18  ;;  %v8706_v59 = vld [vmem:[%s16709_s5 + $0xf00] sm:$0xff]  ;;  %v17576_v15 = vld [vmem:[#allocation83_spill] sm:$0xff]  ;;  %v17578_v1 = vld [vmem:[#allocation33_spill] sm:$0xff] }
 0x531   : > { %v7974_v37 = vadd.f32 %v7973_v9, %v7946_v60  ;;  %v6102_v50 = vadd.f32 %v6076_v6, %v5971_v19  ;;  %v7924_v62 = vmul.f32 %v9057_v4, %v16054_v27  ;;  %v17575_v8 = vld [vmem:[#allocation86_spill] sm:$0xff]  ;;  %v16094_v11 = vadd.f32 %v6595_v10, %v6490_v29  ;;  %v8729_v19 = vld [vmem:[%s16709_s5 + $0xfb8] sm:$0xff]  ;;  %v8731_v6 = vld [vmem:[%s16709_s5 + $0xfc8] sm:$0xff] }
 0x532   : > { %v6103_v0 = vadd.f32 %v6077_v45, %v5972_v14  ;;  %v6620_v23 = vadd.f32 %v17576_v15, %v17575_v8  ;;  %v7949_v36 = vadd.f32 %v7923_v34, %v7818_v35  ;;  %v17577_v39 = vld [vmem:[#allocation10_spill] sm:$0xff]  ;;  %v6207_v18 = vmul.f32 %v8705_v17, %v17578_v1  ;;  %v17581_v9 = vld [vmem:[#allocation41_spill] sm:$0xff]  ;;  %v8876_v10 = vld [vmem:[%s16709_s5 + $0x1450] sm:$0xff] }
 0x533   : > { %v7975_v22 = vadd.f32 %v7974_v37, %v7947_v58  ;;  %v6206_v31 = vmul.f32 %v8704_v13, %v17577_v39  ;;  %v8730_v40 = vld [vmem:[%s16709_s5 + $0xfc0] sm:$0xff]  ;;  %v7950_v29 = vadd.f32 %v7924_v62, %v7819_v2  ;;  %v6208_v35 = vmul.f32 %v8706_v59, %v17581_v9  ;;  %v8732_v2 = vld [vmem:[%s16709_s5 + $0xfd0] sm:$0xff]  ;;  %v17586_v1 = vld [vmem:[#allocation75_spill] sm:$0xff] }
 0x534   : > { %v17579_v14 = vld [vmem:[#allocation62_spill] sm:$0xff]  ;;  %v6233_v17 = vadd.f32 %v6207_v18, %v6102_v50  ;;  %v17583_v59 = vld [vmem:[#allocation44_spill] sm:$0xff]  ;;  %v16139_v18 = vmul.f32 %v8876_v10, %v17586_v1  ;;  %v8755_v9 = vld [vmem:[%s16709_s5 + $0x1088] sm:$0xff] }
 0x535   : > { %v6724_v4 = vmul.f32 %v8802_v28, %v17579_v14  ;;  %v17580_v49 = vld [vmem:[#allocation70_spill] sm:$0xff]  ;;  %v7976_v45 = vadd.f32 %v7975_v22, %v7948_v52  ;;  %v6232_v13 = vadd.f32 %v6206_v31, %v15993_v20  ;;  %v8877_v28 = vld [vmem:[%s16709_s5 + $0x1458] sm:$0xff]  ;;  %v6337_v62 = vmul.f32 %v8730_v40, %v17583_v59  ;;  %v8828_v52 = vld [vmem:[%s16709_s5 + $0x12d0] sm:$0xff] }
 0x536   : > { %v6725_v60 = vmul.f32 %v8803_v63, %v17580_v49  ;;  %v8902_v34 = vld [vmem:[%s16709_s5 + $0x1520] sm:$0xff]  ;;  %v6234_v63 = vadd.f32 %v6208_v35, %v6103_v0  ;;  %v8827_v20 = vld [vmem:[%s16709_s5 + $0x12c8] sm:$0xff]  ;;  %v17584_v8 = vld [vmem:[#allocation12_spill] sm:$0xff]  ;;  %v7978_v14 = vsel %vm7962_vm4, %v7950_v29, 0.0 }
 0x537   : > { %v17582_v58 = vld [vmem:[#allocation66_spill] sm:$0xff]  ;;  %v7977_v50 = vadd.f32 %v7976_v45, %v7949_v36  ;;  %v6338_v15 = vmul.f32 %v8731_v6, %v17584_v8  ;;  %v17585_v0 = vld [vmem:[#allocation3_spill] sm:$0xff]  ;;  %v6363_v6 = vadd.f32 %v6337_v62, %v6232_v13  ;;  %v8853_v62 = vld [vmem:[%s16709_s5 + $0x1398] sm:$0xff] }
 0x538   : > { %v6336_v37 = vmul.f32 %v8729_v19, %v17582_v58  ;;  %v8754_v22 = vld [vmem:[%s16709_s5 + $0x1080] sm:$0xff]  ;;  %v6750_v39 = vadd.f32 %v6724_v4, %v17585_v0  ;;  %v16136_v31 = vadd.f32 %v6725_v60, %v6620_v23  ;;  %v17588_v49 = vld [vmem:[#allocation107_spill] sm:$0xff]  ;;  %v8756_v4 = vld [vmem:[%s16709_s5 + $0x1090] sm:$0xff] }
 0x539   : > { %v17587_v19 = vld [vmem:[#allocation42_spill] sm:$0xff]  ;;  %v6339_v36 = vmul.f32 %v8732_v2, %v17588_v49  ;;  %v8757_v23 = vld [vmem:[%s16709_s5 + $0x1098] sm:$0xff]  ;;  %v7979_v60 = vadd.f32 %v7978_v14, %v7977_v50  ;;  %v6364_v10 = vadd.f32 %v6338_v15, %v6233_v17  ;;  %v17590_v58 = vld [vmem:[#allocation64_spill] sm:$0xff] }
 0x53a   : > { %v16142_v40 = vmul.f32 %v8902_v34, %v17587_v19  ;;  %v6362_v35 = vadd.f32 %v6336_v37, %v16005_v3  ;;  %v8758_v29 = vld [vmem:[%s16709_s5 + $0x10a0] sm:$0xff]  ;;  %v8903_v34 = vld [vmem:[%s16709_s5 + $0x1528] sm:$0xff]  ;;  %v6854_v59 = vmul.f32 %v8827_v20, %v17590_v58  ;;  %v8852_v50 = vld [vmem:[%s16709_s5 + $0x1390] sm:$0xff] }
 0x53b   : > { %v17589_v45 = vld [vmem:[#allocation74_spill] sm:$0xff]  ;;  %v6365_v8 = vadd.f32 %v6339_v36, %v6234_v63  ;;  %v17591_v3 = vld [vmem:[#allocation89_spill] sm:$0xff]  ;;  %7980 = vadd.xlane.f32.xlu0 %v7979_v60  ;;  %v17593_v15 = vld [vmem:[#allocation52_spill] sm:$0xff] }
 0x53c   : > { %v6855_v2 = vmul.f32 %v8828_v52, %v17589_v45  ;;  %v6466_v13 = vmul.f32 %v8754_v22, %v17591_v3  ;;  %v17592_v17 = vld [vmem:[#allocation69_spill] sm:$0xff]  ;;  %v6467_v0 = vmul.f32 %v8755_v9, %v17593_v15  ;;  %v17595_v20 = vld [vmem:[#allocation110_spill] sm:$0xff]  ;;  %v8779_v63 = vld [vmem:[%s16709_s5 + $0x1148] sm:$0xff] }
 0x53d   : > { %v16169_v37 = vmul.f32 %v8877_v28, %v17592_v17  ;;  %v17594_v52 = vld [vmem:[#allocation109_spill] sm:$0xff]  ;;  %v6469_v19 = vmul.f32 %v8757_v23, %v17595_v20  ;;  %v8780_v28 = vld [vmem:[%s16709_s5 + $0x1150] sm:$0xff]  ;;  %v8782_v9 = vld [vmem:[%s16709_s5 + $0x1160] sm:$0xff] }
 0x53e   : > { %v6468_v1 = vmul.f32 %v8756_v4, %v17594_v52  ;;  %v17596_v22 = vld [vmem:[#allocation48_spill] sm:$0xff]  ;;  %v6492_v49 = vadd.f32 %v6466_v13, %v16030_v5  ;;  %v8781_v36 = vld [vmem:[%s16709_s5 + $0x1158] sm:$0xff]  ;;  %v8783_v4 = vld [vmem:[%s16709_s5 + $0x1168] sm:$0xff]  ;;  %v16195_v45 = vadd.f32 %v6855_v2, %v6750_v39  ;;  %v6493_v5 = vadd.f32 %v6467_v0, %v6362_v35 }
 0x53f   : > { %v6470_v14 = vmul.f32 %v8758_v29, %v17596_v22  ;;  %v17597_v23 = vld [vmem:[#allocation80_spill] sm:$0xff]  ;;  %v6495_v13 = vadd.f32 %v6469_v19, %v6364_v10  ;;  %v17599_v15 = vld [vmem:[#allocation53_spill] sm:$0xff]  ;;  %v8878_v20 = vld [vmem:[%s16709_s5 + $0x1460] sm:$0xff] }
 0x540   : > { %v6880_v60 = vadd.f32 %v6854_v59, %v17597_v23  ;;  %v17598_v58 = vld [vmem:[#allocation72_spill] sm:$0xff]  ;;  %v6494_v3 = vadd.f32 %v6468_v1, %v6363_v6  ;;  %v6984_v52 = vmul.f32 %v8852_v50, %v17599_v15  ;;  %v17600_v59 = vld [vmem:[#allocation61_spill] sm:$0xff]  ;;  %v17601_v2 = vld [vmem:[#allocation91_spill] sm:$0xff] }
 0x541   : > { %v16198_v29 = vmul.f32 %v8903_v34, %v17598_v58  ;;  %v8784_v17 = vld [vmem:[%s16709_s5 + $0x1170] sm:$0xff]  ;;  %v6496_v22 = vadd.f32 %v6470_v14, %v6365_v8  ;;  %v6596_v39 = vmul.f32 %v8779_v63, %v17600_v59  ;;  %v6597_v23 = vmul.f32 %v8780_v28, %v17601_v2  ;;  %v17602_v34 = vld [vmem:[#allocation97_spill] sm:$0xff]  ;;  %v17605_v1 = vld [vmem:[#allocation111_spill] sm:$0xff] }
 0x542   : > { %v6985_v58 = vmul.f32 %v8853_v62, %v17602_v34  ;;  %v17603_v35 = vld [vmem:[#allocation16_spill] sm:$0xff]  ;;  %v6600_v19 = vmul.f32 %v8783_v4, %v17605_v1  ;;  %v8805_v8 = vld [vmem:[%s16709_s5 + $0x1218] sm:$0xff]  ;;  %v8806_v63 = vld [vmem:[%s16709_s5 + $0x1220] sm:$0xff] }
 0x543   : > { %v6598_v6 = vmul.f32 %v8781_v36, %v17603_v35  ;;  %v17604_v10 = vld [vmem:[#allocation92_spill] sm:$0xff]  ;;  %v17606_v28 = vld [vmem:[#allocation21_spill] sm:$0xff]  ;;  %v6622_v14 = vadd.f32 %v6596_v39, %v16064_v33  ;;  %v6623_v36 = vadd.f32 %v6597_v23, %v6492_v49  ;;  %v8810_v33 = vld [vmem:[%s16709_s5 + $0x1240] sm:$0xff] }
 0x544   : > { %v6599_v0 = vmul.f32 %v8782_v9, %v17604_v10  ;;  %v8804_v50 = vld [vmem:[%s16709_s5 + $0x1210] sm:$0xff]  ;;  %v6601_v62 = vmul.f32 %v8784_v17, %v17606_v28  ;;  %v8807_v9 = vld [vmem:[%s16709_s5 + $0x1228] sm:$0xff]  ;;  %v8809_v15 = vld [vmem:[%s16709_s5 + $0x1238] sm:$0xff]  ;;  %v6626_v17 = vadd.f32 %v6600_v19, %v6495_v13  ;;  %v16237_v49 = vadd.f32 %v6985_v58, %v6880_v60 }
 0x545   : > { %v8808_v4 = vld [vmem:[%s16709_s5 + $0x1230] sm:$0xff]  ;;  %v17607_v59 = vld [vmem:[#allocation73_spill] sm:$0xff]  ;;  %v6624_v34 = vadd.f32 %v6598_v6, %v6493_v5  ;;  %v17609_v1 = vld [vmem:[#allocation22_spill] sm:$0xff] }
 0x546   : > { %v7010_v2 = vadd.f32 %v6984_v52, %v17607_v59  ;;  %v6625_v35 = vadd.f32 %v6599_v0, %v6494_v3  ;;  %v6627_v39 = vadd.f32 %v6601_v62, %v6496_v22  ;;  %v17608_v23 = vld [vmem:[#allocation8_spill] sm:$0xff]  ;;  %v6727_v28 = vmul.f32 %v8805_v8, %v17609_v1  ;;  %v17610_v27 = vld [vmem:[#allocation14_spill] sm:$0xff]  ;;  %v8829_v52 = vld [vmem:[%s16709_s5 + $0x12d8] sm:$0xff] }
 0x547   : > { %v6726_v10 = vmul.f32 %v8804_v50, %v17608_v23  ;;  %v6728_v26 = vmul.f32 %v8806_v63, %v17610_v27  ;;  %v17611_v5 = vld [vmem:[#allocation54_spill] sm:$0xff]  ;;  %v17612_v13 = vld [vmem:[#allocation24_spill] sm:$0xff]  ;;  %v17615_v58 = vld [vmem:[#allocation113_spill] sm:$0xff] }
 0x548   : > { %v7115_v3 = vmul.f32 %v8878_v20, %v17611_v5  ;;  %v6729_v6 = vmul.f32 %v8807_v9, %v17612_v13  ;;  %v17613_v0 = vld [vmem:[#allocation96_spill] sm:$0xff]  ;;  %v6732_v50 = vmul.f32 %v8810_v33, %v17615_v58  ;;  %v6753_v8 = vadd.f32 %v6727_v28, %v6622_v14  ;;  %v8830_v20 = vld [vmem:[%s16709_s5 + $0x12e0] sm:$0xff]  ;;  %v8831_v62 = vld [vmem:[%s16709_s5 + $0x12e8] sm:$0xff] }
 0x549   : > { %v6730_v19 = vmul.f32 %v8808_v4, %v17613_v0  ;;  %v17614_v59 = vld [vmem:[#allocation112_spill] sm:$0xff]  ;;  %v6752_v27 = vadd.f32 %v6726_v10, %v16094_v11  ;;  %v6754_v63 = vadd.f32 %v6728_v26, %v6623_v36  ;;  %v8833_v9 = vld [vmem:[%s16709_s5 + $0x12f8] sm:$0xff]  ;;  %v8834_v11 = vld [vmem:[%s16709_s5 + $0x1300] sm:$0xff] }
 0x54a   : > { %v6731_v60 = vmul.f32 %v8809_v15, %v17614_v59  ;;  %v8832_v22 = vld [vmem:[%s16709_s5 + $0x12f0] sm:$0xff]  ;;  %v6755_v4 = vadd.f32 %v6729_v6, %v6624_v34  ;;  %v8835_v26 = vld [vmem:[%s16709_s5 + $0x1308] sm:$0xff]  ;;  %v6758_v10 = vadd.f32 %v6732_v50, %v6627_v39  ;;  %v17617_v1 = vld [vmem:[#allocation29_spill] sm:$0xff]  ;;  %v16277_v28 = vadd.f32 %v7115_v3, %v7010_v2 }
 0x54b   : > { %v6756_v15 = vadd.f32 %v6730_v19, %v6625_v35  ;;  %v8836_v14 = vld [vmem:[%s16709_s5 + $0x1310] sm:$0xff]  ;;  %v17616_v36 = vld [vmem:[#allocation59_spill] sm:$0xff]  ;;  %v7139_v34 = vadd.f32 %v16139_v18, %v17617_v1  ;;  %v17619_v5 = vld [vmem:[#allocation2_spill] sm:$0xff] }
 0x54c   : > { %v6757_v23 = vadd.f32 %v6731_v60, %v6626_v17  ;;  %v6856_v33 = vmul.f32 %v8829_v52, %v17616_v36  ;;  %v17618_v35 = vld [vmem:[#allocation31_spill] sm:$0xff]  ;;  %v6857_v13 = vmul.f32 %v8830_v20, %v17619_v5  ;;  %v17620_v6 = vld [vmem:[#allocation76_spill] sm:$0xff]  ;;  %v17622_v60 = vld [vmem:[#allocation9_spill] sm:$0xff] }
 0x54d   : > { %v7140_v17 = vadd.f32 %v16169_v37, %v17618_v35  ;;  %v6858_v0 = vmul.f32 %v8831_v62, %v17620_v6  ;;  %v17621_v19 = vld [vmem:[#allocation63_spill] sm:$0xff]  ;;  %v6860_v58 = vmul.f32 %v8833_v9, %v17622_v60  ;;  %v8854_v39 = vld [vmem:[%s16709_s5 + $0x13a0] sm:$0xff]  ;;  %v17623_v52 = vld [vmem:[#allocation85_spill] sm:$0xff] }
 0x54e   : > { %v6859_v59 = vmul.f32 %v8832_v22, %v17621_v19  ;;  %v8855_v18 = vld [vmem:[%s16709_s5 + $0x13a8] sm:$0xff]  ;;  %v6861_v37 = vmul.f32 %v8834_v11, %v17623_v52  ;;  %v17625_v50 = vld [vmem:[#allocation88_spill] sm:$0xff]  ;;  %v6882_v62 = vadd.f32 %v6856_v33, %v16136_v31  ;;  %v8857_v9 = vld [vmem:[%s16709_s5 + $0x13b8] sm:$0xff]  ;;  %v6883_v1 = vadd.f32 %v6857_v13, %v6752_v27 }
 0x54f   : > { %v17624_v2 = vld [vmem:[#allocation51_spill] sm:$0xff]  ;;  %v6863_v20 = vmul.f32 %v8836_v14, %v17625_v50  ;;  %v8856_v22 = vld [vmem:[%s16709_s5 + $0x13b0] sm:$0xff]  ;;  %v8858_v36 = vld [vmem:[%s16709_s5 + $0x13c0] sm:$0xff]  ;;  %v6884_v11 = vadd.f32 %v6858_v0, %v6753_v8  ;;  %v16331_v50 = vadd.f32 %v16142_v40, %v7139_v34 }
 0x550   : > { %v6862_v3 = vmul.f32 %v8835_v26, %v17624_v2  ;;  %v6885_v35 = vadd.f32 %v6859_v59, %v6754_v63  ;;  %v6886_v26 = vadd.f32 %v6860_v58, %v6755_v4  ;;  %v8859_v31 = vld [vmem:[%s16709_s5 + $0x13c8] sm:$0xff]  ;;  %v8860_v14 = vld [vmem:[%s16709_s5 + $0x13d0] sm:$0xff]  ;;  %v6887_v33 = vadd.f32 %v6861_v37, %v6756_v15  ;;  %v8861_v19 = vld [vmem:[%s16709_s5 + $0x13d8] sm:$0xff] }
 0x551   : > { %v6889_v6 = vadd.f32 %v6863_v20, %v6758_v10  ;;  %v8862_v27 = vld [vmem:[%s16709_s5 + $0x13e0] sm:$0xff]  ;;  %v17627_v4 = vld [vmem:[#allocation99_spill] sm:$0xff]  ;;  %v17629_v60 = vld [vmem:[#allocation101_spill] sm:$0xff]  ;;  %v16334_v20 = vadd.f32 %v16198_v29, %v7140_v17 }
 0x552   : > { %v6888_v5 = vadd.f32 %v6862_v3, %v6757_v23  ;;  %v17626_v8 = vld [vmem:[#allocation78_spill] sm:$0xff]  ;;  %v6987_v13 = vmul.f32 %v8855_v18, %v17627_v4  ;;  %v6989_v58 = vmul.f32 %v8857_v9, %v17629_v60  ;;  %v17630_v52 = vld [vmem:[#allocation77_spill] sm:$0xff]  ;;  %v17631_v23 = vld [vmem:[#allocation84_spill] sm:$0xff] }
 0x553   : > { %v6986_v63 = vmul.f32 %v8854_v39, %v17626_v8  ;;  %v17628_v0 = vld [vmem:[#allocation58_spill] sm:$0xff]  ;;  %v6990_v15 = vmul.f32 %v8858_v36, %v17630_v52  ;;  %v6991_v10 = vmul.f32 %v8859_v31, %v17631_v23  ;;  %v17632_v37 = vld [vmem:[#allocation28_spill] sm:$0xff]  ;;  %v8879_v3 = vld [vmem:[%s16709_s5 + $0x1468] sm:$0xff] }
 0x554   : > { %v6988_v59 = vmul.f32 %v8856_v22, %v17628_v0  ;;  %v6992_v2 = vmul.f32 %v8860_v14, %v17632_v37  ;;  %v8880_v39 = vld [vmem:[%s16709_s5 + $0x1470] sm:$0xff]  ;;  %v8881_v18 = vld [vmem:[%s16709_s5 + $0x1478] sm:$0xff]  ;;  %v7013_v8 = vadd.f32 %v6987_v13, %v6882_v62  ;;  %v8882_v4 = vld [vmem:[%s16709_s5 + $0x1480] sm:$0xff]  ;;  %v7015_v34 = vadd.f32 %v6989_v58, %v6884_v11 }
 0x555   : > { %v17633_v22 = vld [vmem:[#allocation60_spill] sm:$0xff]  ;;  %v17634_v36 = vld [vmem:[#allocation45_spill] sm:$0xff]  ;;  %v7012_v14 = vadd.f32 %v6986_v63, %v16195_v45  ;;  %v8883_v0 = vld [vmem:[%s16709_s5 + $0x1488] sm:$0xff]  ;;  %v7016_v17 = vadd.f32 %v6990_v15, %v6885_v35 }
 0x556   : > { %v6993_v9 = vmul.f32 %v8861_v19, %v17633_v22  ;;  %v6994_v31 = vmul.f32 %v8862_v27, %v17634_v36  ;;  %v8884_v40 = vld [vmem:[%s16709_s5 + $0x1490] sm:$0xff]  ;;  %v7014_v29 = vadd.f32 %v6988_v59, %v6883_v1  ;;  %v7017_v19 = vadd.f32 %v6991_v10, %v6886_v26  ;;  %v8885_v45 = vld [vmem:[%s16709_s5 + $0x1498] sm:$0xff]  ;;  %v8886_v62 = vld [vmem:[%s16709_s5 + $0x14a0] sm:$0xff] }
 0x557   : > { %v8887_v27 = vld [vmem:[%s16709_s5 + $0x14a8] sm:$0xff]  ;;  %v7018_v63 = vadd.f32 %v6992_v2, %v6887_v33  ;;  %v8888_v1 = vld [vmem:[%s16709_s5 + $0x14b0] sm:$0xff]  ;;  %v17635_v11 = vld [vmem:[#allocation98_spill] sm:$0xff] }
 0x558   : > { %v7019_v13 = vadd.f32 %v6993_v9, %v6888_v5  ;;  %v7020_v60 = vadd.f32 %v6994_v31, %v6889_v6  ;;  %v7116_v35 = vmul.f32 %v8879_v3, %v17635_v11  ;;  %v17636_v26 = vld [vmem:[#allocation79_spill] sm:$0xff]  ;;  %v17637_v58 = vld [vmem:[#allocation81_spill] sm:$0xff]  ;;  %v17638_v15 = vld [vmem:[#allocation56_spill] sm:$0xff] }
 0x559   : > { %v7117_v59 = vmul.f32 %v8880_v39, %v17636_v26  ;;  %v7118_v52 = vmul.f32 %v8881_v18, %v17637_v58  ;;  %v7119_v23 = vmul.f32 %v8882_v4, %v17638_v15  ;;  %v17639_v10 = vld [vmem:[#allocation94_spill] sm:$0xff]  ;;  %v17642_v5 = vld [vmem:[#allocation115_spill] sm:$0xff]  ;;  %v17643_v2 = vld [vmem:[#allocation116_spill] sm:$0xff] }
 0x55a   : > { %v7120_v37 = vmul.f32 %v8883_v0, %v17639_v10  ;;  %v17640_v22 = vld [vmem:[#allocation102_spill] sm:$0xff]  ;;  %v7123_v6 = vmul.f32 %v8886_v62, %v17642_v5  ;;  %v7124_v9 = vmul.f32 %v8887_v27, %v17643_v2  ;;  %v8904_v3 = vld [vmem:[%s16709_s5 + $0x1530] sm:$0xff]  ;;  %v8905_v39 = vld [vmem:[%s16709_s5 + $0x1538] sm:$0xff] }
 0x55b   : > { %v7121_v36 = vmul.f32 %v8884_v40, %v17640_v22  ;;  %v17641_v57 = vld [vmem:[#allocation114_spill] sm:$0xff]  ;;  %v17644_v31 = vld [vmem:[#allocation117_spill] sm:$0xff]  ;;  %v7143_v0 = vadd.f32 %v7117_v59, %v7012_v14  ;;  %v7144_v40 = vadd.f32 %v7118_v52, %v7013_v8  ;;  %v8908_v62 = vld [vmem:[%s16709_s5 + $0x1550] sm:$0xff]  ;;  %v7145_v11 = vadd.f32 %v7119_v23, %v7014_v29 }
 0x55c   : > { %v7122_v33 = vmul.f32 %v8885_v45, %v17641_v57  ;;  %v8906_v18 = vld [vmem:[%s16709_s5 + $0x1540] sm:$0xff]  ;;  %v7125_v4 = vmul.f32 %v8888_v1, %v17644_v31  ;;  %v7142_v57 = vadd.f32 %v7116_v35, %v16237_v49  ;;  %v8907_v45 = vld [vmem:[%s16709_s5 + $0x1548] sm:$0xff]  ;;  %v8909_v27 = vld [vmem:[%s16709_s5 + $0x1558] sm:$0xff]  ;;  %v7146_v26 = vadd.f32 %v7120_v37, %v7015_v34 }
 0x55d   : > { %v7147_v58 = vadd.f32 %v7121_v36, %v7016_v17  ;;  %v8910_v49 = vld [vmem:[%s16709_s5 + $0x1560] sm:$0xff]  ;;  %v8911_v14 = vld [vmem:[%s16709_s5 + $0x1568] sm:$0xff]  ;;  %v8912_v8 = vld [vmem:[%s16709_s5 + $0x1570] sm:$0xff]  ;;  %v7149_v35 = vadd.f32 %v7123_v6, %v7018_v63  ;;  %v7150_v59 = vadd.f32 %v7124_v9, %v7019_v13 }
 0x55e   : > { %v7148_v1 = vadd.f32 %v7122_v33, %v7017_v19  ;;  %v7151_v52 = vadd.f32 %v7125_v4, %v7020_v60  ;;  %v8913_v29 = vld [vmem:[%s16709_s5 + $0x1578] sm:$0xff]  ;;  %v8914_v34 = vld [vmem:[%s16709_s5 + $0x1580] sm:$0xff]  ;;  %v17645_v17 = vld [vmem:[#allocation55_spill] sm:$0xff] }
 0x55f   : > { %v7246_v19 = vmul.f32 %v8904_v3, %v17645_v17  ;;  %v17646_v15 = vld [vmem:[#allocation90_spill] sm:$0xff]  ;;  %v17647_v10 = vld [vmem:[#allocation25_spill] sm:$0xff]  ;;  %v17648_v22 = vld [vmem:[#allocation27_spill] sm:$0xff] }
 0x560   : > { %v7247_v23 = vmul.f32 %v8905_v39, %v17646_v15  ;;  %v7248_v37 = vmul.f32 %v8906_v18, %v17647_v10  ;;  %v7249_v36 = vmul.f32 %v8907_v45, %v17648_v22  ;;  %v17649_v33 = vld [vmem:[#allocation57_spill] sm:$0xff]  ;;  %v17650_v13 = vld [vmem:[#allocation4_spill] sm:$0xff]  ;;  %v17652_v2 = vld [vmem:[#allocation71_spill] sm:$0xff] }
 0x561   : > { %v7250_v63 = vmul.f32 %v8908_v62, %v17649_v33  ;;  %v7251_v60 = vmul.f32 %v8909_v27, %v17650_v13  ;;  %v17651_v5 = vld [vmem:[#allocation104_spill] sm:$0xff]  ;;  %v7253_v9 = vmul.f32 %v8911_v14, %v17652_v2  ;;  %v17653_v31 = vld [vmem:[#allocation118_spill] sm:$0xff]  ;;  %v17654_v17 = vld [vmem:[#allocation119_spill] sm:$0xff]  ;;  %v7272_v45 = vadd.f32 %v7246_v19, %v16277_v28 }
 0x562   : > { %v7252_v6 = vmul.f32 %v8910_v49, %v17651_v5  ;;  %v7254_v4 = vmul.f32 %v8912_v8, %v17653_v31  ;;  %v8928_v3 = vld [vmem:[%s16709_s5 + $0x15f0] sm:$0xff]  ;;  %v7255_v39 = vmul.f32 %v8913_v29, %v17654_v17  ;;  %v7273_v10 = vadd.f32 %v7247_v23, %v7142_v57  ;;  %v8929_v62 = vld [vmem:[%s16709_s5 + $0x15f8] sm:$0xff]  ;;  %v8930_v27 = vld [vmem:[%s16709_s5 + $0x1600] sm:$0xff] }
 0x563   : > { %v17655_v15 = vld [vmem:[#allocation120_spill] sm:$0xff]  ;;  %v8931_v49 = vld [vmem:[%s16709_s5 + $0x1608] sm:$0xff]  ;;  %v7274_v14 = vadd.f32 %v7248_v37, %v7143_v0  ;;  %v7275_v8 = vadd.f32 %v7249_v36, %v7144_v40  ;;  %v7276_v29 = vadd.f32 %v7250_v63, %v7145_v11  ;;  %v7277_v22 = vadd.f32 %v7251_v60, %v7146_v26  ;;  %v8933_v57 = vld [vmem:[%s16709_s5 + $0x1618] sm:$0xff] }
 0x564   : > { %v7256_v18 = vmul.f32 %v8914_v34, %v17655_v15  ;;  %v8932_v28 = vld [vmem:[%s16709_s5 + $0x1610] sm:$0xff]  ;;  %v8934_v34 = vld [vmem:[%s16709_s5 + $0x1620] sm:$0xff]  ;;  %v7278_v19 = vadd.f32 %v7252_v6, %v7147_v58  ;;  %v7279_v23 = vadd.f32 %v7253_v9, %v7148_v1  ;;  %v7280_v33 = vadd.f32 %v7254_v4, %v7149_v35  ;;  %v8935_v0 = vld [vmem:[%s16709_s5 + $0x1628] sm:$0xff] }
 0x565   : > { %v7281_v13 = vadd.f32 %v7255_v39, %v7150_v59  ;;  %v8936_v40 = vld [vmem:[%s16709_s5 + $0x1630] sm:$0xff]  ;;  %v8937_v11 = vld [vmem:[%s16709_s5 + $0x1638] sm:$0xff]  ;;  %v8938_v58 = vld [vmem:[%s16709_s5 + $0x1640] sm:$0xff] }
 0x566   : > { %v7282_v26 = vadd.f32 %v7256_v18, %v7151_v52  ;;  %v8939_v1 = vld [vmem:[%s16709_s5 + $0x1648] sm:$0xff]  ;;  %v17657_v37 = vld [vmem:[#allocation68_spill] sm:$0xff]  ;;  %v17662_v17 = vld [vmem:[#allocation121_spill] sm:$0xff] }
 0x567   : > { %v17656_v35 = vld [vmem:[#allocation43_spill] sm:$0xff]  ;;  %v7376_v36 = vmul.f32 %v8929_v62, %v17657_v37  ;;  %v17658_v63 = vld [vmem:[#allocation100_spill] sm:$0xff]  ;;  %v7381_v39 = vmul.f32 %v8934_v34, %v17662_v17  ;;  %v17663_v15 = vld [vmem:[#allocation122_spill] sm:$0xff] }
 0x568   : > { %v7375_v59 = vmul.f32 %v8928_v3, %v17656_v35  ;;  %v7377_v60 = vmul.f32 %v8930_v27, %v17658_v63  ;;  %v8940_v5 = vld [vmem:[%s16709_s5 + $0x1650] sm:$0xff]  ;;  %v17659_v6 = vld [vmem:[#allocation23_spill] sm:$0xff]  ;;  %v7382_v18 = vmul.f32 %v8935_v0, %v17663_v15 }
 0x569   : > { %v7378_v52 = vmul.f32 %v8931_v49, %v17659_v6  ;;  %v17660_v2 = vld [vmem:[#allocation7_spill] sm:$0xff]  ;;  %v17665_v35 = vld [vmem:[#allocation124_spill] sm:$0xff]  ;;  %v7402_v63 = vadd.f32 %v7376_v36, %v16334_v20  ;;  %v8954_v49 = vld [vmem:[%s16709_s5 + $0x16c0] sm:$0xff]  ;;  %v7407_v16 = vadd.f32 %v7381_v39, %v7276_v29 }
 0x56a   : > { %v7379_v9 = vmul.f32 %v8932_v28, %v17660_v2  ;;  %v17661_v31 = vld [vmem:[#allocation103_spill] sm:$0xff]  ;;  %v7384_v37 = vmul.f32 %v8937_v11, %v17665_v35  ;;  %v8956_v28 = vld [vmem:[%s16709_s5 + $0x16d0] sm:$0xff]  ;;  %v17667_v6 = vld [vmem:[#allocation126_spill] sm:$0xff]  ;;  %v7401_v0 = vadd.f32 %v7375_v59, %v16331_v50 }
 0x56b   : > { %v7380_v4 = vmul.f32 %v8933_v57, %v17661_v31  ;;  %v8955_v3 = vld [vmem:[%s16709_s5 + $0x16c8] sm:$0xff]  ;;  %v17666_v57 = vld [vmem:[#allocation125_spill] sm:$0xff]  ;;  %v7386_v2 = vmul.f32 %v8939_v1, %v17667_v6  ;;  %v7403_v31 = vadd.f32 %v7377_v60, %v7272_v45  ;;  %v7404_v11 = vadd.f32 %v7378_v52, %v7273_v10  ;;  %v17670_v1 = vld [vmem:[#allocation26_spill] sm:$0xff] }
 0x56c   : > { %v17664_v62 = vld [vmem:[#allocation123_spill] sm:$0xff]  ;;  %v7385_v34 = vmul.f32 %v8938_v58, %v17666_v57  ;;  %v7405_v15 = vadd.f32 %v7379_v9, %v7274_v14  ;;  %v8957_v20 = vld [vmem:[%s16709_s5 + $0x16d8] sm:$0xff]  ;;  %v8958_v58 = vld [vmem:[%s16709_s5 + $0x16e0] sm:$0xff]  ;;  %v7506_v57 = vmul.f32 %v8954_v49, %v17670_v1  ;;  %v7408_v14 = vadd.f32 %v7382_v18, %v7277_v22 }
 0x56d   : > { %v7383_v27 = vmul.f32 %v8936_v40, %v17664_v62  ;;  %v17668_v40 = vld [vmem:[#allocation127_spill] sm:$0xff]  ;;  %v7406_v35 = vadd.f32 %v7380_v4, %v7275_v8  ;;  %v17671_v50 = vld [vmem:[#allocation82_spill] sm:$0xff]  ;;  %v8981_v10 = vld [vmem:[%s16709_s5 + $0x1798] sm:$0xff]  ;;  %v16491_v60 = vadd.f32 %v7384_v37, %v7279_v23 }
 0x56e   : > { %v7387_v17 = vmul.f32 %v8940_v5, %v17668_v40  ;;  %v17669_v36 = vld [vmem:[#allocation67_spill] sm:$0xff]  ;;  %v7508_v45 = vmul.f32 %v8956_v28, %v17671_v50  ;;  %v8980_v5 = vld [vmem:[%s16709_s5 + $0x1790] sm:$0xff]  ;;  %v8982_v52 = vld [vmem:[%s16709_s5 + $0x17a0] sm:$0xff]  ;;  %v16502_v9 = vadd.f32 %v7385_v34, %v7280_v33  ;;  %v7638_v6 = vmul.f32 %v8981_v10, %v15700_v7 }
 0x56f   : > { %v7507_v62 = vmul.f32 %v8955_v3, %v17669_v36  ;;  %v7409_v59 = vadd.f32 %v7383_v27, %v7278_v19  ;;  %v8959_v8 = vld [vmem:[%s16709_s5 + $0x16e8] sm:$0xff]  ;;  %v8960_v22 = vld [vmem:[%s16709_s5 + $0x16f0] sm:$0xff]  ;;  %v8961_v19 = vld [vmem:[%s16709_s5 + $0x16f8] sm:$0xff]  ;;  %v7532_v3 = vadd.f32 %v7506_v57, %v7401_v0  ;;  %v16514_v27 = vadd.f32 %v7386_v2, %v7281_v13 }
 0x570   : > { %v8962_v23 = vld [vmem:[%s16709_s5 + $0x1700] sm:$0xff]  ;;  %v17672_v4 = vld [vmem:[#allocation128_spill] sm:$0xff]  ;;  %v7534_v18 = vadd.f32 %v7508_v45, %v7403_v31  ;;  %v16516_v33 = vadd.f32 %v7387_v17, %v7282_v26  ;;  %v8963_v37 = vld [vmem:[%s16709_s5 + $0x1708] sm:$0xff]  ;;  %v7637_v40 = vmul.f32 %v8980_v5, %v15696_v25 }
 0x571   : > { %v7533_v29 = vadd.f32 %v7507_v62, %v7402_v63  ;;  %v7509_v39 = vmul.f32 %v8957_v20, %v17672_v4  ;;  %v8964_v63 = vld [vmem:[%s16709_s5 + $0x1710] sm:$0xff]  ;;  %v17673_v49 = vld [vmem:[#allocation129_spill] sm:$0xff]  ;;  %v8983_v34 = vld [vmem:[%s16709_s5 + $0x17a8] sm:$0xff] }
 0x572   : > { %v7510_v28 = vmul.f32 %v8958_v58, %v17673_v49  ;;  %v8965_v13 = vld [vmem:[%s16709_s5 + $0x1718] sm:$0xff]  ;;  %v8966_v26 = vld [vmem:[%s16709_s5 + $0x1720] sm:$0xff]  ;;  %v17675_v17 = vld [vmem:[#allocation32_spill] sm:$0xff]  ;;  %v7663_v4 = vadd.f32 %v7637_v40, %v7532_v3 }
 0x573   : > { %v17674_v2 = vld [vmem:[#allocation130_spill] sm:$0xff]  ;;  %v7535_v31 = vadd.f32 %v7509_v39, %v7404_v11  ;;  %v7639_v20 = vmul.f32 %v8982_v52, %v17675_v17  ;;  %v9007_v36 = vld [vmem:[%s16709_s5 + $0x1868] sm:$0xff]  ;;  %v17677_v58 = vld [vmem:[#allocation132_spill] sm:$0xff]  ;;  %v7664_v45 = vadd.f32 %v7638_v6, %v7533_v29 }
 0x574   : > { %v7511_v0 = vmul.f32 %v8959_v8, %v17674_v2  ;;  %v17676_v7 = vld [vmem:[#allocation131_spill] sm:$0xff]  ;;  %v7513_v1 = vmul.f32 %v8961_v19, %v17677_v58  ;;  %v17678_v57 = vld [vmem:[#allocation133_spill] sm:$0xff]  ;;  %v9006_v10 = vld [vmem:[%s16709_s5 + $0x1860] sm:$0xff] }
 0x575   : > { %v7512_v62 = vmul.f32 %v8960_v22, %v17676_v7  ;;  %v7514_v50 = vmul.f32 %v8962_v23, %v17678_v57  ;;  %v9008_v25 = vld [vmem:[%s16709_s5 + $0x1870] sm:$0xff]  ;;  %v17679_v11 = vld [vmem:[#allocation134_spill] sm:$0xff]  ;;  %v7665_v39 = vadd.f32 %v7639_v20, %v7534_v18  ;;  %v17681_v22 = vld [vmem:[#allocation135_spill] sm:$0xff]  ;;  %v7536_v7 = vadd.f32 %v7510_v28, %v7405_v15 }
 0x576   : > { %v7515_v8 = vmul.f32 %v8963_v37, %v17679_v11  ;;  %v17680_v5 = vld [vmem:[#allocation6_spill] sm:$0xff]  ;;  %v7516_v49 = vmul.f32 %v8964_v63, %v17681_v22  ;;  %v17682_v19 = vld [vmem:[#allocation136_spill] sm:$0xff]  ;;  %v17683_v23 = vld [vmem:[#allocation137_spill] sm:$0xff]  ;;  %v7769_v37 = vmul.f32 %v9007_v36, %v15804_v44  ;;  %v7537_v40 = vadd.f32 %v7511_v0, %v7406_v35 }
 0x577   : > { %v7640_v52 = vmul.f32 %v8983_v34, %v17680_v5  ;;  %v7517_v2 = vmul.f32 %v8965_v13, %v17682_v19  ;;  %v7518_v29 = vmul.f32 %v8966_v26, %v17683_v23  ;;  %v8984_v6 = vld [vmem:[%s16709_s5 + $0x17b0] sm:$0xff]  ;;  %v9009_v17 = vld [vmem:[%s16709_s5 + $0x1878] sm:$0xff]  ;;  %v8986_v18 = vld [vmem:[%s16709_s5 + $0x17c0] sm:$0xff]  ;;  %v7768_v34 = vmul.f32 %v9006_v10, %v15815_v21 }
 0x578   : > { %v8985_v3 = vld [vmem:[%s16709_s5 + $0x17b8] sm:$0xff]  ;;  %v7770_v13 = vmul.f32 %v9008_v25, %v15819_v42  ;;  %v7538_v44 = vadd.f32 %v7512_v62, %v7407_v16  ;;  %v7539_v15 = vadd.f32 %v7513_v1, %v7408_v14  ;;  %v7795_v28 = vadd.f32 %v7769_v37, %v7664_v45  ;;  %v9032_v20 = vld [vmem:[%s16709_s5 + $0x1930] sm:$0xff]  ;;  %v8987_v21 = vld [vmem:[%s16709_s5 + $0x17c8] sm:$0xff] }
 0x579   : > { %v7666_v63 = vadd.f32 %v7640_v52, %v7535_v31  ;;  %v9033_v26 = vld [vmem:[%s16709_s5 + $0x1938] sm:$0xff]  ;;  %v9034_v31 = vld [vmem:[%s16709_s5 + $0x1940] sm:$0xff]  ;;  %v17685_v58 = vld [vmem:[#allocation147_spill] sm:$0xff]  ;;  %v7794_v35 = vadd.f32 %v7768_v34, %v7663_v4  ;;  %v7540_v14 = vadd.f32 %v7514_v50, %v7409_v59  ;;  %v7899_v50 = vmul.f32 %v9032_v20, %v15890_v55 }
 0x57a   : > { %v17684_v42 = vld [vmem:[#allocation138_spill] sm:$0xff]  ;;  %v7771_v57 = vmul.f32 %v9009_v17, %v17685_v58  ;;  %v7796_v16 = vadd.f32 %v7770_v13, %v7665_v39  ;;  %v17686_v0 = vld [vmem:[#allocation139_spill] sm:$0xff]  ;;  %v17687_v1 = vld [vmem:[#allocation140_spill] sm:$0xff]  ;;  %v7900_v11 = vmul.f32 %v9033_v26, %v15875_v38  ;;  %v7901_v4 = vmul.f32 %v9034_v31, %v15894_v24 }
 0x57b   : > { %v7641_v36 = vmul.f32 %v8984_v6, %v17684_v42  ;;  %v7642_v62 = vmul.f32 %v8985_v3, %v17686_v0  ;;  %v7643_v45 = vmul.f32 %v8986_v18, %v17687_v1  ;;  %v9010_v10 = vld [vmem:[%s16709_s5 + $0x1880] sm:$0xff]  ;;  %v9035_v25 = vld [vmem:[%s16709_s5 + $0x1948] sm:$0xff]  ;;  %v17688_v39 = vld [vmem:[#allocation141_spill] sm:$0xff]  ;;  %v7541_v18 = vadd.f32 %v7515_v8, %v16491_v60 }
 0x57c   : > { %v9011_v52 = vld [vmem:[%s16709_s5 + $0x1888] sm:$0xff]  ;;  %v7797_v59 = vadd.f32 %v7771_v57, %v7666_v63  ;;  %v7644_v22 = vmul.f32 %v8987_v21, %v17688_v39  ;;  %v9012_v6 = vld [vmem:[%s16709_s5 + $0x1890] sm:$0xff]  ;;  %v7926_v17 = vadd.f32 %v7900_v11, %v7795_v28  ;;  %v9013_v37 = vld [vmem:[%s16709_s5 + $0x1898] sm:$0xff]  ;;  %v7772_v55 = vmul.f32 %v9010_v10, %v15837_v56 }
 0x57d   : > { %v7667_v5 = vadd.f32 %v7641_v36, %v7536_v7  ;;  %v7668_v19 = vadd.f32 %v7642_v62, %v7537_v40  ;;  %v7669_v23 = vadd.f32 %v7643_v45, %v7538_v44  ;;  %v8988_v38 = vld [vmem:[%s16709_s5 + $0x17d0] sm:$0xff]  ;;  %v7902_v24 = vmul.f32 %v9035_v25, %v15926_v32  ;;  %v8989_v40 = vld [vmem:[%s16709_s5 + $0x17d8] sm:$0xff]  ;;  %v8990_v32 = vld [vmem:[%s16709_s5 + $0x17e0] sm:$0xff] }
 0x57e   : > { %v7925_v7 = vadd.f32 %v7899_v50, %v7794_v35  ;;  %v7927_v3 = vadd.f32 %v7901_v4, %v7796_v16  ;;  %v7542_v63 = vadd.f32 %v7516_v49, %v16502_v9  ;;  %v7670_v34 = vadd.f32 %v7644_v22, %v7539_v15  ;;  %v9036_v26 = vld [vmem:[%s16709_s5 + $0x1950] sm:$0xff]  ;;  %v17690_v15 = vld [vmem:[#allocation142_spill] sm:$0xff]  ;;  %v17691_v20 = vld [vmem:[#allocation149_spill] sm:$0xff] }
 0x57f   : > { %v7773_v13 = vmul.f32 %v9011_v52, %v15844_v54  ;;  %v17689_v56 = vld [vmem:[#allocation148_spill] sm:$0xff]  ;;  %v7798_v60 = vadd.f32 %v7772_v55, %v7667_v5  ;;  %v7928_v8 = vadd.f32 %v7902_v24, %v7797_v59  ;;  %v7543_v49 = vadd.f32 %v7517_v2, %v16514_v27  ;;  %v9037_v21 = vld [vmem:[%s16709_s5 + $0x1958] sm:$0xff]  ;;  %v9038_v42 = vld [vmem:[%s16709_s5 + $0x1960] sm:$0xff] }
 0x580   : > { %v7774_v44 = vmul.f32 %v9012_v6, %v17689_v56  ;;  %v7951_v9 = vadd.f32 %v7926_v17, %v7925_v7  ;;  %v7544_v54 = vadd.f32 %v7518_v29, %v16516_v33  ;;  %v7645_v28 = vmul.f32 %v8988_v38, %v17690_v15  ;;  %v8991_v36 = vld [vmem:[%s16709_s5 + $0x17e8] sm:$0xff]  ;;  %v9014_v27 = vld [vmem:[%s16709_s5 + $0x18a0] sm:$0xff]  ;;  %v17693_v16 = vld [vmem:[#allocation144_spill] sm:$0xff] }
 0x581   : > { %v7775_v31 = vmul.f32 %v9013_v37, %v17691_v20  ;;  %v7799_v33 = vadd.f32 %v7773_v13, %v7668_v19  ;;  %v7903_v29 = vmul.f32 %v9036_v26, %v15946_v43  ;;  %v17692_v57 = vld [vmem:[#allocation143_spill] sm:$0xff]  ;;  %v7647_v0 = vmul.f32 %v8990_v32, %v17693_v16  ;;  %v8992_v10 = vld [vmem:[%s16709_s5 + $0x17f0] sm:$0xff]  ;;  %v9017_v19 = vld [vmem:[%s16709_s5 + $0x18b8] sm:$0xff] }
 0x582   : > { %v7800_v2 = vadd.f32 %v7774_v44, %v7669_v23  ;;  %v7952_v58 = vadd.f32 %v7951_v9, %v7927_v3  ;;  %v7646_v35 = vmul.f32 %v8989_v40, %v17692_v57  ;;  %v7671_v62 = vadd.f32 %v7645_v28, %v7540_v14  ;;  %v9039_v45 = vld [vmem:[%s16709_s5 + $0x1968] sm:$0xff]  ;;  %v17694_v14 = vld [vmem:[#allocation145_spill] sm:$0xff]  ;;  %v9016_v39 = vld [vmem:[%s16709_s5 + $0x18b0] sm:$0xff] }
 0x583   : > { %v7801_v1 = vadd.f32 %v7775_v31, %v7670_v34  ;;  %v9015_v25 = vld [vmem:[%s16709_s5 + $0x18a8] sm:$0xff]  ;;  %v7904_v43 = vmul.f32 %v9037_v21, %v15960_v61  ;;  %v7905_v11 = vmul.f32 %v9038_v42, %v15964_v41  ;;  %v7929_v5 = vadd.f32 %v7903_v29, %v7798_v60  ;;  %v17695_v17 = vld [vmem:[#allocation146_spill] sm:$0xff]  ;;  %v9040_v24 = vld [vmem:[%s16709_s5 + $0x1970] sm:$0xff] }
 0x584   : > { %v7953_v52 = vadd.f32 %v7952_v58, %v7928_v8  ;;  %v7648_v59 = vmul.f32 %v8991_v36, %v17694_v14  ;;  %v7672_v50 = vadd.f32 %v7646_v35, %v7541_v18  ;;  %v7673_v4 = vadd.f32 %v7647_v0, %v7542_v63  ;;  %v9042_v13 = vld [vmem:[%s16709_s5 + $0x1980] sm:$0xff]  ;;  %v9044_v60 = vld [vmem:[%s16709_s5 + $0x1990] sm:$0xff]  ;;  %v17696_v8 = vld [vmem:[#allocation19_spill] sm:$0xff] }
 0x585   : > { %v7776_v22 = vmul.f32 %v9014_v27, %v15856_v12  ;;  %v7906_v61 = vmul.f32 %v9039_v45, %v15982_v53  ;;  %v7930_v23 = vadd.f32 %v7904_v43, %v7799_v33  ;;  %v7931_v41 = vadd.f32 %v7905_v11, %v7800_v2  ;;  %v9018_v12 = vld [vmem:[%s16709_s5 + $0x18c0] sm:$0xff]  ;;  %v17698_v20 = vld [vmem:[#allocation20_spill] sm:$0xff]  ;;  %v17699_v36 = vld [vmem:[#allocation5_spill] sm:$0xff] }
 0x586   : > { %v7954_v6 = vadd.f32 %v7953_v52, %v7929_v5  ;;  %v7649_v38 = vmul.f32 %v8992_v10, %v17695_v17  ;;  %v7674_v37 = vadd.f32 %v7648_v59, %v7543_v49  ;;  %v7777_v55 = vmul.f32 %v9015_v25, %v15866_v48  ;;  %v9041_v48 = vld [vmem:[%s16709_s5 + $0x1978] sm:$0xff]  ;;  %v17697_v49 = vld [vmem:[#allocation39_spill] sm:$0xff]  ;;  %v7982_v45 = vld [vmem:[%s16710_s6] sm:$0xff] }
 0x587   : > { %v7778_v7 = vmul.f32 %v9016_v39, %v15870_v46  ;;  %v7802_v3 = vadd.f32 %v7776_v22, %v7671_v62  ;;  %v7932_v53 = vadd.f32 %v7906_v61, %v7801_v1  ;;  %v7779_v34 = vmul.f32 %v9017_v19, %v15901_v30  ;;  %v9043_v30 = vld [vmem:[%s16709_s5 + $0x1988] sm:$0xff] }
 0x588   : > { %v7955_v18 = vadd.f32 %v7954_v6, %v7930_v23  ;;  %v7675_v63 = vadd.f32 %v7649_v38, %v7544_v54  ;;  %v7803_v26 = vadd.f32 %v7777_v55, %v7672_v50  ;;  %v7907_v32 = vmul.f32 %v9040_v24, %v15999_v51  ;;  %v7983_v0 = vld [vmem:[%s16710_s6 + $0x8] sm:$0xff] }
 0x589   : > { %v7804_v40 = vadd.f32 %v7778_v7, %v7673_v4  ;;  %v7780_v46 = vmul.f32 %v9018_v12, %v15905_v47  ;;  %v7805_v44 = vadd.f32 %v7779_v34, %v7674_v37  ;;  %v7908_v9 = vmul.f32 %v9041_v48, %v17696_v8 }
 0x58a   : > { %v7956_v56 = vadd.f32 %v7955_v18, %v7931_v41  ;;  %v7909_v54 = vmul.f32 %v9042_v13, %v17697_v49  ;;  %v7933_v15 = vadd.f32 %v7907_v32, %v7802_v3  ;;  %v7910_v31 = vmul.f32 %v9043_v30, %v17698_v20 }
 0x58b   : > { %v7806_v51 = vadd.f32 %v7780_v46, %v7675_v63  ;;  %v7934_v47 = vadd.f32 %v7908_v9, %v7803_v26  ;;  %v7911_v27 = vmul.f32 %v9044_v60, %v17699_v36 }
 0x58c   : > { %v7957_v28 = vadd.f32 %v7956_v56, %v7932_v53  ;;  %v7935_v21 = vadd.f32 %v7909_v54, %v7804_v40  ;;  %v7936_v33 = vadd.f32 %v7910_v31, %v7805_v44 }
 0x58d   : > { %v7937_v29 = vadd.f32 %v7911_v27, %v7806_v51 }
 0x58e   : > { %v7958_v42 = vadd.f32 %v7957_v28, %v7933_v15 }
 0x58f   : > { %v7963_v35 = vsel %vm7962_vm4, %v7937_v29, 0.0 }
 0x590   : > { %v7959_v2 = vadd.f32 %v7958_v42, %v7934_v47 }
 0x592   : > { %v7960_v58 = vadd.f32 %v7959_v2, %v7935_v21 }
 0x594   : > { %v7961_v57 = vadd.f32 %v7960_v58, %v7936_v33 }
 0x596   : > { %v7964_v16 = vadd.f32 %v7963_v35, %v7961_v57 }
 0x598   : > { %7965 = vadd.xlane.f32.xlu1 %v7964_v16 }
 0x5c4   : > { %v7981_v62 = vpop.xlane.xlu0 %7980 }
 0x5c5   : > { %v7985_v1 = vadd.f32 %v7983_v0, %v7981_v62 }
 0x5c7   : > { %7988 = vst.msk [vmem:[%s278_s26 + $0x8] sm:$0xff] %vm7986_vm5, %v7985_v1 }
 0x621   : > { %v7966_v10 = vpop.xlane.xlu1 %7965 }
 0x622   : > { %v7984_v25 = vadd.f32 %v7982_v45, %v7966_v10 }
 0x624   : > { %7987 = vst.msk [vmem:[%s278_s26] sm:$0xff] %vm7986_vm5, %v7984_v25 }
 0x625 PF: > { %s17_s24 = sadd.s32 1, %s9214_s24  }
 0x626   : > { %p14_p4 = scmp.ge.s32.totalorder %s17_s24, 4  }
 0x628   :  { %16 = sbr.rel (!%p14_p4) target bundleno = 1 (0x1), region = 109 }

</bundles_post_ra>
